<compile_context>
chip_gen: v5e
topology: v5e:2x2
jax: 0.10.0
libtpu: 0.0.40
codegen_flags: <defaults>
</compile_context>

<pallas_src>
import math
import functools

import jax
import jax.numpy as jnp
from jax.experimental import pallas as pl
from jax.experimental.pallas import tpu as pltpu


# ----------------------------------------------------------------------------------------------
# Kernel
# ----------------------------------------------------------------------------------------------
def _conv_ffn_kernel(x_ref, top_ref, bot_ref, wdw_ref, bdw_ref, w1_ref, b1_ref,
                     w2_ref, b2_ref, o_ref, pad_ref,
                     *, TH, W, C, HID, OUT, HID_TILE, eps):
    r = pl.program_id(1)
    n_r = pl.num_programs(1)

    # ---- build the zero-padded (TH+2, W+2, C) dwconv window in VMEM (no host-side pad) ----
    # Left/right columns and (conditionally) top/bottom halo rows are zero; interior is the
    # current row tile; halo rows come from the clamped neighbor-row blocks.
    pad_ref[...] = jnp.zeros_like(pad_ref)
    pad_ref[1:TH + 1, 1:W + 1, :] = x_ref[0]

    @pl.when(r > 0)
    def _():                                   # top halo row (stays zero at the image border)
        pad_ref[0:1, 1:W + 1, :] = top_ref[0]

    @pl.when(r < n_r - 1)
    def _():                                   # bottom halo row
        pad_ref[TH + 1:TH + 2, 1:W + 1, :] = bot_ref[0]

    # ---- depthwise 3x3 conv (padding=1, groups=C); f32 accumulation on the VPU ----
    # Hoist the (sublane-unaligned) W-axis shifts: one column view per kw, then only cheap
    # major-axis (H) slices inside the 3x3 loop.
    wdw = wdw_ref[...]                         # (3, 3, C) f32
    acc = jnp.zeros((TH, W, C), jnp.float32)
    for kw in range(3):
        col = pad_ref[:, kw:kw + W, :].astype(jnp.float32)   # (TH + 2, W, C)
        for kh in range(3):
            acc = acc + col[kh:kh + TH, :, :] * wdw[kh, kw, :]
    acc = acc + bdw_ref[0]                     # (C,) broadcast

    # ---- LayerNorm over channels (two-pass stats; gamma/beta folded into pwconv1) ----
    mean = jnp.mean(acc, axis=-1, keepdims=True)
    var = jnp.mean(jnp.square(acc - mean), axis=-1, keepdims=True)
    xn = (acc - mean) * jax.lax.rsqrt(var + eps)

    # ---- pwconv1 -> GELU -> pwconv2, chunked over the hidden dim (bf16 MXU, f32 acc) ----
    xm = xn.reshape(TH * W, C).astype(jnp.bfloat16)
    h2 = jnp.zeros((TH * W, OUT), jnp.float32)
    inv_sqrt2 = 1.0 / math.sqrt(2.0)
    for c0 in range(0, HID, HID_TILE):
        c1 = min(c0 + HID_TILE, HID)
        h1 = jnp.dot(xm, w1_ref[:, c0:c1], preferred_element_type=jnp.float32)
        h1 = h1 + b1_ref[0, c0:c1]
        # Exact erf GELU (matches nn.GELU() default).
        h1 = 0.5 * h1 * (1.0 + jax.lax.erf(h1 * inv_sqrt2))
        h2 = h2 + jnp.dot(h1.astype(jnp.bfloat16), w2_ref[c0:c1, :],
                          preferred_element_type=jnp.float32)
    h2 = h2 + b2_ref[...]

    o_ref[0] = h2.reshape(TH, W, OUT).astype(o_ref.dtype)


# ----------------------------------------------------------------------------------------------
# Tiling / VMEM helpers (generation-aware)
# ----------------------------------------------------------------------------------------------
def _vmem_capacity_bytes():
    try:
        info = pltpu.get_tpu_info()
        cap = int(getattr(info, "vmem_capacity_bytes", 0) or 0)
        if cap > 0:
            return cap
    except Exception:
        pass
    return 128 * 1024 * 1024    # v5e / v6e capacity; v7x is discovered via get_tpu_info


def _pick_hid_tile(hid):
    if hid <= 512:
        return hid
    for t in (512, 384, 256, 128):
        if hid % t == 0:
            return t
    return hid


def _choose_row_tile(B, H, W, C, HID, OUT, hid_tile, io_bytes, budget_bytes, max_row_tile=None):
    """Largest divisor-of-H row tile whose full working set fits the budget, preferring tilings
    with >= 2 total grid steps and an even step count (v7x megacore balance)."""

    def vmem_bytes(th):
        rows = th * W
        return int(
            2 * th * W * C * io_bytes              # double-buffered input row tile
            + 2 * 2 * W * C * io_bytes             # double-buffered halo rows
            + 2 * th * W * OUT * io_bytes          # double-buffered output tile
            + (th + 2) * (W + 2) * C * io_bytes    # in-kernel padded scratch
            + 3 * (th + 2) * W * C * 4             # hoisted f32 column views
            + 2 * rows * C * 4                     # dwconv acc + LN output (f32)
            + rows * C * 2                         # xm (bf16 matmul LHS)
            + rows * hid_tile * (4 + 2)            # h1 chunk (f32) + bf16 copy
            + rows * OUT * 4                       # h2 f32 accumulator
            + 2 * ((C * HID + HID * OUT) * 2       # bf16 matmul weights (x2 buffering)
                   + (9 * C + C + HID + OUT) * 4)  # dw weight + biases (f32)
        )

    divisors = [d for d in range(1, H + 1)
                if H % d == 0 and (max_row_tile is None or d <= max_row_tile)]
    fitting = [d for d in divisors if vmem_bytes(d) <= budget_bytes] or [min(divisors or [1])]

    def rank(d):
        steps = B * (H // d)
        return (steps >= 2, steps % 2 == 0, d)

    th = max(fitting, key=rank)
    return th, vmem_bytes(th)


# ----------------------------------------------------------------------------------------------
# Wrapper
# ----------------------------------------------------------------------------------------------
def conv_ffn_pallas(x_nchw, params, *, eps=1e-5, io_dtype=jnp.bfloat16, max_row_tile=None):
    """x_nchw: (B, C, H, W) float32.  Returns (B, OUT, H, W) float32."""
    wdw, bdw, gamma, beta, w1, b1, w2, b2 = params
    B, C, H, W = x_nchw.shape
    HID = w1.shape[1]
    OUT = w2.shape[1]

    # Fold LayerNorm affine into pwconv1:  (xn*g + be) @ w1 + b1 == xn @ (g[:,None]*w1) + (be@w1 + b1)
    g = gamma.reshape(-1)
    be = beta.reshape(-1)
    w1f = (g[:, None] * w1).astype(jnp.bfloat16)
    b1f = (be @ w1 + b1.reshape(-1)).reshape(1, HID).astype(jnp.float32)
    w2c = w2.astype(jnp.bfloat16)
    b2c = b2.reshape(1, OUT).astype(jnp.float32)
    wdwc = wdw.astype(jnp.float32)
    bdwc = bdw.reshape(1, C).astype(jnp.float32)

    # Single HBM pass: NCHW -> NHWC fused with the narrow-I/O cast.  No zero pad.
    x_nhwc = jnp.transpose(x_nchw, (0, 2, 3, 1)).astype(io_dtype)
    io_bytes = jnp.dtype(io_dtype).itemsize

    cap = _vmem_capacity_bytes()
    ceiling = (3 * cap) // 4                    # headroom for compiler scratch (48 MiB on v7x)
    hid_tile = _pick_hid_tile(HID)
    TH, est = _choose_row_tile(B, H, W, C, HID, OUT, hid_tile, io_bytes,
                               budget_bytes=int(0.85 * ceiling), max_row_tile=max_row_tile)
    nR = H // TH
    vmem_limit = int(min(ceiling, max(32 * 1024 * 1024, int(1.3 * est))))

    kernel = functools.partial(_conv_ffn_kernel, TH=TH, W=W, C=C, HID=HID, OUT=OUT,
                               HID_TILE=hid_tile, eps=eps)

    flops = B * H * W * (18 * C + 2 * C * HID + 2 * HID * OUT)
    bytes_accessed = (B * H * W * C * io_bytes            # input
                      + B * nR * 2 * W * C * io_bytes     # halo re-reads
                      + B * H * W * OUT * io_bytes        # output
                      + 2 * (C * HID + HID * OUT)         # bf16 matmul weights
                      + 4 * (10 * C + HID + OUT))         # dw weight + biases

    out_nhwc = pl.pallas_call(
        kernel,
        out_shape=jax.ShapeDtypeStruct((B, H, W, OUT), io_dtype),
        grid_spec=pltpu.PrefetchScalarGridSpec(
            num_scalar_prefetch=0,
            grid=(B, nR),
            in_specs=[
                # current row tile
                pl.BlockSpec((1, TH, W, C), lambda b, r: (b, r, 0, 0)),
                # row above the tile (clamped; kernel zeroes it when r == 0)
                pl.BlockSpec((1, 1, W, C),
                             lambda b, r: (b, jnp.maximum(r * TH - 1, 0), 0, 0)),
                # row below the tile (clamped; kernel zeroes it when r == nR - 1)
                pl.BlockSpec((1, 1, W, C),
                             lambda b, r: (b, jnp.minimum((r + 1) * TH, H - 1), 0, 0)),
                pl.BlockSpec((3, 3, C), lambda b, r: (0, 0, 0)),    # dw weight (f32)
                pl.BlockSpec((1, C), lambda b, r: (0, 0)),          # dw bias
                pl.BlockSpec((C, HID), lambda b, r: (0, 0)),        # pwconv1 weight (bf16, LN folded)
                pl.BlockSpec((1, HID), lambda b, r: (0, 0)),        # pwconv1 bias  (LN folded)
                pl.BlockSpec((HID, OUT), lambda b, r: (0, 0)),      # pwconv2 weight (bf16)
                pl.BlockSpec((1, OUT), lambda b, r: (0, 0)),        # pwconv2 bias
            ],
            out_specs=pl.BlockSpec((1, TH, W, OUT), lambda b, r: (b, r, 0, 0)),
            scratch_shapes=[pltpu.VMEM((TH + 2, W + 2, C), io_dtype)],
        ),
        compiler_params=pltpu.CompilerParams(
            dimension_semantics=("parallel", "parallel"),
            vmem_limit_bytes=vmem_limit,
        ),
        cost_estimate=pl.CostEstimate(
            flops=flops,
            transcendentals=B * H * W * HID,
            bytes_accessed=bytes_accessed,
        ),
    )(x_nhwc, x_nhwc, x_nhwc, wdwc, bdwc, w1f, b1f, w2c, b2c)

    # NHWC -> NCHW (PyTorch convention), upcast back to f32 in the same XLA pass.
    return jnp.transpose(out_nhwc, (0, 3, 1, 2)).astype(jnp.float32)


# ----------------------------------------------------------------------------------------------
# Params / reference / test
# ----------------------------------------------------------------------------------------------
def init_params(key, in_channel, out_channel, expan_ratio=4):
    """Init mirroring the module: trunc_normal(std=0.02) conv weights, zero biases, LN gamma=1/beta=0."""
    hidden = int(expan_ratio * in_channel)
    k1, k2, k3 = jax.random.split(key, 3)

    def trunc(k, shape, std=0.02):
        return std * jax.random.truncated_normal(k, -2.0, 2.0, shape, jnp.float32)

    wdw = trunc(k1, (3, 3, in_channel))                       # torch (C,1,3,3) -> (3,3,C)
    bdw = jnp.zeros((1, in_channel), jnp.float32)
    w1 = trunc(k2, (in_channel, hidden))                      # torch (hid,C,1,1) -> (C,hid)
    b1 = jnp.zeros((1, hidden), jnp.float32)
    w2 = trunc(k3, (hidden, out_channel))                     # torch (out,hid,1,1) -> (hid,out)
    b2 = jnp.zeros((1, out_channel), jnp.float32)
    gamma = jnp.ones((1, in_channel), jnp.float32)
    beta = jnp.zeros((1, in_channel), jnp.float32)
    return wdw, bdw, gamma, beta, w1, b1, w2, b2


def _reference_jax(x_nchw, params, eps=1e-5):
    """Pure-JAX f32 reference (same math as the PyTorch module)."""
    wdw, bdw, gamma, beta, w1, b1, w2, b2 = params
    B, C, H, W = x_nchw.shape
    x = jnp.transpose(x_nchw, (0, 2, 3, 1))
    xp = jnp.pad(x, ((0, 0), (1, 1), (1, 1), (0, 0)))
    acc = jnp.zeros((B, H, W, C), jnp.float32)
    for kh in range(3):
        for kw in range(3):
            acc = acc + xp[:, kh:kh + H, kw:kw + W, :] * wdw[kh, kw, :]
    acc = acc + bdw[0]
    mean = jnp.mean(acc, -1, keepdims=True)
    var = jnp.mean((acc - mean) ** 2, -1, keepdims=True)
    xn = (acc - mean) * jax.lax.rsqrt(var + eps) * gamma[0] + beta[0]
    h1 = xn @ w1 + b1[0]
    h1 = 0.5 * h1 * (1.0 + jax.lax.erf(h1 / jnp.sqrt(2.0)))
    h2 = h1 @ w2 + b2[0]
    return jnp.transpose(h2, (0, 3, 1, 2))


if __name__ == "__main__":
    key = jax.random.PRNGKey(0)
    kx, kp = jax.random.split(key)

    B, C, H, W = 2, 4, 16, 16
    OUT = 4
    x = jax.random.normal(kx, (B, C, H, W), jnp.float32)
    params = init_params(kp, in_channel=C, out_channel=OUT, expan_ratio=4)

    ref = jax.block_until_ready(_reference_jax(x, params))

    # Default tiling (whole image per step for this small shape).
    out = jax.block_until_ready(conv_ffn_pallas(x, params))
    assert out.shape == (B, OUT, H, W), out.shape
    max_err = float(jnp.max(jnp.abs(out - ref)))
    assert jnp.allclose(out, ref, atol=5e-4, rtol=2e-2), max_err

    # Forced multi-row-tile run: exercises the in-kernel halo exchange between row tiles.
    out_tiled = jax.block_until_ready(conv_ffn_pallas(x, params, max_row_tile=4))
    max_err_tiled = float(jnp.max(jnp.abs(out_tiled - ref)))
    assert jnp.allclose(out_tiled, ref, atol=5e-4, rtol=2e-2), max_err_tiled

    print("KERNEL_OK")
</pallas_src>

<mosaic_0001>
module attributes {stable_mosaic.version = 11 : i64} {
  func.func @_conv_ffn_kernel(%arg0: i32, %arg1: i32, %arg2: memref<1x16x16x4xbf16, #tpu.memory_space<vmem>>, %arg3: memref<1x1x16x4xbf16, #tpu.memory_space<vmem>>, %arg4: memref<1x1x16x4xbf16, #tpu.memory_space<vmem>>, %arg5: memref<3x3x4xf32, #tpu.memory_space<vmem>>, %arg6: memref<1x4xf32, #tpu.memory_space<vmem>>, %arg7: memref<4x16xbf16, #tpu.memory_space<vmem>>, %arg8: memref<1x16xf32, #tpu.memory_space<vmem>>, %arg9: memref<16x4xbf16, #tpu.memory_space<vmem>>, %arg10: memref<1x4xf32, #tpu.memory_space<vmem>>, %arg11: memref<1x16x16x4xbf16, #tpu.memory_space<vmem>>, %arg12: memref<18x18x4xbf16, #tpu.memory_space<vmem>>) attributes {dimension_semantics = [#tpu.dimension_semantics<parallel>, #tpu.dimension_semantics<parallel>], iteration_bounds = array<i64: 2, 1>, scalar_prefetch = 0 : i64, scratch_operands = 1 : i64, tpu.core_type = #tpu.core_type<tc>, window_params = [{transform_indices = @transform_0, window_bounds = array<i64: 1, 16, 16, 4>}, {transform_indices = @transform_1, window_bounds = array<i64: 1, 1, 16, 4>}, {transform_indices = @transform_2, window_bounds = array<i64: 1, 1, 16, 4>}, {pipeline_mode = #tpu.pipeline_mode<synchronous>, transform_indices = @transform_3, window_bounds = array<i64: 3, 3, 4>}, {pipeline_mode = #tpu.pipeline_mode<synchronous>, transform_indices = @transform_4, window_bounds = array<i64: 1, 4>}, {pipeline_mode = #tpu.pipeline_mode<synchronous>, transform_indices = @transform_5, window_bounds = array<i64: 4, 16>}, {pipeline_mode = #tpu.pipeline_mode<synchronous>, transform_indices = @transform_6, window_bounds = array<i64: 1, 16>}, {pipeline_mode = #tpu.pipeline_mode<synchronous>, transform_indices = @transform_7, window_bounds = array<i64: 16, 4>}, {pipeline_mode = #tpu.pipeline_mode<synchronous>, transform_indices = @transform_8, window_bounds = array<i64: 1, 4>}, {transform_indices = @transform_9, window_bounds = array<i64: 1, 16, 16, 4>}]} {
    %cst = arith.constant 0.000000e+00 : bf16
    %0 = vector.broadcast %cst : bf16 to vector<18x18x4xbf16>
    %c0 = arith.constant 0 : index
    %c0_0 = arith.constant 0 : index
    %c0_1 = arith.constant 0 : index
    %1 = vector.load %arg12[%c0, %c0_0, %c0_1] : memref<18x18x4xbf16, #tpu.memory_space<vmem>>, vector<18x18x4xbf16>
    tpu.vector_store %arg12[%c0, %c0_0, %c0_1], %0 {strides = array<i32>} : memref<18x18x4xbf16, #tpu.memory_space<vmem>>, vector<18x18x4xbf16>,
    %c0_2 = arith.constant 0 : index
    %c0_3 = arith.constant 0 : index
    %c0_4 = arith.constant 0 : index
    %c0_5 = arith.constant 0 : index
    %2 = vector.load %arg2[%c0_2, %c0_3, %c0_4, %c0_5] : memref<1x16x16x4xbf16, #tpu.memory_space<vmem>>, vector<1x16x16x4xbf16>
    %3 = vector.shape_cast %2 : vector<1x16x16x4xbf16> to vector<16x16x4xbf16>
    %c1 = arith.constant 1 : index
    %c1_6 = arith.constant 1 : index
    %c0_7 = arith.constant 0 : index
    %4 = vector.load %arg12[%c1, %c1_6, %c0_7] : memref<18x18x4xbf16, #tpu.memory_space<vmem>>, vector<16x16x4xbf16>
    tpu.vector_store %arg12[%c1, %c1_6, %c0_7], %3 {strides = array<i32>} : memref<18x18x4xbf16, #tpu.memory_space<vmem>>, vector<16x16x4xbf16>,
    %c0_i32 = arith.constant 0 : i32
    %5 = arith.cmpi sgt, %arg1, %c0_i32 : i32
    %6 = arith.extui %5 : i1 to i32
    %c0_i32_8 = arith.constant 0 : i32
    %7 = arith.cmpi ne, %6, %c0_i32_8 : i32
    scf.if %7 {
      %c0_48 = arith.constant 0 : index
      %c0_49 = arith.constant 0 : index
      %c0_50 = arith.constant 0 : index
      %c0_51 = arith.constant 0 : index
      %135 = vector.load %arg3[%c0_48, %c0_49, %c0_50, %c0_51] : memref<1x1x16x4xbf16, #tpu.memory_space<vmem>>, vector<1x1x16x4xbf16>
      %136 = vector.shape_cast %135 : vector<1x1x16x4xbf16> to vector<1x16x4xbf16>
      %c0_52 = arith.constant 0 : index
      %c1_53 = arith.constant 1 : index
      %c0_54 = arith.constant 0 : index
      %137 = vector.load %arg12[%c0_52, %c1_53, %c0_54] : memref<18x18x4xbf16, #tpu.memory_space<vmem>>, vector<1x16x4xbf16>
      tpu.vector_store %arg12[%c0_52, %c1_53, %c0_54], %136 {strides = array<i32>} : memref<18x18x4xbf16, #tpu.memory_space<vmem>>, vector<1x16x4xbf16>,
    } else {
    }
    %c0_i32_9 = arith.constant 0 : i32
    %8 = arith.cmpi slt, %arg1, %c0_i32_9 : i32
    %9 = arith.extui %8 : i1 to i32
    %c0_i32_10 = arith.constant 0 : i32
    %10 = arith.cmpi ne, %9, %c0_i32_10 : i32
    scf.if %10 {
      %c0_48 = arith.constant 0 : index
      %c0_49 = arith.constant 0 : index
      %c0_50 = arith.constant 0 : index
      %c0_51 = arith.constant 0 : index
      %135 = vector.load %arg4[%c0_48, %c0_49, %c0_50, %c0_51] : memref<1x1x16x4xbf16, #tpu.memory_space<vmem>>, vector<1x1x16x4xbf16>
      %136 = vector.shape_cast %135 : vector<1x1x16x4xbf16> to vector<1x16x4xbf16>
      %c17 = arith.constant 17 : index
      %c1_52 = arith.constant 1 : index
      %c0_53 = arith.constant 0 : index
      %137 = vector.load %arg12[%c17, %c1_52, %c0_53] : memref<18x18x4xbf16, #tpu.memory_space<vmem>>, vector<1x16x4xbf16>
      tpu.vector_store %arg12[%c17, %c1_52, %c0_53], %136 {strides = array<i32>} : memref<18x18x4xbf16, #tpu.memory_space<vmem>>, vector<1x16x4xbf16>,
    } else {
    }
    %c0_11 = arith.constant 0 : index
    %c0_12 = arith.constant 0 : index
    %c0_13 = arith.constant 0 : index
    %11 = vector.load %arg5[%c0_11, %c0_12, %c0_13] : memref<3x3x4xf32, #tpu.memory_space<vmem>>, vector<3x3x4xf32>
    %cst_14 = arith.constant 0.000000e+00 : f32
    %12 = vector.broadcast %cst_14 : f32 to vector<16x16x4xf32>
    %c0_15 = arith.constant 0 : index
    %c0_16 = arith.constant 0 : index
    %c0_17 = arith.constant 0 : index
    %13 = vector.load %arg12[%c0_15, %c0_16, %c0_17] : memref<18x18x4xbf16, #tpu.memory_space<vmem>>, vector<18x16x4xbf16>
    %14 = arith.extf %13 : vector<18x16x4xbf16> to vector<18x16x4xf32>
    %15 = vector.extract_strided_slice %14 {offsets = [0, 0, 0], sizes = [16, 16, 4], strides = [1, 1, 1]} : vector<18x16x4xf32> to vector<16x16x4xf32>
    %16 = vector.extract_strided_slice %11 {offsets = [0, 0, 0], sizes = [1, 1, 4], strides = [1, 1, 1]} : vector<3x3x4xf32> to vector<1x1x4xf32>
    %17 = vector.shape_cast %16 : vector<1x1x4xf32> to vector<4xf32>
    %18 = vector.shape_cast %17 : vector<4xf32> to vector<1x1x4xf32>
    %19 = vector.broadcast %18 : vector<1x1x4xf32> to vector<16x16x4xf32>
    %20 = arith.mulf %15, %19 : vector<16x16x4xf32>
    %21 = arith.addf %12, %20 : vector<16x16x4xf32>
    %22 = vector.extract_strided_slice %14 {offsets = [1, 0, 0], sizes = [16, 16, 4], strides = [1, 1, 1]} : vector<18x16x4xf32> to vector<16x16x4xf32>
    %23 = vector.extract_strided_slice %11 {offsets = [1, 0, 0], sizes = [1, 1, 4], strides = [1, 1, 1]} : vector<3x3x4xf32> to vector<1x1x4xf32>
    %24 = vector.shape_cast %23 : vector<1x1x4xf32> to vector<4xf32>
    %25 = vector.shape_cast %24 : vector<4xf32> to vector<1x1x4xf32>
    %26 = vector.broadcast %25 : vector<1x1x4xf32> to vector<16x16x4xf32>
    %27 = arith.mulf %22, %26 : vector<16x16x4xf32>
    %28 = arith.addf %21, %27 : vector<16x16x4xf32>
    %29 = vector.extract_strided_slice %14 {offsets = [2, 0, 0], sizes = [16, 16, 4], strides = [1, 1, 1]} : vector<18x16x4xf32> to vector<16x16x4xf32>
    %30 = vector.extract_strided_slice %11 {offsets = [2, 0, 0], sizes = [1, 1, 4], strides = [1, 1, 1]} : vector<3x3x4xf32> to vector<1x1x4xf32>
    %31 = vector.shape_cast %30 : vector<1x1x4xf32> to vector<4xf32>
    %32 = vector.shape_cast %31 : vector<4xf32> to vector<1x1x4xf32>
    %33 = vector.broadcast %32 : vector<1x1x4xf32> to vector<16x16x4xf32>
    %34 = arith.mulf %29, %33 : vector<16x16x4xf32>
    %35 = arith.addf %28, %34 : vector<16x16x4xf32>
    %c0_18 = arith.constant 0 : index
    %c1_19 = arith.constant 1 : index
    %c0_20 = arith.constant 0 : index
    %36 = vector.load %arg12[%c0_18, %c1_19, %c0_20] : memref<18x18x4xbf16, #tpu.memory_space<vmem>>, vector<18x16x4xbf16>
    %37 = arith.extf %36 : vector<18x16x4xbf16> to vector<18x16x4xf32>
    %38 = vector.extract_strided_slice %37 {offsets = [0, 0, 0], sizes = [16, 16, 4], strides = [1, 1, 1]} : vector<18x16x4xf32> to vector<16x16x4xf32>
    %39 = vector.extract_strided_slice %11 {offsets = [0, 1, 0], sizes = [1, 1, 4], strides = [1, 1, 1]} : vector<3x3x4xf32> to vector<1x1x4xf32>
    %40 = vector.shape_cast %39 : vector<1x1x4xf32> to vector<4xf32>
    %41 = vector.shape_cast %40 : vector<4xf32> to vector<1x1x4xf32>
    %42 = vector.broadcast %41 : vector<1x1x4xf32> to vector<16x16x4xf32>
    %43 = arith.mulf %38, %42 : vector<16x16x4xf32>
    %44 = arith.addf %35, %43 : vector<16x16x4xf32>
    %45 = vector.extract_strided_slice %37 {offsets = [1, 0, 0], sizes = [16, 16, 4], strides = [1, 1, 1]} : vector<18x16x4xf32> to vector<16x16x4xf32>
    %46 = vector.extract_strided_slice %11 {offsets = [1, 1, 0], sizes = [1, 1, 4], strides = [1, 1, 1]} : vector<3x3x4xf32> to vector<1x1x4xf32>
    %47 = vector.shape_cast %46 : vector<1x1x4xf32> to vector<4xf32>
    %48 = vector.shape_cast %47 : vector<4xf32> to vector<1x1x4xf32>
    %49 = vector.broadcast %48 : vector<1x1x4xf32> to vector<16x16x4xf32>
    %50 = arith.mulf %45, %49 : vector<16x16x4xf32>
    %51 = arith.addf %44, %50 : vector<16x16x4xf32>
    %52 = vector.extract_strided_slice %37 {offsets = [2, 0, 0], sizes = [16, 16, 4], strides = [1, 1, 1]} : vector<18x16x4xf32> to vector<16x16x4xf32>
    %53 = vector.extract_strided_slice %11 {offsets = [2, 1, 0], sizes = [1, 1, 4], strides = [1, 1, 1]} : vector<3x3x4xf32> to vector<1x1x4xf32>
    %54 = vector.shape_cast %53 : vector<1x1x4xf32> to vector<4xf32>
    %55 = vector.shape_cast %54 : vector<4xf32> to vector<1x1x4xf32>
    %56 = vector.broadcast %55 : vector<1x1x4xf32> to vector<16x16x4xf32>
    %57 = arith.mulf %52, %56 : vector<16x16x4xf32>
    %58 = arith.addf %51, %57 : vector<16x16x4xf32>
    %c0_21 = arith.constant 0 : index
    %c2 = arith.constant 2 : index
    %c0_22 = arith.constant 0 : index
    %59 = vector.load %arg12[%c0_21, %c2, %c0_22] : memref<18x18x4xbf16, #tpu.memory_space<vmem>>, vector<18x16x4xbf16>
    %60 = arith.extf %59 : vector<18x16x4xbf16> to vector<18x16x4xf32>
    %61 = vector.extract_strided_slice %60 {offsets = [0, 0, 0], sizes = [16, 16, 4], strides = [1, 1, 1]} : vector<18x16x4xf32> to vector<16x16x4xf32>
    %62 = vector.extract_strided_slice %11 {offsets = [0, 2, 0], sizes = [1, 1, 4], strides = [1, 1, 1]} : vector<3x3x4xf32> to vector<1x1x4xf32>
    %63 = vector.shape_cast %62 : vector<1x1x4xf32> to vector<4xf32>
    %64 = vector.shape_cast %63 : vector<4xf32> to vector<1x1x4xf32>
    %65 = vector.broadcast %64 : vector<1x1x4xf32> to vector<16x16x4xf32>
    %66 = arith.mulf %61, %65 : vector<16x16x4xf32>
    %67 = arith.addf %58, %66 : vector<16x16x4xf32>
    %68 = vector.extract_strided_slice %60 {offsets = [1, 0, 0], sizes = [16, 16, 4], strides = [1, 1, 1]} : vector<18x16x4xf32> to vector<16x16x4xf32>
    %69 = vector.extract_strided_slice %11 {offsets = [1, 2, 0], sizes = [1, 1, 4], strides = [1, 1, 1]} : vector<3x3x4xf32> to vector<1x1x4xf32>
    %70 = vector.shape_cast %69 : vector<1x1x4xf32> to vector<4xf32>
    %71 = vector.shape_cast %70 : vector<4xf32> to vector<1x1x4xf32>
    %72 = vector.broadcast %71 : vector<1x1x4xf32> to vector<16x16x4xf32>
    %73 = arith.mulf %68, %72 : vector<16x16x4xf32>
    %74 = arith.addf %67, %73 : vector<16x16x4xf32>
    %75 = vector.extract_strided_slice %60 {offsets = [2, 0, 0], sizes = [16, 16, 4], strides = [1, 1, 1]} : vector<18x16x4xf32> to vector<16x16x4xf32>
    %76 = vector.extract_strided_slice %11 {offsets = [2, 2, 0], sizes = [1, 1, 4], strides = [1, 1, 1]} : vector<3x3x4xf32> to vector<1x1x4xf32>
    %77 = vector.shape_cast %76 : vector<1x1x4xf32> to vector<4xf32>
    %78 = vector.shape_cast %77 : vector<4xf32> to vector<1x1x4xf32>
    %79 = vector.broadcast %78 : vector<1x1x4xf32> to vector<16x16x4xf32>
    %80 = arith.mulf %75, %79 : vector<16x16x4xf32>
    %81 = arith.addf %74, %80 : vector<16x16x4xf32>
    %c0_23 = arith.constant 0 : index
    %c0_24 = arith.constant 0 : index
    %82 = vector.load %arg6[%c0_23, %c0_24] : memref<1x4xf32, #tpu.memory_space<vmem>>, vector<1x4xf32>
    %83 = vector.shape_cast %82 : vector<1x4xf32> to vector<4xf32>
    %84 = vector.shape_cast %83 : vector<4xf32> to vector<1x1x4xf32>
    %85 = vector.broadcast %84 : vector<1x1x4xf32> to vector<16x16x4xf32>
    %86 = arith.addf %81, %85 : vector<16x16x4xf32>
    %cst_25 = arith.constant dense<0.000000e+00> : vector<16x16xf32>
    %87 = vector.multi_reduction <add>, %86, %cst_25 [2] : vector<16x16x4xf32> to vector<16x16xf32>
    %88 = vector.shape_cast %87 : vector<16x16xf32> to vector<16x16x1xf32>
    %cst_26 = arith.constant 4.000000e+00 : f32
    %89 = vector.broadcast %cst_26 : f32 to vector<16x16x1xf32>
    %90 = arith.divf %88, %89 : vector<16x16x1xf32>
    %91 = vector.broadcast %90 : vector<16x16x1xf32> to vector<16x16x4xf32>
    %92 = arith.subf %86, %91 : vector<16x16x4xf32>
    %93 = arith.mulf %92, %92 : vector<16x16x4xf32>
    %cst_27 = arith.constant dense<0.000000e+00> : vector<16x16xf32>
    %94 = vector.multi_reduction <add>, %93, %cst_27 [2] : vector<16x16x4xf32> to vector<16x16xf32>
    %95 = vector.shape_cast %94 : vector<16x16xf32> to vector<16x16x1xf32>
    %cst_28 = arith.constant 4.000000e+00 : f32
    %96 = vector.broadcast %cst_28 : f32 to vector<16x16x1xf32>
    %97 = arith.divf %95, %96 : vector<16x16x1xf32>
    %98 = vector.broadcast %90 : vector<16x16x1xf32> to vector<16x16x4xf32>
    %99 = arith.subf %86, %98 : vector<16x16x4xf32>
    %cst_29 = arith.constant 9.99999974E-6 : f32
    %100 = vector.broadcast %cst_29 : f32 to vector<16x16x1xf32>
    %101 = arith.addf %97, %100 : vector<16x16x1xf32>
    %102 = math.rsqrt %101 : vector<16x16x1xf32>
    %103 = vector.broadcast %102 : vector<16x16x1xf32> to vector<16x16x4xf32>
    %104 = arith.mulf %99, %103 : vector<16x16x4xf32>
    %105 = vector.shape_cast %104 : vector<16x16x4xf32> to vector<256x4xf32>
    %106 = arith.truncf %105 : vector<256x4xf32> to vector<256x4xbf16>
    %cst_30 = arith.constant 0.000000e+00 : f32
    %107 = vector.broadcast %cst_30 : f32 to vector<256x4xf32>
    %c0_31 = arith.constant 0 : index
    %c0_32 = arith.constant 0 : index
    %108 = vector.load %arg7[%c0_31, %c0_32] : memref<4x16xbf16, #tpu.memory_space<vmem>>, vector<4x16xbf16>
    %cst_33 = arith.constant dense<0.000000e+00> : vector<256x16xf32>
    %109 = tpu.matmul %106, %108, %cst_33 {dimension_numbers = #tpu.dot_dimension_numbers<[1], [0], [0], [1], [0, 0, 1, 1], [], []>} : vector<256x4xbf16>, vector<4x16xbf16>, vector<256x16xf32> -> vector<256x16xf32>
    %c0_34 = arith.constant 0 : index
    %c0_35 = arith.constant 0 : index
    %110 = vector.load %arg8[%c0_34, %c0_35] : memref<1x16xf32, #tpu.memory_space<vmem>>, vector<1x16xf32>
    %111 = vector.shape_cast %110 : vector<1x16xf32> to vector<16xf32>
    %112 = vector.shape_cast %111 : vector<16xf32> to vector<1x16xf32>
    %113 = vector.broadcast %112 : vector<1x16xf32> to vector<256x16xf32>
    %114 = arith.addf %109, %113 : vector<256x16xf32>
    %cst_36 = arith.constant 5.000000e-01 : f32
    %115 = vector.broadcast %cst_36 : f32 to vector<256x16xf32>
    %116 = arith.mulf %115, %114 : vector<256x16xf32>
    %cst_37 = arith.constant 0.707106769 : f32
    %117 = vector.broadcast %cst_37 : f32 to vector<256x16xf32>
    %118 = arith.mulf %114, %117 : vector<256x16xf32>
    %119 = math.erf %118 : vector<256x16xf32>
    %cst_38 = arith.constant 1.000000e+00 : f32
    %120 = vector.broadcast %cst_38 : f32 to vector<256x16xf32>
    %121 = arith.addf %120, %119 : vector<256x16xf32>
    %122 = arith.mulf %116, %121 : vector<256x16xf32>
    %123 = arith.truncf %122 : vector<256x16xf32> to vector<256x16xbf16>
    %c0_39 = arith.constant 0 : index
    %c0_40 = arith.constant 0 : index
    %124 = vector.load %arg9[%c0_39, %c0_40] : memref<16x4xbf16, #tpu.memory_space<vmem>>, vector<16x4xbf16>
    %cst_41 = arith.constant dense<0.000000e+00> : vector<256x4xf32>
    %125 = tpu.matmul %123, %124, %cst_41 {dimension_numbers = #tpu.dot_dimension_numbers<[1], [0], [0], [1], [0, 0, 1, 1], [], []>} : vector<256x16xbf16>, vector<16x4xbf16>, vector<256x4xf32> -> vector<256x4xf32>
    %126 = arith.addf %107, %125 : vector<256x4xf32>
    %c0_42 = arith.constant 0 : index
    %c0_43 = arith.constant 0 : index
    %127 = vector.load %arg10[%c0_42, %c0_43] : memref<1x4xf32, #tpu.memory_space<vmem>>, vector<1x4xf32>
    %128 = vector.broadcast %127 : vector<1x4xf32> to vector<256x4xf32>
    %129 = arith.addf %126, %128 : vector<256x4xf32>
    %130 = vector.shape_cast %129 : vector<256x4xf32> to vector<16x16x4xf32>
    %131 = arith.truncf %130 : vector<16x16x4xf32> to vector<16x16x4xbf16>
    %c0_44 = arith.constant 0 : index
    %c0_45 = arith.constant 0 : index
    %c0_46 = arith.constant 0 : index
    %c0_47 = arith.constant 0 : index
    %132 = vector.load %arg11[%c0_44, %c0_45, %c0_46, %c0_47] : memref<1x16x16x4xbf16, #tpu.memory_space<vmem>>, vector<1x16x16x4xbf16>
    %133 = vector.shape_cast %132 : vector<1x16x16x4xbf16> to vector<16x16x4xbf16>
    %134 = vector.shape_cast %131 : vector<16x16x4xbf16> to vector<1x16x16x4xbf16>
    tpu.vector_store %arg11[%c0_44, %c0_45, %c0_46, %c0_47], %134 {strides = array<i32>} : memref<1x16x16x4xbf16, #tpu.memory_space<vmem>>, vector<1x16x16x4xbf16>,
    return
  }
  func.func @transform_0(%arg0: i32, %arg1: i32) -> (i32, i32, i32, i32) {
    %c0_i32 = arith.constant 0 : i32
    %c0_i32_0 = arith.constant 0 : i32
    %c0_i32_1 = arith.constant 0 : i32
    return %arg0, %arg1, %c0_i32, %c0_i32_0 : i32, i32, i32, i32
  }
  func.func @transform_1(%arg0: i32, %arg1: i32) -> (i32, i32, i32, i32) {
    %c16_i32 = arith.constant 16 : i32
    %0 = arith.muli %arg1, %c16_i32 : i32
    %c1_i32 = arith.constant 1 : i32
    %1 = arith.subi %0, %c1_i32 : i32
    %c0_i32 = arith.constant 0 : i32
    %2 = arith.maxsi %1, %c0_i32 : i32
    %c0_i32_0 = arith.constant 0 : i32
    %c0_i32_1 = arith.constant 0 : i32
    %c0_i32_2 = arith.constant 0 : i32
    return %arg0, %2, %c0_i32_0, %c0_i32_1 : i32, i32, i32, i32
  }
  func.func @transform_2(%arg0: i32, %arg1: i32) -> (i32, i32, i32, i32) {
    %c1_i32 = arith.constant 1 : i32
    %0 = arith.addi %arg1, %c1_i32 : i32
    %c16_i32 = arith.constant 16 : i32
    %1 = arith.muli %0, %c16_i32 : i32
    %c15_i32 = arith.constant 15 : i32
    %2 = arith.minsi %1, %c15_i32 : i32
    %c0_i32 = arith.constant 0 : i32
    %c0_i32_0 = arith.constant 0 : i32
    %c0_i32_1 = arith.constant 0 : i32
    return %arg0, %2, %c0_i32, %c0_i32_0 : i32, i32, i32, i32
  }
  func.func @transform_3(%arg0: i32, %arg1: i32) -> (i32, i32, i32) {
    %c0_i32 = arith.constant 0 : i32
    %c0_i32_0 = arith.constant 0 : i32
    %c0_i32_1 = arith.constant 0 : i32
    %c0_i32_2 = arith.constant 0 : i32
    return %c0_i32, %c0_i32_0, %c0_i32_1 : i32, i32, i32
  }
  func.func @transform_4(%arg0: i32, %arg1: i32) -> (i32, i32) {
    %c0_i32 = arith.constant 0 : i32
    %c0_i32_0 = arith.constant 0 : i32
    %c0_i32_1 = arith.constant 0 : i32
    return %c0_i32, %c0_i32_0 : i32, i32
  }
  func.func @transform_5(%arg0: i32, %arg1: i32) -> (i32, i32) {
    %c0_i32 = arith.constant 0 : i32
    %c0_i32_0 = arith.constant 0 : i32
    %c0_i32_1 = arith.constant 0 : i32
    return %c0_i32, %c0_i32_0 : i32, i32
  }
  func.func @transform_6(%arg0: i32, %arg1: i32) -> (i32, i32) {
    %c0_i32 = arith.constant 0 : i32
    %c0_i32_0 = arith.constant 0 : i32
    %c0_i32_1 = arith.constant 0 : i32
    return %c0_i32, %c0_i32_0 : i32, i32
  }
  func.func @transform_7(%arg0: i32, %arg1: i32) -> (i32, i32) {
    %c0_i32 = arith.constant 0 : i32
    %c0_i32_0 = arith.constant 0 : i32
    %c0_i32_1 = arith.constant 0 : i32
    return %c0_i32, %c0_i32_0 : i32, i32
  }
  func.func @transform_8(%arg0: i32, %arg1: i32) -> (i32, i32) {
    %c0_i32 = arith.constant 0 : i32
    %c0_i32_0 = arith.constant 0 : i32
    %c0_i32_1 = arith.constant 0 : i32
    return %c0_i32, %c0_i32_0 : i32, i32
  }
  func.func @transform_9(%arg0: i32, %arg1: i32) -> (i32, i32, i32, i32) {
    %c0_i32 = arith.constant 0 : i32
    %c0_i32_0 = arith.constant 0 : i32
    %c0_i32_1 = arith.constant 0 : i32
    return %arg0, %arg1, %c0_i32, %c0_i32_0 : i32, i32, i32, i32
  }
}

</mosaic_0001>

<bundles_post_ra>
// kernel: tpu_custom_call.1
= control target key start
LH: loop header
LB: loop body
LE: loop exit
PB: predicated region body
PF: predicated region fallthrough
CT: control target
= control target key end

     0   :  { %s5949_s28 = smov 0   ;;  %s5951_s29 = smov 0   ;;  %s10788_s0 = inlined_call_operand.vmem [shape: bf16[2,16,16,4], index: 0, kind: input, shape index: {}]   ;;  %s10789_s1 = inlined_call_operand.vmem [shape: bf16[2,16,16,4], index: 1, kind: input, shape index: {}]   ;;  %s10790_s2 = inlined_call_operand.vmem [shape: bf16[2,16,16,4], index: 2, kind: input, shape index: {}]   ;;  %s10791_s3 = inlined_call_operand.vmem [shape: f32[3,3,4], index: 3, kind: input, shape index: {}]   ;;  %s10792_s4 = inlined_call_operand.vmem [shape: f32[1,4], index: 4, kind: input, shape index: {}]   ;;  %s10793_s5 = inlined_call_operand.vmem [shape: bf16[4,16], index: 5, kind: input, shape index: {}]   ;;  %s10794_s6 = inlined_call_operand.vmem [shape: f32[1,16], index: 6, kind: input, shape index: {}]   ;;  %s10795_s7 = inlined_call_operand.vmem [shape: bf16[16,4], index: 7, kind: input, shape index: {}]   ;;  %s10796_s8 = inlined_call_operand.vmem [shape: f32[1,4], index: 8, kind: input, shape index: {}]   ;;  %s10797_s9 = inlined_call_operand.vmem [shape: bf16[2,16,16,4], index: 9, kind: output, shape index: {}]  }
   0x1   :  { %s5953_s30 = smov 0  }
   0x2 LB: > { %s31_s10 = sadd.s32 1, %s5891_s29  ;;  %p5578_p0 = scmp.ge.s32.totalorder %s5895_s30, 1  ;;  %s5895_s30 = sphi %s5953_s30, %s19_s30   ;;  %s5891_s29 = sphi %s5951_s29, %s11375_s29   ;;  %s5887_s28 = sphi %s5949_s28, %s11374_s28  }
   0x3   : > { %p33_p1 = scmp.ge.s32.totalorder %s31_s10, 2  ;;  %p373_p2 = scmp.lt.s32.totalorder %s5895_s30, 3 }
   0x5   : > { %s11377_s10 = smov (%p33_p1, %s31_s10), 0  ;;  %p374_p3 = pnand %p5578_p0, %p373_p2 }
   0x7   : > { %377 = sbr.rel (%p374_p3) target bundleno = 1169 (0x491), region = 56 }
   0xc   : > { %p446_p4 = scmp.lt.s32.totalorder %s5887_s28, 1  ;;  %vm502_vm0 = vcmask 27648   ;;  %v10805_v0 = vmov 0   ;;  %vm590_vm1 = vsmask.f32 256  ;;  %vm1501_vm6 = vcmask 1046528  }
   0xd   : > { %528 = vst.msk [vmem:[#allocation2 + $0x60] sm:$0xf] %vm502_vm0, %v10805_v0  ;;  %vm591_vm2 = vsmask.f32 4368  ;;  %vm915_vm3 = vsmask.f32 7938 }
   0xe   : > { %s11379_s28 = smov (!%p446_p4, %s5887_s28), 1  ;;  %529 = vst.msk [vmem:[#allocation2 + $0x64] sm:$0xf] %vm502_vm0, %v10805_v0  ;;  %vm5997_vm4 = vmor %vm590_vm1, %vm591_vm2  ;;  %v1098_v40 = vld [vmem:[%s10791_s3] sm:$0x7]  ;;  %vm2261_vm7 = vcmask 1045504  }
   0xf   : > { %531 = vst.msk [vmem:[#allocation2 + $0x6c] sm:$0xf] %vm502_vm0, %v10805_v0  ;;  %s5657_s11 = sshll.u32 %s11379_s28, 7  ;;  %vm6007_vm5 = vmand %vm502_vm0, %vm915_vm3  ;;  %v1099_v44 = vld [vmem:[%s10791_s3 + $0x4] sm:$0x7]  ;;  %v6055_v52 = vperm.slane %v1098_v40, 0 }
  0x10   : > { %532 = vst.msk [vmem:[#allocation2 + $0x70] sm:$0xf] %vm502_vm0, %v10805_v0  ;;  %s5983_s14 = scalar_lea.vmem %s10788_s0, %s5657_s11  ;;  %v1100_v45 = vld [vmem:[%s10791_s3 + $0x8] sm:$0x7]  ;;  %v6057_v53 = vperm.slane %v1099_v44, 0  ;;  %v6061_v55 = vperm.slane %v1098_v40, 1  ;;  %s10504_s25 = scalar_lea.vmem %s10797_s9, %s5657_s11 }
  0x11   : > { %534 = vst.msk [vmem:[#allocation2 + $0x78] sm:$0xf] %vm502_vm0, %v10805_v0  ;;  %v572_v1 = vld [vmem:[%s5983_s14 + $0x38] sm:$0xf]  ;;  %v573_v2 = vld [vmem:[%s5983_s14 + $0x3c] sm:$0xf] }
  0x12   : > { %535 = vst.msk [vmem:[#allocation2 + $0x7c] sm:$0xf] %vm502_vm0, %v10805_v0  ;;  %v574_v3 = vld [vmem:[%s5983_s14 + $0x40] sm:$0xf]  ;;  %v575_v4 = vld [vmem:[%s5983_s14 + $0x44] sm:$0xf] }
  0x13   : > { %v576_v5 = vld [vmem:[%s5983_s14 + $0x48] sm:$0xf]  ;;  %v577_v6 = vld [vmem:[%s5983_s14 + $0x4c] sm:$0xf]  ;;  %v713_v7 = vshrl.u32 %v572_v1, 16  ;;  %v716_v8 = vshll.u32 %v572_v1, 16 }
  0x14   : > { %v721_v9 = vshrl.u32 %v573_v2, 16  ;;  %v724_v10 = vshll.u32 %v573_v2, 16  ;;  %v730_v11 = vshrl.u32 %v574_v3, 16  ;;  %v733_v12 = vshll.u32 %v574_v3, 16  ;;  %v968_v20 = vld [vmem:[#allocation2 + $0x60] sm:$0xf] }
  0x15   : > { %v738_v13 = vshrl.u32 %v575_v4, 16  ;;  %v741_v14 = vshll.u32 %v575_v4, 16  ;;  %v715_v16 = vrot.slane %v713_v7, 7  ;;  %v747_v18 = vshrl.u32 %v576_v5, 16  ;;  %503 = vst.msk [vmem:[#allocation2] sm:$0xf] %vm502_vm0, %v10805_v0 }
  0x16   : > { %v6001_v17 = vrot.slane %v721_v9, 7  ;;  %v750_v19 = vshll.u32 %v576_v5, 16  ;;  %v732_v21 = vrot.slane %v730_v11, 7  ;;  %v755_v23 = vshrl.u32 %v577_v6, 16  ;;  %v975_v30 = vld [vmem:[#allocation2 + $0x6c] sm:$0xf] }
  0x17   : > { %v6003_v22 = vrot.slane %v738_v13, 7  ;;  %v758_v24 = vshll.u32 %v577_v6, 16  ;;  %v718_v26 = vor.u32 %v716_v8, %v715_v16  ;;  %v719_v27 = vrot.slane %v715_v16, 4  ;;  %504 = vst.msk [vmem:[#allocation2 + $0x4] sm:$0xf] %vm502_vm0, %v10805_v0 }
  0x18   : > { %v726_v28 = vor.u32 %v724_v10, %v6001_v17  ;;  %v749_v29 = vrot.slane %v747_v18, 7  ;;  %v735_v31 = vor.u32 %v733_v12, %v732_v21  ;;  %v736_v32 = vrot.slane %v732_v21, 4  ;;  %v982_v35 = vld [vmem:[#allocation2 + $0x78] sm:$0xf]  ;;  %v6041_v47 = vld [vmem:[%s5983_s14] sm:$0xf] }
  0x19   : > { %v743_v33 = vor.u32 %v741_v14, %v6003_v22  ;;  %v6013_v34 = vrot.slane %v755_v23, 7  ;;  %v969_v39 = vsel %vm6007_vm5, %v718_v26, %v968_v20  ;;  %v6044_v48 = vld [vmem:[%s5983_s14 + $0x4] sm:$0xf]  ;;  %v6049_v50 = vld [vmem:[%s5983_s14 + $0x8] sm:$0xf]  ;;  %v6059_v54 = vperm.slane %v1100_v45, 0 }
  0x1a   : > { %v727_v36 = vsel %vm5997_vm4, %v719_v27, %v726_v28  ;;  %v752_v37 = vor.u32 %v750_v19, %v749_v29  ;;  %v753_v38 = vrot.slane %v749_v29, 4  ;;  %970 = vst [vmem:[#allocation2 + $0x60] sm:$0xf] %v969_v39  ;;  %v976_v43 = vsel %vm6007_vm5, %v735_v31, %v975_v30  ;;  %v6052_v51 = vld [vmem:[%s5983_s14 + $0xc] sm:$0xf] }
  0x1b   : > { %v744_v41 = vsel %vm5997_vm4, %v736_v32, %v743_v33  ;;  %v760_v42 = vor.u32 %v758_v24, %v6013_v34  ;;  %971 = vst.msk [vmem:[#allocation2 + $0x64] sm:$0xf] %vm502_vm0, %v727_v36  ;;  %v6063_v56 = vperm.slane %v1099_v44, 1  ;;  %v6065_v57 = vperm.slane %v1100_v45, 1  ;;  %v6086_v6 = vld [vmem:[%s5983_s14 + $0x50] sm:$0xf] }
  0x1c   : > { %v983_v46 = vsel %vm6007_vm5, %v752_v37, %v982_v35  ;;  %977 = vst [vmem:[#allocation2 + $0x6c] sm:$0xf] %v976_v43  ;;  %v594_v58 = vshrl.u32 %v6041_v47, 16  ;;  %v602_v59 = vshrl.u32 %v6044_v48, 16  ;;  %v6070_v60 = vperm.slane %v1098_v40, 2 }
  0x1d   : > { %v761_v49 = vsel %vm5997_vm4, %v753_v38, %v760_v42  ;;  %978 = vst.msk [vmem:[#allocation2 + $0x70] sm:$0xf] %vm502_vm0, %v744_v41  ;;  %v6072_v61 = vperm.slane %v1099_v44, 2  ;;  %v611_v62 = vshrl.u32 %v6049_v50, 16  ;;  %v619_v63 = vshrl.u32 %v6052_v51, 16 }
  0x1e   : > { %984 = vst [vmem:[#allocation2 + $0x78] sm:$0xf] %v983_v46  ;;  %v6076_v1 = vperm.slane %v1100_v45, 2  ;;  %v597_v2 = vshll.u32 %v6041_v47, 16  ;;  %v605_v3 = vshll.u32 %v6044_v48, 16  ;;  %v614_v4 = vshll.u32 %v6049_v50, 16 }
  0x1f   : > { %985 = vst.msk [vmem:[#allocation2 + $0x7c] sm:$0xf] %vm502_vm0, %v761_v49  ;;  %v6092_v9 = vrot.slane %v594_v58, 7  ;;  %v6094_v10 = vrot.slane %v602_v59, 7  ;;  %v622_v11 = vshll.u32 %v6052_v51, 16  ;;  %v6103_v16 = vrot.slane %v611_v62, 7 }
  0x20   : > { %507 = vst.msk [vmem:[#allocation2 + $0xc] sm:$0xf] %vm502_vm0, %v10805_v0  ;;  %v6105_v18 = vrot.slane %v619_v63, 7  ;;  %v764_v21 = vshrl.u32 %v6086_v6, 16  ;;  %vm2924_vm8 = vcmask 31744   ;;  %vm505_vm9 = vcmask 24576  }
  0x21   : > { %v2136_v5 = vld [vmem:[#allocation2 + $0x60] sm:$0xe]  ;;  %508 = vst.msk [vmem:[#allocation2 + $0x10] sm:$0xf] %vm502_vm0, %v10805_v0  ;;  %v617_v48 = vrot.slane %v6103_v16, 4  ;;  %vm6497_vm10 = vmand %vm505_vm9, %vm590_vm1  ;;  %vm3705_vm12 = vcmask 1041408  }
  0x22   : > { %v5702_v7 = vld [vmem:[#allocation2 + $0x60] sm:$0xff]   ;;  %v6088_v8 = vunpack.c.l.bf16 %v2136_v5  ;;  %510 = vst.msk [vmem:[#allocation2 + $0x18] sm:$0xf] %vm502_vm0, %v10805_v0 }
  0x23   : > { %v6097_v12 = vunpack.c.l.bf16 %v5702_v7  ;;  %v6099_v13 = vunpack.c.h.bf16 %v5702_v7  ;;  %v2137_v14 = vld [vmem:[#allocation2 + $0x6c] sm:$0xe]  ;;  %511 = vst.msk [vmem:[#allocation2 + $0x1c] sm:$0xf] %vm502_vm0, %v10805_v0 }
  0x24   : > { %10983 = vst [vmem:[#allocation3_spill] sm:$0xff] %v6088_v8  ;;  %v1119_v19 = vld [vmem:[#allocation2 + $0x6c] sm:$0xff]   ;;  %v6109_v20 = vmul.f32 %v6070_v60, %v6088_v8  ;;  %v6128_v31 = vunpack.c.l.bf16 %v2137_v14 }
  0x25   : > { %10984 = vst [vmem:[#allocation4_spill] sm:$0xff] %v6097_v12  ;;  %v6114_v23 = vunpack.c.l.bf16 %v1119_v19  ;;  %v6116_v24 = vunpack.c.h.bf16 %v1119_v19  ;;  %v1190_v26 = vmul.f32 %v6097_v12, %v6055_v52  ;;  %v1429_v27 = vmul.f32 %v6097_v12, %v6061_v55  ;;  %v2138_v28 = vld [vmem:[#allocation2 + $0x78] sm:$0xe]  ;;  %v6178_v19 = vld [vmem:[#allocation2] sm:$0xff]  }
  0x26   : > { %10985 = vst [vmem:[#allocation5_spill] sm:$0xff] %v6099_v13  ;;  %v5703_v29 = vld [vmem:[#allocation2 + $0x78] sm:$0xff]   ;;  %v6126_v30 = vmul.f32 %v6099_v13, %v6061_v55  ;;  %v6130_v32 = vunpack.c.l.bf16 %v2138_v28  ;;  %v6134_v33 = vmul.f32 %v6099_v13, %v6070_v60  ;;  %v2302_v42 = vrot.slane %v6109_v20, 2 }
  0x27   : > { %513 = vst.msk [vmem:[#allocation2 + $0x24] sm:$0xf] %vm502_vm0, %v10805_v0  ;;  %v6138_v35 = vunpack.c.l.bf16 %v5703_v29  ;;  %v6140_v36 = vunpack.c.h.bf16 %v5703_v29  ;;  %v1255_v37 = vmul.f32 %v6057_v53, %v6114_v23  ;;  %v1542_v38 = vrot.slane %v1429_v27, 1 }
  0x28   : > { %10986 = vst [vmem:[#allocation6_spill] sm:$0xff] %v6114_v23  ;;  %v10803_v39 = vrot.slane %v6126_v30, 1  ;;  %v1671_v40 = vmul.f32 %v6063_v56, %v6114_v23  ;;  %v6151_v41 = vmul.f32 %v6063_v56, %v6116_v24  ;;  %v10802_v62 = vrot.slane %v6134_v33, 2 }
  0x29   : > { %10987 = vst [vmem:[#allocation7_spill] sm:$0xff] %v6116_v24  ;;  %v1287_v43 = vadd.f32 %v1255_v37, %v1190_v26  ;;  %v1320_v44 = vmul.f32 %v6138_v35, %v6059_v54  ;;  %v1912_v45 = vmul.f32 %v6138_v35, %v6065_v57  ;;  %v6162_v46 = vmul.f32 %v6140_v36, %v6065_v57 }
  0x2a   : > { %514 = vst.msk [vmem:[#allocation2 + $0x28] sm:$0xf] %vm502_vm0, %v10805_v0  ;;  %v1544_v49 = vsel %vm1501_vm6, %v1542_v38, %v10803_v39  ;;  %v1783_v58 = vrot.slane %v1671_v40, 1  ;;  %v10801_v59 = vrot.slane %v6151_v41, 1  ;;  %v2431_v14 = vmul.f32 %v6072_v61, %v6128_v31 }
  0x2b   : > { %10988 = vst [vmem:[#allocation8_spill] sm:$0xff] %v6128_v31  ;;  %v1352_v63 = vadd.f32 %v1320_v44, %v1287_v43  ;;  %v2024_v5 = vrot.slane %v1912_v45, 1  ;;  %v10800_v7 = vrot.slane %v6162_v46, 1  ;;  %v6185_v26 = vmul.f32 %v6072_v61, %v6116_v24 }
  0x2c   : > { %10989 = vst [vmem:[#allocation9_spill] sm:$0xff] %v6130_v32  ;;  %v1785_v20 = vsel %vm1501_vm6, %v1783_v58, %v10801_v59  ;;  %v2672_v27 = vmul.f32 %v6076_v1, %v6130_v32  ;;  %v6191_v28 = vmul.f32 %v6140_v36, %v6076_v1  ;;  %v6200_v37 = vor.u32 %v597_v2, %v6092_v9  ;;  %v2128_v2 = vld [vmem:[#allocation2] sm:$0xe]  ;;  %v579_v58 = vld [vmem:[%s5983_s14 + $0x54] sm:$0xf] }
  0x2d   : > { %10990 = vst [vmem:[#allocation10_spill] sm:$0xff] %v6134_v33  ;;  %v1630_v29 = vadd.f32 %v1544_v49, %v1352_v63  ;;  %v600_v38 = vrot.slane %v6092_v9, 4  ;;  %v607_v40 = vor.u32 %v605_v3, %v6094_v10  ;;  %v2026_v43 = vsel %vm1501_vm6, %v2024_v5, %v10800_v7 }
  0x2e   : > { %516 = vst.msk [vmem:[#allocation2 + $0x30] sm:$0xf] %vm502_vm0, %v10805_v0  ;;  %v2543_v44 = vrot.slane %v2431_v14, 2  ;;  %v10799_v45 = vrot.slane %v6185_v26, 2  ;;  %v5665_v47 = vunpack.c.l.bf16 %v6178_v19  ;;  %v624_v3 = vor.u32 %v622_v11, %v6105_v18 }
  0x2f   : > { %10991 = vst [vmem:[#allocation11_spill] sm:$0xff] %v6138_v35  ;;  %v1871_v49 = vadd.f32 %v1785_v20, %v1630_v29  ;;  %v6220_v9 = vunpack.c.h.bf16 %v6178_v19  ;;  %v2304_v63 = vsel %vm2261_vm7, %v2302_v42, %v10802_v62  ;;  %v2784_v5 = vrot.slane %v2672_v27, 2  ;;  %v917_v42 = vld [vmem:[#allocation2 + $0xc] sm:$0xf] }
  0x30   : > { %10992 = vst [vmem:[#allocation12_spill] sm:$0xff] %v6140_v36  ;;  %v10798_v14 = vrot.slane %v6191_v28, 2  ;;  %v6231_v20 = vrot.slane %v764_v21, 7  ;;  %v6238_v11 = vor.u32 %v614_v4, %v6103_v16  ;;  %v2146_v27 = vunpack.c.l.bf16 %v2128_v2  ;;  %v926_v16 = vld [vmem:[#allocation2 + $0x18] sm:$0xf] }
  0x31   : > { %517 = vst.msk [vmem:[#allocation2 + $0x34] sm:$0xf] %vm502_vm0, %v10805_v0  ;;  %v2112_v51 = vadd.f32 %v2026_v43, %v1871_v49  ;;  %v2545_v29 = vsel %vm2261_vm7, %v2543_v44, %v10799_v45  ;;  %v608_v21 = vsel %vm5997_vm4, %v600_v38, %v607_v40  ;;  %v1405_v43 = vmul.f32 %v5665_v47, %v6061_v55 }
  0x32   : > { %10993 = vst [vmem:[#allocation13_spill] sm:$0xff] %v6151_v41  ;;  %v772_v49 = vshrl.u32 %v579_v58, 16  ;;  %v6254_v4 = vsel %vm5997_vm4, %v617_v48, %v624_v3  ;;  %v6258_v44 = vmul.f32 %v6220_v9, %v6061_v55  ;;  %v767_v38 = vshll.u32 %v6086_v6, 16  ;;  %v6277_v6 = vld [vmem:[%s10792_s4] ss:$0 sm:$0xff] }
  0x33   : > { %519 = vst.msk [vmem:[#allocation2 + $0x3c] sm:$0xf] %vm502_vm0, %v10805_v0  ;;  %v2390_v50 = vadd.f32 %v2304_v63, %v2112_v51  ;;  %v2786_v40 = vsel %vm2261_vm7, %v2784_v5, %v10798_v14  ;;  %v918_v2 = vsel %vm6007_vm5, %v6200_v37, %v917_v42  ;;  %v6271_v48 = vmul.f32 %v6220_v9, %v6070_v60 }
  0x34   : > { %10994 = vst [vmem:[#allocation14_spill] sm:$0xff] %v6162_v46  ;;  %v770_v3 = vrot.slane %v6231_v20, 4  ;;  %v2165_v5 = vmul.f32 %v6070_v60, %v2146_v27  ;;  %v6282_v51 = vrot.slane %v772_v49, 7  ;;  %v775_v37 = vshll.u32 %v579_v58, 16 }
  0x35   : > { %520 = vst.msk [vmem:[#allocation2 + $0x40] sm:$0xf] %vm502_vm0, %v10805_v0  ;;  %v2631_v63 = vadd.f32 %v2545_v29, %v2390_v50  ;;  %v927_v42 = vsel %vm6007_vm5, %v6238_v11, %v926_v16  ;;  %v1502_v29 = vrot.slane %v1405_v43, 1  ;;  %v1432_v50 = vmul.f32 %v6061_v55, %v6114_v23 }
  0x36   : > { %522 = vst.msk [vmem:[#allocation2 + $0x48] sm:$0xf] %vm502_vm0, %v10805_v0  ;;  %v6293_v14 = vmul.f32 %v6061_v55, %v6116_v24  ;;  %v1674_v27 = vmul.f32 %v6138_v35, %v6063_v56  ;;  %v6302_v11 = vmul.f32 %v6140_v36, %v6063_v56  ;;  %v769_v49 = vor.u32 %v767_v38, %v6231_v20 }
  0x37   : > { %523 = vst.msk [vmem:[#allocation2 + $0x4c] sm:$0xf] %vm502_vm0, %v10805_v0  ;;  %v2872_v45 = vadd.f32 %v2786_v40, %v2631_v63  ;;  %v1192_v16 = vmul.f32 %v6055_v52, %v6114_v23  ;;  %v1257_v40 = vmul.f32 %v6138_v35, %v6057_v53  ;;  %v2262_v7 = vrot.slane %v2165_v5, 2 }
  0x38   : > { %10995 = vst [vmem:[#allocation15_spill] sm:$0xff] %v6185_v26  ;;  %v777_v59 = vor.u32 %v775_v37, %v6282_v51  ;;  %v2192_v62 = vmul.f32 %v6070_v60, %v6128_v31  ;;  %v1547_v38 = vrot.slane %v1432_v50, 1  ;;  %v2434_v43 = vmul.f32 %v6072_v61, %v6130_v32 }
  0x39   : > { %10996 = vst [vmem:[#allocation16_spill] sm:$0xff] %v6191_v28  ;;  %v6313_v63 = vadd.f32 %v6277_v6, %v2872_v45  ;;  %v6325_v45 = vmul.f32 %v6070_v60, %v6116_v24  ;;  %v1788_v37 = vrot.slane %v1674_v27, 1  ;;  %v6336_v50 = vmul.f32 %v6140_v36, %v6072_v61 }
  0x3a   : > { %525 = vst.msk [vmem:[#allocation2 + $0x54] sm:$0xf] %vm502_vm0, %v10805_v0  ;;  %v6341_v39 = vmul.f32 %v5665_v47, %v6055_v52  ;;  %v1191_v31 = vmul.f32 %v6099_v13, %v6055_v52  ;;  %v1256_v27 = vmul.f32 %v6057_v53, %v6116_v24  ;;  %v6355_v47 = vadd.f32 %v1257_v40, %v1192_v16 }
  0x3b   : > { %526 = vst.msk [vmem:[#allocation2 + $0x58] sm:$0xf] %vm502_vm0, %v10805_v0  ;;  %v2973_v5 = vsel %vm2924_vm8, %v6313_v63, 0.0  ;;  %v11003_v58 = vrot.slane %v6271_v48, 2  ;;  %v10813_v8 = vrot.slane %v6325_v45, 2  ;;  %v2548_v12 = vrot.slane %v2434_v43, 2 }
  0x3c   : > { %537 = vst.msk [vmem:[#allocation2 + $0x84] sm:$0xf] %vm502_vm0, %v10805_v0  ;;  %2974 = vadd.xlane.f32.xlu0 %v2973_v5 }
  0x3d   : > { %538 = vst.msk [vmem:[#allocation2 + $0x88] sm:$0xf] %vm502_vm0, %v10805_v0  ;;  %v6360_v23 = vsel %vm2261_vm7, %v2262_v7, %v11003_v58  ;;  %v10814_v58 = vrot.slane %v6336_v50, 2 }
  0x3e   : > { %540 = vst.msk [vmem:[#allocation2 + $0x90] sm:$0xf] %vm502_vm0, %v10805_v0 }
  0x3f   : > { %541 = vst.msk [vmem:[#allocation2 + $0x94] sm:$0xf] %vm502_vm0, %v10805_v0 }
  0x40   : > { %543 = vst.msk [vmem:[#allocation2 + $0x9c] sm:$0xf] %vm502_vm0, %v10805_v0 }
  0x41   : > { %544 = vst.msk [vmem:[#allocation2 + $0xa0] sm:$0xf] %vm502_vm0, %v10805_v0 }
  0x42   : > { %546 = vst.msk [vmem:[#allocation2 + $0xa8] sm:$0xf] %vm502_vm0, %v10805_v0 }
  0x43   : > { %547 = vst.msk [vmem:[#allocation2 + $0xac] sm:$0xf] %vm502_vm0, %v10805_v0  ;;  %v989_v20 = vld [vmem:[#allocation2 + $0x84] sm:$0xf] }
  0x44   : > { %549 = vst.msk [vmem:[#allocation2 + $0xb4] sm:$0xf] %vm502_vm0, %v10805_v0  ;;  %v990_v19 = vsel %vm6007_vm5, %v769_v49, %v989_v20  ;;  %v1288_v49 = vadd.f32 %v1256_v27, %v1191_v31 }
  0x45   : > { %10997 = vst [vmem:[#allocation17_spill] sm:$0xff] %v6293_v14 }
  0x46   : > { %550 = vst.msk [vmem:[#allocation2 + $0xb8] sm:$0xf] %vm502_vm0, %v10805_v0 }
  0x47   : > { %10998 = vst [vmem:[#allocation18_spill] sm:$0xff] %v6302_v11 }
  0x48   : > { %552 = vst.msk [vmem:[#allocation2 + $0xc0] sm:$0xf] %vm502_vm0, %v10805_v0 }
  0x49   : > { %10999 = vst [vmem:[#allocation19_spill] sm:$0xff] %v6313_v63 }
  0x4a   : > { %553 = vst.msk [vmem:[#allocation2 + $0xc4] sm:$0xf] %vm502_vm0, %v10805_v0 }
  0x4b   : > { %555 = vst.msk [vmem:[#allocation2 + $0xcc] sm:$0xf] %vm502_vm0, %v10805_v0 }
  0x4c   : > { %11000 = vst [vmem:[#allocation20_spill] sm:$0xff] %v6325_v45 }
  0x4d   : > { %556 = vst.msk [vmem:[#allocation2 + $0xd0] sm:$0xf] %vm502_vm0, %v10805_v0  ;;  %v11002_v0 = vrot.slane %v6258_v44, 1 }
  0x4e   : > { %11001 = vst [vmem:[#allocation21_spill] sm:$0xff] %v6336_v50 }
  0x4f   : > { %919 = vst [vmem:[#allocation2 + $0xc] sm:$0xf] %v918_v2  ;;  %v6351_v5 = vsel %vm1501_vm6, %v1502_v29, %v11002_v0  ;;  %v2307_v2 = vrot.slane %v2192_v62, 2  ;;  %v562_v0 = vld [vmem:[%s5983_s14 + $0x10] sm:$0xf]  ;;  %v11004_v29 = vrot.slane %v6293_v14, 1 }
  0x50   : > { %920 = vst.msk [vmem:[#allocation2 + $0x10] sm:$0xf] %vm502_vm0, %v608_v21  ;;  %v778_v21 = vsel %vm5997_vm4, %v770_v3, %v777_v59  ;;  %v563_v59 = vld [vmem:[%s5983_s14 + $0x14] sm:$0xf]  ;;  %v628_v3 = vshrl.u32 %v562_v0, 16 }
  0x51   : > { %928 = vst [vmem:[#allocation2 + $0x18] sm:$0xf] %v927_v42  ;;  %v6371_v62 = vsel %vm1501_vm6, %v1547_v38, %v11004_v29  ;;  %v11005_v42 = vrot.slane %v6302_v11, 1  ;;  %v636_v16 = vshrl.u32 %v563_v59, 16  ;;  %v631_v38 = vshll.u32 %v562_v0, 16 }
  0x52   : > { %929 = vst.msk [vmem:[#allocation2 + $0x1c] sm:$0xf] %vm502_vm0, %v6254_v4  ;;  %v1321_v4 = vmul.f32 %v6140_v36, %v6059_v54  ;;  %v6385_v20 = vrot.slane %v628_v3, 7  ;;  %v6390_v29 = vsel %vm2261_vm7, %v2307_v2, %v10813_v8  ;;  %v6403_v0 = vsel %vm2261_vm7, %v2548_v12, %v10814_v58  ;;  %v6422_v2 = vld [vmem:[#allocation2 + $0x24] sm:$0xf] }
  0x53   : > { %v6376_v7 = vsel %vm1501_vm6, %v1788_v37, %v11005_v42  ;;  %991 = vst [vmem:[#allocation2 + $0x84] sm:$0xf] %v990_v19  ;;  %v639_v37 = vshll.u32 %v563_v59, 16  ;;  %v11006_v19 = vmov 0   ;;  %v6396_v42 = vrot.slane %v636_v16, 7 }
  0x54   : > { %992 = vst.msk [vmem:[#allocation2 + $0x88] sm:$0xf] %vm502_vm0, %v778_v21  ;;  %v6410_v3 = vor.u32 %v631_v38, %v6385_v20  ;;  %v6415_v27 = vadd.f32 %v1321_v4, %v1288_v49  ;;  %v6419_v12 = vmul.f32 %v6220_v9, %v6055_v52  ;;  %v6446_v58 = vmul.f32 %v6055_v52, %v6116_v24 }
  0x55   : > { %530 = vst.msk [vmem:[#allocation2 + $0x68] sm:$0x1] %vm505_vm9, %v11006_v19  ;;  %v6431_v40 = vor.u32 %v639_v37, %v6396_v42  ;;  %v6450_v37 = vmul.f32 %v6140_v36, %v6057_v53 }
  0x56   : > { %11007 = vst [vmem:[#allocation22_spill] sm:$0xff] %v6396_v42  ;;  %v6398_v21 = vld [vmem:[#allocation2 + $0xc] sm:$0xe] }
  0x57   : > { %11008 = vst [vmem:[#allocation23_spill] sm:$0xff] %v6398_v21  ;;  %v1103_v8 = vld [vmem:[#allocation2 + $0xc] sm:$0xff]   ;;  %v10815_v16 = vunpack.c.l.bf16 %v6398_v21 }
  0x58   : > { %533 = vst.msk [vmem:[#allocation2 + $0x74] sm:$0x1] %vm505_vm9, %v11006_v19  ;;  %v6424_v59 = vunpack.c.l.bf16 %v1103_v8  ;;  %v6426_v38 = vunpack.c.h.bf16 %v1103_v8  ;;  %v2130_v31 = vld [vmem:[#allocation2 + $0x18] sm:$0xe] }
  0x59   : > { %536 = vst.msk [vmem:[#allocation2 + $0x80] sm:$0x1] %vm505_vm9, %v11006_v19  ;;  %v5699_v49 = vld [vmem:[#allocation2 + $0x18] sm:$0xff]   ;;  %v6437_v4 = vunpack.c.l.bf16 %v2130_v31  ;;  %v2407_v8 = vmul.f32 %v6072_v61, %v10815_v16 }
  0x5a   : > { %506 = vst.msk [vmem:[#allocation2 + $0x8] sm:$0x1] %vm505_vm9, %v11006_v19  ;;  %v6452_v43 = vunpack.c.l.bf16 %v5699_v49  ;;  %v6454_v9 = vunpack.c.h.bf16 %v5699_v49  ;;  %v1239_v31 = vmul.f32 %v6057_v53, %v6424_v59  ;;  %v1647_v16 = vmul.f32 %v6063_v56, %v6424_v59 }
  0x5b   : > { %11009 = vst [vmem:[#allocation24_spill] sm:$0xff] %v6437_v4  ;;  %v6464_v24 = vmul.f32 %v6063_v56, %v6426_v38  ;;  %v6468_v13 = vmul.f32 %v6072_v61, %v6426_v38  ;;  %v2503_v63 = vrot.slane %v2407_v8, 2  ;;  %v2648_v49 = vmul.f32 %v6076_v1, %v6437_v4  ;;  %v1123_v42 = vld [vmem:[#allocation2 + $0x84] sm:$0xff]  }
  0x5c   : > { %509 = vst.msk [vmem:[#allocation2 + $0x14] sm:$0x1] %vm505_vm9, %v11006_v19  ;;  %v1271_v32 = vadd.f32 %v1239_v31, %v6341_v39  ;;  %v1304_v36 = vmul.f32 %v6452_v43, %v6059_v54  ;;  %v1743_v35 = vrot.slane %v1647_v16, 1  ;;  %v1888_v21 = vmul.f32 %v6452_v43, %v6065_v57  ;;  %v2139_v31 = vld [vmem:[#allocation2 + $0x84] sm:$0xe] }
  0x5d   : > { %512 = vst.msk [vmem:[#allocation2 + $0x20] sm:$0x1] %vm505_vm9, %v11006_v19  ;;  %v6484_v4 = vmul.f32 %v6454_v9, %v6065_v57  ;;  %v6489_v39 = vmul.f32 %v6454_v9, %v6076_v1  ;;  %v2744_v11 = vrot.slane %v2648_v49, 2  ;;  %v6493_v14 = vunpack.c.l.bf16 %v1123_v42  ;;  %v972_v50 = vld [vmem:[#allocation2 + $0x68] sm:$0x1] }
  0x5e   : > { %11010 = vst [vmem:[#allocation25_spill] sm:$0xff] %v6464_v24  ;;  %v1336_v16 = vadd.f32 %v1304_v36, %v1271_v32  ;;  %v1984_v45 = vrot.slane %v1888_v21, 1  ;;  %v11016_v28 = vrot.slane %v6464_v24, 1  ;;  %v11017_v36 = vrot.slane %v6468_v13, 2 }
  0x5f   : > { %11011 = vst [vmem:[#allocation26_spill] sm:$0xff] %v6468_v13  ;;  %v2745_v49 = vrot.slane %v6489_v39, 2  ;;  %v6514_v41 = vunpack.c.h.bf16 %v1123_v42  ;;  %v1322_v24 = vmul.f32 %v6059_v54, %v6493_v14  ;;  %v6528_v42 = vunpack.c.l.bf16 %v2139_v31 }
  0x60   : > { %515 = vst.msk [vmem:[#allocation2 + $0x2c] sm:$0x1] %vm505_vm9, %v11006_v19  ;;  %v1745_v26 = vsel %vm1501_vm6, %v1743_v35, %v11016_v28  ;;  %v2505_v21 = vsel %vm2261_vm7, %v2503_v63, %v11017_v36  ;;  %v1614_v46 = vadd.f32 %v6351_v5, %v1336_v16  ;;  %v1915_v35 = vmul.f32 %v6065_v57, %v6493_v14  ;;  %v979_v28 = vld [vmem:[#allocation2 + $0x74] sm:$0x1]  ;;  %v986_v32 = vld [vmem:[#allocation2 + $0x80] sm:$0x1] }
  0x61   : > { %518 = vst.msk [vmem:[#allocation2 + $0x38] sm:$0x1] %vm505_vm9, %v11006_v19  ;;  %v11018_v63 = vrot.slane %v6484_v4, 1  ;;  %v2746_v5 = vsel %vm2261_vm7, %v2744_v11, %v2745_v49  ;;  %v11020_v16 = vrot.slane %v6001_v17, 4  ;;  %v2675_v17 = vmul.f32 %v6076_v1, %v6528_v42 }
  0x62   : > { %11012 = vst [vmem:[#allocation27_spill] sm:$0xff] %v6484_v4  ;;  %v1855_v33 = vadd.f32 %v1745_v26, %v1614_v46  ;;  %v1354_v4 = vadd.f32 %v1322_v24, %v6355_v47  ;;  %v11021_v31 = vrot.slane %v6003_v22, 4  ;;  %v11022_v24 = vrot.slane %v6013_v34, 4 }
  0x63   : > { %521 = vst.msk [vmem:[#allocation2 + $0x44] sm:$0x1] %vm505_vm9, %v11006_v19  ;;  %v1986_v36 = vsel %vm1501_vm6, %v1984_v45, %v11018_v63  ;;  %v923_v13 = vld [vmem:[#allocation2 + $0x14] sm:$0x1]  ;;  %v6539_v45 = vmul.f32 %v6065_v57, %v6514_v41  ;;  %v2029_v63 = vrot.slane %v1915_v35, 1 }
  0x64   : > { %11013 = vst [vmem:[#allocation28_spill] sm:$0xff] %v6493_v14  ;;  %v973_v14 = vsel %vm6497_vm10, %v11020_v16, %v972_v50  ;;  %v930_v11 = vld [vmem:[#allocation2 + $0x20] sm:$0x1]  ;;  %v6545_v50 = vmul.f32 %v6076_v1, %v6514_v41  ;;  %v980_v46 = vsel %vm6497_vm10, %v11021_v31, %v979_v28  ;;  %v987_v26 = vsel %vm6497_vm10, %v11022_v24, %v986_v32  ;;  %v1368_v28 = vld [vmem:[#allocation2 + $0x8] sm:$0x1] }
  0x65   : > { %524 = vst.msk [vmem:[#allocation2 + $0x50] sm:$0x1] %vm505_vm9, %v11006_v19  ;;  %v1632_v47 = vadd.f32 %v6371_v62, %v1354_v4  ;;  %v10845_v35 = vrot.slane %v6539_v45, 1  ;;  %v11023_v16 = vrot.slane %v6094_v10, 4  ;;  %v2789_v31 = vrot.slane %v2675_v17, 2 }
  0x66   : > { %527 = vst.msk [vmem:[#allocation2 + $0x5c] sm:$0x1] %vm505_vm9, %v11006_v19  ;;  %v10844_v34 = vrot.slane %v6545_v50, 2  ;;  %v11024_v32 = vrot.slane %v6105_v18, 4  ;;  %v1240_v62 = vmul.f32 %v6057_v53, %v6426_v38  ;;  %v1305_v18 = vmul.f32 %v6454_v9, %v6059_v54 }
  0x67   : > { %539 = vst.msk [vmem:[#allocation2 + $0x8c] sm:$0x1] %vm505_vm9, %v11006_v19  ;;  %v924_v22 = vsel %vm6497_vm10, %v11023_v16, %v923_v13  ;;  %v1873_v10 = vadd.f32 %v6376_v7, %v1632_v47  ;;  %v2031_v13 = vsel %vm1501_vm6, %v2029_v63, %v10845_v35  ;;  %v1386_v7 = vunpack.c.l.bf16 %v1368_v28 }
  0x68   : > { %11019 = vst [vmem:[#allocation29_spill] sm:$0xff] %v6528_v42  ;;  %v1290_v63 = vadd.f32 %v6450_v37, %v6446_v58  ;;  %v11025_v24 = vrot.slane %v6282_v51, 4 }
  0x69   : > { %542 = vst.msk [vmem:[#allocation2 + $0x98] sm:$0x1] %vm505_vm9, %v11006_v19  ;;  %v1407_v58 = vmul.f32 %v6061_v55, %v1386_v7  ;;  %v2167_v37 = vmul.f32 %v6070_v60, %v1386_v7 }
  0x6a   : > { %974 = vst [vmem:[#allocation2 + $0x68] sm:$0x1] %v973_v14  ;;  %v2096_v14 = vadd.f32 %v1986_v36, %v1855_v33  ;;  %v931_v33 = vsel %vm6497_vm10, %v11024_v32, %v930_v11  ;;  %v2791_v36 = vsel %vm2261_vm7, %v2789_v31, %v10844_v34 }
  0x6b   : > { %545 = vst.msk [vmem:[#allocation2 + $0xa4] sm:$0x1] %vm505_vm9, %v11006_v19 }
  0x6c   : > { %981 = vst [vmem:[#allocation2 + $0x74] sm:$0x1] %v980_v46  ;;  %v2374_v4 = vadd.f32 %v6360_v23, %v2096_v14  ;;  %v1272_v23 = vadd.f32 %v1240_v62, %v6419_v12  ;;  %v2114_v46 = vadd.f32 %v2031_v13, %v1873_v10  ;;  %v1323_v14 = vmul.f32 %v6059_v54, %v6514_v41 }
  0x6d   : > { %988 = vst [vmem:[#allocation2 + $0x80] sm:$0x1] %v987_v26  ;;  %v1505_v62 = vrot.slane %v1407_v58, 1  ;;  %v6611_v10 = vmul.f32 %v6055_v52, %v6424_v59 }
  0x6e   : > { %548 = vst.msk [vmem:[#allocation2 + $0xb0] sm:$0x1] %vm505_vm9, %v11006_v19  ;;  %v993_v11 = vld [vmem:[#allocation2 + $0x8c] sm:$0x1]  ;;  %v2615_v17 = vadd.f32 %v2505_v21, %v2374_v4  ;;  %v1337_v12 = vadd.f32 %v1305_v18, %v1272_v23  ;;  %v11026_v21 = vrot.slane %v6385_v20, 4  ;;  %v2392_v28 = vadd.f32 %v6390_v29, %v2114_v46 }
  0x6f   : > { %551 = vst.msk [vmem:[#allocation2 + $0xbc] sm:$0x1] %vm505_vm9, %v11006_v19  ;;  %v994_v26 = vsel %vm6497_vm10, %v11025_v24, %v993_v11  ;;  %v6607_v32 = vadd.f32 %v1323_v14, %v1290_v63  ;;  %v2265_v4 = vrot.slane %v2167_v37, 2  ;;  %v6615_v20 = vmul.f32 %v6452_v43, %v6057_v53 }
  0x70   : > { %554 = vst.msk [vmem:[#allocation2 + $0xc8] sm:$0x1] %vm505_vm9, %v11006_v19  ;;  %v642_v51 = vsel %vm5997_vm4, %v11026_v21, %v6431_v40  ;;  %v2856_v16 = vadd.f32 %v2746_v5, %v2615_v17  ;;  %v2633_v29 = vadd.f32 %v6403_v0, %v2392_v28  ;;  %v11030_v23 = vrot.slane %v6258_v44, 1 }
  0x71   : > { %v1376_v47 = vld [vmem:[#allocation2 + $0x68] sm:$0x1]  ;;  %557 = vst.msk [vmem:[#allocation2 + $0xd4] sm:$0x1] %vm505_vm9, %v11006_v19  ;;  %v11031_v11 = vrot.slane %v6271_v48, 2  ;;  %v11032_v63 = vsel %vm6007_vm5, %v6410_v3, %v6422_v2 }
  0x72   : > { %v6605_v31 = vunpack.c.l.bf16 %v1376_v47  ;;  %925 = vst [vmem:[#allocation2 + $0x14] sm:$0x1] %v924_v22  ;;  %v6618_v40 = vadd.f32 %v6277_v6, %v2856_v16  ;;  %v1506_v7 = vsel %vm1501_vm6, %v11030_v23, %v1505_v62  ;;  %v2874_v46 = vadd.f32 %v2791_v36, %v2633_v29  ;;  %v11035_v16 = vld [vmem:[#allocation10_spill] sm:$0xff] }
  0x73   : > { %v1377_v19 = vld [vmem:[#allocation2 + $0x74] sm:$0x1]  ;;  %932 = vst [vmem:[#allocation2 + $0x20] sm:$0x1] %v931_v33  ;;  %v6635_v0 = vsel %vm2261_vm7, %v11031_v11, %v2265_v4  ;;  %v11034_v36 = vrot.slane %v6126_v30, 1  ;;  %v1615_v37 = vadd.f32 %v1506_v7, %v1337_v12  ;;  %v11036_v28 = vrot.slane %v11035_v16, 2 }
  0x74   : > { %11027 = vst [vmem:[#allocation30_spill] sm:$0xff] %v6605_v31  ;;  %v1378_v5 = vld [vmem:[#allocation2 + $0x80] sm:$0x1]  ;;  %v6621_v22 = vunpack.c.l.bf16 %v1377_v19  ;;  %v1431_v33 = vmul.f32 %v6061_v55, %v6605_v31  ;;  %v2191_v18 = vmul.f32 %v6070_v60, %v6605_v31  ;;  %v2925_v17 = vsel %vm2924_vm8, %v6618_v40, 0.0  ;;  %v11039_v12 = vld [vmem:[#allocation14_spill] sm:$0xff] }
  0x75   : > { %11028 = vst [vmem:[#allocation31_spill] sm:$0xff] %v6618_v40  ;;  %v6625_v13 = vunpack.c.l.bf16 %v1378_v5  ;;  %2926 = vadd.xlane.f32.xlu1 %v2925_v17  ;;  %v6654_v3 = vadd.f32 %v6277_v6, %v2874_v46  ;;  %v11037_v5 = vld [vmem:[#allocation13_spill] sm:$0xff]  ;;  %v11040_v7 = vrot.slane %v11039_v12, 1  ;;  %v11041_v17 = vld [vmem:[#allocation15_spill] sm:$0xff] }
  0x76   : > { %11029 = vst [vmem:[#allocation32_spill] sm:$0xff] %v6621_v22  ;;  %v1545_v24 = vrot.slane %v1431_v33, 1  ;;  %v1673_v44 = vmul.f32 %v6063_v56, %v6621_v22  ;;  %v2433_v14 = vmul.f32 %v6072_v61, %v6621_v22  ;;  %v11038_v33 = vrot.slane %v11037_v5, 1 }
  0x77   : > { %995 = vst [vmem:[#allocation2 + $0x8c] sm:$0x1] %v994_v26  ;;  %v1914_v48 = vmul.f32 %v6065_v57, %v6625_v13  ;;  %v2305_v26 = vrot.slane %v2191_v18, 2  ;;  %v2674_v2 = vmul.f32 %v6076_v1, %v6625_v13  ;;  %v2979_v29 = vsel %vm2924_vm8, %v6654_v3, 0.0 }
  0x78   : > { %935 = vst [vmem:[#allocation2 + $0x24] sm:$0xf] %v11032_v63  ;;  %v1546_v47 = vsel %vm1501_vm6, %v11034_v36, %v1545_v24  ;;  %v1786_v58 = vrot.slane %v1673_v44, 1  ;;  %v2546_v62 = vrot.slane %v2433_v14, 2  ;;  %2980 = vadd.xlane.f32.xlu2 %v2979_v29  ;;  %v11042_v46 = vrot.slane %v11041_v17, 2 }
  0x79   : > { %936 = vst.msk [vmem:[#allocation2 + $0x28] sm:$0xf] %vm502_vm0, %v642_v51  ;;  %v1631_v21 = vadd.f32 %v1546_v47, %v6415_v27  ;;  %v2027_v51 = vrot.slane %v1914_v48, 1  ;;  %v2306_v19 = vsel %vm2261_vm7, %v11036_v28, %v2305_v26  ;;  %v1369_v4 = vld [vmem:[#allocation2 + $0x14] sm:$0x1]  ;;  %v2787_v18 = vrot.slane %v2674_v2, 2 }
  0x7a   : > { %11033 = vst [vmem:[#allocation33_spill] sm:$0xff] %v6654_v3  ;;  %v1787_v30 = vsel %vm1501_vm6, %v11038_v33, %v1786_v58  ;;  %v1370_v23 = vld [vmem:[#allocation2 + $0x20] sm:$0x1]  ;;  %v6668_v11 = vunpack.c.l.bf16 %v1369_v4  ;;  %v2547_v24 = vsel %vm2261_vm7, %v11042_v46, %v2546_v62  ;;  %v1434_v28 = vmul.f32 %v6061_v55, %v6621_v22 }
  0x7b   : > { %v1872_v27 = vadd.f32 %v1787_v30, %v1631_v21  ;;  %v2028_v63 = vsel %vm1501_vm6, %v11040_v7, %v2027_v51  ;;  %v6676_v44 = vunpack.c.l.bf16 %v1370_v23  ;;  %v11043_v26 = vld [vmem:[#allocation16_spill] sm:$0xff]  ;;  %v1676_v29 = vmul.f32 %v6063_v56, %v6625_v13 }
  0x7c   : > { %v11044_v14 = vrot.slane %v11043_v26, 2  ;;  %v1649_v36 = vmul.f32 %v6063_v56, %v6668_v11  ;;  %v2409_v47 = vmul.f32 %v6072_v61, %v6668_v11  ;;  %v1550_v23 = vrot.slane %v1434_v28, 1 }
  0x7d   : > { %v2113_v21 = vadd.f32 %v2028_v63, %v1872_v27  ;;  %v1890_v51 = vmul.f32 %v6065_v57, %v6676_v44  ;;  %v2650_v16 = vmul.f32 %v6076_v1, %v6676_v44  ;;  %v11045_v27 = vld [vmem:[#allocation25_spill] sm:$0xff]  ;;  %v11047_v63 = vld [vmem:[#allocation26_spill] sm:$0xff] }
  0x7e   : > { %v1379_v48 = vld [vmem:[#allocation2 + $0x8c] sm:$0x1]  ;;  %v2788_v2 = vsel %vm2261_vm7, %v11044_v14, %v2787_v18  ;;  %v1746_v62 = vrot.slane %v1649_v36, 1  ;;  %v2506_v4 = vrot.slane %v2409_v47, 2  ;;  %v11046_v12 = vrot.slane %v11045_v27, 1  ;;  %v11049_v47 = vld [vmem:[#allocation27_spill] sm:$0xff] }
  0x7f   : > { %v6685_v58 = vunpack.c.l.bf16 %v1379_v48  ;;  %v2391_v33 = vadd.f32 %v2306_v19, %v2113_v21  ;;  %v1987_v30 = vrot.slane %v1890_v51, 1  ;;  %v2747_v18 = vrot.slane %v2650_v16, 2  ;;  %v11051_v51 = vld [vmem:[#allocation17_spill] sm:$0xff] }
  0x80   : > { %v1747_v7 = vsel %vm1501_vm6, %v11046_v12, %v1746_v62  ;;  %v11048_v17 = vrot.slane %v11047_v63, 2  ;;  %v1791_v48 = vrot.slane %v1676_v29, 1  ;;  %v11050_v34 = vrot.slane %v11049_v47, 1  ;;  %v1107_v21 = vld [vmem:[#allocation2 + $0x24] sm:$0xff]   ;;  %v11053_v62 = vld [vmem:[#allocation18_spill] sm:$0xff] }
  0x81   : > { %v1917_v5 = vmul.f32 %v6065_v57, %v6685_v58  ;;  %v2632_v14 = vadd.f32 %v2547_v24, %v2391_v33  ;;  %v1856_v36 = vadd.f32 %v1747_v7, %v1615_v37  ;;  %v2748_v19 = vsel %vm2261_vm7, %v2745_v49, %v2747_v18  ;;  %v11057_v7 = vld [vmem:[#allocation20_spill] sm:$0xff] }
  0x82   : > { %v2507_v46 = vsel %vm2261_vm7, %v11048_v17, %v2506_v4  ;;  %v1988_v35 = vsel %vm1501_vm6, %v11050_v34, %v1987_v30  ;;  %v11052_v16 = vrot.slane %v11051_v51, 1  ;;  %v11054_v27 = vrot.slane %v11053_v62, 1 }
  0x83   : > { %v2032_v26 = vrot.slane %v1917_v5, 1  ;;  %v11055_v24 = vrot.slane %v6539_v45, 1  ;;  %v2194_v34 = vmul.f32 %v6070_v60, %v6621_v22  ;;  %v2873_v29 = vadd.f32 %v2788_v2, %v2632_v14 }
  0x84   : > { %v1551_v28 = vsel %vm1501_vm6, %v11052_v16, %v1550_v23  ;;  %v1792_v4 = vsel %vm1501_vm6, %v11054_v27, %v1791_v48  ;;  %v2097_v39 = vadd.f32 %v1988_v35, %v1856_v36  ;;  %v2436_v5 = vmul.f32 %v6072_v61, %v6625_v13 }
  0x85   : > { %v2033_v37 = vsel %vm1501_vm6, %v11055_v24, %v2032_v26  ;;  %v1633_v49 = vadd.f32 %v1551_v28, %v6607_v32  ;;  %v2310_v33 = vrot.slane %v2194_v34, 2  ;;  %v2677_v30 = vmul.f32 %v6076_v1, %v6685_v58 }
  0x86   : > { %v6725_v18 = vunpack.c.l.bf16 %v1107_v21  ;;  %v6727_v23 = vunpack.c.h.bf16 %v1107_v21  ;;  %v6730_v45 = vadd.f32 %v6277_v6, %v2873_v29  ;;  %v2375_v12 = vadd.f32 %v6635_v0, %v2097_v39  ;;  %v11059_v21 = vld [vmem:[#allocation21_spill] sm:$0xff] }
  0x87   : > { %v1874_v2 = vadd.f32 %v1792_v4, %v1633_v49  ;;  %v2551_v35 = vrot.slane %v2436_v5, 2  ;;  %v11058_v32 = vrot.slane %v11057_v7, 2  ;;  %v2792_v17 = vrot.slane %v2677_v30, 2 }
  0x88   : > { %11056 = vst [vmem:[#allocation10_spill] sm:$0xff] %v6730_v45  ;;  %v1273_v48 = vadd.f32 %v6615_v20, %v6611_v10  ;;  %v1306_v26 = vmul.f32 %v6059_v54, %v6725_v18  ;;  %v2976_v14 = vsel %vm2924_vm8, %v6730_v45, 0.0  ;;  %v2616_v36 = vadd.f32 %v2507_v46, %v2375_v12 }
  0x89   : > { %v2311_v63 = vsel %vm2261_vm7, %v11058_v32, %v2310_v33  ;;  %v2115_v47 = vadd.f32 %v2033_v37, %v1874_v2  ;;  %v11060_v0 = vrot.slane %v11059_v21, 2  ;;  %2977 = vadd.xlane.f32.xlu0 %v2976_v14  ;;  %v11061_v16 = vrot.slane %v6545_v50, 2  ;;  %v2131_v50 = vld [vmem:[#allocation2 + $0x24] sm:$0xe] }
  0x8a   : > { %v1338_v62 = vadd.f32 %v1306_v26, %v1273_v48  ;;  %v1408_v10 = vmul.f32 %v6061_v55, %v6424_v59  ;;  %v6752_v20 = vmul.f32 %v6061_v55, %v6426_v38  ;;  %v2857_v27 = vadd.f32 %v2748_v19, %v2616_v36  ;;  %v11064_v48 = vld [vmem:[#allocation23_spill] sm:$0xff] }
  0x8b   : > { %v2552_v51 = vsel %vm2261_vm7, %v11060_v0, %v2551_v35  ;;  %v2793_v28 = vsel %vm2261_vm7, %v11061_v16, %v2792_v17  ;;  %v2393_v46 = vadd.f32 %v2311_v63, %v2115_v47  ;;  %v1650_v4 = vmul.f32 %v6452_v43, %v6063_v56  ;;  %v11066_v47 = vld [vmem:[#allocation24_spill] sm:$0xff] }
  0x8c   : > { %v6758_v24 = vmul.f32 %v6454_v9, %v6063_v56  ;;  %v1507_v37 = vrot.slane %v1408_v10, 1  ;;  %v10852_v34 = vrot.slane %v6752_v20, 1  ;;  %v1891_v59 = vmul.f32 %v6065_v57, %v6725_v18 }
  0x8d   : > { %v6765_v29 = vmul.f32 %v6065_v57, %v6727_v23  ;;  %v6768_v19 = vadd.f32 %v6277_v6, %v2857_v27  ;;  %v2634_v39 = vadd.f32 %v2552_v51, %v2393_v46  ;;  %v1748_v49 = vrot.slane %v1650_v4, 1 }
  0x8e   : > { %v10850_v5 = vrot.slane %v6758_v24, 1  ;;  %v1509_v33 = vsel %vm1501_vm6, %v1507_v37, %v10852_v34  ;;  %v1989_v30 = vrot.slane %v1891_v59, 1  ;;  %v6775_v2 = vunpack.c.l.bf16 %v2131_v50  ;;  %v581_v50 = vld [vmem:[%s5983_s14 + $0x5c] sm:$0xf] }
  0x8f   : > { %11062 = vst [vmem:[#allocation13_spill] sm:$0xff] %v6768_v19  ;;  %v10846_v12 = vrot.slane %v6765_v29, 1  ;;  %v2928_v35 = vsel %vm2924_vm8, %v6768_v19, 0.0  ;;  %v2875_v7 = vadd.f32 %v2793_v28, %v2634_v39  ;;  %v1616_v32 = vadd.f32 %v1509_v33, %v1338_v62  ;;  %v580_v62 = vld [vmem:[%s5983_s14 + $0x58] sm:$0xf] }
  0x90   : > { %11063 = vst [vmem:[#allocation14_spill] sm:$0xff] %v6775_v2  ;;  %v1750_v63 = vsel %vm1501_vm6, %v1748_v49, %v10850_v5  ;;  %2929 = vadd.xlane.f32.xlu1 %v2928_v35  ;;  %v11065_v26 = vunpack.c.l.bf16 %v11064_v48  ;;  %v6790_v36 = vmul.f32 %v6070_v60, %v6426_v38  ;;  %v2410_v21 = vmul.f32 %v6072_v61, %v11066_v47 }
  0x91   : > { %v1991_v17 = vsel %vm1501_vm6, %v1989_v30, %v10846_v12  ;;  %v6795_v0 = vadd.f32 %v6277_v6, %v2875_v7  ;;  %v1857_v51 = vadd.f32 %v1750_v63, %v1616_v32  ;;  %v6799_v16 = vmul.f32 %v6454_v9, %v6072_v61 }
  0x92   : > { %v2168_v14 = vmul.f32 %v6070_v60, %v11065_v26  ;;  %v2651_v28 = vmul.f32 %v6076_v1, %v6775_v2  ;;  %v10849_v27 = vrot.slane %v6790_v36, 2  ;;  %v2508_v46 = vrot.slane %v2410_v21, 2  ;;  %v11068_v21 = vld [vmem:[#allocation11_spill] sm:$0xff] }
  0x93   : > { %11067 = vst [vmem:[#allocation15_spill] sm:$0xff] %v6795_v0  ;;  %v6807_v4 = vmul.f32 %v6076_v1, %v6727_v23  ;;  %v2982_v37 = vsel %vm2924_vm8, %v6795_v0, 0.0  ;;  %v2098_v59 = vadd.f32 %v1991_v17, %v1857_v51  ;;  %v10847_v39 = vrot.slane %v6799_v16, 2 }
  0x94   : > { %v2267_v10 = vrot.slane %v2168_v14, 2  ;;  %v2749_v49 = vrot.slane %v2651_v28, 2  ;;  %2983 = vadd.xlane.f32.xlu2 %v2982_v37  ;;  %v781_v35 = vshrl.u32 %v580_v62, 16  ;;  %v784_v7 = vshll.u32 %v580_v62, 16  ;;  %v11069_v28 = vld [vmem:[#allocation28_spill] sm:$0xff] }
  0x95   : > { %v10848_v30 = vrot.slane %v6807_v4, 2  ;;  %v2510_v63 = vsel %vm2261_vm7, %v2508_v46, %v10847_v39  ;;  %v789_v48 = vshrl.u32 %v581_v50, 16  ;;  %v792_v26 = vshll.u32 %v581_v50, 16  ;;  %v11070_v46 = vld [vmem:[#allocation12_spill] sm:$0xff] }
  0x96   : > { %v2269_v33 = vsel %vm2261_vm7, %v2267_v10, %v10849_v27  ;;  %v783_v14 = vrot.slane %v781_v35, 7  ;;  %v1194_v51 = vmul.f32 %v11068_v21, %v6055_v52  ;;  %v1259_v10 = vmul.f32 %v6057_v53, %v11069_v28 }
  0x97   : > { %v2376_v32 = vadd.f32 %v2269_v33, %v2098_v59  ;;  %v2751_v17 = vsel %vm2261_vm7, %v2749_v49, %v10848_v30  ;;  %v791_v62 = vrot.slane %v789_v48, 7  ;;  %v996_v59 = vld [vmem:[#allocation2 + $0x90] sm:$0xf]  ;;  %v1435_v33 = vmul.f32 %v11068_v21, %v6061_v55 }
  0x98   : > { %v6831_v50 = vmul.f32 %v11070_v46, %v6061_v55  ;;  %v786_v12 = vor.u32 %v784_v7, %v783_v14  ;;  %v787_v39 = vrot.slane %v783_v14, 4  ;;  %v6833_v49 = vadd.f32 %v1259_v10, %v1194_v51  ;;  %v11071_v7 = vld [vmem:[#allocation9_spill] sm:$0xff] }
  0x99   : > { %v2617_v37 = vadd.f32 %v2510_v63, %v2376_v32  ;;  %v1677_v35 = vmul.f32 %v6063_v56, %v11069_v28  ;;  %v794_v27 = vor.u32 %v792_v26, %v791_v62  ;;  %v1552_v5 = vrot.slane %v1435_v33, 1  ;;  %v11073_v33 = vld [vmem:[#allocation22_spill] sm:$0xff] }
  0x9a   : > { %v10851_v32 = vrot.slane %v6831_v50, 1  ;;  %v997_v63 = vsel %vm6007_vm5, %v786_v12, %v996_v59  ;;  %v6842_v48 = vmul.f32 %v6063_v56, %v6514_v41  ;;  %v2195_v14 = vmul.f32 %v6070_v60, %v11071_v7 }
  0x9b   : > { %v2858_v30 = vadd.f32 %v2751_v17, %v2617_v37  ;;  %v1793_v21 = vrot.slane %v1677_v35, 1  ;;  %v795_v26 = vsel %vm5997_vm4, %v787_v39, %v794_v27  ;;  %998 = vst [vmem:[#allocation2 + $0x90] sm:$0xf] %v997_v63  ;;  %v6858_v12 = vmul.f32 %v11070_v46, %v6070_v60  ;;  %v937_v39 = vld [vmem:[#allocation2 + $0x2c] sm:$0x1] }
  0x9c   : > { %v6854_v17 = vsel %vm1501_vm6, %v1552_v5, %v10851_v32  ;;  %999 = vst.msk [vmem:[#allocation2 + $0x94] sm:$0xf] %vm502_vm0, %v795_v26  ;;  %v10854_v10 = vrot.slane %v6842_v48, 1  ;;  %v2312_v37 = vrot.slane %v2195_v14, 2  ;;  %v6866_v27 = vmul.f32 %v6072_v61, %v6514_v41 }
  0x9d   : > { %v6847_v51 = vadd.f32 %v6277_v6, %v2858_v30  ;;  %v2437_v30 = vmul.f32 %v6072_v61, %v6528_v42  ;;  %v10853_v59 = vrot.slane %v6858_v12, 2  ;;  %v643_v35 = vrot.slane %v11073_v33, 4 }
  0x9e   : > { %v1177_v63 = vmul.f32 %v6055_v52, %v6426_v38  ;;  %v6877_v7 = vsel %vm1501_vm6, %v1793_v21, %v10854_v10  ;;  %v10860_v26 = vrot.slane %v6866_v27, 2  ;;  %v1242_v32 = vmul.f32 %v6454_v9, %v6057_v53 }
  0x9f   : > { %11072 = vst [vmem:[#allocation16_spill] sm:$0xff] %v6847_v51  ;;  %v2931_v5 = vsel %vm2924_vm8, %v6847_v51, 0.0  ;;  %v2553_v14 = vrot.slane %v2437_v30, 2  ;;  %v6885_v34 = vsel %vm2261_vm7, %v2312_v37, %v10853_v59  ;;  %v938_v38 = vsel %vm6497_vm10, %v643_v35, %v937_v39  ;;  %v1000_v39 = vld [vmem:[#allocation2 + $0x98] sm:$0x1] }
  0xa0   : > { %2932 = vadd.xlane.f32.xlu0 %v2931_v5  ;;  %v1307_v5 = vmul.f32 %v6059_v54, %v6727_v23  ;;  %v1410_v21 = vmul.f32 %v6061_v55, %v6668_v11  ;;  %939 = vst [vmem:[#allocation2 + $0x2c] sm:$0x1] %v938_v38  ;;  %v1274_v33 = vadd.f32 %v1242_v32, %v1177_v63  ;;  %v796_v22 = vrot.slane %v791_v62, 4 }
  0xa1   : > { %v6896_v30 = vsel %vm2261_vm7, %v2553_v14, %v10860_v26  ;;  %v1652_v37 = vmul.f32 %v6063_v56, %v6676_v44  ;;  %v2170_v59 = vmul.f32 %v6070_v60, %v6668_v11  ;;  %v2412_v10 = vmul.f32 %v6072_v61, %v6676_v44 }
  0xa2   : > { %v1510_v35 = vrot.slane %v1410_v21, 1  ;;  %v1195_v31 = vmul.f32 %v11070_v46, %v6055_v52  ;;  %v2140_v51 = vld [vmem:[#allocation2 + $0x90] sm:$0xe]  ;;  %v1339_v14 = vadd.f32 %v1307_v5, %v1274_v33  ;;  %v1260_v32 = vmul.f32 %v6057_v53, %v6514_v41 }
  0xa3   : > { %v1751_v26 = vrot.slane %v1652_v37, 1  ;;  %v2270_v38 = vrot.slane %v2170_v59, 2  ;;  %v5704_v63 = vld [vmem:[#allocation2 + $0x90] sm:$0xff]   ;;  %v6908_v0 = vunpack.c.l.bf16 %v2140_v51  ;;  %v11075_v11 = vrot.slane %v6752_v20, 1 }
  0xa4   : > { %v2511_v19 = vrot.slane %v2412_v10, 2  ;;  %v1001_v62 = vsel %vm6497_vm10, %v796_v22, %v1000_v39  ;;  %v6915_v45 = vunpack.c.l.bf16 %v5704_v63  ;;  %v6917_v46 = vunpack.c.h.bf16 %v5704_v63 }
  0xa5   : > { %11074 = vst [vmem:[#allocation25_spill] sm:$0xff] %v6908_v0  ;;  %v1511_v21 = vsel %vm1501_vm6, %v11075_v11, %v1510_v35  ;;  %v11076_v59 = vrot.slane %v6758_v24, 1  ;;  %v2678_v51 = vmul.f32 %v6076_v1, %v6908_v0  ;;  %v11077_v20 = vrot.slane %v6790_v36, 2 }
  0xa6   : > { %v1617_v5 = vadd.f32 %v1511_v21, %v1339_v14  ;;  %1002 = vst [vmem:[#allocation2 + $0x98] sm:$0x1] %v1001_v62  ;;  %v11078_v37 = vrot.slane %v6799_v16, 2  ;;  %v1292_v39 = vadd.f32 %v1260_v32, %v1195_v31  ;;  %v1324_v35 = vmul.f32 %v6915_v45, %v6059_v54 }
  0xa7   : > { %v1752_v33 = vsel %vm1501_vm6, %v11076_v59, %v1751_v26  ;;  %v2271_v10 = vsel %vm2261_vm7, %v11077_v20, %v2270_v38  ;;  %v1918_v24 = vmul.f32 %v6915_v45, %v6065_v57  ;;  %v1919_v26 = vmul.f32 %v6917_v46, %v6065_v57  ;;  %v1371_v38 = vld [vmem:[#allocation2 + $0x2c] sm:$0x1] }
  0xa8   : > { %v6930_v22 = vsel %vm2261_vm7, %v11078_v37, %v2511_v19  ;;  %v2679_v36 = vmul.f32 %v6917_v46, %v6076_v1  ;;  %v2794_v14 = vrot.slane %v2678_v51, 2  ;;  %v1858_v63 = vadd.f32 %v1752_v33, %v1617_v5 }
  0xa9   : > { %v1325_v19 = vmul.f32 %v6917_v46, %v6059_v54  ;;  %v1437_v31 = vmul.f32 %v6061_v55, %v6625_v13  ;;  %v1356_v16 = vadd.f32 %v1324_v35, %v6833_v49  ;;  %v2034_v32 = vrot.slane %v1918_v24, 1 }
  0xaa   : > { %v2035_v11 = vrot.slane %v1919_v26, 1  ;;  %v2795_v21 = vrot.slane %v2679_v36, 2  ;;  %v6945_v62 = vunpack.c.l.bf16 %v1371_v38  ;;  %v1679_v51 = vmul.f32 %v6063_v56, %v6685_v58 }
  0xab   : > { %v1357_v59 = vadd.f32 %v1325_v19, %v1292_v39  ;;  %v1555_v20 = vrot.slane %v1437_v31, 1  ;;  %v1634_v5 = vadd.f32 %v6854_v17, %v1356_v16  ;;  %v2197_v49 = vmul.f32 %v6070_v60, %v6625_v13 }
  0xac   : > { %v2036_v33 = vsel %vm1501_vm6, %v2034_v32, %v2035_v11  ;;  %v2796_v37 = vsel %vm2261_vm7, %v2794_v14, %v2795_v21  ;;  %v1893_v35 = vmul.f32 %v6065_v57, %v6945_v62  ;;  %v2653_v39 = vmul.f32 %v6076_v1, %v6945_v62 }
  0xad   : > { %v1380_v24 = vld [vmem:[#allocation2 + $0x98] sm:$0x1]  ;;  %v11079_v26 = vrot.slane %v6831_v50, 1  ;;  %v1796_v36 = vrot.slane %v1679_v51, 1  ;;  %v1875_v38 = vadd.f32 %v6877_v7, %v1634_v5  ;;  %v2315_v31 = vrot.slane %v2197_v49, 2 }
  0xae   : > { %v6962_v19 = vunpack.c.l.bf16 %v1380_v24  ;;  %v1992_v13 = vrot.slane %v1893_v35, 1  ;;  %v2752_v16 = vrot.slane %v2653_v39, 2  ;;  %v11080_v32 = vrot.slane %v6842_v48, 1  ;;  %v564_v50 = vld [vmem:[%s5983_s14 + $0x18] sm:$0xf] }
  0xaf   : > { %v1556_v17 = vsel %vm1501_vm6, %v11079_v26, %v1555_v20  ;;  %v2439_v40 = vmul.f32 %v6072_v61, %v6685_v58  ;;  %v2116_v0 = vadd.f32 %v2036_v33, %v1875_v38  ;;  %v11081_v7 = vrot.slane %v6858_v12, 2  ;;  %v565_v51 = vld [vmem:[%s5983_s14 + $0x1c] sm:$0xf] }
  0xb0   : > { %v1635_v14 = vadd.f32 %v1556_v17, %v1357_v59  ;;  %v1797_v3 = vsel %vm1501_vm6, %v11080_v32, %v1796_v36  ;;  %v1920_v20 = vmul.f32 %v6065_v57, %v6962_v19  ;;  %v11082_v5 = vrot.slane %v6765_v29, 1 }
  0xb1   : > { %v2316_v59 = vsel %vm2261_vm7, %v11081_v7, %v2315_v31  ;;  %v11083_v49 = vrot.slane %v6807_v4, 2  ;;  %v2556_v39 = vrot.slane %v2439_v40, 2  ;;  %v2394_v33 = vadd.f32 %v6885_v34, %v2116_v0 }
  0xb2   : > { %v1876_v42 = vadd.f32 %v1797_v3, %v1635_v14  ;;  %v1993_v48 = vsel %vm1501_vm6, %v11082_v5, %v1992_v13  ;;  %v2680_v3 = vmul.f32 %v6076_v1, %v6962_v19  ;;  %v2037_v26 = vrot.slane %v1920_v20, 1 }
  0xb3   : > { %v2753_v35 = vsel %vm2261_vm7, %v11083_v49, %v2752_v16  ;;  %v2099_v24 = vadd.f32 %v1993_v48, %v1858_v63  ;;  %v645_v12 = vshrl.u32 %v564_v50, 16  ;;  %v11084_v17 = vrot.slane %v6866_v27, 2  ;;  %v940_v63 = vld [vmem:[#allocation2 + $0x30] sm:$0xf]  ;;  %v944_v48 = vld [vmem:[#allocation2 + $0x38] sm:$0x1] }
  0xb4   : > { %v2797_v29 = vrot.slane %v2680_v3, 2  ;;  %v648_v38 = vshll.u32 %v564_v50, 16  ;;  %v653_v14 = vshrl.u32 %v565_v51, 16  ;;  %v2635_v4 = vadd.f32 %v6896_v30, %v2394_v33 }
  0xb5   : > { %v2557_v36 = vsel %vm2261_vm7, %v11084_v17, %v2556_v39  ;;  %v2377_v31 = vadd.f32 %v2271_v10, %v2099_v24  ;;  %v2038_v40 = vsel %vm1501_vm6, %v2035_v11, %v2037_v26  ;;  %v647_v13 = vrot.slane %v645_v12, 7 }
  0xb6   : > { %v2117_v16 = vadd.f32 %v2038_v40, %v1876_v42  ;;  %v2798_v32 = vsel %vm2261_vm7, %v2795_v21, %v2797_v29  ;;  %v655_v34 = vrot.slane %v653_v14, 7  ;;  %v656_v0 = vshll.u32 %v565_v51, 16 }
  0xb7   : > { %v2876_v20 = vadd.f32 %v2796_v37, %v2635_v4  ;;  %v2618_v27 = vadd.f32 %v6930_v22, %v2377_v31  ;;  %v650_v7 = vor.u32 %v648_v38, %v647_v13  ;;  %v651_v5 = vrot.slane %v647_v13, 4  ;;  %v7028_v4 = vld [vmem:[%s10792_s4] ss:$0 sm:$0xff] }
  0xb8   : > { %v2395_v50 = vadd.f32 %v2316_v59, %v2117_v16  ;;  %v658_v49 = vor.u32 %v656_v0, %v655_v34  ;;  %v660_v39 = vrot.slane %v655_v34, 4  ;;  %v1179_v30 = vmul.f32 %v6454_v9, %v6055_v52 }
  0xb9   : > { %v6995_v10 = vadd.f32 %v6277_v6, %v2876_v20  ;;  %v2859_v42 = vadd.f32 %v2753_v35, %v2618_v27  ;;  %v941_v11 = vsel %vm6007_vm5, %v650_v7, %v940_v63  ;;  %v1244_v21 = vmul.f32 %v6057_v53, %v6727_v23 }
  0xba   : > { %v2636_v22 = vadd.f32 %v2557_v36, %v2395_v50  ;;  %v659_v37 = vsel %vm5997_vm4, %v651_v5, %v658_v49  ;;  %942 = vst [vmem:[#allocation2 + $0x30] sm:$0xf] %v941_v11  ;;  %v945_v59 = vsel %vm6497_vm10, %v660_v39, %v944_v48  ;;  %v1412_v51 = vmul.f32 %v6454_v9, %v6061_v55 }
  0xbb   : > { %11085 = vst [vmem:[#allocation26_spill] sm:$0xff] %v6995_v10  ;;  %v2985_v35 = vsel %vm2924_vm8, %v6995_v10, 0.0  ;;  %v7010_v3 = vadd.f32 %v6277_v6, %v2859_v42  ;;  %v1276_v33 = vadd.f32 %v1244_v21, %v1179_v30  ;;  %v1413_v24 = vmul.f32 %v6061_v55, %v6676_v44 }
  0xbc   : > { %943 = vst.msk [vmem:[#allocation2 + $0x34] sm:$0xf] %vm502_vm0, %v659_v37  ;;  %2986 = vadd.xlane.f32.xlu2 %v2985_v35  ;;  %v2877_v26 = vadd.f32 %v2798_v32, %v2636_v22  ;;  %v1513_v12 = vrot.slane %v1412_v51, 1  ;;  %v1654_v17 = vmul.f32 %v6063_v56, %v6727_v23  ;;  %v1655_v36 = vmul.f32 %v6063_v56, %v6945_v62 }
  0xbd   : > { %11086 = vst [vmem:[#allocation27_spill] sm:$0xff] %v7010_v3  ;;  %v2934_v6 = vsel %vm2924_vm8, %v7010_v3, 0.0  ;;  %v1515_v29 = vrot.slane %v1413_v24, 1  ;;  %v2172_v38 = vmul.f32 %v6454_v9, %v6070_v60  ;;  %v2173_v14 = vmul.f32 %v6070_v60, %v6676_v44 }
  0xbe   : > { %946 = vst [vmem:[#allocation2 + $0x38] sm:$0x1] %v945_v59  ;;  %2935 = vadd.xlane.f32.xlu1 %v2934_v6  ;;  %v7031_v31 = vadd.f32 %v7028_v4, %v2877_v26  ;;  %v1754_v40 = vrot.slane %v1654_v17, 1  ;;  %v1756_v13 = vrot.slane %v1655_v36, 1  ;;  %v2414_v16 = vmul.f32 %v6072_v61, %v6727_v23 }
  0xbf   : > { %v1516_v32 = vsel %vm1501_vm6, %v1513_v12, %v1515_v29  ;;  %v2273_v9 = vrot.slane %v2172_v38, 2  ;;  %v2275_v34 = vrot.slane %v2173_v14, 2  ;;  %v2415_v44 = vmul.f32 %v6072_v61, %v6945_v62 }
  0xc0   : > { %11087 = vst [vmem:[#allocation17_spill] sm:$0xff] %v7031_v31  ;;  %v2988_v0 = vsel %vm2924_vm8, %v7031_v31, 0.0  ;;  %v1757_v63 = vsel %vm1501_vm6, %v1754_v40, %v1756_v13  ;;  %v2514_v20 = vrot.slane %v2414_v16, 2  ;;  %v1178_v27 = vmul.f32 %v6452_v43, %v6055_v52 }
  0xc1   : > { %2989 = vadd.xlane.f32.xlu0 %v2988_v0  ;;  %v2276_v7 = vsel %vm2261_vm7, %v2273_v9, %v2275_v34  ;;  %v2516_v5 = vrot.slane %v2415_v44, 2  ;;  %v1243_v48 = vmul.f32 %v6057_v53, %v6725_v18  ;;  %v1411_v50 = vmul.f32 %v6452_v43, %v6061_v55  ;;  %v2132_v49 = vld [vmem:[#allocation2 + $0x30] sm:$0xe] }
  0xc2   : > { %v1653_v30 = vmul.f32 %v6063_v56, %v6725_v18  ;;  %v7050_v42 = vunpack.c.l.bf16 %v2132_v49  ;;  %v2171_v11 = vmul.f32 %v6070_v60, %v11066_v47  ;;  %v2413_v21 = vmul.f32 %v6072_v61, %v6775_v2 }
  0xc3   : > { %v5700_v39 = vld [vmem:[#allocation2 + $0x30] sm:$0xff]   ;;  %v2517_v59 = vsel %vm2261_vm7, %v2514_v20, %v2516_v5  ;;  %v1275_v43 = vadd.f32 %v1243_v48, %v1178_v27  ;;  %v1512_v24 = vrot.slane %v1411_v50, 1  ;;  %v582_v5 = vld [vmem:[%s5983_s14 + $0x60] sm:$0xf] }
  0xc4   : > { %11088 = vst [vmem:[#allocation18_spill] sm:$0xff] %v7050_v42  ;;  %v7056_v22 = vunpack.c.h.bf16 %v5700_v39  ;;  %v7059_v51 = vunpack.c.l.bf16 %v5700_v39  ;;  %v1753_v26 = vrot.slane %v1653_v30, 1  ;;  %v2272_v17 = vrot.slane %v2171_v11, 2 }
  0xc5   : > { %v1372_v37 = vld [vmem:[#allocation2 + $0x38] sm:$0x1]  ;;  %v1514_v13 = vsel %vm1501_vm6, %v1512_v24, %v1513_v12  ;;  %v2654_v12 = vmul.f32 %v6076_v1, %v7050_v42  ;;  %v583_v24 = vld [vmem:[%s5983_s14 + $0x64] sm:$0xf] }
  0xc6   : > { %11089 = vst [vmem:[#allocation20_spill] sm:$0xff] %v7056_v22  ;;  %v7061_v35 = vunpack.c.l.bf16 %v1372_v37  ;;  %v1309_v47 = vmul.f32 %v7056_v22, %v6059_v54  ;;  %v1895_v36 = vmul.f32 %v7056_v22, %v6065_v57  ;;  %v2655_v6 = vmul.f32 %v7056_v22, %v6076_v1 }
  0xc7   : > { %11090 = vst [vmem:[#allocation21_spill] sm:$0xff] %v7059_v51  ;;  %v1308_v29 = vmul.f32 %v7059_v51, %v6059_v54  ;;  %v1755_v16 = vsel %vm1501_vm6, %v1753_v26, %v1754_v40  ;;  %v1894_v49 = vmul.f32 %v7059_v51, %v6065_v57  ;;  %v2274_v39 = vsel %vm2261_vm7, %v2272_v17, %v2273_v9 }
  0xc8   : > { %11091 = vst [vmem:[#allocation23_spill] sm:$0xff] %v7061_v35  ;;  %v1896_v38 = vmul.f32 %v6065_v57, %v7061_v35  ;;  %v2656_v14 = vmul.f32 %v6076_v1, %v7061_v35  ;;  %v1341_v34 = vadd.f32 %v1309_v47, %v1276_v33  ;;  %v1995_v44 = vrot.slane %v1895_v36, 1 }
  0xc9   : > { %v2755_v0 = vrot.slane %v2655_v6, 2  ;;  %v1340_v27 = vadd.f32 %v1308_v29, %v1275_v43  ;;  %v2513_v37 = vrot.slane %v2413_v21, 2  ;;  %v1994_v43 = vrot.slane %v1894_v49, 1 }
  0xca   : > { %v1997_v48 = vrot.slane %v1896_v38, 1  ;;  %v2757_v50 = vrot.slane %v2656_v14, 2  ;;  %v1619_v30 = vadd.f32 %v1516_v32, %v1341_v34  ;;  %v798_v26 = vshrl.u32 %v582_v5, 16 }
  0xcb   : > { %v1618_v11 = vadd.f32 %v1514_v13, %v1340_v27  ;;  %v2515_v6 = vsel %vm2261_vm7, %v2513_v37, %v2514_v20  ;;  %v2754_v29 = vrot.slane %v2654_v12, 2  ;;  %v1996_v9 = vsel %vm1501_vm6, %v1994_v43, %v1995_v44  ;;  %v1003_v27 = vld [vmem:[#allocation2 + $0x9c] sm:$0xf] }
  0xcc   : > { %v1998_v33 = vsel %vm1501_vm6, %v1995_v44, %v1997_v48  ;;  %v2758_v40 = vsel %vm2261_vm7, %v2755_v0, %v2757_v50  ;;  %v1860_v47 = vadd.f32 %v1757_v63, %v1619_v30  ;;  %v800_v32 = vrot.slane %v798_v26, 7 }
  0xcd   : > { %v1859_v36 = vadd.f32 %v1755_v16, %v1618_v11  ;;  %v801_v17 = vshll.u32 %v582_v5, 16  ;;  %v806_v21 = vshrl.u32 %v583_v24, 16  ;;  %v2756_v13 = vsel %vm2261_vm7, %v2754_v29, %v2755_v0  ;;  %v7121_v29 = vld [vmem:[%s5983_s14 + $0x20] sm:$0xf] }
  0xce   : > { %v2101_v38 = vadd.f32 %v1998_v33, %v1860_v47  ;;  %v809_v34 = vshll.u32 %v583_v24, 16  ;;  %v804_v50 = vrot.slane %v800_v32, 4  ;;  %v1196_v63 = vmul.f32 %v6055_v52, %v11069_v28 }
  0xcf   : > { %v2100_v14 = vadd.f32 %v1996_v9, %v1859_v36  ;;  %v803_v48 = vor.u32 %v801_v17, %v800_v32  ;;  %v7089_v49 = vrot.slane %v806_v21, 7  ;;  %v1261_v44 = vmul.f32 %v6915_v45, %v6057_v53  ;;  %v11092_v36 = vld [vmem:[#allocation29_spill] sm:$0xff] }
  0xd0   : > { %v2379_v20 = vadd.f32 %v2276_v7, %v2101_v38  ;;  %v1438_v5 = vmul.f32 %v6061_v55, %v11069_v28  ;;  %v7102_v11 = vmul.f32 %v6061_v55, %v6514_v41  ;;  %v1680_v7 = vmul.f32 %v6915_v45, %v6063_v56  ;;  %v11093_v17 = vld [vmem:[#allocation25_spill] sm:$0xff]  ;;  %v567_v38 = vld [vmem:[%s5983_s14 + $0x24] sm:$0xf] }
  0xd1   : > { %v2378_v16 = vadd.f32 %v2274_v39, %v2100_v14  ;;  %v811_v30 = vor.u32 %v809_v34, %v7089_v49  ;;  %v1004_v0 = vsel %vm6007_vm5, %v803_v48, %v1003_v27  ;;  %v7111_v33 = vmul.f32 %v6917_v46, %v6063_v56 }
  0xd2   : > { %v2620_v39 = vadd.f32 %v2517_v59, %v2379_v20  ;;  %1005 = vst [vmem:[#allocation2 + $0x9c] sm:$0xf] %v1004_v0  ;;  %v1557_v12 = vrot.slane %v1438_v5, 1  ;;  %v10872_v24 = vrot.slane %v7102_v11, 1  ;;  %v1798_v43 = vrot.slane %v1680_v7, 1 }
  0xd3   : > { %v2619_v37 = vadd.f32 %v2515_v6, %v2378_v16  ;;  %v812_v28 = vsel %vm5997_vm4, %v804_v50, %v811_v30  ;;  %v2198_v59 = vmul.f32 %v6070_v60, %v11092_v36  ;;  %v7118_v6 = vmul.f32 %v6070_v60, %v6514_v41 }
  0xd4   : > { %v2861_v26 = vadd.f32 %v2758_v40, %v2620_v39  ;;  %1006 = vst.msk [vmem:[#allocation2 + $0xa0] sm:$0xf] %vm502_vm0, %v812_v28  ;;  %v1293_v9 = vadd.f32 %v1261_v44, %v1196_v63  ;;  %v10871_v32 = vrot.slane %v7111_v33, 1  ;;  %v2440_v21 = vmul.f32 %v6072_v61, %v11093_v17 }
  0xd5   : > { %v2860_v47 = vadd.f32 %v2756_v13, %v2619_v37  ;;  %v7128_v40 = vmul.f32 %v6917_v46, %v6072_v61  ;;  %v2317_v34 = vrot.slane %v2198_v59, 2  ;;  %v10870_v27 = vrot.slane %v7118_v6, 2 }
  0xd6   : > { %v7132_v14 = vadd.f32 %v7028_v4, %v2861_v26  ;;  %v1559_v48 = vsel %vm1501_vm6, %v1557_v12, %v10872_v24  ;;  %v2558_v50 = vrot.slane %v2440_v21, 2  ;;  %v662_v20 = vshrl.u32 %v7121_v29, 16 }
  0xd7   : > { %v7135_v13 = vadd.f32 %v7028_v4, %v2860_v47  ;;  %v10869_v63 = vrot.slane %v7128_v40, 2  ;;  %v1800_v5 = vsel %vm1501_vm6, %v1798_v43, %v10871_v32  ;;  %v670_v30 = vshrl.u32 %v567_v38, 16 }
  0xd8   : > { %11094 = vst [vmem:[#allocation24_spill] sm:$0xff] %v7132_v14  ;;  %v2940_v16 = vsel %vm2924_vm8, %v7132_v14, 0.0  ;;  %v7153_v7 = vsel %vm2261_vm7, %v2317_v34, %v10870_v27  ;;  %v7160_v37 = vrot.slane %v662_v20, 7  ;;  %v673_v12 = vshll.u32 %v567_v38, 16 }
  0xd9   : > { %11095 = vst [vmem:[#allocation11_spill] sm:$0xff] %v7135_v13  ;;  %v2937_v44 = vsel %vm2924_vm8, %v7135_v13, 0.0  ;;  %2941 = vadd.xlane.f32.xlu2 %v2940_v16  ;;  %v2141_v0 = vld [vmem:[#allocation2 + $0x9c] sm:$0xe]  ;;  %v7158_v39 = vsel %vm2261_vm7, %v2558_v50, %v10869_v63  ;;  %v672_v43 = vrot.slane %v670_v30, 7  ;;  %v1181_v26 = vmul.f32 %v6055_v52, %v6727_v23 }
  0xda   : > { %2938 = vadd.xlane.f32.xlu1 %v2937_v44  ;;  %v7162_v28 = vunpack.c.l.bf16 %v2141_v0  ;;  %v7168_v47 = vmul.f32 %v6061_v55, %v6727_v23  ;;  %v668_v59 = vrot.slane %v7160_v37, 4  ;;  %v1246_v21 = vmul.f32 %v7056_v22, %v6057_v53  ;;  %v951_v30 = vld [vmem:[#allocation2 + $0x44] sm:$0x1] }
  0xdb   : > { %v1127_v36 = vld [vmem:[#allocation2 + $0x9c] sm:$0xff]   ;;  %v1416_v34 = vmul.f32 %v6061_v55, %v6945_v62  ;;  %v7177_v38 = vmul.f32 %v7056_v22, %v6063_v56  ;;  %v675_v44 = vor.u32 %v673_v12, %v672_v43  ;;  %v677_v0 = vrot.slane %v672_v43, 4 }
  0xdc   : > { %v7179_v50 = vunpack.c.l.bf16 %v1127_v36  ;;  %v7181_v20 = vunpack.c.h.bf16 %v1127_v36  ;;  %v2681_v16 = vmul.f32 %v6076_v1, %v7162_v28  ;;  %v1658_v32 = vmul.f32 %v6063_v56, %v7061_v35 }
  0xdd   : > { %v1520_v27 = vrot.slane %v1416_v34, 1  ;;  %v676_v34 = vsel %vm5997_vm4, %v668_v59, %v675_v44  ;;  %v952_v63 = vsel %vm6497_vm10, %v677_v0, %v951_v30  ;;  %v1278_v14 = vadd.f32 %v1246_v21, %v1181_v26 }
  0xde   : > { %v1326_v24 = vmul.f32 %v6059_v54, %v7179_v50  ;;  %v1921_v13 = vmul.f32 %v6065_v57, %v7179_v50  ;;  %v7194_v36 = vmul.f32 %v6065_v57, %v7181_v20  ;;  %v7198_v12 = vmul.f32 %v6076_v1, %v7181_v20  ;;  %950 = vst.msk [vmem:[#allocation2 + $0x40] sm:$0xf] %vm502_vm0, %v676_v34 }
  0xdf   : > { %v2799_v43 = vrot.slane %v2681_v16, 2  ;;  %953 = vst [vmem:[#allocation2 + $0x44] sm:$0x1] %v952_v63  ;;  %v10883_v2 = vrot.slane %v7177_v38, 1  ;;  %v1761_v51 = vrot.slane %v1658_v32, 1  ;;  %v7210_v16 = vmul.f32 %v6070_v60, %v6727_v23 }
  0xe0   : > { %v1358_v31 = vadd.f32 %v1326_v24, %v1293_v9  ;;  %v2039_v3 = vrot.slane %v1921_v13, 1  ;;  %v10887_v10 = vrot.slane %v7194_v36, 1  ;;  %v10884_v42 = vrot.slane %v7198_v12, 2 }
  0xe1   : > { %v2176_v59 = vmul.f32 %v6070_v60, %v6945_v62  ;;  %v11096_v9 = vrot.slane %v7168_v47, 1  ;;  %v7222_v63 = vmul.f32 %v7056_v22, %v6072_v61  ;;  %v10885_v32 = vrot.slane %v7210_v16, 2 }
  0xe2   : > { %v1636_v26 = vadd.f32 %v1559_v48, %v1358_v31  ;;  %v2041_v24 = vsel %vm1501_vm6, %v2039_v3, %v10887_v10  ;;  %v2801_v23 = vsel %vm2261_vm7, %v2799_v43, %v10884_v42  ;;  %v2418_v31 = vmul.f32 %v6072_v61, %v7061_v35  ;;  %v1007_v48 = vld [vmem:[#allocation2 + $0xa4] sm:$0x1] }
  0xe3   : > { %v1521_v13 = vsel %vm1501_vm6, %v11096_v9, %v1520_v27  ;;  %v2280_v62 = vrot.slane %v2176_v59, 2  ;;  %v10886_v21 = vrot.slane %v7222_v63, 2  ;;  %v813_v27 = vrot.slane %v7089_v49, 4 }
  0xe4   : > { %v1877_v3 = vadd.f32 %v1800_v5, %v1636_v26  ;;  %v1197_v44 = vmul.f32 %v6055_v52, %v6514_v41  ;;  %v1762_v30 = vsel %vm1501_vm6, %v10883_v2, %v1761_v51  ;;  %v2521_v0 = vrot.slane %v2418_v31, 2 }
  0xe5   : > { %v1262_v43 = vmul.f32 %v6917_v46, %v6057_v53  ;;  %v1327_v34 = vmul.f32 %v6059_v54, %v7181_v20  ;;  %v1008_v5 = vsel %vm6497_vm10, %v813_v27, %v1007_v48  ;;  %v1440_v49 = vmul.f32 %v6061_v55, %v6685_v58  ;;  %v1112_v26 = vld [vmem:[#allocation2 + $0x40] sm:$0xf] }
  0xe6   : > { %v2118_v59 = vadd.f32 %v2041_v24, %v1877_v3  ;;  %v1682_v41 = vmul.f32 %v6063_v56, %v6962_v19  ;;  %v2281_v51 = vsel %vm2261_vm7, %v10885_v32, %v2280_v62  ;;  %1009 = vst [vmem:[#allocation2 + $0xa4] sm:$0x1] %v1008_v5  ;;  %v2200_v31 = vmul.f32 %v6070_v60, %v6685_v58  ;;  %v1373_v27 = vld [vmem:[#allocation2 + $0x44] sm:$0x1] }
  0xe7   : > { %v1294_v9 = vadd.f32 %v1262_v43, %v1197_v44  ;;  %v2442_v24 = vmul.f32 %v6072_v61, %v6962_v19  ;;  %v7255_v3 = vunpack.c.l.bf16 %v1112_v26  ;;  %v2522_v2 = vsel %vm2261_vm7, %v10886_v21, %v2521_v0  ;;  %v584_v26 = vld [vmem:[%s5983_s14 + $0x68] sm:$0xf] }
  0xe8   : > { %v2396_v48 = vadd.f32 %v7153_v7, %v2118_v59  ;;  %v1560_v42 = vrot.slane %v1440_v49, 1  ;;  %v7260_v62 = vunpack.c.l.bf16 %v1373_v27  ;;  %v1801_v43 = vrot.slane %v1682_v41, 1 }
  0xe9   : > { %11097 = vst [vmem:[#allocation28_spill] sm:$0xff] %v7255_v3  ;;  %v1359_v44 = vadd.f32 %v1327_v34, %v1294_v9  ;;  %v2320_v5 = vrot.slane %v2200_v31, 2  ;;  %v1311_v32 = vmul.f32 %v6059_v54, %v7255_v3  ;;  %v7267_v7 = vmul.f32 %v6065_v57, %v7255_v3 }
  0xea   : > { %11098 = vst [vmem:[#allocation12_spill] sm:$0xff] %v7260_v62  ;;  %v2637_v58 = vadd.f32 %v7158_v39, %v2396_v48  ;;  %v7271_v59 = vmul.f32 %v6076_v1, %v7255_v3  ;;  %v1899_v0 = vmul.f32 %v6065_v57, %v7260_v62  ;;  %v2659_v34 = vmul.f32 %v6076_v1, %v7260_v62 }
  0xeb   : > { %v11099_v49 = vrot.slane %v7102_v11, 1  ;;  %v2561_v41 = vrot.slane %v2442_v24, 2  ;;  %v1343_v31 = vadd.f32 %v1311_v32, %v1278_v14  ;;  %v10897_v48 = vrot.slane %v7267_v7, 1 }
  0xec   : > { %v2878_v9 = vadd.f32 %v2801_v23, %v2637_v58  ;;  %v10896_v27 = vrot.slane %v7271_v59, 2  ;;  %v2002_v21 = vrot.slane %v1899_v0, 1  ;;  %v2762_v10 = vrot.slane %v2659_v34, 2  ;;  %v585_v23 = vld [vmem:[%s5983_s14 + $0x6c] sm:$0xf] }
  0xed   : > { %v1561_v39 = vsel %vm1501_vm6, %v11099_v49, %v1560_v42  ;;  %v11100_v3 = vrot.slane %v7111_v33, 1  ;;  %v1621_v22 = vadd.f32 %v1521_v13, %v1343_v31  ;;  %v1381_v42 = vld [vmem:[#allocation2 + $0xa4] sm:$0x1]  ;;  %v11102_v24 = vrot.slane %v7118_v6, 2 }
  0xee   : > { %v1637_v35 = vadd.f32 %v1561_v39, %v1359_v44  ;;  %v7287_v11 = vadd.f32 %v7028_v4, %v2878_v9  ;;  %v815_v32 = vshrl.u32 %v584_v26, 16  ;;  %v2003_v58 = vsel %vm1501_vm6, %v10897_v48, %v2002_v21  ;;  %v1010_v39 = vld [vmem:[#allocation2 + $0xa8] sm:$0xf] }
  0xef   : > { %v1802_v62 = vsel %vm1501_vm6, %v11100_v3, %v1801_v43  ;;  %v2321_v14 = vsel %vm2261_vm7, %v11102_v24, %v2320_v5  ;;  %v2763_v33 = vsel %vm2261_vm7, %v10896_v27, %v2762_v10  ;;  %v7299_v3 = vunpack.c.l.bf16 %v1381_v42 }
  0xf0   : > { %11101 = vst [vmem:[#allocation9_spill] sm:$0xff] %v7287_v11  ;;  %v11103_v44 = vrot.slane %v7128_v40, 2  ;;  %v2991_v6 = vsel %vm2924_vm8, %v7287_v11, 0.0  ;;  %v1862_v43 = vadd.f32 %v1762_v30, %v1621_v22  ;;  %v817_v5 = vrot.slane %v815_v32, 7  ;;  %v1014_v32 = vld [vmem:[#allocation2 + $0xb0] sm:$0x1] }
  0xf1   : > { %v818_v0 = vshll.u32 %v584_v26, 16  ;;  %2992 = vadd.xlane.f32.xlu2 %v2991_v6  ;;  %v1923_v21 = vmul.f32 %v6065_v57, %v7299_v3  ;;  %v2683_v34 = vmul.f32 %v6076_v1, %v7299_v3  ;;  %v823_v10 = vshrl.u32 %v585_v23, 16 }
  0xf2   : > { %v2562_v13 = vsel %vm2261_vm7, %v11103_v44, %v2561_v41  ;;  %v826_v49 = vshll.u32 %v585_v23, 16  ;;  %v2103_v9 = vadd.f32 %v2003_v58, %v1862_v43  ;;  %v1878_v40 = vadd.f32 %v1802_v62, %v1637_v35 }
  0xf3   : > { %v820_v31 = vor.u32 %v818_v0, %v817_v5  ;;  %v821_v41 = vrot.slane %v817_v5, 4  ;;  %v2042_v42 = vrot.slane %v1923_v21, 1  ;;  %v2802_v24 = vrot.slane %v2683_v34, 2 }
  0xf4   : > { %v825_v44 = vrot.slane %v823_v10, 7  ;;  %v1199_v22 = vmul.f32 %v6917_v46, %v6055_v52  ;;  %v2381_v30 = vadd.f32 %v2281_v51, %v2103_v9  ;;  %v1442_v6 = vmul.f32 %v6917_v46, %v6061_v55 }
  0xf5   : > { %v1011_v26 = vsel %vm6007_vm5, %v820_v31, %v1010_v39  ;;  %v1443_v23 = vmul.f32 %v6061_v55, %v6962_v19  ;;  %v11104_v35 = vrot.slane %v7194_v36, 1  ;;  %v1264_v51 = vmul.f32 %v6057_v53, %v7181_v20 }
  0xf6   : > { %v828_v58 = vor.u32 %v826_v49, %v825_v44  ;;  %v830_v43 = vrot.slane %v825_v44, 4  ;;  %1012 = vst [vmem:[#allocation2 + $0xa8] sm:$0xf] %v1011_v26  ;;  %v2622_v5 = vadd.f32 %v2522_v2, %v2381_v30  ;;  %v11105_v21 = vrot.slane %v7198_v12, 2 }
  0xf7   : > { %v2043_v62 = vsel %vm1501_vm6, %v11104_v35, %v2042_v42  ;;  %v1563_v10 = vrot.slane %v1442_v6, 1  ;;  %v1565_v9 = vrot.slane %v1443_v23, 1  ;;  %v1684_v49 = vmul.f32 %v6063_v56, %v7181_v20 }
  0xf8   : > { %v2119_v0 = vadd.f32 %v2043_v62, %v1878_v40  ;;  %v2803_v34 = vsel %vm2261_vm7, %v11105_v21, %v2802_v24  ;;  %v829_v39 = vsel %vm5997_vm4, %v821_v41, %v828_v58  ;;  %v1015_v36 = vsel %vm6497_vm10, %v830_v43, %v1014_v32 }
  0xf9   : > { %v2863_v31 = vadd.f32 %v2763_v33, %v2622_v5  ;;  %1013 = vst.msk [vmem:[#allocation2 + $0xac] sm:$0xf] %vm502_vm0, %v829_v39  ;;  %v1685_v2 = vmul.f32 %v6063_v56, %v7299_v3  ;;  %v2202_v12 = vmul.f32 %v6917_v46, %v6070_v60  ;;  %v1296_v40 = vadd.f32 %v1264_v51, %v1199_v22 }
  0xfa   : > { %v2397_v42 = vadd.f32 %v2321_v14, %v2119_v0  ;;  %1016 = vst [vmem:[#allocation2 + $0xb0] sm:$0x1] %v1015_v36  ;;  %v1804_v41 = vrot.slane %v1684_v49, 1  ;;  %v2203_v24 = vmul.f32 %v6070_v60, %v6962_v19  ;;  %v2444_v44 = vmul.f32 %v6072_v61, %v7181_v20 }
  0xfb   : > { %v7342_v33 = vadd.f32 %v7028_v4, %v2863_v31  ;;  %v1806_v30 = vrot.slane %v1685_v2, 1  ;;  %v2323_v26 = vrot.slane %v2202_v12, 2  ;;  %v1566_v32 = vsel %vm1501_vm6, %v1563_v10, %v1565_v9 }
  0xfc   : > { %v2638_v14 = vadd.f32 %v2562_v13, %v2397_v42  ;;  %v2325_v6 = vrot.slane %v2203_v24, 2  ;;  %v2445_v46 = vmul.f32 %v6072_v61, %v7299_v3  ;;  %v1198_v22 = vmul.f32 %v6915_v45, %v6055_v52 }
  0xfd   : > { %11106 = vst [vmem:[#allocation22_spill] sm:$0xff] %v7342_v33  ;;  %v2946_v19 = vsel %vm2924_vm8, %v7342_v33, 0.0  ;;  %v2564_v35 = vrot.slane %v2444_v44, 2  ;;  %v1263_v62 = vmul.f32 %v6057_v53, %v7179_v50  ;;  %v2142_v13 = vld [vmem:[#allocation2 + $0xa8] sm:$0xe]  ;;  %v1807_v58 = vsel %vm1501_vm6, %v1804_v41, %v1806_v30 }
  0xfe   : > { %v2879_v23 = vadd.f32 %v2803_v34, %v2638_v14  ;;  %2947 = vadd.xlane.f32.xlu1 %v2946_v19  ;;  %v2566_v43 = vrot.slane %v2445_v46, 2  ;;  %v1441_v51 = vmul.f32 %v6915_v45, %v6061_v55  ;;  %v1683_v5 = vmul.f32 %v6063_v56, %v7179_v50 }
  0xff   : > { %v2326_v21 = vsel %vm2261_vm7, %v2323_v26, %v2325_v6  ;;  %v1295_v34 = vadd.f32 %v1263_v62, %v1198_v22  ;;  %v2201_v39 = vmul.f32 %v6070_v60, %v11093_v17  ;;  %v7364_v31 = vunpack.c.l.bf16 %v2142_v13 }
 0x100   : > { %v7359_v0 = vadd.f32 %v7028_v4, %v2879_v23  ;;  %v5705_v36 = vld [vmem:[#allocation2 + $0xa8] sm:$0xff]   ;;  %v1562_v9 = vrot.slane %v1441_v51, 1  ;;  %v1803_v49 = vrot.slane %v1683_v5, 1  ;;  %v2443_v45 = vmul.f32 %v6072_v61, %v7162_v28 }
 0x101   : > { %v7370_v2 = vunpack.c.h.bf16 %v5705_v36  ;;  %v1382_v12 = vld [vmem:[#allocation2 + $0xb0] sm:$0x1]  ;;  %v7372_v24 = vunpack.c.l.bf16 %v5705_v36  ;;  %v2322_v44 = vrot.slane %v2201_v39, 2  ;;  %v2567_v17 = vsel %vm2261_vm7, %v2564_v35, %v2566_v43 }
 0x102   : > { %11107 = vst [vmem:[#allocation29_spill] sm:$0xff] %v7359_v0  ;;  %v2994_v42 = vsel %vm2924_vm8, %v7359_v0, 0.0  ;;  %v7374_v14 = vunpack.c.l.bf16 %v1382_v12  ;;  %v1564_v30 = vsel %vm1501_vm6, %v1562_v9, %v1563_v10  ;;  %v1805_v6 = vsel %vm1501_vm6, %v1803_v49, %v1804_v41 }
 0x103   : > { %11108 = vst [vmem:[#allocation25_spill] sm:$0xff] %v7370_v2  ;;  %2995 = vadd.xlane.f32.xlu0 %v2994_v42  ;;  %v1329_v46 = vmul.f32 %v7370_v2, %v6059_v54  ;;  %v1925_v22 = vmul.f32 %v7370_v2, %v6065_v57  ;;  %v2685_v19 = vmul.f32 %v7370_v2, %v6076_v1  ;;  %v2563_v13 = vrot.slane %v2443_v45, 2  ;;  %v947_v45 = vld [vmem:[#allocation2 + $0x3c] sm:$0xf] }
 0x104   : > { %11109 = vst [vmem:[#allocation34_spill] sm:$0xff] %v7374_v14  ;;  %v1328_v23 = vmul.f32 %v7372_v24, %v6059_v54  ;;  %v1926_v62 = vmul.f32 %v6065_v57, %v7374_v14  ;;  %v2686_v10 = vmul.f32 %v6076_v1, %v7374_v14  ;;  %v1924_v41 = vmul.f32 %v7372_v24, %v6065_v57 }
 0x105   : > { %v1361_v43 = vadd.f32 %v1329_v46, %v1296_v40  ;;  %v2045_v51 = vrot.slane %v1925_v22, 1  ;;  %v2324_v39 = vsel %vm2261_vm7, %v2322_v44, %v2323_v26  ;;  %v2805_v9 = vrot.slane %v2685_v19, 2  ;;  %v11110_v22 = vld [vmem:[#allocation21_spill] sm:$0xff] }
 0x106   : > { %v1360_v5 = vadd.f32 %v1328_v23, %v1295_v34  ;;  %v2047_v36 = vrot.slane %v1926_v62, 1  ;;  %v2807_v49 = vrot.slane %v2686_v10, 2  ;;  %v2044_v42 = vrot.slane %v1924_v41, 1  ;;  %v568_v10 = vld [vmem:[%s5983_s14 + $0x28] sm:$0xf] }
 0x107   : > { %v1639_v12 = vadd.f32 %v1566_v32, %v1361_v43  ;;  %v2684_v48 = vmul.f32 %v6076_v1, %v7364_v31  ;;  %v665_v0 = vshll.u32 %v7121_v29, 16  ;;  %v2565_v34 = vsel %vm2261_vm7, %v2563_v13, %v2564_v35  ;;  %v11111_v35 = vld [vmem:[#allocation14_spill] sm:$0xff] }
 0x108   : > { %v1638_v27 = vadd.f32 %v1564_v30, %v1360_v5  ;;  %v2048_v33 = vsel %vm1501_vm6, %v2045_v51, %v2047_v36  ;;  %v2046_v40 = vsel %vm1501_vm6, %v2044_v42, %v2045_v51  ;;  %v1180_v26 = vmul.f32 %v6055_v52, %v6725_v18  ;;  %v11112_v51 = vld [vmem:[#allocation18_spill] sm:$0xff]  ;;  %v569_v36 = vld [vmem:[%s5983_s14 + $0x2c] sm:$0xf] }
 0x109   : > { %v1880_v44 = vadd.f32 %v1807_v58, %v1639_v12  ;;  %v2804_v32 = vrot.slane %v2684_v48, 2  ;;  %v667_v30 = vor.u32 %v665_v0, %v7160_v37  ;;  %v1245_v19 = vmul.f32 %v11110_v22, %v6057_v53 }
 0x10a   : > { %v1879_v46 = vadd.f32 %v1805_v6, %v1638_v27  ;;  %v1414_v29 = vmul.f32 %v6061_v55, %v6725_v18  ;;  %v1656_v23 = vmul.f32 %v11110_v22, %v6063_v56  ;;  %v2174_v62 = vmul.f32 %v6070_v60, %v11111_v35  ;;  %v11175_v25 = vld [vmem:[#allocation25_spill] sm:$0xff] }
 0x10b   : > { %v2121_v41 = vadd.f32 %v2048_v33, %v1880_v44  ;;  %v2808_v27 = vsel %vm2261_vm7, %v2805_v9, %v2807_v49  ;;  %v948_v37 = vsel %vm6007_vm5, %v667_v30, %v947_v45  ;;  %v2806_v58 = vsel %vm2261_vm7, %v2804_v32, %v2805_v9 }
 0x10c   : > { %v2120_v48 = vadd.f32 %v2046_v40, %v1879_v46  ;;  %949 = vst [vmem:[#allocation2 + $0x3c] sm:$0xf] %v948_v37  ;;  %v1517_v0 = vrot.slane %v1414_v29, 1  ;;  %v1758_v18 = vrot.slane %v1656_v23, 1  ;;  %v2277_v6 = vrot.slane %v2174_v62, 2 }
 0x10d   : > { %v2399_v13 = vadd.f32 %v2326_v21, %v2121_v41  ;;  %v2416_v5 = vmul.f32 %v6072_v61, %v11112_v51  ;;  %v679_v42 = vshrl.u32 %v568_v10, 16  ;;  %v1277_v33 = vadd.f32 %v1245_v19, %v1180_v26  ;;  %v11117_v41 = vld [vmem:[#allocation20_spill] sm:$0xff] }
 0x10e   : > { %v2398_v43 = vadd.f32 %v2324_v39, %v2120_v48  ;;  %v11113_v49 = vrot.slane %v7168_v47, 1  ;;  %v11114_v40 = vrot.slane %v7177_v38, 1  ;;  %v682_v45 = vshll.u32 %v568_v10, 16  ;;  %v954_v47 = vld [vmem:[#allocation2 + $0x48] sm:$0xf] }
 0x10f   : > { %v2640_v44 = vadd.f32 %v2567_v17, %v2399_v13  ;;  %v2518_v21 = vrot.slane %v2416_v5, 2  ;;  %v681_v39 = vrot.slane %v679_v42, 7  ;;  %v11115_v32 = vrot.slane %v7210_v16, 2 }
 0x110   : > { %v1519_v12 = vsel %vm1501_vm6, %v1517_v0, %v11113_v49  ;;  %v7425_v9 = vsel %vm1501_vm6, %v1758_v18, %v11114_v40  ;;  %v2639_v46 = vadd.f32 %v2565_v34, %v2398_v43  ;;  %v687_v26 = vshrl.u32 %v569_v36, 16  ;;  %v11120_v0 = vld [vmem:[#allocation28_spill] sm:$0xff] }
 0x111   : > { %v7430_v30 = vsel %vm2261_vm7, %v2277_v6, %v11115_v32  ;;  %v690_v19 = vshll.u32 %v569_v36, 16  ;;  %v1417_v29 = vmul.f32 %v11110_v22, %v6061_v55  ;;  %v2881_v38 = vadd.f32 %v2808_v27, %v2640_v44  ;;  %v7465_v36 = vld [vmem:[%s5983_s14 + $0x70] sm:$0xf] }
 0x112   : > { %v2880_v23 = vadd.f32 %v2806_v58, %v2639_v46  ;;  %v684_v35 = vor.u32 %v682_v45, %v681_v39  ;;  %v1182_v17 = vmul.f32 %v11110_v22, %v6055_v52  ;;  %v11116_v34 = vrot.slane %v7222_v63, 2 }
 0x113   : > { %v685_v62 = vrot.slane %v681_v39, 4  ;;  %v7441_v10 = vrot.slane %v687_v26, 7  ;;  %v7445_v48 = vmul.f32 %v11117_v41, %v6061_v55  ;;  %v7448_v27 = vadd.f32 %v7028_v4, %v2881_v38  ;;  %v1111_v22 = vld [vmem:[#allocation2 + $0x3c] sm:$0xf] }
 0x114   : > { %v7439_v16 = vsel %vm2261_vm7, %v2518_v21, %v11116_v34  ;;  %v7451_v37 = vadd.f32 %v7028_v4, %v2880_v23  ;;  %v2133_v58 = vld [vmem:[#allocation2 + $0x3c] sm:$0xe]  ;;  %v955_v63 = vsel %vm6007_vm5, %v684_v35, %v954_v47  ;;  %v7457_v18 = vmul.f32 %v6063_v56, %v11120_v0 }
 0x115   : > { %11118 = vst [vmem:[#allocation21_spill] sm:$0xff] %v7448_v27  ;;  %v7459_v6 = vunpack.c.l.bf16 %v1111_v22  ;;  %v7461_v13 = vunpack.c.l.bf16 %v2133_v58  ;;  %v692_v43 = vor.u32 %v690_v19, %v7441_v10  ;;  %v1522_v5 = vrot.slane %v1417_v29, 1  ;;  %v587_v58 = vld [vmem:[%s5983_s14 + $0x74] sm:$0xf] }
 0x116   : > { %11119 = vst [vmem:[#allocation14_spill] sm:$0xff] %v7451_v37  ;;  %v3000_v42 = vsel %vm2924_vm8, %v7448_v27, 0.0  ;;  %v2997_v49 = vsel %vm2924_vm8, %v7451_v37, 0.0  ;;  %v10903_v40 = vrot.slane %v7445_v48, 1  ;;  %v2177_v45 = vmul.f32 %v6070_v60, %v11112_v51 }
 0x117   : > { %11121 = vst [vmem:[#allocation18_spill] sm:$0xff] %v7461_v13  ;;  %3001 = vadd.xlane.f32.xlu2 %v3000_v42  ;;  %2998 = vadd.xlane.f32.xlu1 %v2997_v49  ;;  %v1310_v44 = vmul.f32 %v6059_v54, %v7459_v6  ;;  %v1897_v46 = vmul.f32 %v6065_v57, %v7459_v6  ;;  %v10902_v39 = vrot.slane %v7457_v18, 1  ;;  %v832_v19 = vshrl.u32 %v7465_v36, 16 }
 0x118   : > { %956 = vst [vmem:[#allocation2 + $0x48] sm:$0xf] %v955_v63  ;;  %v2657_v21 = vmul.f32 %v6076_v1, %v7461_v13  ;;  %v693_v32 = vsel %vm5997_vm4, %v685_v62, %v692_v43  ;;  %v1247_v51 = vmul.f32 %v6057_v53, %v7459_v6  ;;  %v1659_v26 = vmul.f32 %v6063_v56, %v7459_v6 }
 0x119   : > { %v1342_v47 = vadd.f32 %v1310_v44, %v1277_v33  ;;  %v1999_v29 = vrot.slane %v1897_v46, 1  ;;  %957 = vst.msk [vmem:[#allocation2 + $0x4c] sm:$0xf] %vm502_vm0, %v693_v32  ;;  %v7491_v23 = vmul.f32 %v11117_v41, %v6070_v60  ;;  %v1524_v35 = vsel %vm1501_vm6, %v1522_v5, %v10903_v40 }
 0x11a   : > { %v2759_v38 = vrot.slane %v2657_v21, 2  ;;  %v1763_v34 = vrot.slane %v1659_v26, 1  ;;  %v2282_v62 = vrot.slane %v2177_v45, 2  ;;  %v2419_v22 = vmul.f32 %v6072_v61, %v7461_v13 }
 0x11b   : > { %v1620_v63 = vadd.f32 %v1519_v12, %v1342_v47  ;;  %v11122_v33 = vrot.slane %v7267_v7, 1  ;;  %v1279_v42 = vadd.f32 %v1247_v51, %v1182_v17  ;;  %v10901_v49 = vrot.slane %v7491_v23, 2 }
 0x11c   : > { %v11123_v44 = vrot.slane %v7271_v59, 2  ;;  %v7508_v5 = vmul.f32 %v6072_v61, %v11120_v0  ;;  %v2523_v45 = vrot.slane %v2419_v22, 2  ;;  %v7510_v32 = vrot.slane %v832_v19, 7 }
 0x11d   : > { %v2001_v43 = vsel %vm1501_vm6, %v1999_v29, %v11122_v33  ;;  %v1861_v12 = vadd.f32 %v7425_v9, %v1620_v63  ;;  %v1765_v7 = vsel %vm1501_vm6, %v1763_v34, %v10902_v39  ;;  %v840_v51 = vshrl.u32 %v587_v58, 16 }
 0x11e   : > { %v2761_v46 = vsel %vm2261_vm7, %v2759_v38, %v11123_v44  ;;  %v7521_v59 = vsel %vm2261_vm7, %v2282_v62, %v10901_v49  ;;  %v10900_v26 = vrot.slane %v7508_v5, 2  ;;  %v838_v47 = vrot.slane %v7510_v32, 4 }
 0x11f   : > { %v2134_v21 = vld [vmem:[#allocation2 + $0x48] sm:$0xe]  ;;  %v843_v19 = vshll.u32 %v587_v58, 16  ;;  %v2102_v29 = vadd.f32 %v2001_v43, %v1861_v12  ;;  %v842_v38 = vrot.slane %v840_v51, 7  ;;  %v1201_v34 = vmul.f32 %v6055_v52, %v7181_v20  ;;  %v1021_v12 = vld [vmem:[#allocation2 + $0xbc] sm:$0x1] }
 0x120   : > { %v7516_v17 = vunpack.c.l.bf16 %v2134_v21  ;;  %v5701_v22 = vld [vmem:[#allocation2 + $0x48] sm:$0xff]   ;;  %v7532_v63 = vsel %vm2261_vm7, %v2523_v45, %v10900_v26  ;;  %v1266_v62 = vmul.f32 %v7370_v2, %v6057_v53  ;;  %v7538_v58 = vmul.f32 %v6061_v55, %v7181_v20 }
 0x121   : > { %v1446_v33 = vmul.f32 %v6061_v55, %v7299_v3  ;;  %v2380_v43 = vadd.f32 %v7430_v30, %v2102_v29  ;;  %v7543_v44 = vunpack.c.l.bf16 %v5701_v22  ;;  %v7545_v21 = vunpack.c.h.bf16 %v5701_v22 }
 0x122   : > { %11124 = vst [vmem:[#allocation20_spill] sm:$0xff] %v7516_v17  ;;  %v2660_v9 = vmul.f32 %v6076_v1, %v7516_v17  ;;  %v7549_v45 = vmul.f32 %v7370_v2, %v6063_v56  ;;  %v845_v26 = vor.u32 %v843_v19, %v842_v38  ;;  %v847_v49 = vrot.slane %v842_v38, 4 }
 0x123   : > { %11125 = vst [vmem:[#allocation28_spill] sm:$0xff] %v7543_v44  ;;  %v2621_v40 = vadd.f32 %v7439_v16, %v2380_v43  ;;  %v1312_v37 = vmul.f32 %v7543_v44, %v6059_v54  ;;  %v1900_v30 = vmul.f32 %v7543_v44, %v6065_v57  ;;  %v7559_v29 = vmul.f32 %v7545_v21, %v6065_v57 }
 0x124   : > { %v2764_v51 = vrot.slane %v2660_v9, 2  ;;  %v7563_v22 = vmul.f32 %v7545_v21, %v6076_v1  ;;  %v846_v19 = vsel %vm5997_vm4, %v838_v47, %v845_v26  ;;  %v1022_v16 = vsel %vm6497_vm10, %v847_v49, %v1021_v12 }
 0x125   : > { %v1570_v9 = vrot.slane %v1446_v33, 1  ;;  %v2862_v38 = vadd.f32 %v2761_v46, %v2621_v40  ;;  %v1344_v43 = vadd.f32 %v1312_v37, %v1279_v42  ;;  %v2004_v39 = vrot.slane %v1900_v30, 1  ;;  %1020 = vst.msk [vmem:[#allocation2 + $0xb8] sm:$0xf] %vm502_vm0, %v846_v19  ;;  %v958_v30 = vld [vmem:[#allocation2 + $0x50] sm:$0x1] }
 0x126   : > { %v10913_v27 = vrot.slane %v7559_v29, 1  ;;  %v10911_v11 = vrot.slane %v7563_v22, 2  ;;  %1023 = vst [vmem:[#allocation2 + $0xbc] sm:$0x1] %v1022_v16  ;;  %v1298_v17 = vadd.f32 %v1266_v62, %v1201_v34  ;;  %v1688_v13 = vmul.f32 %v6063_v56, %v7374_v14 }
 0x127   : > { %v10910_v26 = vrot.slane %v7549_v45, 1  ;;  %v7576_v47 = vadd.f32 %v7028_v4, %v2862_v38  ;;  %v1622_v49 = vadd.f32 %v1524_v35, %v1344_v43  ;;  %v11127_v37 = vrot.slane %v7538_v58, 1 }
 0x128   : > { %v7583_v42 = vmul.f32 %v6070_v60, %v7181_v20  ;;  %v2006_v46 = vsel %vm1501_vm6, %v2004_v39, %v10913_v27  ;;  %v1811_v34 = vrot.slane %v1688_v13, 1  ;;  %v2206_v62 = vmul.f32 %v6070_v60, %v7299_v3 }
 0x129   : > { %11126 = vst [vmem:[#allocation35_spill] sm:$0xff] %v7576_v47  ;;  %v1571_v40 = vsel %vm1501_vm6, %v11127_v37, %v1570_v9  ;;  %v7592_v4 = vmul.f32 %v7370_v2, %v6072_v61  ;;  %v2943_v35 = vsel %vm2924_vm8, %v7576_v47, 0.0  ;;  %v1863_v33 = vadd.f32 %v1765_v7, %v1622_v49 }
 0x12a   : > { %v10912_v12 = vrot.slane %v7583_v42, 2  ;;  %v2448_v20 = vmul.f32 %v6072_v61, %v7374_v14  ;;  %2944 = vadd.xlane.f32.xlu0 %v2943_v35  ;;  %v2766_v13 = vsel %vm2261_vm7, %v2764_v51, %v10911_v11  ;;  %v1812_v3 = vsel %vm1501_vm6, %v10910_v26, %v1811_v34  ;;  %v11128_v34 = vld [vmem:[#allocation23_spill] sm:$0xff] }
 0x12b   : > { %v2330_v39 = vrot.slane %v2206_v62, 2  ;;  %v694_v19 = vrot.slane %v7441_v10, 4  ;;  %v2104_v16 = vadd.f32 %v2006_v46, %v1863_v33  ;;  %v1183_v9 = vmul.f32 %v11117_v41, %v6055_v52 }
 0x12c   : > { %v1248_v38 = vmul.f32 %v6057_v53, %v11120_v0  ;;  %v1132_v43 = vld [vmem:[#allocation2 + $0xb8] sm:$0xf]  ;;  %v2571_v49 = vrot.slane %v2448_v20, 2  ;;  %v1313_v37 = vmul.f32 %v7545_v21, %v6059_v54  ;;  %v1419_v10 = vmul.f32 %v6061_v55, %v11128_v34 }
 0x12d   : > { %v959_v51 = vsel %vm6497_vm10, %v694_v19, %v958_v30  ;;  %v2382_v46 = vadd.f32 %v7521_v59, %v2104_v16  ;;  %v7618_v62 = vunpack.c.l.bf16 %v1132_v43  ;;  %v1383_v35 = vld [vmem:[#allocation2 + $0xbc] sm:$0x1]  ;;  %v2331_v41 = vsel %vm2261_vm7, %v10912_v12, %v2330_v39  ;;  %v11131_v19 = vld [vmem:[#allocation12_spill] sm:$0xff] }
 0x12e   : > { %960 = vst [vmem:[#allocation2 + $0x50] sm:$0x1] %v959_v51  ;;  %v1280_v33 = vadd.f32 %v1248_v38, %v1183_v9  ;;  %v7623_v20 = vunpack.c.l.bf16 %v1383_v35  ;;  %v1525_v30 = vrot.slane %v1419_v10, 1  ;;  %v1661_v26 = vmul.f32 %v6063_v56, %v11131_v19 }
 0x12f   : > { %11129 = vst [vmem:[#allocation23_spill] sm:$0xff] %v7618_v62  ;;  %v2179_v11 = vmul.f32 %v6070_v60, %v11128_v34  ;;  %v2623_v59 = vadd.f32 %v7532_v63, %v2382_v46  ;;  %v1331_v16 = vmul.f32 %v6059_v54, %v7618_v62  ;;  %v7634_v43 = vmul.f32 %v6065_v57, %v7618_v62 }
 0x130   : > { %11130 = vst [vmem:[#allocation36_spill] sm:$0xff] %v7623_v20  ;;  %v7638_v39 = vmul.f32 %v6076_v1, %v7618_v62  ;;  %v1929_v9 = vmul.f32 %v6065_v57, %v7623_v20  ;;  %v2689_v38 = vmul.f32 %v6076_v1, %v7623_v20  ;;  %v1345_v51 = vadd.f32 %v1313_v37, %v1280_v33  ;;  %v7652_v20 = vld [vmem:[%s10792_s4] ss:$0 sm:$0xff] }
 0x131   : > { %11132 = vst [vmem:[#allocation12_spill] sm:$0xff] %v7634_v43  ;;  %v11134_v63 = vrot.slane %v7445_v48, 1  ;;  %v2864_v10 = vadd.f32 %v2766_v13, %v2623_v59  ;;  %v1363_v46 = vadd.f32 %v1331_v16, %v1298_v17  ;;  %v10920_v35 = vrot.slane %v7634_v43, 1 }
 0x132   : > { %11133 = vst [vmem:[#allocation37_spill] sm:$0xff] %v7638_v39  ;;  %v10919_v12 = vrot.slane %v7638_v39, 2  ;;  %v2052_v27 = vrot.slane %v1929_v9, 1  ;;  %v2812_v7 = vrot.slane %v2689_v38, 2  ;;  %v1766_v14 = vrot.slane %v1661_v26, 1 }
 0x133   : > { %v1526_v34 = vsel %vm1501_vm6, %v11134_v63, %v1525_v30  ;;  %v7655_v48 = vadd.f32 %v7652_v20, %v2864_v10  ;;  %v1641_v37 = vadd.f32 %v1571_v40, %v1363_v46  ;;  %v11136_v17 = vrot.slane %v7592_v4, 2  ;;  %v7663_v30 = vld [vmem:[%s5983_s14 + $0x30] sm:$0xf]  ;;  %v571_v40 = vld [vmem:[%s5983_s14 + $0x34] sm:$0xf] }
 0x134   : > { %v1623_v47 = vadd.f32 %v1526_v34, %v1345_v51  ;;  %v2421_v33 = vmul.f32 %v6072_v61, %v11131_v19  ;;  %v2053_v26 = vsel %vm1501_vm6, %v10920_v35, %v2052_v27  ;;  %v11137_v16 = vrot.slane %v7457_v18, 1 }
 0x135   : > { %11135 = vst [vmem:[#allocation38_spill] sm:$0xff] %v7655_v48  ;;  %v2572_v13 = vsel %vm2261_vm7, %v11136_v17, %v2571_v49  ;;  %v1374_v59 = vld [vmem:[#allocation2 + $0x50] sm:$0x1]  ;;  %v2285_v38 = vrot.slane %v2179_v11, 2  ;;  %v2949_v51 = vsel %vm2924_vm8, %v7655_v48, 0.0  ;;  %v1882_v49 = vadd.f32 %v1812_v3, %v1641_v37 }
 0x136   : > { %v1767_v9 = vsel %vm1501_vm6, %v11137_v16, %v1766_v14  ;;  %v2813_v63 = vsel %vm2261_vm7, %v10919_v12, %v2812_v7  ;;  %v7677_v34 = vunpack.c.l.bf16 %v1374_v59  ;;  %2950 = vadd.xlane.f32.xlu2 %v2949_v51  ;;  %v2526_v27 = vrot.slane %v2421_v33, 2 }
 0x137   : > { %v1864_v10 = vadd.f32 %v1767_v9, %v1623_v47  ;;  %v5898_v46 = vmov 4.0   ;;  %v696_v18 = vshrl.u32 %v7663_v30, 16  ;;  %v2123_v14 = vadd.f32 %v2053_v26, %v1882_v49  ;;  %v2975_v49 = vpop.xlane.xlu0 %2974 }
 0x138   : > { %5738 = vrcp.f32 %v5898_v46  ;;  %v1902_v11 = vmul.f32 %v6065_v57, %v7677_v34  ;;  %v2662_v3 = vmul.f32 %v6076_v1, %v7677_v34  ;;  %v704_v37 = vshrl.u32 %v571_v40, 16 }
 0x139   : > { %v11138_v17 = vrot.slane %v7491_v23, 2  ;;  %v7687_v59 = vrot.slane %v696_v18, 7  ;;  %v707_v47 = vshll.u32 %v571_v40, 16  ;;  %v1185_v33 = vmul.f32 %v6055_v52, %v11120_v0 }
 0x13a   : > { %v2401_v16 = vadd.f32 %v2331_v41, %v2123_v14  ;;  %v2007_v9 = vrot.slane %v1902_v11, 1  ;;  %v2767_v26 = vrot.slane %v2662_v3, 2  ;;  %v706_v51 = vrot.slane %v704_v37, 7  ;;  %v2927_v3 = vpop.xlane.xlu1 %2926 }
 0x13b   : > { %v2286_v7 = vsel %vm2261_vm7, %v11138_v17, %v2285_v38  ;;  %v702_v46 = vrot.slane %v7687_v59, 4  ;;  %v1250_v12 = vmul.f32 %v7545_v21, %v6057_v53  ;;  %v7696_v23 = vmul.f32 %v6061_v55, %v11120_v0  ;;  %v965_v17 = vld [vmem:[#allocation2 + $0x5c] sm:$0x1] }
 0x13c   : > { %v1422_v38 = vmul.f32 %v6061_v55, %v11131_v19  ;;  %v2642_v40 = vadd.f32 %v2572_v13, %v2401_v16  ;;  %v11139_v18 = vrot.slane %v7559_v29, 1  ;;  %v11140_v14 = vrot.slane %v7508_v5, 2 }
 0x13d   : > { %v709_v37 = vor.u32 %v707_v47, %v706_v51  ;;  %v11141_v62 = vrot.slane %v7563_v22, 2  ;;  %v711_v39 = vrot.slane %v706_v51, 4  ;;  %v7709_v43 = vadd.f32 %v1250_v12, %v1185_v33 }
 0x13e   : > { %v2008_v41 = vsel %vm1501_vm6, %v11139_v18, %v2007_v9  ;;  %v2527_v11 = vsel %vm2261_vm7, %v11140_v14, %v2526_v27  ;;  %v5739_v35 = vpop.eup %5738  ;;  %v2883_v13 = vadd.f32 %v2813_v63, %v2642_v40  ;;  %v10931_v5 = vrot.slane %v7696_v23, 1  ;;  %v2981_v9 = vpop.xlane.xlu2 %2980 }
 0x13f   : > { %v2105_v48 = vadd.f32 %v2008_v41, %v1864_v10  ;;  %v2768_v2 = vsel %vm2261_vm7, %v11141_v62, %v2767_v26  ;;  %v3022_v29 = vmul.f32 4.0, %v5739_v35  ;;  %v710_v16 = vsel %vm5997_vm4, %v702_v46, %v709_v37 }
 0x140   : > { %964 = vst.msk [vmem:[#allocation2 + $0x58] sm:$0xf] %vm502_vm0, %v710_v16  ;;  %v966_v10 = vsel %vm6497_vm10, %v711_v39, %v965_v17  ;;  %v1530_v22 = vrot.slane %v1422_v38, 1  ;;  %v7719_v62 = vmul.f32 %v7545_v21, %v6063_v56  ;;  %v7722_v12 = vadd.f32 %v7652_v20, %v2883_v13  ;;  %v2978_v17 = vpop.xlane.xlu0 %2977 }
 0x141   : > { %v2383_v27 = vadd.f32 %v2286_v7, %v2105_v48  ;;  %v3023_v63 = vsub.f32 1.0, %v3022_v29  ;;  %967 = vst [vmem:[#allocation2 + $0x5c] sm:$0x1] %v966_v10  ;;  %v1664_v47 = vmul.f32 %v6063_v56, %v7677_v34  ;;  %v7728_v48 = vmul.f32 %v6070_v60, %v11120_v0 }
 0x142   : > { %11142 = vst [vmem:[#allocation39_spill] sm:$0xff] %v7722_v12  ;;  %vm3026_vm11 = vweird.f32 %v5739_v35  ;;  %v10930_v39 = vrot.slane %v7719_v62, 1  ;;  %v2182_v33 = vmul.f32 %v6070_v60, %v11131_v19  ;;  %v3006_v26 = vsel %vm2924_vm8, %v7722_v12, 0.0 }
 0x143   : > { %v2624_v7 = vadd.f32 %v2527_v11, %v2383_v27  ;;  %v3024_v51 = vmul.f32 %v5739_v35, %v3023_v63  ;;  %v1771_v46 = vrot.slane %v1664_v47, 1  ;;  %v10928_v38 = vrot.slane %v7728_v48, 2  ;;  %3007 = vadd.xlane.f32.xlu1 %v3006_v26 }
 0x144   : > { %v2290_v18 = vrot.slane %v2182_v33, 2  ;;  %v7738_v0 = vmul.f32 %v7545_v21, %v6072_v61  ;;  %v2424_v41 = vmul.f32 %v6072_v61, %v7677_v34  ;;  %v1531_v19 = vsel %vm1501_vm6, %v10931_v5, %v1530_v22  ;;  %v2930_v22 = vpop.xlane.xlu1 %2929 }
 0x145   : > { %v2865_v40 = vadd.f32 %v2768_v2, %v2624_v7  ;;  %v3025_v14 = vadd.f32 %v5739_v35, %v3024_v51  ;;  %v1772_v11 = vsel %vm1501_vm6, %v10930_v39, %v1771_v46  ;;  %v835_v37 = vshll.u32 %v7465_v36, 16  ;;  %v1017_v39 = vld [vmem:[#allocation2 + $0xb4] sm:$0xf] }
 0x146   : > { %v7755_v13 = vsel %vm2261_vm7, %v10928_v38, %v2290_v18  ;;  %v10929_v29 = vrot.slane %v7738_v0, 2  ;;  %v2531_v16 = vrot.slane %v2424_v41, 2  ;;  %v1200_v36 = vmul.f32 %v6055_v52, %v7179_v50  ;;  %v11144_v41 = vld [vmem:[#allocation19_spill] sm:$0xff] }
 0x147   : > { %v7750_v2 = vadd.f32 %v7652_v20, %v2865_v40  ;;  %v7759_v27 = vsel %vm3026_vm11, %v5739_v35, %v3025_v14  ;;  %v1116_v10 = vld [vmem:[#allocation2 + $0x58] sm:$0xf]  ;;  %v837_v63 = vor.u32 %v835_v37, %v7510_v32  ;;  %v1265_v47 = vmul.f32 %v7372_v24, %v6057_v53 }
 0x148   : > { %v3044_v33 = vmul.f32 %v7759_v27, %v2975_v49  ;;  %v3028_v26 = vmul.f32 %v7759_v27, %v2927_v3  ;;  %v3046_v35 = vmul.f32 %v7759_v27, %v2981_v9  ;;  %v1375_v51 = vld [vmem:[#allocation2 + $0x5c] sm:$0x1]  ;;  %v3045_v46 = vmul.f32 %v7759_v27, %v2978_v17  ;;  %v11148_v3 = vld [vmem:[#allocation33_spill] sm:$0xff]  ;;  %v2984_v17 = vpop.xlane.xlu2 %2983 }
 0x149   : > { %11143 = vst [vmem:[#allocation40_spill] sm:$0xff] %v7750_v2  ;;  %v2952_v7 = vsel %vm2924_vm8, %v7750_v2, 0.0  ;;  %v7772_v32 = vunpack.c.l.bf16 %v1116_v10  ;;  %v7774_v40 = vunpack.c.l.bf16 %v1375_v51  ;;  %v2532_v18 = vsel %vm2261_vm7, %v10929_v29, %v2531_v16  ;;  %v11146_v49 = vld [vmem:[#allocation31_spill] sm:$0xff]  ;;  %v11150_v10 = vld [vmem:[#allocation10_spill] sm:$0xff] }
 0x14a   : > { %2953 = vadd.xlane.f32.xlu0 %v2952_v7  ;;  %v7780_v14 = vsub.f32 %v11144_v41, %v3044_v33  ;;  %v7783_v37 = vsub.f32 %v11146_v49, %v3028_v26  ;;  %v7786_v9 = vsub.f32 %v11148_v3, %v3046_v35  ;;  %v3029_v7 = vmul.f32 %v7759_v27, %v2930_v22  ;;  %v11152_v35 = vld [vmem:[#allocation13_spill] sm:$0xff] }
 0x14b   : > { %v7790_v38 = vsub.f32 %v11150_v10, %v3045_v46  ;;  %v1315_v51 = vmul.f32 %v6059_v54, %v7772_v32  ;;  %v7796_v16 = vmul.f32 %v6065_v57, %v7772_v32  ;;  %v1905_v33 = vmul.f32 %v6065_v57, %v7774_v40 }
 0x14c   : > { %11145 = vst [vmem:[#allocation19_spill] sm:$0xff] %v7780_v14  ;;  %v7802_v26 = vmul.f32 %v6076_v1, %v7772_v32  ;;  %v2665_v22 = vmul.f32 %v6076_v1, %v7774_v40  ;;  %v7807_v46 = vsub.f32 %v11152_v35, %v3029_v7  ;;  %v3108_v41 = vmul.f32 %v7780_v14, %v7780_v14 }
 0x14d   : > { %11147 = vst [vmem:[#allocation31_spill] sm:$0xff] %v7783_v37  ;;  %v1347_v49 = vadd.f32 %v1315_v51, %v7709_v43  ;;  %v10936_v3 = vrot.slane %v7796_v16, 1  ;;  %v2012_v10 = vrot.slane %v1905_v33, 1  ;;  %v3047_v29 = vmul.f32 %v7759_v27, %v2984_v17  ;;  %v11154_v43 = vld [vmem:[#allocation15_spill] sm:$0xff] }
 0x14e   : > { %11149 = vst [vmem:[#allocation33_spill] sm:$0xff] %v7786_v9  ;;  %v10935_v5 = vrot.slane %v7802_v26, 2  ;;  %v2772_v2 = vrot.slane %v2665_v22, 2  ;;  %v3172_v12 = vsel %vm2924_vm8, %v3108_v41, 0.0  ;;  %v3109_v7 = vmul.f32 %v7790_v38, %v7790_v38 }
 0x14f   : > { %11151 = vst [vmem:[#allocation10_spill] sm:$0xff] %v7790_v38  ;;  %v1625_v35 = vadd.f32 %v1531_v19, %v1347_v49  ;;  %v2013_v14 = vsel %vm1501_vm6, %v10936_v3, %v2012_v10  ;;  %v7822_v51 = vsub.f32 %v11154_v43, %v3047_v29  ;;  %v3093_v17 = vmul.f32 %v7807_v46, %v7807_v46 }
 0x150   : > { %11153 = vst [vmem:[#allocation13_spill] sm:$0xff] %v7807_v46  ;;  %v2773_v33 = vsel %vm2261_vm7, %v10935_v5, %v2772_v2  ;;  %v3175_v22 = vsel %vm2924_vm8, %v3109_v7, 0.0  ;;  %v1018_v41 = vsel %vm6007_vm5, %v837_v63, %v1017_v39  ;;  %v1297_v19 = vadd.f32 %v1265_v47, %v1200_v36 }
 0x151   : > { %11155 = vst [vmem:[#allocation15_spill] sm:$0xff] %v7822_v51  ;;  %v1866_v49 = vadd.f32 %v1772_v11, %v1625_v35  ;;  %3176 = vadd.xlane.f32.xlu1 %v3175_v22  ;;  %v7833_v10 = vsel %vm2924_vm8, %v3093_v17, 0.0  ;;  %v1444_v29 = vmul.f32 %v6061_v55, %v7179_v50  ;;  %v699_v43 = vshll.u32 %v7663_v30, 16 }
 0x152   : > { %3173 = vadd.xlane.f32.xlu0 %v3172_v12  ;;  %1019 = vst [vmem:[#allocation2 + $0xb4] sm:$0xf] %v1018_v41  ;;  %v1686_v2 = vmul.f32 %v7372_v24, %v6063_v56  ;;  %v2204_v7 = vmul.f32 %v6070_v60, %v7162_v28  ;;  %v2446_v39 = vmul.f32 %v6072_v61, %v7364_v31  ;;  %v11156_v22 = vrot.slane %v7538_v58, 1 }
 0x153   : > { %v3092_v12 = vmul.f32 %v7783_v37, %v7783_v37  ;;  %v2107_v11 = vadd.f32 %v2013_v14, %v1866_v49  ;;  %v1567_v63 = vrot.slane %v1444_v29, 1  ;;  %v3110_v36 = vmul.f32 %v7786_v9, %v7786_v9  ;;  %v961_v29 = vld [vmem:[#allocation2 + $0x54] sm:$0xf]  ;;  %v11171_v37 = vld [vmem:[#allocation37_spill] sm:$0xff] }
 0x154   : > { %v3111_v50 = vmul.f32 %v7822_v51, %v7822_v51  ;;  %v1808_v30 = vrot.slane %v1686_v2, 1  ;;  %v2327_v47 = vrot.slane %v2204_v7, 2  ;;  %v2568_v35 = vrot.slane %v2446_v39, 2 }
 0x155   : > { %v3124_v17 = vsel %vm2924_vm8, %v3092_v12, 0.0  ;;  %v2385_v28 = vadd.f32 %v7755_v13, %v2107_v11  ;;  %v1569_v41 = vsel %vm1501_vm6, %v1567_v63, %v11156_v22  ;;  %v7856_v14 = vsel %vm2924_vm8, %v3110_v36, 0.0  ;;  %v2933_v12 = vpop.xlane.xlu0 %2932  ;;  %v2987_v11 = vpop.xlane.xlu2 %2986  ;;  %v11160_v22 = vld [vmem:[#allocation16_spill] sm:$0xff] }
 0x156   : > { %v7859_v49 = vsel %vm2924_vm8, %v3111_v50, 0.0  ;;  %v11157_v5 = vrot.slane %v7549_v45, 1  ;;  %v11158_v7 = vrot.slane %v7583_v42, 2  ;;  %v11159_v58 = vrot.slane %v7592_v4, 2 }
 0x157   : > { %v701_v63 = vor.u32 %v699_v43, %v7687_v59  ;;  %v2626_v36 = vadd.f32 %v2532_v18, %v2385_v28  ;;  %v3030_v50 = vmul.f32 %v7759_v27, %v2933_v12  ;;  %v3048_v45 = vmul.f32 %v7759_v27, %v2987_v11 }
 0x158   : > { %v1810_v2 = vsel %vm1501_vm6, %v1808_v30, %v11157_v5  ;;  %v7867_v39 = vsel %vm2261_vm7, %v2327_v47, %v11158_v7  ;;  %v7872_v13 = vsel %vm2261_vm7, %v2568_v35, %v11159_v58  ;;  %v1184_v42 = vmul.f32 %v6055_v52, %v7459_v6 }
 0x159   : > { %v1131_v5 = vld [vmem:[#allocation2 + $0xb4] sm:$0xf]  ;;  %v962_v4 = vsel %vm6007_vm5, %v701_v63, %v961_v29  ;;  %v1249_v47 = vmul.f32 %v7543_v44, %v6057_v53  ;;  %v1420_v35 = vmul.f32 %v6061_v55, %v7459_v6  ;;  %v1662_v59 = vmul.f32 %v7543_v44, %v6063_v56  ;;  %3125 = vadd.xlane.f32.xlu1 %v3124_v17 }
 0x15a   : > { %v2143_v30 = vld [vmem:[#allocation2 + $0xb4] sm:$0xe]  ;;  %v2867_v18 = vadd.f32 %v2773_v33, %v2626_v36  ;;  %v7887_v43 = vunpack.c.l.bf16 %v1131_v5  ;;  %v7892_v7 = vsub.f32 %v11160_v22, %v3030_v50  ;;  %963 = vst [vmem:[#allocation2 + $0x54] sm:$0xf] %v962_v4  ;;  %v588_v50 = vld [vmem:[%s5983_s14 + $0x78] sm:$0xf] }
 0x15b   : > { %v7889_v28 = vunpack.c.l.bf16 %v2143_v30  ;;  %v11162_v29 = vld [vmem:[#allocation26_spill] sm:$0xff]  ;;  %v1281_v12 = vadd.f32 %v1249_v47, %v1184_v42  ;;  %v1527_v6 = vrot.slane %v1420_v35, 1  ;;  %v1768_v11 = vrot.slane %v1662_v59, 1  ;;  %v11168_v35 = vld [vmem:[#allocation20_spill] sm:$0xff] }
 0x15c   : > { %11161 = vst [vmem:[#allocation16_spill] sm:$0xff] %v7892_v7  ;;  %v7895_v58 = vsub.f32 %v11162_v29, %v3048_v45  ;;  %v7898_v63 = vadd.f32 %v7652_v20, %v2867_v18  ;;  %v1330_v33 = vmul.f32 %v6059_v54, %v7887_v43  ;;  %v1927_v17 = vmul.f32 %v6065_v57, %v7887_v43  ;;  %v11167_v4 = vld [vmem:[#allocation18_spill] sm:$0xff]  ;;  %v589_v18 = vld [vmem:[%s5983_s14 + $0x7c] sm:$0xf] }
 0x15d   : > { %v2687_v36 = vmul.f32 %v6076_v1, %v7889_v28  ;;  %v11165_v5 = vrot.slane %v7696_v23, 1  ;;  %v11166_v42 = vrot.slane %v7719_v62, 1  ;;  %v2180_v47 = vmul.f32 %v6070_v60, %v11167_v4 }
 0x15e   : > { %11163 = vst [vmem:[#allocation26_spill] sm:$0xff] %v7895_v58  ;;  %v2422_v59 = vmul.f32 %v6072_v61, %v11168_v35  ;;  %v2958_v22 = vsel %vm2924_vm8, %v7898_v63, 0.0  ;;  %v1362_v29 = vadd.f32 %v1330_v33, %v1297_v19  ;;  %v2049_v3 = vrot.slane %v1927_v17, 1 }
 0x15f   : > { %11164 = vst [vmem:[#allocation41_spill] sm:$0xff] %v7898_v63  ;;  %v1529_v45 = vsel %vm1501_vm6, %v1527_v6, %v11165_v5  ;;  %v1770_v30 = vsel %vm1501_vm6, %v1768_v11, %v11166_v42  ;;  %v2809_v51 = vrot.slane %v2687_v36, 2  ;;  %2959 = vadd.xlane.f32.xlu2 %v2958_v22  ;;  %v2287_v23 = vrot.slane %v2180_v47, 2  ;;  %v11169_v11 = vld [vmem:[#allocation12_spill] sm:$0xff] }
 0x160   : > { %v2528_v6 = vrot.slane %v2422_v59, 2  ;;  %v849_v5 = vshrl.u32 %v588_v50, 16  ;;  %v852_v62 = vshll.u32 %v588_v50, 16  ;;  %v1640_v9 = vadd.f32 %v1569_v41, %v1362_v29 }
 0x161   : > { %v11170_v42 = vrot.slane %v11169_v11, 1  ;;  %v11172_v46 = vrot.slane %v11171_v37, 2  ;;  %v857_v35 = vshrl.u32 %v589_v18, 16  ;;  %v1115_v44 = vld [vmem:[#allocation2 + $0x54] sm:$0xf]  ;;  %v11173_v19 = vrot.slane %v7728_v48, 2 }
 0x162   : > { %v2135_v63 = vld [vmem:[#allocation2 + $0x54] sm:$0xe]  ;;  %v11174_v17 = vrot.slane %v7738_v0, 2  ;;  %v851_v41 = vrot.slane %v849_v5, 7  ;;  %v860_v50 = vshll.u32 %v589_v18, 16  ;;  %v1881_v47 = vadd.f32 %v1810_v2, %v1640_v9 }
 0x163   : > { %v2051_v4 = vsel %vm1501_vm6, %v2049_v3, %v11170_v42  ;;  %v2811_v38 = vsel %vm2261_vm7, %v2809_v51, %v11172_v46  ;;  %v2289_v33 = vsel %vm2261_vm7, %v2287_v23, %v11173_v19  ;;  %v7934_v3 = vunpack.c.l.bf16 %v1115_v44  ;;  %v1024_v51 = vld [vmem:[#allocation2 + $0xc0] sm:$0xf] }
 0x164   : > { %v7932_v36 = vsel %vm2261_vm7, %v2528_v6, %v11174_v17  ;;  %v7936_v37 = vunpack.c.l.bf16 %v2135_v63  ;;  %v7938_v46 = vrot.slane %v857_v35, 7  ;;  %v854_v59 = vor.u32 %v852_v62, %v851_v41  ;;  %v2936_v6 = vpop.xlane.xlu1 %2935 }
 0x165   : > { %v855_v22 = vrot.slane %v851_v41, 4  ;;  %v1202_v48 = vmul.f32 %v7372_v24, %v6055_v52  ;;  %v1267_v0 = vmul.f32 %v6057_v53, %v7887_v43  ;;  %v2122_v29 = vadd.f32 %v2051_v4, %v1881_v47 }
 0x166   : > { %v1314_v18 = vmul.f32 %v6059_v54, %v7934_v3  ;;  %v1903_v44 = vmul.f32 %v6065_v57, %v7934_v3  ;;  %v2663_v9 = vmul.f32 %v6076_v1, %v7936_v37  ;;  %v862_v2 = vor.u32 %v860_v50, %v7938_v46 }
 0x167   : > { %v1025_v63 = vsel %vm6007_vm5, %v854_v59, %v1024_v51  ;;  %v7953_v35 = vadd.f32 %v1267_v0, %v1202_v48  ;;  %v1447_v23 = vmul.f32 %v7372_v24, %v6061_v55  ;;  %v2400_v5 = vadd.f32 %v7867_v39, %v2122_v29  ;;  %3128 = vadd.xlane.f32.xlu2 %v7833_v10  ;;  %v11178_v51 = vld [vmem:[#allocation23_spill] sm:$0xff] }
 0x168   : > { %v1346_v62 = vadd.f32 %v1314_v18, %v1281_v12  ;;  %v2009_v11 = vrot.slane %v1903_v44, 1  ;;  %v2769_v42 = vrot.slane %v2663_v9, 2  ;;  %1026 = vst [vmem:[#allocation2 + $0xc0] sm:$0xf] %v1025_v63  ;;  %v863_v4 = vsel %vm5997_vm4, %v855_v22, %v862_v2  ;;  %v2990_v2 = vpop.xlane.xlu0 %2989  ;;  %v2942_v63 = vpop.xlane.xlu2 %2941 }
 0x169   : > { %v7963_v19 = vmul.f32 %v11175_v25, %v6061_v55  ;;  %v1572_v17 = vrot.slane %v1447_v23, 1  ;;  %v1689_v24 = vmul.f32 %v6063_v56, %v7887_v43  ;;  %v2641_v41 = vadd.f32 %v7872_v13, %v2400_v5  ;;  %1027 = vst.msk [vmem:[#allocation2 + $0xc4] sm:$0xf] %vm502_vm0, %v863_v4 }
 0x16a   : > { %v1624_v39 = vadd.f32 %v1529_v45, %v1346_v62  ;;  %v11176_v12 = vrot.slane %v7796_v16, 1  ;;  %v11177_v10 = vrot.slane %v7802_v26, 2  ;;  %v7978_v59 = vmul.f32 %v6063_v56, %v11178_v51 }
 0x16b   : > { %v10951_v47 = vrot.slane %v7963_v19, 1  ;;  %v1813_v22 = vrot.slane %v1689_v24, 1  ;;  %v2207_v13 = vmul.f32 %v6070_v60, %v7364_v31  ;;  %v2882_v45 = vadd.f32 %v2811_v38, %v2641_v41 }
 0x16c   : > { %v2011_v50 = vsel %vm1501_vm6, %v2009_v11, %v11176_v12  ;;  %v2771_v15 = vsel %vm2261_vm7, %v2769_v42, %v11177_v10  ;;  %v1865_v16 = vadd.f32 %v1770_v30, %v1624_v39  ;;  %v7984_v48 = vmul.f32 %v11175_v25, %v6070_v60  ;;  %v2939_v39 = vpop.xlane.xlu1 %2938 }
 0x16d   : > { %v2449_v26 = vmul.f32 %v6072_v61, %v7889_v28  ;;  %v1574_v0 = vsel %vm1501_vm6, %v1572_v17, %v10951_v47  ;;  %v10948_v29 = vrot.slane %v7978_v59, 1  ;;  %v2332_v18 = vrot.slane %v2207_v13, 2 }
 0x16e   : > { %v7994_v44 = vmul.f32 %v6072_v61, %v11178_v51  ;;  %v7997_v31 = vadd.f32 %v7652_v20, %v2882_v45  ;;  %v2106_v38 = vadd.f32 %v2011_v50, %v1865_v16  ;;  %v10947_v30 = vrot.slane %v7984_v48, 2  ;;  %v11180_v50 = vld [vmem:[#allocation27_spill] sm:$0xff] }
 0x16f   : > { %v2573_v9 = vrot.slane %v2449_v26, 2  ;;  %v1815_v23 = vsel %vm1501_vm6, %v1813_v22, %v10948_v29  ;;  %v8003_v5 = vld [vmem:[#allocation2 + $0xc0] sm:$0xe]  ;;  %v3031_v11 = vmul.f32 %v7759_v27, %v2936_v6  ;;  %v3094_v42 = vmul.f32 %v7892_v7, %v7892_v7  ;;  %3179 = vadd.xlane.f32.xlu2 %v7856_v14  ;;  %v11182_v26 = vld [vmem:[#allocation17_spill] sm:$0xff]  ;;  %v11187_v29 = vld [vmem:[#allocation11_spill] sm:$0xff] }
 0x170   : > { %11179 = vst [vmem:[#allocation18_spill] sm:$0xff] %v7997_v31  ;;  %v10946_v62 = vrot.slane %v7994_v44, 2  ;;  %v3003_v4 = vsel %vm2924_vm8, %v7997_v31, 0.0  ;;  %v2384_v17 = vadd.f32 %v2289_v33, %v2106_v38  ;;  %v10945_v24 = vunpack.c.l.bf16 %v8003_v5  ;;  %v5706_v12 = vld [vmem:[#allocation2 + $0xc0] sm:$0xff]   ;;  %v11191_v7 = vld [vmem:[#allocation9_spill] sm:$0xff] }
 0x171   : > { %v8015_v41 = vsel %vm2261_vm7, %v2332_v18, %v10947_v30  ;;  %3004 = vadd.xlane.f32.xlu0 %v3003_v4  ;;  %v8024_v10 = vsub.f32 %v11180_v50, %v3031_v11  ;;  %v8027_v33 = vsel %vm2924_vm8, %v3094_v42, 0.0  ;;  %v3049_v22 = vmul.f32 %v7759_v27, %v2990_v2 }
 0x172   : > { %v8021_v6 = vsel %vm2261_vm7, %v2573_v9, %v10946_v62  ;;  %v2625_v13 = vadd.f32 %v7932_v36, %v2384_v17  ;;  %v8031_v45 = vunpack.c.l.bf16 %v5706_v12  ;;  %v8033_v16 = vunpack.c.h.bf16 %v5706_v12  ;;  %v11184_v12 = vld [vmem:[#allocation24_spill] sm:$0xff]  ;;  %v8066_v62 = vld [vmem:[#allocation2 + $0xcc] sm:$0xff]  }
 0x173   : > { %11181 = vst [vmem:[#allocation12_spill] sm:$0xff] %v8024_v10  ;;  %v2690_v14 = vmul.f32 %v6076_v1, %v10945_v24  ;;  %v8039_v18 = vsub.f32 %v11182_v26, %v3049_v22  ;;  %v3033_v38 = vmul.f32 %v7759_v27, %v2942_v63  ;;  %v3095_v9 = vmul.f32 %v8024_v10, %v8024_v10  ;;  %v1028_v24 = vld [vmem:[#allocation2 + $0xc8] sm:$0x1] }
 0x174   : > { %v3032_v2 = vmul.f32 %v7759_v27, %v2939_v39  ;;  %v2866_v11 = vadd.f32 %v2771_v15, %v2625_v13  ;;  %v1332_v36 = vmul.f32 %v8031_v45, %v6059_v54  ;;  %v1930_v42 = vmul.f32 %v8031_v45, %v6065_v57 }
 0x175   : > { %11183 = vst [vmem:[#allocation37_spill] sm:$0xff] %v8039_v18  ;;  %v8051_v4 = vmul.f32 %v8033_v16, %v6065_v57  ;;  %v8055_v17 = vmul.f32 %v8033_v16, %v6076_v1  ;;  %v2814_v63 = vrot.slane %v2690_v14, 2  ;;  %v8058_v50 = vsub.f32 %v11184_v12, %v3033_v38  ;;  %v2993_v12 = vpop.xlane.xlu2 %2992 }
 0x176   : > { %v3133_v15 = vsel %vm2924_vm8, %v3095_v9, 0.0  ;;  %v8062_v39 = vadd.f32 %v7652_v20, %v2866_v11  ;;  %v1364_v22 = vadd.f32 %v1332_v36, %v7953_v35  ;;  %v2054_v13 = vrot.slane %v1930_v42, 1 }
 0x177   : > { %11185 = vst [vmem:[#allocation25_spill] sm:$0xff] %v8058_v50  ;;  %v10949_v26 = vrot.slane %v8051_v4, 1  ;;  %v10950_v30 = vrot.slane %v8055_v17, 2  ;;  %v8070_v14 = vsub.f32 %v11187_v29, %v3032_v2  ;;  %v864_v38 = vrot.slane %v7938_v46, 4 }
 0x178   : > { %11186 = vst [vmem:[#allocation23_spill] sm:$0xff] %v8062_v39  ;;  %v1203_v9 = vmul.f32 %v11175_v25, %v6055_v52  ;;  %v2955_v11 = vsel %vm2924_vm8, %v8062_v39, 0.0  ;;  %v1642_v35 = vadd.f32 %v1574_v0, %v1364_v22  ;;  %v1268_v42 = vmul.f32 %v6057_v53, %v11178_v51 }
 0x179   : > { %11188 = vst [vmem:[#allocation27_spill] sm:$0xff] %v8070_v14  ;;  %v2056_v36 = vsel %vm1501_vm6, %v2054_v13, %v10949_v26  ;;  %3182 = vadd.xlane.f32.xlu0 %v7859_v49  ;;  %2956 = vadd.xlane.f32.xlu1 %v2955_v11  ;;  %v2816_v46 = vsel %vm2261_vm7, %v2814_v63, %v10950_v30  ;;  %v8091_v29 = vunpack.c.h.bf16 %v8066_v62  ;;  %v11189_v13 = vld [vmem:[#allocation34_spill] sm:$0xff]  ;;  %v11190_v11 = vld [vmem:[#allocation36_spill] sm:$0xff]  ;;  %v11193_v39 = vrot.slane %v7963_v19, 1 }
 0x17a   : > { %v1029_v25 = vsel %vm6497_vm10, %v864_v38, %v1028_v24  ;;  %v1333_v0 = vmul.f32 %v8033_v16, %v6059_v54  ;;  %v1883_v2 = vadd.f32 %v1815_v23, %v1642_v35  ;;  %v1300_v22 = vadd.f32 %v1268_v42, %v1203_v9 }
 0x17b   : > { %1030 = vst [vmem:[#allocation2 + $0xc8] sm:$0x1] %v1029_v25  ;;  %v1449_v49 = vmul.f32 %v6061_v55, %v11189_v13  ;;  %v1691_v26 = vmul.f32 %v6063_v56, %v11190_v11  ;;  %v2209_v63 = vmul.f32 %v6070_v60, %v11189_v13  ;;  %v2451_v8 = vmul.f32 %v6072_v61, %v11190_v11 }
 0x17c   : > { %v3113_v24 = vmul.f32 %v8039_v18, %v8039_v18  ;;  %v3050_v38 = vmul.f32 %v7759_v27, %v2993_v12  ;;  %v2124_v23 = vadd.f32 %v2056_v36, %v1883_v2  ;;  %v1365_v35 = vadd.f32 %v1333_v0, %v1300_v22 }
 0x17d   : > { %v1575_v9 = vrot.slane %v1449_v49, 1  ;;  %v1816_v42 = vrot.slane %v1691_v26, 1  ;;  %v2335_v25 = vrot.slane %v2209_v63, 2  ;;  %v2576_v30 = vrot.slane %v2451_v8, 2 }
 0x17e   : > { %v8105_v47 = vsel %vm2924_vm8, %v3113_v24, 0.0  ;;  %v8108_v10 = vsub.f32 %v11191_v7, %v3050_v38  ;;  %v2402_v13 = vadd.f32 %v8015_v41, %v2124_v23  ;;  %v11194_v12 = vrot.slane %v7978_v59, 1 }
 0x17f   : > { %v1576_v18 = vsel %vm1501_vm6, %v11193_v39, %v1575_v9  ;;  %v3112_v26 = vmul.f32 %v7895_v58, %v7895_v58  ;;  %v11195_v2 = vrot.slane %v7984_v48, 2  ;;  %v11196_v7 = vrot.slane %v7994_v44, 2 }
 0x180   : > { %11192 = vst [vmem:[#allocation17_spill] sm:$0xff] %v8108_v10  ;;  %v1817_v36 = vsel %vm1501_vm6, %v11194_v12, %v1816_v42  ;;  %v1643_v0 = vadd.f32 %v1576_v18, %v1365_v35  ;;  %v3097_v19 = vmul.f32 %v8058_v50, %v8058_v50  ;;  %v2643_v39 = vadd.f32 %v8021_v6, %v2402_v13  ;;  %v11197_v6 = vld [vmem:[#allocation5_spill] sm:$0xff]  ;;  %v11211_v50 = vld [vmem:[#allocation3_spill] sm:$0xff] }
 0x181   : > { %v2336_v22 = vsel %vm2261_vm7, %v11195_v2, %v2335_v25  ;;  %v2577_v41 = vsel %vm2261_vm7, %v11196_v7, %v2576_v30  ;;  %v3184_v59 = vsel %vm2924_vm8, %v3112_v26, 0.0  ;;  %v3096_v49 = vmul.f32 %v8070_v14, %v8070_v14  ;;  %3131 = vadd.xlane.f32.xlu0 %v8027_v33  ;;  %3134 = vadd.xlane.f32.xlu1 %v3133_v15 }
 0x182   : > { %v1187_v18 = vmul.f32 %v7545_v21, %v6055_v52  ;;  %v1384_v48 = vld [vmem:[#allocation2 + $0xc8] sm:$0x1]  ;;  %v1884_v44 = vadd.f32 %v1817_v36, %v1643_v0  ;;  %v8135_v30 = vsel %vm2924_vm8, %v3097_v19, 0.0  ;;  %v1252_v63 = vmul.f32 %v6057_v53, %v7772_v32 }
 0x183   : > { %v1317_v8 = vmul.f32 %v11197_v6, %v6059_v54  ;;  %v2884_v24 = vadd.f32 %v2816_v46, %v2643_v39  ;;  %v8141_v38 = vunpack.c.l.bf16 %v1384_v48  ;;  %v8144_v23 = vsel %vm2924_vm8, %v3096_v49, 0.0 }
 0x184   : > { %v8148_v33 = vmul.f32 %v7545_v21, %v6061_v55  ;;  %v1284_v15 = vadd.f32 %v1252_v63, %v1187_v18  ;;  %v1425_v35 = vmul.f32 %v6061_v55, %v7677_v34  ;;  %v8154_v9 = vmul.f32 %v6063_v56, %v7772_v32  ;;  %v11199_v63 = vld [vmem:[#allocation30_spill] sm:$0xff] }
 0x185   : > { %v1667_v46 = vmul.f32 %v6063_v56, %v7774_v40  ;;  %v8159_v42 = vadd.f32 %v7652_v20, %v2884_v24  ;;  %v1932_v25 = vmul.f32 %v6065_v57, %v8141_v38  ;;  %v2692_v13 = vmul.f32 %v6076_v1, %v8141_v38 }
 0x186   : > { %v10957_v12 = vrot.slane %v8148_v33, 1  ;;  %v1349_v36 = vadd.f32 %v1317_v8, %v1284_v15  ;;  %v1535_v26 = vrot.slane %v1425_v35, 1  ;;  %v10956_v0 = vrot.slane %v8154_v9, 1 }
 0x187   : > { %11198 = vst [vmem:[#allocation24_spill] sm:$0xff] %v8159_v42  ;;  %v1776_v2 = vrot.slane %v1667_v46, 1  ;;  %v3009_v7 = vsel %vm2924_vm8, %v8159_v42, 0.0  ;;  %v2057_v19 = vrot.slane %v1932_v25, 1  ;;  %v2817_v39 = vrot.slane %v2692_v13, 2 }
 0x188   : > { %v8171_v49 = vmul.f32 %v11197_v6, %v6065_v57  ;;  %3010 = vadd.xlane.f32.xlu2 %v3009_v7  ;;  %v1536_v18 = vsel %vm1501_vm6, %v10957_v12, %v1535_v26  ;;  %v1908_v8 = vmul.f32 %v6065_v57, %v11199_v63  ;;  %v8183_v24 = vmul.f32 %v7545_v21, %v6070_v60 }
 0x189   : > { %v1777_v48 = vsel %vm1501_vm6, %v10956_v0, %v1776_v2  ;;  %v11200_v15 = vrot.slane %v8051_v4, 1  ;;  %v11201_v46 = vrot.slane %v8055_v17, 2  ;;  %v1627_v13 = vadd.f32 %v1536_v18, %v1349_v36  ;;  %3185 = vadd.xlane.f32.xlu1 %v3184_v59 }
 0x18a   : > { %v10961_v26 = vrot.slane %v8171_v49, 1  ;;  %v2017_v2 = vrot.slane %v1908_v8, 1  ;;  %v2185_v0 = vmul.f32 %v6070_v60, %v7677_v34  ;;  %v10960_v21 = vrot.slane %v8183_v24, 2 }
 0x18b   : > { %v2058_v35 = vsel %vm1501_vm6, %v11200_v15, %v2057_v19  ;;  %v2818_v25 = vsel %vm2261_vm7, %v11201_v46, %v2817_v39  ;;  %v1868_v12 = vadd.f32 %v1777_v48, %v1627_v13  ;;  %v8197_v4 = vmul.f32 %v6072_v61, %v7772_v32 }
 0x18c   : > { %v2125_v7 = vadd.f32 %v2058_v35, %v1884_v44  ;;  %v2427_v17 = vmul.f32 %v6072_v61, %v7774_v40  ;;  %v8203_v36 = vmul.f32 %v11197_v6, %v6076_v1  ;;  %v2948_v44 = vpop.xlane.xlu1 %2947  ;;  %v2018_v34 = vsel %vm1501_vm6, %v10961_v26, %v2017_v2  ;;  %v2996_v26 = vpop.xlane.xlu0 %2995 }
 0x18d   : > { %v2295_v19 = vrot.slane %v2185_v0, 2  ;;  %v2668_v39 = vmul.f32 %v6076_v1, %v11199_v63  ;;  %v2109_v18 = vadd.f32 %v2018_v34, %v1868_v12  ;;  %v10959_v48 = vrot.slane %v8197_v4, 2 }
 0x18e   : > { %v2403_v59 = vadd.f32 %v2336_v22, %v2125_v7  ;;  %v2536_v8 = vrot.slane %v2427_v17, 2  ;;  %v10958_v15 = vrot.slane %v8203_v36, 2  ;;  %v3035_v13 = vmul.f32 %v7759_v27, %v2948_v44  ;;  %v1385_v7 = vld [vmem:[#allocation2 + $0xd4] sm:$0x1] }
 0x18f   : > { %v2296_v46 = vsel %vm2261_vm7, %v10960_v21, %v2295_v19  ;;  %v2777_v22 = vrot.slane %v2668_v39, 2  ;;  %v3114_v12 = vmul.f32 %v8108_v10, %v8108_v10  ;;  %v1205_v17 = vmul.f32 %v6055_v52, %v11178_v51  ;;  %v11202_v44 = vld [vmem:[#allocation22_spill] sm:$0xff] }
 0x190   : > { %v2644_v35 = vadd.f32 %v2577_v41, %v2403_v59  ;;  %v2387_v2 = vadd.f32 %v2296_v46, %v2109_v18  ;;  %v2537_v0 = vsel %vm2261_vm7, %v10959_v48, %v2536_v8  ;;  %3188 = vadd.xlane.f32.xlu2 %v8105_v47  ;;  %v8228_v34 = vsub.f32 %v11202_v44, %v3035_v13 }
 0x191   : > { %v2778_v59 = vsel %vm2261_vm7, %v10958_v15, %v2777_v22  ;;  %v1270_v19 = vmul.f32 %v8033_v16, %v6057_v53  ;;  %v8233_v18 = vsel %vm2924_vm8, %v3114_v12, 0.0  ;;  %v1335_v8 = vmul.f32 %v6059_v54, %v8091_v29 }
 0x192   : > { %v2885_v41 = vadd.f32 %v2818_v25, %v2644_v35  ;;  %v2628_v39 = vadd.f32 %v2537_v0, %v2387_v2  ;;  %v1403_v25 = vunpack.c.l.bf16 %v1385_v7  ;;  %v8242_v46 = vmul.f32 %v6061_v55, %v11178_v51 }
 0x193   : > { %v1302_v35 = vadd.f32 %v1270_v19, %v1205_v17  ;;  %v1452_v22 = vmul.f32 %v6061_v55, %v11190_v11  ;;  %v8248_v2 = vmul.f32 %v8033_v16, %v6063_v56  ;;  %v1694_v0 = vmul.f32 %v6063_v56, %v8141_v38 }
 0x194   : > { %v8238_v47 = vadd.f32 %v7652_v20, %v2885_v41  ;;  %v2869_v13 = vadd.f32 %v2778_v59, %v2628_v39  ;;  %v8254_v7 = vmul.f32 %v6065_v57, %v8091_v29  ;;  %v10962_v41 = vrot.slane %v8242_v46, 1 }
 0x195   : > { %v1367_v17 = vadd.f32 %v1335_v8, %v1302_v35  ;;  %v1580_v44 = vrot.slane %v1452_v22, 1  ;;  %v10963_v19 = vrot.slane %v8248_v2, 1  ;;  %v1821_v39 = vrot.slane %v1694_v0, 1 }
 0x196   : > { %11203 = vst [vmem:[#allocation11_spill] sm:$0xff] %v8238_v47  ;;  %v3012_v12 = vsel %vm2924_vm8, %v8238_v47, 0.0  ;;  %v8260_v59 = vadd.f32 %v7652_v20, %v2869_v13  ;;  %v1935_v15 = vmul.f32 %v6065_v57, %v1403_v25  ;;  %v10964_v21 = vrot.slane %v8254_v7, 1 }
 0x197   : > { %3013 = vadd.xlane.f32.xlu0 %v3012_v12  ;;  %v1581_v48 = vsel %vm1501_vm6, %v10962_v41, %v1580_v44  ;;  %v8270_v8 = vmul.f32 %v6070_v60, %v11178_v51  ;;  %v2212_v35 = vmul.f32 %v6070_v60, %v11190_v11  ;;  %v1822_v0 = vsel %vm1501_vm6, %v10963_v19, %v1821_v39 }
 0x198   : > { %11204 = vst [vmem:[#allocation34_spill] sm:$0xff] %v8260_v59  ;;  %v2964_v22 = vsel %vm2924_vm8, %v8260_v59, 0.0  ;;  %v1645_v13 = vadd.f32 %v1581_v48, %v1367_v17  ;;  %v2062_v12 = vrot.slane %v1935_v15, 1  ;;  %3137 = vadd.xlane.f32.xlu2 %v8144_v23  ;;  %v8283_v41 = vmul.f32 %v8033_v16, %v6072_v61  ;;  %v3002_v48 = vpop.xlane.xlu2 %3001 }
 0x199   : > { %2965 = vadd.xlane.f32.xlu1 %v2964_v22  ;;  %v10966_v44 = vrot.slane %v8270_v8, 2  ;;  %v2340_v51 = vrot.slane %v2212_v35, 2  ;;  %v2454_v11 = vmul.f32 %v6072_v61, %v8141_v38  ;;  %v8292_v23 = vmul.f32 %v6076_v1, %v8091_v29  ;;  %v2999_v35 = vpop.xlane.xlu1 %2998 }
 0x19a   : > { %v1886_v17 = vadd.f32 %v1822_v0, %v1645_v13  ;;  %v2063_v15 = vsel %vm1501_vm6, %v10964_v21, %v2062_v12  ;;  %v2695_v39 = vmul.f32 %v6076_v1, %v1403_v25  ;;  %v10968_v22 = vrot.slane %v8283_v41, 2  ;;  %v11205_v25 = vld [vmem:[#allocation29_spill] sm:$0xff] }
 0x19b   : > { %v2341_v16 = vsel %vm2261_vm7, %v10966_v44, %v2340_v51  ;;  %v2581_v38 = vrot.slane %v2454_v11, 2  ;;  %v3051_v13 = vmul.f32 %v7759_v27, %v2996_v26  ;;  %v10967_v19 = vrot.slane %v8292_v23, 2  ;;  %v11206_v44 = vld [vmem:[#allocation28_spill] sm:$0xff] }
 0x19c   : > { %v2127_v0 = vadd.f32 %v2063_v15, %v1886_v17  ;;  %v2822_v12 = vrot.slane %v2695_v39, 2  ;;  %v3053_v21 = vmul.f32 %v7759_v27, %v3002_v48  ;;  %v3052_v51 = vmul.f32 %v7759_v27, %v2999_v35  ;;  %v11207_v48 = vld [vmem:[#allocation21_spill] sm:$0xff]  ;;  %v11209_v35 = vld [vmem:[#allocation4_spill] sm:$0xff] }
 0x19d   : > { %v2582_v29 = vsel %vm2261_vm7, %v10968_v22, %v2581_v38  ;;  %v8306_v10 = vsub.f32 %v11205_v25, %v3051_v13  ;;  %v1186_v11 = vmul.f32 %v11206_v44, %v6055_v52  ;;  %v1251_v39 = vmul.f32 %v6057_v53, %v7934_v3  ;;  %v11208_v38 = vld [vmem:[#allocation14_spill] sm:$0xff] }
 0x19e   : > { %v2405_v26 = vadd.f32 %v2341_v16, %v2127_v0  ;;  %v2823_v17 = vsel %vm2261_vm7, %v10967_v19, %v2822_v12  ;;  %v8316_v15 = vsub.f32 %v11207_v48, %v3053_v21  ;;  %v8321_v13 = vsub.f32 %v11208_v38, %v3052_v51  ;;  %v11210_v48 = vld [vmem:[#allocation20_spill] sm:$0xff] }
 0x19f   : > { %3140 = vadd.xlane.f32.xlu0 %v8135_v30  ;;  %v1316_v25 = vmul.f32 %v11209_v35, %v6059_v54  ;;  %v1423_v30 = vmul.f32 %v11206_v44, %v6061_v55  ;;  %v1665_v16 = vmul.f32 %v6063_v56, %v7934_v3  ;;  %v1283_v12 = vadd.f32 %v1251_v39, %v1186_v11 }
 0x1a0   : > { %v2646_v0 = vadd.f32 %v2582_v29, %v2405_v26  ;;  %v1906_v21 = vmul.f32 %v11209_v35, %v6065_v57  ;;  %v2183_v19 = vmul.f32 %v6070_v60, %v11210_v48  ;;  %v2425_v38 = vmul.f32 %v6072_v61, %v7936_v37 }
 0x1a1   : > { %v1532_v22 = vrot.slane %v1423_v30, 1  ;;  %v1773_v51 = vrot.slane %v1665_v16, 1  ;;  %v2666_v14 = vmul.f32 %v6076_v1, %v11211_v50  ;;  %v1348_v58 = vadd.f32 %v1316_v25, %v1283_v12  ;;  %v2945_v25 = vpop.xlane.xlu0 %2944  ;;  %v11218_v12 = vld [vmem:[#allocation35_spill] sm:$0xff] }
 0x1a2   : > { %v2887_v44 = vadd.f32 %v2823_v17, %v2646_v0  ;;  %v2014_v59 = vrot.slane %v1906_v21, 1  ;;  %v2292_v47 = vrot.slane %v2183_v19, 2  ;;  %v11212_v29 = vrot.slane %v8148_v33, 1 }
 0x1a3   : > { %v11213_v26 = vrot.slane %v8154_v9, 1  ;;  %v2533_v30 = vrot.slane %v2425_v38, 2  ;;  %v2774_v16 = vrot.slane %v2666_v14, 2  ;;  %v11214_v31 = vrot.slane %v8171_v49, 1 }
 0x1a4   : > { %v1534_v11 = vsel %vm1501_vm6, %v1532_v22, %v11212_v29  ;;  %v8344_v48 = vadd.f32 %v7652_v20, %v2887_v44  ;;  %v11215_v19 = vrot.slane %v8183_v24, 2  ;;  %v11216_v22 = vrot.slane %v8197_v4, 2  ;;  %v11219_v44 = vld [vmem:[#allocation6_spill] sm:$0xff] }
 0x1a5   : > { %v1775_v39 = vsel %vm1501_vm6, %v1773_v51, %v11213_v26  ;;  %v1626_v42 = vadd.f32 %v1534_v11, %v1348_v58  ;;  %v2016_v17 = vsel %vm1501_vm6, %v2014_v59, %v11214_v31  ;;  %v3099_v14 = vmul.f32 %v8228_v34, %v8228_v34 }
 0x1a6   : > { %v2294_v33 = vsel %vm2261_vm7, %v2292_v47, %v11215_v19  ;;  %v2535_v9 = vsel %vm2261_vm7, %v2533_v30, %v11216_v22  ;;  %v3115_v20 = vmul.f32 %v8306_v10, %v8306_v10  ;;  %v3018_v58 = vsel %vm2924_vm8, %v8344_v48, 0.0 }
 0x1a7   : > { %3191 = vadd.xlane.f32.xlu0 %v8233_v18  ;;  %v1867_v31 = vadd.f32 %v1775_v39, %v1626_v42  ;;  %v11217_v49 = vrot.slane %v8203_v36, 2  ;;  %v3034_v4 = vmul.f32 %v7759_v27, %v2945_v25  ;;  %3019 = vadd.xlane.f32.xlu2 %v3018_v58  ;;  %v8369_v59 = vmul.f32 %v8316_v15, %v8316_v15 }
 0x1a8   : > { %v3193_v47 = vsel %vm2924_vm8, %v3115_v20, 0.0  ;;  %v3116_v18 = vmul.f32 %v8321_v13, %v8321_v13  ;;  %v1188_v0 = vmul.f32 %v6055_v52, %v7934_v3  ;;  %v3145_v36 = vsel %vm2924_vm8, %v3099_v14, 0.0 }
 0x1a9   : > { %v2776_v24 = vsel %vm2261_vm7, %v2774_v16, %v11217_v49  ;;  %v2108_v42 = vadd.f32 %v2016_v17, %v1867_v31  ;;  %3194 = vadd.xlane.f32.xlu1 %v3193_v47  ;;  %v8377_v21 = vsub.f32 %v11218_v12, %v3034_v4  ;;  %v1253_v51 = vmul.f32 %v11209_v35, %v6057_v53  ;;  %v11220_v49 = vld [vmem:[#allocation7_spill] sm:$0xff] }
 0x1aa   : > { %v8382_v38 = vsel %vm2924_vm8, %v3116_v18, 0.0  ;;  %v1318_v29 = vmul.f32 %v6059_v54, %v11219_v44  ;;  %v1426_v11 = vmul.f32 %v6061_v55, %v7934_v3  ;;  %v8390_v26 = vmul.f32 %v6061_v55, %v7772_v32 }
 0x1ab   : > { %v2386_v39 = vadd.f32 %v2294_v33, %v2108_v42  ;;  %v3098_v30 = vmul.f32 %v8377_v21, %v8377_v21  ;;  %v1285_v16 = vadd.f32 %v1253_v51, %v1188_v0  ;;  %v1668_v17 = vmul.f32 %v11209_v35, %v6063_v56 }
 0x1ac   : > { %v1537_v25 = vrot.slane %v1426_v11, 1  ;;  %v1538_v19 = vrot.slane %v8390_v26, 1  ;;  %v8399_v22 = vmul.f32 %v11197_v6, %v6063_v56  ;;  %v1909_v3 = vmul.f32 %v6065_v57, %v11219_v44 }
 0x1ad   : > { %v2627_v14 = vadd.f32 %v2535_v9, %v2386_v39  ;;  %v3142_v33 = vsel %vm2924_vm8, %v3098_v30, 0.0  ;;  %v1350_v20 = vadd.f32 %v1318_v29, %v1285_v16  ;;  %v1778_v58 = vrot.slane %v1668_v17, 1  ;;  %v2951_v29 = vpop.xlane.xlu2 %2950 }
 0x1ae   : > { %v1539_v31 = vsel %vm1501_vm6, %v1537_v25, %v1538_v19  ;;  %v1779_v35 = vrot.slane %v8399_v22, 1  ;;  %v8410_v4 = vmul.f32 %v6065_v57, %v11220_v49  ;;  %v2019_v47 = vrot.slane %v1909_v3, 1 }
 0x1af   : > { %v2868_v18 = vadd.f32 %v2776_v24, %v2627_v14  ;;  %v1628_v0 = vadd.f32 %v1539_v31, %v1350_v20  ;;  %v2186_v9 = vmul.f32 %v6070_v60, %v7936_v37  ;;  %v8416_v42 = vmul.f32 %v6070_v60, %v7772_v32  ;;  %3146 = vadd.xlane.f32.xlu2 %v3145_v36  ;;  %v8431_v37 = vld [vmem:[%s10792_s4] ss:$0 sm:$0xff]  ;;  %v11222_v31 = vld [vmem:[#allocation38_spill] sm:$0xff] }
 0x1b0   : > { %v1780_v12 = vsel %vm1501_vm6, %v1778_v58, %v1779_v35  ;;  %v10978_v51 = vrot.slane %v8410_v4, 1  ;;  %v2428_v44 = vmul.f32 %v6072_v61, %v11211_v50  ;;  %v8426_v24 = vmul.f32 %v11197_v6, %v6072_v61  ;;  %v11221_v20 = vld [vmem:[#allocation8_spill] sm:$0xff] }
 0x1b1   : > { %v8434_v36 = vadd.f32 %v8431_v37, %v2868_v18  ;;  %3143 = vadd.xlane.f32.xlu1 %v3142_v33  ;;  %v1869_v11 = vadd.f32 %v1780_v12, %v1628_v0  ;;  %v2297_v39 = vrot.slane %v2186_v9, 2  ;;  %v10977_v30 = vrot.slane %v8416_v42, 2 }
 0x1b2   : > { %v3036_v50 = vmul.f32 %v7759_v27, %v2951_v29  ;;  %v2021_v16 = vsel %vm1501_vm6, %v2019_v47, %v10978_v51  ;;  %v2538_v17 = vrot.slane %v2428_v44, 2  ;;  %v10976_v25 = vrot.slane %v8426_v24, 2 }
 0x1b3   : > { %v2961_v3 = vsel %vm2924_vm8, %v8434_v36, 0.0  ;;  %v2110_v14 = vadd.f32 %v2021_v16, %v1869_v11  ;;  %v2299_v33 = vsel %vm2261_vm7, %v2297_v39, %v10977_v30  ;;  %v2669_v58 = vmul.f32 %v6076_v1, %v11221_v20  ;;  %v2145_v39 = vld [vmem:[#allocation2 + $0xcc] sm:$0xe] }
 0x1b4   : > { %2962 = vadd.xlane.f32.xlu0 %v2961_v3  ;;  %v8450_v18 = vsub.f32 %v11222_v31, %v3036_v50  ;;  %v2540_v47 = vsel %vm2261_vm7, %v2538_v17, %v10976_v25  ;;  %v8457_v0 = vmul.f32 %v6076_v1, %v11220_v49  ;;  %v1171_v9 = vunpack.c.l.bf16 %v8066_v62 }
 0x1b5   : > { %v2388_v12 = vadd.f32 %v2299_v33, %v2110_v14  ;;  %v2779_v44 = vrot.slane %v2669_v58, 2  ;;  %v1204_v29 = vmul.f32 %v6055_v52, %v7887_v43  ;;  %v1269_v11 = vmul.f32 %v8031_v45, %v6057_v53 }
 0x1b6   : > { %v3100_v50 = vmul.f32 %v8450_v18, %v8450_v18  ;;  %v2780_v16 = vrot.slane %v8457_v0, 2  ;;  %v1334_v17 = vmul.f32 %v6059_v54, %v1171_v9  ;;  %v1450_v3 = vmul.f32 %v6061_v55, %v7887_v43 }
 0x1b7   : > { %v2629_v62 = vadd.f32 %v2540_v47, %v2388_v12  ;;  %v1301_v14 = vadd.f32 %v1269_v11, %v1204_v29  ;;  %v1692_v33 = vmul.f32 %v8031_v45, %v6063_v56  ;;  %v1933_v20 = vmul.f32 %v6065_v57, %v1171_v9  ;;  %3197 = vadd.xlane.f32.xlu2 %v8382_v38 }
 0x1b8   : > { %v3199_v58 = vsel %vm2924_vm8, %v8369_v59, 0.0  ;;  %v2781_v31 = vsel %vm2261_vm7, %v2779_v44, %v2780_v16  ;;  %v1577_v25 = vrot.slane %v1450_v3, 1  ;;  %v2163_v30 = vunpack.c.l.bf16 %v2145_v39 }
 0x1b9   : > { %v2870_v51 = vadd.f32 %v2781_v31, %v2629_v62  ;;  %v1366_v43 = vadd.f32 %v1334_v17, %v1301_v14  ;;  %v1818_v47 = vrot.slane %v1692_v33, 1  ;;  %v2059_v12 = vrot.slane %v1933_v20, 1  ;;  %v3008_v14 = vpop.xlane.xlu1 %3007 }
 0x1ba   : > { %v11223_v29 = vrot.slane %v8242_v46, 1  ;;  %v2210_v9 = vmul.f32 %v6070_v60, %v7889_v28  ;;  %v11224_v59 = vunpack.c.l.bf16 %v8003_v5  ;;  %v2693_v11 = vmul.f32 %v6076_v1, %v2163_v30 }
 0x1bb   : > { %v3148_v44 = vsel %vm2924_vm8, %v3100_v50, 0.0  ;;  %v8490_v39 = vadd.f32 %v8431_v37, %v2870_v51  ;;  %v11225_v3 = vrot.slane %v8248_v2, 1  ;;  %v1189_v30 = vmul.f32 %v6055_v52, %v7772_v32 }
 0x1bc   : > { %v1579_v45 = vsel %vm1501_vm6, %v1577_v25, %v11223_v29  ;;  %v2452_v38 = vmul.f32 %v6072_v61, %v11224_v59  ;;  %3200 = vadd.xlane.f32.xlu0 %v3199_v58  ;;  %v11226_v25 = vrot.slane %v8254_v7, 1  ;;  %v2337_v5 = vrot.slane %v2210_v9, 2 }
 0x1bd   : > { %v1644_v17 = vadd.f32 %v1579_v45, %v1366_v43  ;;  %v1820_v46 = vsel %vm1501_vm6, %v1818_v47, %v11225_v3  ;;  %v2967_v51 = vsel %vm2924_vm8, %v8490_v39, 0.0  ;;  %v1254_v2 = vmul.f32 %v11197_v6, %v6057_v53 }
 0x1be   : > { %v2061_v28 = vsel %vm1501_vm6, %v2059_v12, %v11226_v25  ;;  %v2578_v62 = vrot.slane %v2452_v38, 2  ;;  %v1319_v33 = vmul.f32 %v6059_v54, %v11220_v49  ;;  %v3055_v7 = vmul.f32 %v7759_v27, %v3008_v14  ;;  %v11229_v54 = vld [vmem:[#allocation39_spill] sm:$0xff] }
 0x1bf   : > { %v1885_v50 = vadd.f32 %v1820_v46, %v1644_v17  ;;  %v11227_v20 = vrot.slane %v8270_v8, 2  ;;  %v11228_v31 = vrot.slane %v8283_v41, 2  ;;  %v2819_v32 = vrot.slane %v2693_v11, 2  ;;  %2968 = vadd.xlane.f32.xlu2 %v2967_v51  ;;  %v11230_v8 = vld [vmem:[#allocation32_spill] sm:$0xff]  ;;  %v2954_v11 = vpop.xlane.xlu0 %2953 }
 0x1c0   : > { %v1286_v47 = vadd.f32 %v1254_v2, %v1189_v30  ;;  %v1428_v12 = vmul.f32 %v6061_v55, %v7774_v40  ;;  %v1670_v53 = vmul.f32 %v6063_v56, %v11199_v63  ;;  %v8518_v6 = vsub.f32 %v11229_v54, %v3055_v7 }
 0x1c1   : > { %v2339_v58 = vsel %vm2261_vm7, %v2337_v5, %v11227_v20  ;;  %v2580_v52 = vsel %vm2261_vm7, %v2578_v62, %v11228_v31  ;;  %v2126_v43 = vadd.f32 %v2061_v28, %v1885_v50  ;;  %v1911_v49 = vmul.f32 %v6065_v57, %v11230_v8 }
 0x1c2   : > { %v2188_v41 = vmul.f32 %v6070_v60, %v7774_v40  ;;  %v2430_v29 = vmul.f32 %v6072_v61, %v11199_v63  ;;  %v1351_v9 = vadd.f32 %v1319_v33, %v1286_v47  ;;  %v1540_v59 = vrot.slane %v1428_v12, 1 }
 0x1c3   : > { %v2404_v45 = vadd.f32 %v2339_v58, %v2126_v43  ;;  %v1781_v55 = vrot.slane %v1670_v53, 1  ;;  %v11231_v38 = vrot.slane %v8292_v23, 2  ;;  %v2022_v17 = vrot.slane %v1911_v49, 1 }
 0x1c4   : > { %v2300_v3 = vrot.slane %v2188_v41, 2  ;;  %v2671_v57 = vmul.f32 %v6076_v1, %v11230_v8  ;;  %v3037_v60 = vmul.f32 %v7759_v27, %v2954_v11  ;;  %v1541_v61 = vsel %vm1501_vm6, %v1538_v19, %v1540_v59  ;;  %3149 = vadd.xlane.f32.xlu0 %v3148_v44  ;;  %v3177_v0 = vpop.xlane.xlu1 %3176 }
 0x1c5   : > { %v2821_v56 = vsel %vm2261_vm7, %v2819_v32, %v11231_v38  ;;  %v2645_v46 = vadd.f32 %v2580_v52, %v2404_v45  ;;  %v1782_v40 = vsel %vm1501_vm6, %v1779_v35, %v1781_v55  ;;  %v1629_v63 = vadd.f32 %v1541_v61, %v1351_v9  ;;  %v11234_v35 = vld [vmem:[#allocation40_spill] sm:$0xff] }
 0x1c6   : > { %v11232_v25 = vrot.slane %v8410_v4, 1  ;;  %v2541_v5 = vrot.slane %v2430_v29, 2  ;;  %v3119_v1 = vmul.f32 %v8518_v6, %v8518_v6  ;;  %v11233_v26 = vrot.slane %v8416_v42, 2 }
 0x1c7   : > { %v2886_v23 = vadd.f32 %v2821_v56, %v2645_v46  ;;  %v1870_v62 = vadd.f32 %v1782_v40, %v1629_v63  ;;  %v8550_v44 = vsub.f32 %v11234_v35, %v3037_v60  ;;  %v2782_v30 = vrot.slane %v2671_v57, 2  ;;  %v3174_v33 = vpop.xlane.xlu0 %3173 }
 0x1c8   : > { %v2023_v28 = vsel %vm1501_vm6, %v11232_v25, %v2022_v17  ;;  %v2301_v19 = vsel %vm2261_vm7, %v11233_v26, %v2300_v3  ;;  %v3205_v4 = vsel %vm2924_vm8, %v3119_v1, 0.0  ;;  %v11235_v50 = vrot.slane %v8426_v24, 2 }
 0x1c9   : > { %v8547_v22 = vadd.f32 %v8431_v37, %v2886_v23  ;;  %v2111_v14 = vadd.f32 %v2023_v28, %v1870_v62  ;;  %3206 = vadd.xlane.f32.xlu2 %v3205_v4  ;;  %v2783_v7 = vsel %vm2261_vm7, %v2780_v16, %v2782_v30  ;;  %v3101_v20 = vmul.f32 %v8550_v44, %v8550_v44  ;;  %v11236_v28 = vld [vmem:[#allocation18_spill] sm:$0xff] }
 0x1ca   : > { %v2542_v42 = vsel %vm2261_vm7, %v11235_v50, %v2541_v5  ;;  %v3236_v31 = vmul.f32 %v3174_v33, %v7759_v27  ;;  %v3237_v16 = vmul.f32 %v3177_v0, %v7759_v27 }
 0x1cb   : > { %v3015_v51 = vsel %vm2924_vm8, %v8547_v22, 0.0  ;;  %v2389_v2 = vadd.f32 %v2301_v19, %v2111_v14  ;;  %v3151_v32 = vsel %vm2924_vm8, %v3101_v20, 0.0  ;;  %v3652_v19 = vld [vmem:[%s10793_s5] sm:$0x3] }
 0x1cc   : > { %3016 = vadd.xlane.f32.xlu1 %v3015_v51  ;;  %v3268_v43 = vadd.f32 1e-05, %v3236_v31  ;;  %v8571_v12 = vadd.f32 1e-05, %v3237_v16  ;;  %v3126_v8 = vpop.xlane.xlu1 %3125  ;;  %v3707_v4 = vsel %vm3705_vm12, %v3652_v19, 0  ;;  %v11237_v51 = vld [vmem:[#allocation41_spill] sm:$0xff] }
 0x1cd   : > { %v2630_v58 = vadd.f32 %v2542_v42, %v2389_v2  ;;  %5707 = vmatpush.bf16.msra.mxu2 %v3707_v4  ;;  %3716 = vmatpush.bf16.msra.mxu0 %v3707_v4 }
 0x1ce   : > { %5740 = vrsqrt.f32 %v3268_v43  ;;  %vm3450_vm14 = vweird.f32 %v3268_v43  ;;  %vm3460_vm2 = vweird.f32 %v8571_v12 }
 0x1cf   : > { %v2871_v52 = vadd.f32 %v2783_v7, %v2630_v58  ;;  %5742 = vrsqrt.f32 %v8571_v12 }
 0x1d1   : > { %v8566_v24 = vadd.f32 %v8431_v37, %v2871_v52  ;;  %v3220_v37 = vmul.f32 %v3126_v8, %v7759_v27 }
 0x1d2   : > { %v2960_v53 = vpop.xlane.xlu2 %2959 }
 0x1d3   : > { %v2970_v47 = vsel %vm2924_vm8, %v8566_v24, 0.0  ;;  %v8580_v29 = vadd.f32 1e-05, %v3220_v37  ;;  %v3039_v23 = vmul.f32 %v7759_v27, %v2960_v53  ;;  %v11240_v53 = vld [vmem:[#allocation23_spill] sm:$0xff] }
 0x1d4   : > { %3152 = vadd.xlane.f32.xlu1 %v3151_v32  ;;  %2971 = vadd.xlane.f32.xlu0 %v2970_v47  ;;  %v8574_v54 = vpop.eup %5740 }
 0x1d5   : > { %v8577_v49 = vpop.eup %5742  ;;  %v3445_v41 = vmul.f32 %v8574_v54, %v3268_v43  ;;  %5744 = vrsqrt.f32 %v8580_v29  ;;  %v8616_v50 = vsub.f32 %v11237_v51, %v3039_v23  ;;  %vm3451_vm13 = vweird.f32 %v8574_v54 }
 0x1d6   : > { %v3455_v9 = vmul.f32 %v8577_v49, %v8571_v12  ;;  %vm3461_vm15 = vweird.f32 %v8577_v49  ;;  %vm8625_vm1 = vmor %vm3450_vm14, %vm3451_vm13  ;;  %vm3290_vm9 = vweird.f32 %v8580_v29 }
 0x1d7   : > { %v3446_v55 = vmul.f32 %v8574_v54, %v3445_v41  ;;  %v3103_v37 = vmul.f32 %v8616_v50, %v8616_v50  ;;  %vm3462_vm5 = vmor %vm3460_vm2, %vm3461_vm15 }
 0x1d8   : > { %v3456_v56 = vmul.f32 %v8577_v49, %v3455_v9 }
 0x1d9   : > { %v3447_v17 = vmul.f32 0.5, %v3446_v55 }
 0x1da   : > { %v3129_v45 = vpop.xlane.xlu2 %3128  ;;  %v3457_v3 = vmul.f32 0.5, %v3456_v56  ;;  %v11241_v56 = vld [vmem:[#allocation19_spill] sm:$0xff] }
 0x1db   : > { %v3221_v59 = vmul.f32 %v3129_v45, %v7759_v27  ;;  %v8591_v11 = vpop.eup %5744  ;;  %v3448_v25 = vsub.f32 1.5, %v3447_v17 }
 0x1dc   : > { %v3285_v40 = vmul.f32 %v8591_v11, %v8580_v29  ;;  %v3458_v26 = vsub.f32 1.5, %v3457_v3  ;;  %v11242_v3 = vld [vmem:[#allocation10_spill] sm:$0xff]  ;;  %vm3291_vm7 = vweird.f32 %v8591_v11 }
 0x1dd   : > { %v8587_v38 = vadd.f32 1e-05, %v3221_v59  ;;  %v3449_v42 = vmul.f32 %v8574_v54, %v3448_v25  ;;  %vm3292_vm10 = vmor %vm3290_vm9, %vm3291_vm7 }
 0x1de   : > { %v3286_v35 = vmul.f32 %v8591_v11, %v3285_v40  ;;  %v3459_v58 = vmul.f32 %v8577_v49, %v3458_v26 }
 0x1df   : > { %5746 = vrsqrt.f32 %v8587_v38  ;;  %v3453_v41 = vsel %vm8625_vm1, %v8574_v54, %v3449_v42  ;;  %vm3300_vm3 = vweird.f32 %v8587_v38  ;;  %v11245_v42 = vld [vmem:[#allocation13_spill] sm:$0xff] }
 0x1e0   : > { %v3287_v31 = vmul.f32 0.5, %v3286_v35  ;;  %v3463_v59 = vsel %vm3462_vm5, %v8577_v49, %v3459_v58  ;;  %v3620_v17 = vmul.f32 %v3453_v41, %v11241_v56 }
 0x1e2   : > { %v3180_v46 = vpop.xlane.xlu2 %3179  ;;  %v3288_v45 = vsub.f32 1.5, %v3287_v31 }
 0x1e3   : > { %v3238_v61 = vmul.f32 %v3180_v46, %v7759_v27  ;;  %v3157_v46 = vsel %vm2924_vm8, %v3103_v37, 0.0 }
 0x1e4   : > { %v3005_v57 = vpop.xlane.xlu0 %3004 }
 0x1e5   : > { %v3054_v60 = vmul.f32 %v7759_v27, %v3005_v57  ;;  %v8597_v63 = vpop.eup %5746  ;;  %v8603_v1 = vadd.f32 1e-05, %v3238_v61  ;;  %v3621_v57 = vmul.f32 %v3463_v59, %v11242_v3 }
 0x1e6   : > { %v3295_v62 = vmul.f32 %v8597_v63, %v8587_v38  ;;  %vm3301_vm4 = vweird.f32 %v8597_v63 }
 0x1e7   : > { %v8601_v5 = vsub.f32 %v11236_v28, %v3054_v60  ;;  %5748 = vrsqrt.f32 %v8603_v1  ;;  %v3644_v25 = vpack.c.bf16 %v3621_v57, %v3620_v17  ;;  %vm8662_vm6 = vmor %vm3300_vm3, %vm3301_vm4  ;;  %v3289_v28 = vmul.f32 %v8591_v11, %v3288_v45  ;;  %v11250_v17 = vld [vmem:[#allocation33_spill] sm:$0xff] }
 0x1e8   : > { %v3296_v14 = vmul.f32 %v8597_v63, %v3295_v62  ;;  %vm3470_vm12 = vweird.f32 %v8603_v1 }
 0x1e9   : > { %v3118_v30 = vmul.f32 %v8601_v5, %v8601_v5  ;;  %5595 = vmatmul.msk.bf16.vlgmr.msra.gmra.mxu2 %vm2924_vm8, %v3644_v25  ;;  %v3293_v51 = vsel %vm3292_vm10, %v8591_v11, %v3289_v28  ;;  %v11249_v11 = vld [vmem:[#allocation24_spill] sm:$0xff] }
 0x1ea   : > { %v3297_v33 = vmul.f32 0.5, %v3296_v14 }
 0x1eb   : > { %v3202_v2 = vsel %vm2924_vm8, %v3118_v30, 0.0 }
 0x1ec   : > { %3203 = vadd.xlane.f32.xlu1 %v3202_v2  ;;  %v3183_v7 = vpop.xlane.xlu0 %3182  ;;  %v2957_v20 = vpop.xlane.xlu1 %2956  ;;  %v3298_v0 = vsub.f32 1.5, %v3297_v33 }
 0x1ed   : > { %v3239_v52 = vmul.f32 %v3183_v7, %v7759_v27  ;;  %v3038_v32 = vmul.f32 %v7759_v27, %v2957_v20  ;;  %v8630_v43 = vpop.eup %5748 }
 0x1ee   : > { %v3465_v12 = vmul.f32 %v8630_v43, %v8603_v1  ;;  %v3299_v54 = vmul.f32 %v8597_v63, %v3298_v0  ;;  %vm3471_vm11 = vweird.f32 %v8630_v43 }
 0x1ef   : > { %v8632_v16 = vadd.f32 1e-05, %v3239_v52  ;;  %v8635_v8 = vsub.f32 %v11240_v53, %v3038_v32  ;;  %vm8683_vm13 = vmor %vm3470_vm12, %vm3471_vm11 }
 0x1f0   : > { %v3466_v55 = vmul.f32 %v8630_v43, %v3465_v12  ;;  %v3303_v35 = vsel %vm8662_vm6, %v8597_v63, %v3299_v54  ;;  %v11246_v63 = vld [vmem:[#allocation31_spill] sm:$0xff] }
 0x1f1   : > { %5750 = vrsqrt.f32 %v8632_v16  ;;  %v3102_v9 = vmul.f32 %v8635_v8, %v8635_v8  ;;  %v3605_v2 = vmul.f32 %v3303_v35, %v11245_v42  ;;  %v3604_v58 = vmul.f32 %v3293_v51, %v11246_v63 }
 0x1f2   : > { %v3467_v61 = vmul.f32 0.5, %v3466_v55  ;;  %vm3480_vm15 = vweird.f32 %v8632_v16 }
 0x1f3   : > { %v3154_v60 = vsel %vm2924_vm8, %v3102_v9, 0.0  ;;  %v3636_v32 = vpack.c.bf16 %v3605_v2, %v3604_v58 }
 0x1f4   : > { %3158 = vadd.xlane.f32.xlu1 %v3157_v46  ;;  %v3132_v40 = vpop.xlane.xlu0 %3131  ;;  %v3135_v23 = vpop.xlane.xlu1 %3134  ;;  %3155 = vadd.xlane.f32.xlu0 %v3154_v60  ;;  %v3468_v19 = vsub.f32 1.5, %v3467_v61 }
 0x1f5   : > { %v3222_v62 = vmul.f32 %v3132_v40, %v7759_v27  ;;  %v3223_v26 = vmul.f32 %v3135_v23, %v7759_v27  ;;  %5587 = vmatmul.msk.bf16.vlgmr.msra.gmra.mxu0 %vm2924_vm8, %v3636_v32  ;;  %v11251_v40 = vld [vmem:[#allocation15_spill] sm:$0xff] }
 0x1f6   : > { %v3469_v33 = vmul.f32 %v8630_v43, %v3468_v19 }
 0x1f7   : > { %v5751_v38 = vpop.eup %5750  ;;  %v3254_v30 = vadd.f32 1e-05, %v3222_v62  ;;  %v3255_v4 = vadd.f32 1e-05, %v3223_v26 }
 0x1f8   : > { %v3475_v14 = vmul.f32 %v5751_v38, %v8632_v16  ;;  %vm3481_vm14 = vweird.f32 %v5751_v38  ;;  %v3473_v1 = vsel %vm8683_vm13, %v8630_v43, %v3469_v33  ;;  %v11254_v33 = vld [vmem:[#allocation11_spill] sm:$0xff] }
 0x1f9   : > { %5752 = vrsqrt.f32 %v3254_v30  ;;  %vm3482_vm1 = vmor %vm3480_vm15, %vm3481_vm14  ;;  %v3622_v3 = vmul.f32 %v3473_v1, %v11250_v17  ;;  %vm3310_vm4 = vweird.f32 %v3254_v30  ;;  %vm3320_vm6 = vweird.f32 %v3255_v4  ;;  %v11256_v1 = vld [vmem:[#allocation34_spill] sm:$0xff] }
 0x1fa   : > { %v3476_v7 = vmul.f32 %v5751_v38, %v3475_v14  ;;  %5754 = vrsqrt.f32 %v3255_v4 }
 0x1fb   : > { %v3011_v20 = vpop.xlane.xlu2 %3010 }
 0x1fc   : > { %v3056_v29 = vmul.f32 %v7759_v27, %v3011_v20  ;;  %v3477_v31 = vmul.f32 0.5, %v3476_v7  ;;  %v3186_v52 = vpop.xlane.xlu1 %3185 }
 0x1fd   : > { %v3240_v53 = vmul.f32 %v3186_v52, %v7759_v27 }
 0x1fe   : > { %v8688_v0 = vsub.f32 %v11249_v11, %v3056_v29  ;;  %v3478_v37 = vsub.f32 1.5, %v3477_v31 }
 0x1ff   : > { %v5753_v41 = vpop.eup %5752  ;;  %v8697_v45 = vadd.f32 1e-05, %v3240_v53 }
 0x200   : > { %v3120_v12 = vmul.f32 %v8688_v0, %v8688_v0  ;;  %v5755_v9 = vpop.eup %5754  ;;  %v3479_v59 = vmul.f32 %v5751_v38, %v3478_v37  ;;  %v3305_v54 = vmul.f32 %v5753_v41, %v3254_v30  ;;  %vm3311_vm2 = vweird.f32 %v5753_v41 }
 0x201   : > { %v3315_v55 = vmul.f32 %v5755_v9, %v3255_v4  ;;  %5756 = vrsqrt.f32 %v8697_v45  ;;  %vm3321_vm3 = vweird.f32 %v5755_v9  ;;  %vm8708_vm5 = vmor %vm3310_vm4, %vm3311_vm2  ;;  %v11255_v4 = vld [vmem:[#allocation12_spill] sm:$0xff]  ;;  %vm3490_vm10 = vweird.f32 %v8697_v45 }
 0x202   : > { %v3208_v56 = vsel %vm2924_vm8, %v3120_v12, 0.0  ;;  %v3306_v43 = vmul.f32 %v5753_v41, %v3305_v54  ;;  %v3483_v46 = vsel %vm3482_vm1, %v5751_v38, %v3479_v59  ;;  %vm3322_vm7 = vmor %vm3320_vm6, %vm3321_vm3  ;;  %v11257_v59 = vld [vmem:[#allocation16_spill] sm:$0xff] }
 0x203   : > { %3209 = vadd.xlane.f32.xlu2 %v3208_v56  ;;  %v3189_v57 = vpop.xlane.xlu2 %3188  ;;  %v3316_v60 = vmul.f32 %v5755_v9, %v3315_v55  ;;  %v3623_v23 = vmul.f32 %v3483_v46, %v11251_v40 }
 0x204   : > { %v3241_v61 = vmul.f32 %v3189_v57, %v7759_v27  ;;  %v3307_v25 = vmul.f32 0.5, %v3306_v43 }
 0x205   : > { %v3317_v16 = vmul.f32 0.5, %v3316_v60  ;;  %v3645_v28 = vpack.c.bf16 %v3623_v23, %v3622_v3 }
 0x206   : > { %v3273_v49 = vadd.f32 1e-05, %v3241_v61  ;;  %v3308_v62 = vsub.f32 1.5, %v3307_v25 }
 0x207   : > { %v5757_v26 = vpop.eup %5756  ;;  %v3318_v19 = vsub.f32 1.5, %v3317_v16  ;;  %5596 = vmatmul.msk.bf16.gmra.mxu2 %vm2924_vm8, %v3645_v28 }
 0x208   : > { %5758 = vrsqrt.f32 %v3273_v49  ;;  %v3309_v14 = vmul.f32 %v5753_v41, %v3308_v62  ;;  %v3485_v51 = vmul.f32 %v5757_v26, %v8697_v45  ;;  %vm3491_vm9 = vweird.f32 %v5757_v26 }
 0x209   : > { %v3319_v2 = vmul.f32 %v5755_v9, %v3318_v19  ;;  %vm3500_vm11 = vweird.f32 %v3273_v49  ;;  %vm3492_vm12 = vmor %vm3490_vm10, %vm3491_vm9 }
 0x20a   : > { %v3014_v35 = vpop.xlane.xlu0 %3013  ;;  %v3486_v20 = vmul.f32 %v5757_v26, %v3485_v51  ;;  %v3313_v30 = vsel %vm8708_vm5, %v5753_v41, %v3309_v14 }
 0x20b   : > { %v3057_v38 = vmul.f32 %v7759_v27, %v3014_v35  ;;  %v3138_v63 = vpop.xlane.xlu2 %3137  ;;  %v3323_v52 = vsel %vm3322_vm7, %v5755_v9, %v3319_v2  ;;  %v3606_v54 = vmul.f32 %v3313_v30, %v11257_v59  ;;  %v11258_v35 = vld [vmem:[#allocation26_spill] sm:$0xff] }
 0x20c   : > { %v2966_v58 = vpop.xlane.xlu1 %2965  ;;  %v3224_v29 = vmul.f32 %v3138_v63, %v7759_v27  ;;  %v3487_v32 = vmul.f32 0.5, %v3486_v20  ;;  %v3607_v11 = vmul.f32 %v3323_v52, %v11255_v4 }
 0x20d   : > { %v8713_v7 = vsub.f32 %v11254_v33, %v3057_v38  ;;  %v3041_v31 = vmul.f32 %v7759_v27, %v2966_v58  ;;  %v11259_v33 = vld [vmem:[#allocation37_spill] sm:$0xff] }
 0x20e   : > { %v5759_v53 = vpop.eup %5758  ;;  %v3256_v37 = vadd.f32 1e-05, %v3224_v29  ;;  %v3488_v41 = vsub.f32 1.5, %v3487_v32  ;;  %v3637_v3 = vpack.c.bf16 %v3607_v11, %v3606_v54 }
 0x20f   : > { %v3121_v47 = vmul.f32 %v8713_v7, %v8713_v7  ;;  %v8723_v12 = vsub.f32 %v11256_v1, %v3041_v31  ;;  %v3495_v55 = vmul.f32 %v5759_v53, %v3273_v49  ;;  %vm3501_vm13 = vweird.f32 %v5759_v53 }
 0x210   : > { %5760 = vrsqrt.f32 %v3256_v37  ;;  %v3489_v57 = vmul.f32 %v5757_v26, %v3488_v41  ;;  %5588 = vmatmul.msk.bf16.gmra.mxu0 %vm2924_vm8, %v3637_v3  ;;  %vm3502_vm14 = vmor %vm3500_vm11, %vm3501_vm13  ;;  %vm3330_vm15 = vweird.f32 %v3256_v37 }
 0x211   : > { %v3211_v56 = vsel %vm2924_vm8, %v3121_v47, 0.0  ;;  %v3105_v17 = vmul.f32 %v8723_v12, %v8723_v12  ;;  %v3496_v43 = vmul.f32 %v5759_v53, %v3495_v55 }
 0x212   : > { %3212 = vadd.xlane.f32.xlu0 %v3211_v56  ;;  %v3141_v9 = vpop.xlane.xlu0 %3140  ;;  %v3493_v25 = vsel %vm3492_vm12, %v5757_v26, %v3489_v57 }
 0x213   : > { %v3225_v46 = vmul.f32 %v3141_v9, %v7759_v27  ;;  %v3163_v60 = vsel %vm2924_vm8, %v3105_v17, 0.0  ;;  %v3497_v61 = vmul.f32 0.5, %v3496_v43  ;;  %v3624_v14 = vmul.f32 %v3493_v25, %v11258_v35  ;;  %v11262_v25 = vld [vmem:[#allocation27_spill] sm:$0xff] }
 0x214   : > { %3164 = vadd.xlane.f32.xlu2 %v3163_v60 }
 0x215   : > { %v3257_v40 = vadd.f32 1e-05, %v3225_v46  ;;  %v3498_v23 = vsub.f32 1.5, %v3497_v61 }
 0x216   : > { %v5761_v16 = vpop.eup %5760 }
 0x217   : > { %5762 = vrsqrt.f32 %v3257_v40  ;;  %v3499_v28 = vmul.f32 %v5759_v53, %v3498_v23  ;;  %v3325_v62 = vmul.f32 %v5761_v16, %v3256_v37  ;;  %vm3331_vm1 = vweird.f32 %v5761_v16 }
 0x218   : > { %vm8742_vm2 = vmor %vm3330_vm15, %vm3331_vm1  ;;  %vm3340_vm4 = vweird.f32 %v3257_v40 }
 0x219   : > { %v3326_v38 = vmul.f32 %v5761_v16, %v3325_v62  ;;  %v3503_v45 = vsel %vm3502_vm14, %v5759_v53, %v3499_v28 }
 0x21a   : > { %v3192_v19 = vpop.xlane.xlu0 %3191  ;;  %v3020_v51 = vpop.xlane.xlu2 %3019  ;;  %v3625_v49 = vmul.f32 %v3503_v45, %v11259_v33 }
 0x21b   : > { %v3242_v42 = vmul.f32 %v3192_v19, %v7759_v27  ;;  %v3327_v63 = vmul.f32 0.5, %v3326_v38  ;;  %v3059_v61 = vmul.f32 %v7759_v27, %v3020_v51 }
 0x21c   : > { %v3195_v2 = vpop.xlane.xlu1 %3194  ;;  %v3646_v29 = vpack.c.bf16 %v3625_v49, %v3624_v14  ;;  %v11263_v14 = vld [vmem:[#allocation25_spill] sm:$0xff] }
 0x21d   : > { %v5763_v20 = vpop.eup %5762  ;;  %v3274_v58 = vadd.f32 1e-05, %v3242_v42  ;;  %v3243_v26 = vmul.f32 %v3195_v2, %v7759_v27  ;;  %v3328_v31 = vsub.f32 1.5, %v3327_v63  ;;  %v8765_v51 = vsub.f32 %v8344_v48, %v3059_v61 }
 0x21e   : > { %v3335_v30 = vmul.f32 %v5763_v20, %v3257_v40  ;;  %5597 = vmatmul.msk.bf16.gmra.mxu2 %vm2924_vm8, %v3646_v29  ;;  %vm3341_vm3 = vweird.f32 %v5763_v20 }
 0x21f   : > { %5764 = vrsqrt.f32 %v3274_v58  ;;  %v8737_v52 = vadd.f32 1e-05, %v3243_v26  ;;  %v3329_v47 = vmul.f32 %v5761_v16, %v3328_v31  ;;  %vm3342_vm5 = vmor %vm3340_vm4, %vm3341_vm3  ;;  %vm3510_vm9 = vweird.f32 %v3274_v58 }
 0x220   : > { %v3336_v32 = vmul.f32 %v5763_v20, %v3335_v30 }
 0x221   : > { %5766 = vrsqrt.f32 %v8737_v52  ;;  %v3333_v37 = vsel %vm8742_vm2, %v5761_v16, %v3329_v47  ;;  %vm3520_vm11 = vweird.f32 %v8737_v52 }
 0x222   : > { %v3337_v4 = vmul.f32 0.5, %v3336_v32  ;;  %v3147_v11 = vpop.xlane.xlu2 %3146  ;;  %v3608_v28 = vmul.f32 %v3333_v37, %v11262_v25 }
 0x223   : > { %v3227_v1 = vmul.f32 %v3147_v11, %v7759_v27 }
 0x224   : > { %v3338_v53 = vsub.f32 1.5, %v3337_v4  ;;  %v3144_v59 = vpop.xlane.xlu1 %3143 }
 0x225   : > { %v5765_v54 = vpop.eup %5764  ;;  %v3226_v41 = vmul.f32 %v3144_v59, %v7759_v27  ;;  %v8747_v17 = vadd.f32 1e-05, %v3227_v1  ;;  %v3123_v59 = vmul.f32 %v8765_v51, %v8765_v51 }
 0x226   : > { %v3339_v56 = vmul.f32 %v5763_v20, %v3338_v53  ;;  %v3505_v9 = vmul.f32 %v5765_v54, %v3274_v58  ;;  %vm3511_vm6 = vweird.f32 %v5765_v54 }
 0x227   : > { %v5767_v3 = vpop.eup %5766  ;;  %v2963_v43 = vpop.xlane.xlu0 %2962  ;;  %v8751_v57 = vadd.f32 1e-05, %v3226_v41  ;;  %5768 = vrsqrt.f32 %v8747_v17  ;;  %vm8774_vm10 = vmor %vm3510_vm9, %vm3511_vm6  ;;  %vm3360_vm13 = vweird.f32 %v8747_v17 }
 0x228   : > { %v3506_v46 = vmul.f32 %v5765_v54, %v3505_v9  ;;  %v3515_v60 = vmul.f32 %v5767_v3, %v8737_v52  ;;  %v3040_v23 = vmul.f32 %v7759_v27, %v2963_v43  ;;  %v3343_v19 = vsel %vm3342_vm5, %v5763_v20, %v3339_v56  ;;  %v11266_v9 = vld [vmem:[#allocation17_spill] sm:$0xff] }
 0x229   : > { %5770 = vrsqrt.f32 %v8751_v57  ;;  %v3609_v38 = vmul.f32 %v3343_v19, %v11263_v14  ;;  %vm3521_vm7 = vweird.f32 %v5767_v3  ;;  %vm3350_vm2 = vweird.f32 %v8751_v57 }
 0x22a   : > { %v3507_v16 = vmul.f32 0.5, %v3506_v46  ;;  %v3516_v62 = vmul.f32 %v5767_v3, %v3515_v60  ;;  %v8760_v35 = vsub.f32 %v8434_v36, %v3040_v23  ;;  %v3198_v40 = vpop.xlane.xlu2 %3197  ;;  %vm3522_vm12 = vmor %vm3520_vm11, %vm3521_vm7 }
 0x22b   : > { %v3244_v2 = vmul.f32 %v3198_v40, %v7759_v27  ;;  %v3638_v49 = vpack.c.bf16 %v3609_v38, %v3608_v28 }
 0x22c   : > { %v3508_v42 = vsub.f32 1.5, %v3507_v16  ;;  %v3517_v45 = vmul.f32 0.5, %v3516_v62  ;;  %v3104_v33 = vmul.f32 %v8760_v35, %v8760_v35 }
 0x22d   : > { %v5769_v63 = vpop.eup %5768  ;;  %v8769_v36 = vadd.f32 1e-05, %v3244_v2  ;;  %5589 = vmatmul.msk.bf16.gmra.mxu0 %vm2924_vm8, %v3638_v49 }
 0x22e   : > { %v3509_v20 = vmul.f32 %v5765_v54, %v3508_v42  ;;  %v3518_v26 = vsub.f32 1.5, %v3517_v45  ;;  %v3355_v29 = vmul.f32 %v5769_v63, %v8747_v17  ;;  %v3160_v31 = vsel %vm2924_vm8, %v3104_v33, 0.0 }
 0x22f   : > { %v5771_v30 = vpop.eup %5770  ;;  %v3201_v32 = vpop.xlane.xlu0 %3200  ;;  %5772 = vrsqrt.f32 %v8769_v36  ;;  %3161 = vadd.xlane.f32.xlu1 %v3160_v31  ;;  %vm3361_vm14 = vweird.f32 %v5769_v63  ;;  %vm3530_vm4 = vweird.f32 %v8769_v36 }
 0x230   : > { %v3519_v47 = vmul.f32 %v5767_v3, %v3518_v26  ;;  %v3345_v4 = vmul.f32 %v5771_v30, %v8751_v57  ;;  %v3356_v58 = vmul.f32 %v5769_v63, %v3355_v29  ;;  %v3245_v11 = vmul.f32 %v3201_v32, %v7759_v27  ;;  %vm8799_vm1 = vmor %vm3360_vm13, %vm3361_vm14 }
 0x231   : > { %v3513_v53 = vsel %vm8774_vm10, %v5765_v54, %v3509_v20  ;;  %vm3351_vm15 = vweird.f32 %v5771_v30 }
 0x232   : > { %v3346_v1 = vmul.f32 %v5771_v30, %v3345_v4  ;;  %v3523_v55 = vsel %vm3522_vm12, %v5767_v3, %v3519_v47  ;;  %v3357_v41 = vmul.f32 0.5, %v3356_v58  ;;  %v3277_v52 = vadd.f32 1e-05, %v3245_v11  ;;  %v2969_v56 = vpop.xlane.xlu2 %2968  ;;  %vm3352_vm3 = vmor %vm3350_vm2, %vm3351_vm15 }
 0x233   : > { %v3626_v37 = vmul.f32 %v3513_v53, %v11266_v9  ;;  %v3627_v43 = vmul.f32 %v3523_v55, %v8306_v10  ;;  %v3042_v60 = vmul.f32 %v7759_v27, %v2969_v56  ;;  %v3217_v10 = vsel %vm2924_vm8, %v3123_v59, 0.0 }
 0x234   : > { %v3347_v46 = vmul.f32 0.5, %v3346_v1  ;;  %v3358_v61 = vsub.f32 1.5, %v3357_v41  ;;  %5774 = vrsqrt.f32 %v3277_v52  ;;  %vm3540_vm9 = vweird.f32 %v3277_v52 }
 0x235   : > { %v3647_v54 = vpack.c.bf16 %v3627_v43, %v3626_v37  ;;  %v5773_v23 = vpop.eup %5772  ;;  %v8792_v3 = vsub.f32 %v8490_v39, %v3042_v60 }
 0x236   : > { %v3348_v25 = vsub.f32 1.5, %v3347_v46  ;;  %v3359_v28 = vmul.f32 %v5769_v63, %v3358_v61  ;;  %v3525_v16 = vmul.f32 %v5773_v23, %v8769_v36  ;;  %vm3531_vm5 = vweird.f32 %v5773_v23 }
 0x237   : > { %v3150_v62 = vpop.xlane.xlu0 %3149  ;;  %5598 = vmatmul.msk.bf16.gmra.mxu2 %vm2924_vm8, %v3647_v54  ;;  %3218 = vadd.xlane.f32.xlu1 %v3217_v10  ;;  %v3106_v14 = vmul.f32 %v8792_v3, %v8792_v3  ;;  %vm3532_vm6 = vmor %vm3530_vm4, %vm3531_vm5 }
 0x238   : > { %v3349_v40 = vmul.f32 %v5771_v30, %v3348_v25  ;;  %v3228_v39 = vmul.f32 %v3150_v62, %v7759_v27  ;;  %v3526_v38 = vmul.f32 %v5773_v23, %v3525_v16  ;;  %v3363_v42 = vsel %vm8799_vm1, %v5769_v63, %v3359_v28 }
 0x239   : > { %v3166_v17 = vsel %vm2924_vm8, %v3106_v14, 0.0  ;;  %v3611_v20 = vmul.f32 %v3363_v42, %v8228_v34 }
 0x23a   : > { %v8809_v45 = vadd.f32 1e-05, %v3228_v39  ;;  %v3353_v2 = vsel %vm3352_vm3, %v5771_v30, %v3349_v40  ;;  %v5775_v33 = vpop.eup %5774  ;;  %v3527_v49 = vmul.f32 0.5, %v3526_v38  ;;  %3167 = vadd.xlane.f32.xlu2 %v3166_v17 }
 0x23b   : > { %v3610_v57 = vmul.f32 %v3353_v2, %v8377_v21  ;;  %v3535_v26 = vmul.f32 %v5775_v33, %v3277_v52  ;;  %vm3541_vm7 = vweird.f32 %v5775_v33 }
 0x23c   : > { %5776 = vrsqrt.f32 %v8809_v45  ;;  %v3528_v29 = vsub.f32 1.5, %v3527_v49  ;;  %vm3542_vm10 = vmor %vm3540_vm9, %vm3541_vm7  ;;  %v3207_v54 = vpop.xlane.xlu2 %3206  ;;  %vm3370_vm14 = vweird.f32 %v8809_v45 }
 0x23d   : > { %v3639_v32 = vpack.c.bf16 %v3611_v20, %v3610_v57  ;;  %v3536_v63 = vmul.f32 %v5775_v33, %v3535_v26 }
 0x23e   : > { %v3529_v30 = vmul.f32 %v5773_v23, %v3528_v29 }
 0x23f   : > { %v3017_v31 = vpop.xlane.xlu1 %3016  ;;  %5590 = vmatmul.msk.bf16.gmra.mxu0 %vm2924_vm8, %v3639_v32  ;;  %v3537_v47 = vmul.f32 0.5, %v3536_v63 }
 0x240   : > { %v3058_v48 = vmul.f32 %v7759_v27, %v3017_v31  ;;  %v3533_v11 = vsel %vm3532_vm6, %v5773_v23, %v3529_v30 }
 0x241   : > { %v3538_v4 = vsub.f32 1.5, %v3537_v47 }
 0x242   : > { %v8819_v21 = vsub.f32 %v8547_v22, %v3058_v48  ;;  %v5777_v34 = vpop.eup %5776  ;;  %v3628_v22 = vmul.f32 %v3533_v11, %v8321_v13 }
 0x243   : > { %v3539_v36 = vmul.f32 %v5775_v33, %v3538_v4  ;;  %v3365_v1 = vmul.f32 %v5777_v34, %v8809_v45  ;;  %vm3371_vm11 = vweird.f32 %v5777_v34 }
 0x244   : > { %v3122_v58 = vmul.f32 %v8819_v21, %v8819_v21  ;;  %vm3372_vm15 = vmor %vm3370_vm14, %vm3371_vm11 }
 0x245   : > { %v3543_v56 = vsel %vm3542_vm10, %v5775_v33, %v3539_v36  ;;  %v3366_v46 = vmul.f32 %v5777_v34, %v3365_v1 }
 0x246   : > { %v3214_v53 = vsel %vm2924_vm8, %v3122_v58, 0.0  ;;  %v3629_v37 = vmul.f32 %v3543_v56, %v8316_v15  ;;  %v3247_v15 = vmul.f32 %v3207_v54, %v7759_v27 }
 0x247   : > { %v3153_v59 = vpop.xlane.xlu1 %3152  ;;  %3215 = vadd.xlane.f32.xlu0 %v3214_v53  ;;  %v2972_v41 = vpop.xlane.xlu0 %2971  ;;  %v3367_v13 = vmul.f32 0.5, %v3366_v46 }
 0x248   : > { %v3229_v55 = vmul.f32 %v3153_v59, %v7759_v27  ;;  %v3043_v9 = vmul.f32 %v7759_v27, %v2972_v41  ;;  %v3648_v60 = vpack.c.bf16 %v3629_v37, %v3628_v22 }
 0x249   : > { %v3368_v28 = vsub.f32 1.5, %v3367_v13 }
 0x24a   : > { %v3261_v43 = vadd.f32 1e-05, %v3229_v55  ;;  %v8830_v52 = vsub.f32 %v8566_v24, %v3043_v9  ;;  %5599 = vmatmul.msk.bf16.gmra.mxu2 %vm2924_vm8, %v3648_v60  ;;  %v3279_v24 = vadd.f32 1e-05, %v3247_v15  ;;  %v8849_v60 = vld [vmem:[%s10794_s6] ss:$0 sm:$0xff] }
 0x24b   : > { %v3369_v62 = vmul.f32 %v5777_v34, %v3368_v28 }
 0x24c   : > { %5778 = vrsqrt.f32 %v3261_v43  ;;  %v3107_v61 = vmul.f32 %v8830_v52, %v8830_v52  ;;  %vm3380_vm12 = vweird.f32 %v3261_v43  ;;  %vm3560_vm2 = vweird.f32 %v3279_v24 }
 0x24d   : > { %5780 = vrsqrt.f32 %v3279_v24  ;;  %v3373_v14 = vsel %vm3372_vm15, %v5777_v34, %v3369_v62 }
 0x24e   : > { %v3169_v23 = vsel %vm2924_vm8, %v3107_v61, 0.0  ;;  %v3612_v42 = vmul.f32 %v3373_v14, %v8450_v18 }
 0x24f   : > { %3170 = vadd.xlane.f32.xlu0 %v3169_v23 }
 0x252   : > { %v5779_v25 = vpop.eup %5778 }
 0x253   : > { %v3375_v16 = vmul.f32 %v5779_v25, %v3261_v43  ;;  %vm3381_vm13 = vweird.f32 %v5779_v25  ;;  %v5781_v33 = vpop.eup %5780 }
 0x254   : > { %vm3382_vm1 = vmor %vm3380_vm12, %vm3381_vm13  ;;  %v3555_v49 = vmul.f32 %v5781_v33, %v3279_v24  ;;  %vm3561_vm3 = vweird.f32 %v5781_v33 }
 0x255   : > { %v3376_v10 = vmul.f32 %v5779_v25, %v3375_v16  ;;  %vm3562_vm4 = vmor %vm3560_vm2, %vm3561_vm3 }
 0x256   : > { %v3556_v26 = vmul.f32 %v5781_v33, %v3555_v49 }
 0x257   : > { %v3377_v19 = vmul.f32 0.5, %v3376_v10 }
 0x258   : > { %v3557_v29 = vmul.f32 0.5, %v3556_v26 }
 0x259   : > { %v3378_v40 = vsub.f32 1.5, %v3377_v19 }
 0x25a   : > { %v3558_v47 = vsub.f32 1.5, %v3557_v29 }
 0x25b   : > { %v3379_v39 = vmul.f32 %v5779_v25, %v3378_v40 }
 0x25c   : > { %v3559_v58 = vmul.f32 %v5781_v33, %v3558_v47 }
 0x25d   : > { %v3383_v38 = vsel %vm3382_vm1, %v5779_v25, %v3379_v39 }
 0x25e   : > { %v3613_v17 = vmul.f32 %v3383_v38, %v8550_v44  ;;  %v3563_v55 = vsel %vm3562_vm4, %v5781_v33, %v3559_v58 }
 0x25f   : > { %v3204_v57 = vpop.xlane.xlu1 %3203  ;;  %v3631_v46 = vmul.f32 %v3563_v55, %v8518_v6 }
 0x260   : > { %v3640_v2 = vpack.c.bf16 %v3613_v17, %v3612_v42  ;;  %v3246_v20 = vmul.f32 %v3204_v57, %v7759_v27 }
 0x262   : > { %5591 = vmatmul.msk.bf16.gmra.mxu0 %vm2924_vm8, %v3640_v2  ;;  %v3278_v45 = vadd.f32 1e-05, %v3246_v20 }
 0x264   : > { %5782 = vrsqrt.f32 %v3278_v45  ;;  %vm3550_vm6 = vweird.f32 %v3278_v45 }
 0x267   : > { %v3159_v31 = vpop.xlane.xlu1 %3158  ;;  %v3156_v32 = vpop.xlane.xlu0 %3155 }
 0x268   : > { %v3231_v63 = vmul.f32 %v3159_v31, %v7759_v27  ;;  %v3230_v18 = vmul.f32 %v3156_v32, %v7759_v27 }
 0x26a   : > { %v5783_v48 = vpop.eup %5782  ;;  %v3263_v44 = vadd.f32 1e-05, %v3231_v63  ;;  %v3262_v30 = vadd.f32 1e-05, %v3230_v18 }
 0x26b   : > { %v3545_v34 = vmul.f32 %v5783_v48, %v3278_v45  ;;  %vm3551_vm5 = vweird.f32 %v5783_v48 }
 0x26c   : > { %5784 = vrsqrt.f32 %v3263_v44  ;;  %vm3552_vm7 = vmor %vm3550_vm6, %vm3551_vm5  ;;  %v3758_v25 = vpop.f32.mrf.mxu2  ;;  %vm3400_vm11 = vweird.f32 %v3263_v44  ;;  %vm3390_vm13 = vweird.f32 %v3262_v30 }
 0x26d   : > { %v3546_v4 = vmul.f32 %v5783_v48, %v3545_v34  ;;  %5786 = vrsqrt.f32 %v3262_v30  ;;  %v8853_v28 = vadd.f32 %v8849_v60, %v3758_v25 }
 0x26f   : > { %v3547_v11 = vmul.f32 0.5, %v3546_v4  ;;  %v8856_v10 = vmul.f32 0.70710677, %v8853_v28 }
 0x271   : > { %v3548_v36 = vsub.f32 1.5, %v3547_v11  ;;  %v4502_v40 = vmul.f32 %v8856_v10, %v8856_v10 }
 0x272   : > { %v5785_v53 = vpop.eup %5784  ;;  %v3718_v6 = vpop.f32.mrf.mxu0 }
 0x273   : > { %v5787_v1 = vpop.eup %5786  ;;  %v3549_v59 = vmul.f32 %v5783_v48, %v3548_v36  ;;  %v3395_v22 = vmul.f32 %v5785_v53, %v3263_v44  ;;  %vm3401_vm9 = vweird.f32 %v5785_v53  ;;  %v8859_v24 = vadd.f32 %v8849_v60, %v3718_v6 }
 0x274   : > { %v3385_v41 = vmul.f32 %v5787_v1, %v3262_v30  ;;  %vm3391_vm10 = vweird.f32 %v5787_v1  ;;  %vm3402_vm12 = vmor %vm3400_vm11, %vm3401_vm9  ;;  %v8869_v2 = vmin.f32 %v4502_v40, 16.0  ;;  %v3760_v26 = vpop.f32.mrf.mxu2 }
 0x275   : > { %v3396_v56 = vmul.f32 %v5785_v53, %v3395_v22  ;;  %v3553_v9 = vsel %vm3552_vm7, %v5783_v48, %v3549_v59  ;;  %vm3392_vm14 = vmor %vm3390_vm13, %vm3391_vm10  ;;  %v8864_v39 = vmul.f32 0.70710677, %v8859_v24  ;;  %v8885_v18 = vadd.f32 %v8849_v60, %v3760_v26 }
 0x276   : > { %v3386_v37 = vmul.f32 %v5787_v1, %v3385_v41  ;;  %v3630_v43 = vmul.f32 %v3553_v9, %v8601_v5  ;;  %v3210_v62 = vpop.xlane.xlu2 %3209  ;;  %v4515_v20 = vmul.f32 3.8918573e-05, %v8869_v2 }
 0x277   : > { %v3397_v61 = vmul.f32 0.5, %v3396_v56  ;;  %v3248_v17 = vmul.f32 %v3210_v62, %v7759_v27  ;;  %v3862_v33 = vmul.f32 %v8864_v39, %v8864_v39  ;;  %v8892_v4 = vmul.f32 0.70710677, %v8885_v18 }
 0x278   : > { %v3387_v13 = vmul.f32 0.5, %v3386_v37  ;;  %v3649_v54 = vpack.c.bf16 %v3631_v46, %v3630_v43  ;;  %v4516_v31 = vadd.f32 0.001143296, %v4515_v20 }
 0x279   : > { %v3398_v23 = vsub.f32 1.5, %v3397_v61  ;;  %v8874_v45 = vmin.f32 %v3862_v33, 16.0  ;;  %v4542_v59 = vmul.f32 %v8892_v4, %v8892_v4 }
 0x27a   : > { %v3388_v15 = vsub.f32 1.5, %v3387_v13  ;;  %5600 = vmatmul.msk.bf16.gmra.mxu2 %vm2924_vm8, %v3649_v54  ;;  %v4517_v48 = vmul.f32 %v4516_v31, %v8869_v2  ;;  %v3720_v58 = vpop.f32.mrf.mxu0 }
 0x27b   : > { %v3399_v5 = vmul.f32 %v5785_v53, %v3398_v23  ;;  %v3875_v63 = vmul.f32 3.8918573e-05, %v8874_v45  ;;  %v8900_v55 = vadd.f32 %v8849_v60, %v3720_v58  ;;  %v8905_v9 = vmin.f32 %v4542_v59, 16.0 }
 0x27c   : > { %v3389_v16 = vmul.f32 %v5787_v1, %v3388_v15  ;;  %v4518_v47 = vadd.f32 0.014752088, %v4517_v48 }
 0x27d   : > { %v3403_v19 = vsel %vm3402_vm12, %v5785_v53, %v3399_v5  ;;  %v3876_v30 = vadd.f32 0.001143296, %v3875_v63  ;;  %v3864_v53 = vmul.f32 2.1237322e-06, %v8874_v45  ;;  %v4555_v15 = vmul.f32 3.8918573e-05, %v8905_v9 }
 0x27e   : > { %v3393_v14 = vsel %vm3392_vm14, %v5787_v1, %v3389_v16  ;;  %v3615_v42 = vmul.f32 %v3403_v19, %v8616_v50  ;;  %v8879_v50 = vadd.f32 1e-05, %v3248_v17  ;;  %v4519_v11 = vmul.f32 %v4518_v47, %v8869_v2 }
 0x27f   : > { %v3614_v38 = vmul.f32 %v3393_v14, %v8635_v8  ;;  %v4504_v8 = vmul.f32 2.1237322e-06, %v8869_v2  ;;  %v3877_v34 = vmul.f32 %v3876_v30, %v8874_v45  ;;  %v3865_v61 = vadd.f32 0.00028619796, %v3864_v53 }
 0x280   : > { %v4520_v22 = vadd.f32 0.112945676, %v4519_v11  ;;  %v8914_v5 = vmul.f32 0.70710677, %v8900_v55  ;;  %v4544_v62 = vmul.f32 2.1237322e-06, %v8905_v9  ;;  %vm3570_vm15 = vweird.f32 %v8879_v50 }
 0x281   : > { %v3641_v49 = vpack.c.bf16 %v3615_v42, %v3614_v38  ;;  %v4505_v44 = vadd.f32 0.00028619796, %v4504_v8  ;;  %v3878_v1 = vadd.f32 0.014752088, %v3877_v34  ;;  %v3866_v14 = vmul.f32 %v3865_v61, %v8874_v45 }
 0x282   : > { %v4521_v43 = vmul.f32 %v4520_v22, %v8869_v2  ;;  %v4556_v42 = vadd.f32 0.001143296, %v4555_v15 }
 0x283   : > { %5592 = vmatmul.msk.bf16.gmra.mxu0 %vm2924_vm8, %v3641_v49  ;;  %v4506_v36 = vmul.f32 %v4505_v44, %v8869_v2  ;;  %v3879_v56 = vmul.f32 %v3878_v1, %v8874_v45  ;;  %v3867_v63 = vadd.f32 0.0036580483, %v3866_v14 }
 0x284   : > { %v4522_v25 = vadd.f32 0.4994258, %v4521_v43  ;;  %v4557_v8 = vmul.f32 %v4556_v42, %v8905_v9 }
 0x285   : > { %v3213_v57 = vpop.xlane.xlu0 %3212  ;;  %v4507_v46 = vadd.f32 0.0036580483, %v4506_v36  ;;  %v3880_v13 = vadd.f32 0.112945676, %v3879_v56  ;;  %v3868_v53 = vmul.f32 %v3867_v63, %v8874_v45 }
 0x286   : > { %v3249_v29 = vmul.f32 %v3213_v57, %v7759_v27  ;;  %v4523_v19 = vmul.f32 %v4522_v25, %v8869_v2  ;;  %v3902_v57 = vmul.f32 %v8914_v5, %v8914_v5  ;;  %v4558_v47 = vadd.f32 0.014752088, %v4557_v8 }
 0x287   : > { %v3165_v54 = vpop.xlane.xlu2 %3164  ;;  %v3881_v16 = vmul.f32 %v3880_v13, %v8874_v45  ;;  %v4508_v33 = vmul.f32 %v4507_v46, %v8869_v2 }
 0x288   : > { %v8881_v32 = vadd.f32 1e-05, %v3249_v29  ;;  %v3233_v40 = vmul.f32 %v3165_v54, %v7759_v27  ;;  %v8925_v49 = vadd.f32 1.0, %v4523_v19  ;;  %v4545_v29 = vadd.f32 0.00028619796, %v4544_v62 }
 0x289   : > { %v3882_v38 = vadd.f32 0.4994258, %v3881_v16  ;;  %v4509_v30 = vadd.f32 0.05243302, %v4508_v33  ;;  %v8937_v34 = vmin.f32 %v3902_v57, 16.0  ;;  %v4559_v1 = vmul.f32 %v4558_v47, %v8905_v9 }
 0x28a   : > { %5788 = vrsqrt.f32 %v8881_v32  ;;  %v8933_v31 = vadd.f32 1e-05, %v3233_v40  ;;  %v4546_v11 = vmul.f32 %v4545_v29, %v8905_v9  ;;  %v3763_v36 = vpop.f32.mrf.mxu2  ;;  %vm3580_vm3 = vweird.f32 %v8881_v32 }
 0x28b   : > { %5790 = vrsqrt.f32 %v8879_v50  ;;  %v3883_v26 = vmul.f32 %v3882_v38, %v8874_v45  ;;  %v3915_v59 = vmul.f32 3.8918573e-05, %v8937_v34  ;;  %v4510_v43 = vmul.f32 %v4509_v30, %v8869_v2 }
 0x28c   : > { %5792 = vrcp.f32 %v8925_v49  ;;  %v4547_v61 = vadd.f32 0.0036580483, %v4546_v11  ;;  %v4560_v13 = vadd.f32 0.112945676, %v4559_v1  ;;  %v8949_v54 = vadd.f32 %v8849_v60, %v3763_v36 }
 0x28d   : > { %v8935_v48 = vadd.f32 1.0, %v3883_v26  ;;  %v3916_v25 = vadd.f32 0.001143296, %v3915_v59  ;;  %v4511_v19 = vadd.f32 0.18741608, %v4510_v43  ;;  %v9000_v1 = vmul.f32 0.5, %v8853_v28 }
 0x28e   : > { %v3904_v40 = vmul.f32 2.1237322e-06, %v8937_v34  ;;  %v4548_v42 = vmul.f32 %v4547_v61, %v8905_v9  ;;  %v8967_v33 = vmul.f32 0.70710677, %v8949_v54  ;;  %v9004_v43 = vmul.f32 0.5, %v8859_v24 }
 0x28f   : > { %5794 = vrcp.f32 %v8935_v48  ;;  %v3917_v14 = vmul.f32 %v3916_v25, %v8937_v34  ;;  %vm4530_vm7 = vweird.f32 %v8925_v49  ;;  %vm3890_vm12 = vweird.f32 %v8935_v48 }
 0x290   : > { %v8902_v41 = vpop.eup %5788  ;;  %5796 = vrsqrt.f32 %v8933_v31  ;;  %v3905_v30 = vadd.f32 0.00028619796, %v3904_v40  ;;  %v4549_v11 = vadd.f32 0.05243302, %v4548_v42  ;;  %v9093_v29 = vmul.f32 0.5, %v8949_v54 }
 0x291   : > { %v8907_v37 = vpop.eup %5790  ;;  %v3575_v23 = vmul.f32 %v8902_v41, %v8881_v32  ;;  %vm3581_vm2 = vweird.f32 %v8902_v41  ;;  %v3918_v26 = vadd.f32 0.014752088, %v3917_v14 }
 0x292   : > { %v3565_v6 = vmul.f32 %v8907_v37, %v8879_v50  ;;  %v8945_v22 = vpop.eup %5792  ;;  %vm3571_vm1 = vweird.f32 %v8907_v37  ;;  %vm8974_vm4 = vmor %vm3580_vm3, %vm3581_vm2  ;;  %v4550_v25 = vmul.f32 %v4549_v11, %v8905_v9 }
 0x293   : > { %v3576_v17 = vmul.f32 %v8902_v41, %v3575_v23  ;;  %v4526_v23 = vmul.f32 %v8945_v22, %v8925_v49  ;;  %vm8985_vm5 = vmor %vm3570_vm15, %vm3571_vm1  ;;  %v3919_v47 = vmul.f32 %v3918_v26, %v8937_v34  ;;  %vm4531_vm6 = vweird.f32 %v8945_v22 }
 0x294   : > { %v3566_v20 = vmul.f32 %v8907_v37, %v3565_v6  ;;  %v3869_v6 = vadd.f32 0.05243302, %v3868_v53  ;;  %v4582_v53 = vmul.f32 %v8967_v33, %v8967_v33  ;;  %vm9027_vm10 = vmor %vm4530_vm7, %vm4531_vm6 }
 0x295   : > { %v3577_v44 = vmul.f32 0.5, %v3576_v17  ;;  %v8953_v15 = vpop.eup %5794  ;;  %v4561_v17 = vmul.f32 %v4560_v13, %v8905_v9  ;;  %v4527_v57 = vsub.f32 1.0, %v4526_v23  ;;  %v4534_v23 = vand.u32 2147483647, %v8925_v49 }
 0x296   : > { %v3567_v58 = vmul.f32 0.5, %v3566_v20  ;;  %v8958_v16 = vpop.eup %5796  ;;  %v3886_v20 = vmul.f32 %v8953_v15, %v8935_v48  ;;  %v3870_v8 = vmul.f32 %v3869_v6, %v8874_v45  ;;  %v9014_v24 = vmin.f32 %v4582_v53, 16.0 }
 0x297   : > { %v3578_v56 = vsub.f32 1.5, %v3577_v44  ;;  %v3415_v63 = vmul.f32 %v8958_v16, %v8933_v31  ;;  %v4512_v44 = vmul.f32 %v4511_v19, %v8869_v2  ;;  %v4562_v36 = vadd.f32 0.4994258, %v4561_v17 }
 0x298   : > { %v3568_v46 = vsub.f32 1.5, %v3567_v58  ;;  %v4528_v2 = vmul.f32 %v8945_v22, %v4527_v57  ;;  %v3887_v59 = vsub.f32 1.0, %v3886_v20  ;;  %vm9023_vm9 = vcmp.eq.f32.partialorder %v4534_v23, 8.507059e+37 }
 0x299   : > { %v3579_v62 = vmul.f32 %v8902_v41, %v3578_v56  ;;  %v3920_v56 = vadd.f32 0.112945676, %v3919_v47  ;;  %v4513_v13 = vadd.f32 1.1283791, %v4512_v44  ;;  %v4563_v6 = vmul.f32 %v4562_v36, %v8905_v9 }
 0x29a   : > { %v3569_v38 = vmul.f32 %v8907_v37, %v3568_v46  ;;  %v3416_v46 = vmul.f32 %v8958_v16, %v3415_v63  ;;  %v4529_v19 = vadd.f32 %v8945_v22, %v4528_v2  ;;  %v3888_v40 = vmul.f32 %v8953_v15, %v3887_v59 }
 0x29b   : > { %v3583_v58 = vsel %vm8974_vm4, %v8902_v41, %v3579_v62  ;;  %v3871_v41 = vadd.f32 0.18741608, %v3870_v8  ;;  %v3921_v62 = vmul.f32 %v3920_v56, %v8937_v34  ;;  %v4514_v17 = vmul.f32 %v4513_v13, %v8856_v10  ;;  %v3723_v10 = vpop.f32.mrf.mxu0 }
 0x29c   : > { %v3573_v50 = vsel %vm8985_vm5, %v8907_v37, %v3569_v38  ;;  %v3633_v61 = vmul.f32 %v3583_v58, %v8713_v7  ;;  %v3906_v37 = vmul.f32 %v3905_v30, %v8937_v34  ;;  %v4536_v7 = vand.u32 2147483648, %v8925_v49 }
 0x29d   : > { %v3632_v28 = vmul.f32 %v3573_v50, %v8688_v0  ;;  %v3872_v14 = vmul.f32 %v3871_v41, %v8874_v45  ;;  %v3417_v38 = vmul.f32 0.5, %v3416_v46  ;;  %v3922_v0 = vadd.f32 0.4994258, %v3921_v62  ;;  %v3765_v62 = vpop.f32.mrf.mxu2 }
 0x29e   : > { %v3907_v20 = vadd.f32 0.0036580483, %v3906_v37  ;;  %v4551_v8 = vadd.f32 0.18741608, %v4550_v25  ;;  %v9031_v63 = vadd.f32 1.0, %v4563_v6  ;;  %v4533_v49 = vsel %vm9027_vm10, %v8945_v22, %v4529_v19 }
 0x29f   : > { %v3650_v42 = vpack.c.bf16 %v3633_v61, %v3632_v28  ;;  %v3923_v45 = vmul.f32 %v3922_v0, %v8937_v34  ;;  %v4595_v32 = vmul.f32 3.8918573e-05, %v9014_v24  ;;  %v4537_v44 = vor.u32 1.1754944e-38, %v4536_v7 }
 0x2a0   : > { %v3889_v30 = vadd.f32 %v8953_v15, %v3888_v40  ;;  %vm3891_vm11 = vweird.f32 %v8953_v15  ;;  %v3896_v47 = vand.u32 2147483648, %v8935_v48  ;;  %v3894_v53 = vand.u32 2147483647, %v8935_v48 }
 0x2a1   : > { %5601 = vmatmul.msk.bf16.gmra.mxu2 %vm2924_vm8, %v3650_v42  ;;  %v9042_v58 = vadd.f32 1.0, %v3923_v45  ;;  %v4596_v36 = vadd.f32 0.001143296, %v4595_v32  ;;  %v3908_v50 = vmul.f32 %v3907_v20, %v8937_v34  ;;  %v9049_v22 = vadd.f32 %v8849_v60, %v3723_v10  ;;  %vm9053_vm13 = vmor %vm3890_vm12, %vm3891_vm11 }
 0x2a2   : > { %v3162_v26 = vpop.xlane.xlu1 %3161  ;;  %v4538_v2 = vsel %vm9023_vm9, %v4537_v44, %v4533_v49  ;;  %v3873_v59 = vadd.f32 1.1283791, %v3872_v14  ;;  %v4552_v41 = vmul.f32 %v4551_v8, %v8905_v9  ;;  %5798 = vrcp.f32 %v9031_v63 }
 0x2a3   : > { %v3232_v11 = vmul.f32 %v3162_v26, %v7759_v27  ;;  %v3893_v48 = vsel %vm9053_vm13, %v8953_v15, %v3889_v30  ;;  %v3418_v46 = vsub.f32 1.5, %v3417_v38  ;;  %v4584_v61 = vmul.f32 2.1237322e-06, %v9014_v24  ;;  %v3725_v8 = vpop.f32.mrf.mxu0 }
 0x2a4   : > { %v4597_v13 = vmul.f32 %v4596_v36, %v9014_v24  ;;  %v3897_v23 = vor.u32 1.1754944e-38, %v3896_v47  ;;  %5800 = vrcp.f32 %v9042_v58  ;;  %v9068_v28 = vmul.f32 0.70710677, %v9049_v22 }
 0x2a5   : > { %v9065_v37 = vadd.f32 1e-05, %v3232_v11  ;;  %v4539_v9 = vmul.f32 %v4538_v2, %v4514_v17  ;;  %vm3895_vm14 = vcmp.eq.f32.partialorder %v3894_v53, 8.507059e+37  ;;  %v3909_v25 = vadd.f32 0.05243302, %v3908_v50 }
 0x2a6   : > { %v4598_v6 = vadd.f32 0.014752088, %v4597_v13  ;;  %v3898_v19 = vsel %vm3895_vm14, %v3897_v23, %v3893_v48  ;;  %v9071_v15 = vmul.f32 0.5, %v8885_v18  ;;  %v4553_v7 = vadd.f32 1.1283791, %v4552_v41 }
 0x2a7   : > { %v3942_v40 = vmul.f32 %v9068_v28, %v9068_v28  ;;  %v3874_v14 = vmul.f32 %v3873_v59, %v8864_v39  ;;  %v9077_v38 = vmul.f32 0.5, %v8900_v55  ;;  %v4585_v0 = vadd.f32 0.00028619796, %v4584_v61 }
 0x2a8   : > { %v4599_v42 = vmul.f32 %v4598_v6, %v9014_v24  ;;  %v9080_v17 = vpop.eup %5798  ;;  %v9083_v57 = vmul.f32 %v8958_v16, %v3418_v46  ;;  %5802 = vrsqrt.f32 %v9065_v37  ;;  %v9089_v20 = vadd.f32 %v8849_v60, %v3765_v62 }
 0x2a9   : > { %v9086_v18 = vmin.f32 %v3942_v40, 16.0  ;;  %v5619_v26 = vclamps-f32 %v4539_v9, 1.0  ;;  %v3899_v39 = vmul.f32 %v3898_v19, %v3874_v14  ;;  %v3910_v55 = vmul.f32 %v3909_v25, %v8937_v34 }
 0x2aa   : > { %v9095_v45 = vpop.eup %5800  ;;  %v9098_v32 = vmul.f32 %v4553_v7, %v8892_v4  ;;  %v4600_v10 = vadd.f32 0.112945676, %v4599_v42  ;;  %v4566_v30 = vmul.f32 %v9080_v17, %v9031_v63  ;;  %v4574_v47 = vand.u32 2147483647, %v9031_v63  ;;  %v3219_v50 = vpop.xlane.xlu1 %3218 }
 0x2ab   : > { %v3944_v49 = vmul.f32 2.1237322e-06, %v9086_v18  ;;  %v3955_v44 = vmul.f32 3.8918573e-05, %v9086_v18  ;;  %v4576_v11 = vand.u32 2147483648, %v9031_v63  ;;  %v4586_v54 = vmul.f32 %v4585_v0, %v9014_v24 }
 0x2ac   : > { %v4601_v36 = vmul.f32 %v4600_v10, %v9014_v24  ;;  %v9109_v4 = vmul.f32 0.70710677, %v9089_v20  ;;  %v9112_v2 = vadd.f32 %v8849_v60, %v3725_v8  ;;  %v5158_v59 = vadd.f32 1.0, %v5619_v26 }
 0x2ad   : > { %v3956_v53 = vadd.f32 0.001143296, %v3955_v44  ;;  %v5603_v56 = vclamps-f32 %v3899_v39, 1.0  ;;  %v3911_v41 = vadd.f32 0.18741608, %v3910_v55  ;;  %v3926_v48 = vmul.f32 %v9095_v45, %v9042_v58 }
 0x2ae   : > { %v9116_v46 = vpop.eup %5802  ;;  %v4602_v61 = vadd.f32 0.4994258, %v4601_v36  ;;  %v3945_v13 = vadd.f32 0.00028619796, %v3944_v49  ;;  %v4622_v9 = vmul.f32 %v9109_v4, %v9109_v4  ;;  %v4567_v25 = vsub.f32 1.0, %v4566_v30 }
 0x2af   : > { %v3957_v23 = vmul.f32 %v3956_v53, %v9086_v18  ;;  %v9121_v6 = vor.u32 1.1754944e-38, %v4576_v11  ;;  %v4587_v62 = vadd.f32 0.0036580483, %v4586_v54  ;;  %v3251_v19 = vmul.f32 %v3219_v50, %v7759_v27 }
 0x2b0   : > { %v4603_v7 = vmul.f32 %v4602_v61, %v9014_v24  ;;  %v9125_v14 = vmin.f32 %v4622_v9, 16.0  ;;  %v9128_v0 = vmul.f32 0.70710677, %v9112_v2  ;;  %v9131_v42 = vmul.f32 %v5158_v59, %v9000_v1 }
 0x2b1   : > { %v3958_v40 = vadd.f32 0.014752088, %v3957_v23  ;;  %v5142_v26 = vadd.f32 1.0, %v5603_v56  ;;  %vm4570_vm15 = vweird.f32 %v9031_v63  ;;  %v3912_v39 = vmul.f32 %v3911_v41, %v8937_v34 }
 0x2b2   : > { %v3405_v55 = vmul.f32 %v9116_v46, %v9065_v37  ;;  %v3927_v8 = vsub.f32 1.0, %v3926_v48  ;;  %v9137_v10 = vadd.f32 1.0, %v4603_v7  ;;  %v3946_v49 = vmul.f32 %v3945_v13, %v9086_v18 }
 0x2b3   : > { %v3959_v44 = vmul.f32 %v3958_v40, %v9086_v18  ;;  %v4568_v30 = vmul.f32 %v9080_v17, %v4567_v25  ;;  %v4588_v1 = vmul.f32 %v4587_v62, %v9014_v24  ;;  %v4624_v11 = vmul.f32 2.1237322e-06, %v9125_v14 }
 0x2b4   : > { %v4635_v54 = vmul.f32 3.8918573e-05, %v9125_v14  ;;  %vm4571_vm1 = vweird.f32 %v9080_v17  ;;  %5804 = vrcp.f32 %v9137_v10  ;;  %v9147_v34 = vadd.f32 1e-05, %v3251_v19 }
 0x2b5   : > { %v3982_v36 = vmul.f32 %v9128_v0, %v9128_v0  ;;  %v9152_v53 = vmul.f32 %v5142_v26, %v9004_v43  ;;  %v3913_v50 = vadd.f32 1.1283791, %v3912_v39  ;;  %v3406_v59 = vmul.f32 %v9116_v46, %v3405_v55  ;;  %vm9177_vm5 = vmor %vm4570_vm15, %vm4571_vm1 }
 0x2b6   : > { %v3960_v56 = vadd.f32 0.112945676, %v3959_v44  ;;  %vm9155_vm2 = vcmp.eq.f32.partialorder %v4574_v47, 8.507059e+37  ;;  %v3928_v48 = vmul.f32 %v9095_v45, %v3927_v8  ;;  %v3947_v61 = vadd.f32 0.0036580483, %v3946_v49 }
 0x2b7   : > { %v4625_v13 = vadd.f32 0.00028619796, %v4624_v11  ;;  %v4636_v23 = vadd.f32 0.001143296, %v4635_v54  ;;  %v4569_v9 = vadd.f32 %v9080_v17, %v4568_v30  ;;  %vm3930_vm3 = vweird.f32 %v9042_v58 }
 0x2b8   : > { %v4589_v25 = vadd.f32 0.05243302, %v4588_v1  ;;  %v3961_v43 = vmul.f32 %v3960_v56, %v9086_v18  ;;  %5806 = vrsqrt.f32 %v9147_v34  ;;  %v9166_v19 = vmin.f32 %v3982_v36, 16.0 }
 0x2b9   : > { %v4626_v62 = vmul.f32 %v4625_v13, %v9125_v14  ;;  %v4637_v47 = vmul.f32 %v4636_v23, %v9125_v14  ;;  %vm3931_vm4 = vweird.f32 %v9095_v45  ;;  %v3934_v7 = vand.u32 2147483647, %v9042_v58 }
 0x2ba   : > { %v3936_v40 = vand.u32 2147483648, %v9042_v58  ;;  %v3962_v26 = vadd.f32 0.4994258, %v3961_v43  ;;  %v9171_v39 = vpop.eup %5804  ;;  %v3929_v8 = vadd.f32 %v9095_v45, %v3928_v48  ;;  %v3948_v49 = vmul.f32 %v3947_v61, %v9086_v18  ;;  %vm9198_vm6 = vmor %vm3930_vm3, %vm3931_vm4 }
 0x2bb   : > { %v4638_v44 = vadd.f32 0.014752088, %v4637_v47  ;;  %v3984_v30 = vmul.f32 2.1237322e-06, %v9166_v19  ;;  %v4573_v1 = vsel %vm9177_vm5, %v9080_v17, %v4569_v9  ;;  %v4590_v11 = vmul.f32 %v4589_v25, %v9014_v24 }
 0x2bc   : > { %v4606_v63 = vmul.f32 %v9171_v39, %v9137_v10  ;;  %v3963_v54 = vmul.f32 %v3962_v26, %v9086_v18  ;;  %v4627_v36 = vadd.f32 0.0036580483, %v4626_v62  ;;  %v3995_v61 = vmul.f32 3.8918573e-05, %v9166_v19 }
 0x2bd   : > { %v4639_v56 = vmul.f32 %v4638_v44, %v9125_v14  ;;  %v3985_v48 = vadd.f32 0.00028619796, %v3984_v30  ;;  %v3914_v13 = vmul.f32 %v3913_v50, %v8914_v5  ;;  %v3407_v23 = vmul.f32 0.5, %v3406_v59 }
 0x2be   : > { %v4607_v9 = vsub.f32 1.0, %v4606_v63  ;;  %v9202_v25 = vadd.f32 1.0, %v3963_v54  ;;  %v9204_v43 = vpop.eup %5806  ;;  %v3933_v62 = vsel %vm9198_vm6, %v9095_v45, %v3929_v8  ;;  %v3949_v47 = vadd.f32 0.05243302, %v3948_v49  ;;  %v3168_v63 = vpop.xlane.xlu2 %3167 }
 0x2bf   : > { %v4640_v5 = vadd.f32 0.112945676, %v4639_v56  ;;  %v3996_v50 = vadd.f32 0.001143296, %v3995_v61  ;;  %v4578_v58 = vsel %vm9155_vm2, %v9121_v6, %v4573_v1  ;;  %vm3935_vm7 = vcmp.eq.f32.partialorder %v3934_v7, 8.507059e+37 }
 0x2c0   : > { %v3937_v26 = vor.u32 1.1754944e-38, %v3936_v40  ;;  %v3986_v59 = vmul.f32 %v3985_v48, %v9166_v19  ;;  %v4591_v55 = vadd.f32 0.18741608, %v4590_v11  ;;  %5808 = vrcp.f32 %v9202_v25 }
 0x2c1   : > { %v4628_v44 = vmul.f32 %v4627_v36, %v9125_v14  ;;  %v4641_v30 = vmul.f32 %v4640_v5, %v9125_v14  ;;  %v4608_v8 = vmul.f32 %v9171_v39, %v4607_v9  ;;  %v3595_v49 = vmul.f32 %v9204_v43, %v9147_v34 }
 0x2c2   : > { %v3938_v45 = vsel %vm3935_vm7, %v3937_v26, %v3933_v62  ;;  %v3997_v6 = vmul.f32 %v3996_v50, %v9166_v19  ;;  %v3408_v41 = vsub.f32 1.5, %v3407_v23  ;;  %v9221_v7 = vmul.f32 0.5, %v9049_v22 }
 0x2c3   : > { %v3950_v40 = vmul.f32 %v3949_v47, %v9086_v18  ;;  %v4642_v1 = vadd.f32 0.4994258, %v4641_v30  ;;  %v4579_v11 = vmul.f32 %v4578_v58, %v9098_v32  ;;  %v3987_v54 = vadd.f32 0.0036580483, %v3986_v59 }
 0x2c4   : > { %v3998_v36 = vadd.f32 0.014752088, %v3997_v6  ;;  %v3234_v56 = vmul.f32 %v3168_v63, %v7759_v27  ;;  %v3939_v48 = vmul.f32 %v3938_v45, %v3914_v13  ;;  %v4592_v61 = vmul.f32 %v4591_v55, %v9014_v24  ;;  %v3768_v24 = vpop.f32.mrf.mxu2 }
 0x2c5   : > { %v4629_v17 = vadd.f32 0.05243302, %v4628_v44  ;;  %v4643_v9 = vmul.f32 %v4642_v1, %v9125_v14  ;;  %v4609_v23 = vadd.f32 %v9171_v39, %v4608_v8  ;;  %vm4611_vm9 = vweird.f32 %v9171_v39 }
 0x2c6   : > { %v3596_v22 = vmul.f32 %v9204_v43, %v3595_v49  ;;  %v3999_v62 = vmul.f32 %v3998_v36, %v9166_v19  ;;  %v9232_v47 = vpop.eup %5808  ;;  %vm4610_vm10 = vweird.f32 %v9137_v10  ;;  %v4616_v32 = vand.u32 2147483648, %v9137_v10 }
 0x2c7   : > { %v3951_v13 = vadd.f32 0.18741608, %v3950_v40  ;;  %v9236_v5 = vadd.f32 1.0, %v4643_v9  ;;  %v4614_v50 = vand.u32 2147483647, %v9137_v10  ;;  %v3988_v58 = vmul.f32 %v3987_v54, %v9166_v19  ;;  %vm9244_vm11 = vmor %vm4610_vm10, %vm4611_vm9 }
 0x2c8   : > { %v4000_v26 = vadd.f32 0.112945676, %v3999_v62  ;;  %v9240_v59 = vadd.f32 1e-05, %v3234_v56  ;;  %v5620_v55 = vclamps-f32 %v4579_v11, 1.0  ;;  %v5604_v44 = vclamps-f32 %v3939_v48, 1.0 }
 0x2c9   : > { %v4593_v30 = vadd.f32 1.1283791, %v4592_v61  ;;  %v4630_v45 = vmul.f32 %v4629_v17, %v9125_v14  ;;  %v4613_v10 = vsel %vm9244_vm11, %v9171_v39, %v4609_v23  ;;  %v3966_v8 = vmul.f32 %v9232_v47, %v9202_v25  ;;  %v3216_v17 = vpop.xlane.xlu0 %3215 }
 0x2ca   : > { %5810 = vrcp.f32 %v9236_v5  ;;  %v9256_v49 = vadd.f32 %v8849_v60, %v3768_v24  ;;  %v4617_v6 = vor.u32 1.1754944e-38, %v4616_v32  ;;  %v3952_v40 = vmul.f32 %v3951_v13, %v9086_v18 }
 0x2cb   : > { %v3597_v1 = vmul.f32 0.5, %v3596_v22  ;;  %v4001_v11 = vmul.f32 %v4000_v26, %v9166_v19  ;;  %v9261_v54 = vmul.f32 %v9116_v46, %v3408_v41  ;;  %vm4615_vm12 = vcmp.eq.f32.partialorder %v4614_v50, 8.507059e+37  ;;  %v3728_v41 = vpop.f32.mrf.mxu0 }
 0x2cc   : > { %v3989_v36 = vadd.f32 0.05243302, %v3988_v58  ;;  %5812 = vrsqrt.f32 %v9240_v59  ;;  %v5159_v39 = vadd.f32 1.0, %v5620_v55  ;;  %v5143_v56 = vadd.f32 1.0, %v5604_v44 }
 0x2cd   : > { %vm3411_vm13 = vweird.f32 %v9116_v46  ;;  %v4618_v48 = vsel %vm4615_vm12, %v4617_v6, %v4613_v10  ;;  %v4002_v61 = vadd.f32 0.4994258, %v4001_v11  ;;  %v4594_v9 = vmul.f32 %v4593_v30, %v8967_v33 }
 0x2ce   : > { %v3967_v18 = vsub.f32 1.0, %v3966_v8  ;;  %v4631_v23 = vadd.f32 0.18741608, %v4630_v45  ;;  %v9267_v22 = vmul.f32 0.70710677, %v9256_v49  ;;  %vm3410_vm14 = vweird.f32 %v9065_v37 }
 0x2cf   : > { %v3953_v62 = vadd.f32 1.1283791, %v3952_v40  ;;  %v3598_v32 = vsub.f32 1.5, %v3597_v1  ;;  %v9271_v13 = vmul.f32 0.5, %v9089_v20  ;;  %v4003_v24 = vmul.f32 %v4002_v61, %v9166_v19  ;;  %vm9335_vm5 = vmor %vm3410_vm14, %vm3411_vm13 }
 0x2d0   : > { %v9274_v50 = vpop.eup %5810  ;;  %vm3421_vm15 = vweird.f32 %v8958_v16  ;;  %v4619_v33 = vmul.f32 %v4618_v48, %v4594_v9  ;;  %v9278_v58 = vmul.f32 0.5, %v9112_v2  ;;  %v3990_v26 = vmul.f32 %v3989_v36, %v9166_v19 }
 0x2d1   : > { %v3250_v55 = vmul.f32 %v3216_v17, %v7759_v27  ;;  %v9283_v44 = vmul.f32 %v5159_v39, %v9071_v15  ;;  %v9286_v20 = vmul.f32 %v5143_v56, %v9077_v38  ;;  %v9288_v30 = vadd.f32 1.0, %v4003_v24 }
 0x2d2   : > { %v9291_v63 = vadd.f32 %v8849_v60, %v3728_v41  ;;  %v9293_v45 = vpop.eup %5812  ;;  %vm3420_vm1 = vweird.f32 %v8933_v31  ;;  %v3968_v2 = vmul.f32 %v9232_v47, %v3967_v18  ;;  %v3974_v10 = vand.u32 2147483647, %v9202_v25 }
 0x2d3   : > { %v4632_v8 = vmul.f32 %v4631_v23, %v9125_v14  ;;  %v4662_v15 = vmul.f32 %v9267_v22, %v9267_v22  ;;  %v9302_v38 = vmul.f32 %v3953_v62, %v9068_v28  ;;  %vm3970_vm2 = vweird.f32 %v9202_v25  ;;  %vm9368_vm9 = vmor %vm3420_vm1, %vm3421_vm15 }
 0x2d4   : > { %v9306_v6 = vmul.f32 %v9204_v43, %v3598_v32  ;;  %v4646_v40 = vmul.f32 %v9274_v50, %v9236_v5  ;;  %v5621_v1 = vclamps-f32 %v4619_v33, 1.0  ;;  %v3976_v11 = vand.u32 2147483648, %v9202_v25 }
 0x2d5   : > { %v3991_v36 = vadd.f32 0.18741608, %v3990_v26  ;;  %v9311_v39 = vadd.f32 1e-05, %v3250_v55  ;;  %5814 = vrcp.f32 %v9288_v30  ;;  %v3425_v28 = vmul.f32 %v9293_v45, %v9240_v59 }
 0x2d6   : > { %v9316_v14 = vmin.f32 %v4662_v15, 16.0  ;;  %v9319_v56 = vmul.f32 0.70710677, %v9291_v63  ;;  %v3969_v48 = vadd.f32 %v9232_v47, %v3968_v2  ;;  %vm3971_vm3 = vweird.f32 %v9232_v47 }
 0x2d7   : > { %vm9323_vm4 = vcmp.eq.f32.partialorder %v3974_v10, 8.507059e+37  ;;  %v4633_v17 = vadd.f32 1.1283791, %v4632_v8  ;;  %v4647_v9 = vsub.f32 1.0, %v4646_v40  ;;  %v5160_v32 = vadd.f32 1.0, %v5621_v1  ;;  %vm9343_vm6 = vmor %vm3970_vm2, %vm3971_vm3 }
 0x2d8   : > { %v4664_v18 = vmul.f32 2.1237322e-06, %v9316_v14  ;;  %v4675_v23 = vmul.f32 3.8918573e-05, %v9316_v14  ;;  %v4022_v41 = vmul.f32 %v9319_v56, %v9319_v56  ;;  %v3977_v24 = vor.u32 1.1754944e-38, %v3976_v11 }
 0x2d9   : > { %v3992_v33 = vmul.f32 %v3991_v36, %v9166_v19  ;;  %5816 = vrsqrt.f32 %v9311_v39  ;;  %v4654_v55 = vand.u32 2147483647, %v9236_v5  ;;  %v3426_v37 = vmul.f32 %v9293_v45, %v3425_v28  ;;  %v3171_v28 = vpop.xlane.xlu0 %3170 }
 0x2da   : > { %v4676_v2 = vadd.f32 0.001143296, %v4675_v23  ;;  %v9349_v10 = vmin.f32 %v4022_v41, 16.0  ;;  %v3973_v8 = vsel %vm9343_vm6, %v9232_v47, %v3969_v48  ;;  %v9355_v19 = vmul.f32 %v4633_v17, %v9109_v4  ;;  %v3770_v23 = vpop.f32.mrf.mxu2 }
 0x2db   : > { %vm4650_vm7 = vweird.f32 %v9236_v5  ;;  %v3413_v25 = vsel %vm9335_vm5, %v9116_v46, %v9261_v54  ;;  %v9362_v15 = vpop.eup %5814  ;;  %v4648_v4 = vmul.f32 %v9274_v50, %v4647_v9  ;;  %v4665_v47 = vadd.f32 0.00028619796, %v4664_v18 }
 0x2dc   : > { %v4677_v1 = vmul.f32 %v4676_v2, %v9316_v14  ;;  %v4035_v11 = vmul.f32 3.8918573e-05, %v9349_v10  ;;  %v9376_v36 = vmul.f32 %v5160_v32, %v9093_v29  ;;  %v4656_v46 = vand.u32 2147483648, %v9236_v5 }
 0x2dd   : > { %v3993_v54 = vadd.f32 1.1283791, %v3992_v33  ;;  %v3423_v31 = vsel %vm9368_vm9, %v8958_v16, %v9083_v57  ;;  %v3978_v48 = vsel %vm9323_vm4, %v3977_v24, %v3973_v8  ;;  %vm9385_vm10 = vcmp.eq.f32.partialorder %v4654_v55, 8.507059e+37 }
 0x2de   : > { %11295 = vst [vmem:[#allocation36_spill] sm:$0xff] %v9376_v36  ;;  %v9389_v9 = vmul.f32 0.5, %v3426_v37  ;;  %v4678_v29 = vadd.f32 0.014752088, %v4677_v1  ;;  %v3616_v18 = vmul.f32 %v3413_v25, %v8760_v35  ;;  %vm4651_vm11 = vweird.f32 %v9274_v50 }
 0x2df   : > { %v9392_v41 = vpop.eup %5816  ;;  %v4006_v16 = vmul.f32 %v9362_v15, %v9288_v30  ;;  %v4036_v57 = vadd.f32 0.001143296, %v4035_v11  ;;  %v3617_v61 = vmul.f32 %v3423_v31, %v8723_v12  ;;  %v4649_v62 = vadd.f32 %v9274_v50, %v4648_v4  ;;  %vm9414_vm12 = vmor %vm4650_vm7, %vm4651_vm11 }
 0x2e0   : > { %v4666_v32 = vmul.f32 %v4665_v47, %v9316_v14  ;;  %v4679_v24 = vmul.f32 %v4678_v29, %v9316_v14  ;;  %v3235_v33 = vmul.f32 %v3171_v28, %v7759_v27  ;;  %v4024_v35 = vmul.f32 2.1237322e-06, %v9349_v10 }
 0x2e1   : > { %v4037_v26 = vmul.f32 %v4036_v57, %v9349_v10  ;;  %v3642_v55 = vpack.c.bf16 %v3617_v61, %v3616_v18  ;;  %v9405_v37 = vadd.f32 %v8849_v60, %v3770_v23  ;;  %v3979_v2 = vmul.f32 %v3978_v48, %v9302_v38  ;;  %v3730_v61 = vpop.f32.mrf.mxu0 }
 0x2e2   : > { %v4657_v8 = vor.u32 1.1754944e-38, %v4656_v46  ;;  %v3585_v12 = vmul.f32 %v9392_v41, %v9311_v39  ;;  %v4680_v25 = vadd.f32 0.112945676, %v4679_v24  ;;  %v9419_v40 = vmul.f32 %v3993_v54, %v9128_v0 }
 0x2e3   : > { %v4007_v4 = vsub.f32 1.0, %v4006_v16  ;;  %v9422_v47 = vmul.f32 0.5, %v9256_v49  ;;  %v4038_v38 = vadd.f32 0.014752088, %v4037_v26  ;;  %5593 = vmatmul.msk.bf16.gmra.mxu0 %vm2924_vm8, %v3642_v55  ;;  %v4653_v1 = vsel %vm9414_vm12, %v9274_v50, %v4649_v62 }
 0x2e4   : > { %v4667_v11 = vadd.f32 0.0036580483, %v4666_v32  ;;  %v4681_v5 = vmul.f32 %v4680_v25, %v9316_v14  ;;  %v9429_v46 = vadd.f32 1e-05, %v3235_v33  ;;  %v3428_v28 = vsub.f32 1.5, %v9389_v9 }
 0x2e5   : > { %v4025_v0 = vadd.f32 0.00028619796, %v4024_v35  ;;  %v4039_v54 = vmul.f32 %v4038_v38, %v9349_v10  ;;  %v9434_v49 = vmul.f32 0.70710677, %v9405_v37  ;;  %v5605_v31 = vclamps-f32 %v3979_v2, 1.0  ;;  %v3773_v35 = vpop.f32.mrf.mxu2 }
 0x2e6   : > { %v3586_v48 = vmul.f32 %v9392_v41, %v3585_v12  ;;  %v4682_v29 = vadd.f32 0.4994258, %v4681_v5  ;;  %v9438_v18 = vmul.f32 0.5, %v9291_v63  ;;  %v4658_v50 = vsel %vm9385_vm10, %v4657_v8, %v4653_v1 }
 0x2e7   : > { %v4008_v23 = vmul.f32 %v9362_v15, %v4007_v4  ;;  %v4040_v16 = vadd.f32 0.112945676, %v4039_v54  ;;  %v4702_v57 = vmul.f32 %v9434_v49, %v9434_v49  ;;  %vm4010_vm13 = vweird.f32 %v9288_v30 }
 0x2e8   : > { %v4668_v62 = vmul.f32 %v4667_v11, %v9316_v14  ;;  %v4683_v32 = vmul.f32 %v4682_v29, %v9316_v14  ;;  %5818 = vrsqrt.f32 %v9429_v46  ;;  %v4014_v63 = vand.u32 2147483647, %v9288_v30 }
 0x2e9   : > { %v4026_v17 = vmul.f32 %v4025_v0, %v9349_v10  ;;  %v4041_v24 = vmul.f32 %v4040_v16, %v9349_v10  ;;  %v9452_v33 = vmin.f32 %v4702_v57, 16.0  ;;  %v4659_v26 = vmul.f32 %v4658_v50, %v9355_v19  ;;  %v9468_v19 = vld [vmem:[%s10794_s6] ss:$0 sm:$0xff] }
 0x2ea   : > { %v4016_v55 = vand.u32 2147483648, %v9288_v30  ;;  %v9456_v2 = vadd.f32 1.0, %v4683_v32  ;;  %v9459_v8 = vadd.f32 %v8849_v60, %v3730_v61  ;;  %v4009_v12 = vadd.f32 %v9362_v15, %v4008_v23 }
 0x2eb   : > { %vm4011_vm14 = vweird.f32 %v9362_v15  ;;  %v4042_v25 = vadd.f32 0.4994258, %v4041_v24  ;;  %v4704_v27 = vmul.f32 2.1237322e-06, %v9452_v33  ;;  %v3587_v4 = vmul.f32 0.5, %v3586_v48 }
 0x2ec   : > { %v4669_v38 = vadd.f32 0.05243302, %v4668_v62  ;;  %5820 = vrcp.f32 %v9456_v2  ;;  %v9471_v1 = vadd.f32 %v9468_v19, %v3773_v35  ;;  %v5144_v60 = vadd.f32 1.0, %v5605_v31  ;;  %vm9478_vm15 = vmor %vm4010_vm13, %vm4011_vm14 }
 0x2ed   : > { %v4027_v11 = vadd.f32 0.0036580483, %v4026_v17  ;;  %v4043_v5 = vmul.f32 %v4042_v25, %v9349_v10  ;;  %v4705_v0 = vadd.f32 0.00028619796, %v4704_v27  ;;  %vm9482_vm1 = vcmp.eq.f32.partialorder %v4014_v63, 8.507059e+37 }
 0x2ee   : > { %v9474_v54 = vpop.eup %5818  ;;  %v4017_v50 = vor.u32 1.1754944e-38, %v4016_v55  ;;  %v4715_v23 = vmul.f32 3.8918573e-05, %v9452_v33  ;;  %v9488_v31 = vmul.f32 0.70710677, %v9459_v8  ;;  %v5622_v16 = vclamps-f32 %v4659_v26, 1.0 }
 0x2ef   : > { %v4013_v57 = vsel %vm9478_vm15, %v9362_v15, %v4009_v12  ;;  %v9493_v30 = vadd.f32 1.0, %v4043_v5  ;;  %v4706_v61 = vmul.f32 %v4705_v0, %v9452_v33  ;;  %v4670_v62 = vmul.f32 %v4669_v38, %v9316_v14 }
 0x2f0   : > { %v4716_v32 = vadd.f32 0.001143296, %v4715_v23  ;;  %v4062_v63 = vmul.f32 %v9488_v31, %v9488_v31  ;;  %v9500_v17 = vmul.f32 0.70710677, %v9471_v1  ;;  %v3588_v24 = vsub.f32 1.5, %v3587_v4 }
 0x2f1   : > { %v4028_v35 = vmul.f32 %v4027_v11, %v9349_v10  ;;  %5822 = vrcp.f32 %v9493_v30  ;;  %v3435_v15 = vmul.f32 %v9474_v54, %v9429_v46  ;;  %v4018_v55 = vsel %vm9482_vm1, %v4017_v50, %v4013_v57 }
 0x2f2   : > { %v9506_v26 = vpop.eup %5820  ;;  %v4707_v12 = vadd.f32 0.0036580483, %v4706_v61  ;;  %v4717_v25 = vmul.f32 %v4716_v32, %v9452_v33  ;;  %v9511_v27 = vmin.f32 %v4062_v63, 16.0  ;;  %v5161_v38 = vadd.f32 1.0, %v5622_v16 }
 0x2f3   : > { %v9516_v4 = vmul.f32 %v9293_v45, %v3428_v28  ;;  %v4686_v11 = vmul.f32 %v9506_v26, %v9456_v2  ;;  %v4742_v5 = vmul.f32 %v9500_v17, %v9500_v17  ;;  %v9523_v0 = vmul.f32 %v5144_v60, %v9221_v7 }
 0x2f4   : > { %v4671_v48 = vadd.f32 0.18741608, %v4670_v62  ;;  %v4718_v29 = vadd.f32 0.014752088, %v4717_v25  ;;  %v4064_v50 = vmul.f32 2.1237322e-06, %v9511_v27  ;;  %v9527_v23 = vmul.f32 %v4018_v55, %v9419_v40 }
 0x2f5   : > { %11304 = vst [vmem:[#allocation9_spill] sm:$0xff] %v9523_v0  ;;  %v4029_v9 = vadd.f32 0.05243302, %v4028_v35  ;;  %v4075_v28 = vmul.f32 3.8918573e-05, %v9511_v27  ;;  %v9530_v16 = vmin.f32 %v4742_v5, 16.0  ;;  %v9533_v57 = vmul.f32 %v9392_v41, %v3588_v24 }
 0x2f6   : > { %v3436_v61 = vmul.f32 %v9474_v54, %v3435_v15  ;;  %v4708_v7 = vmul.f32 %v4707_v12, %v9452_v33  ;;  %v4719_v60 = vmul.f32 %v4718_v29, %v9452_v33  ;;  %v9541_v32 = vmul.f32 %v5161_v38, %v9271_v13 }
 0x2f7   : > { %v9538_v62 = vpop.eup %5822  ;;  %v4687_v40 = vsub.f32 1.0, %v4686_v11  ;;  %v4076_v63 = vadd.f32 0.001143296, %v4075_v28  ;;  %v4755_v35 = vmul.f32 3.8918573e-05, %v9530_v16  ;;  %v4672_v55 = vmul.f32 %v4671_v48, %v9316_v14  ;;  %v3733_v48 = vpop.f32.mrf.mxu0 }
 0x2f8   : > { %11305 = vst [vmem:[#allocation5_spill] sm:$0xff] %v9541_v32  ;;  %v4046_v24 = vmul.f32 %v9538_v62, %v9493_v30  ;;  %v4720_v25 = vadd.f32 0.112945676, %v4719_v60  ;;  %v4065_v15 = vadd.f32 0.00028619796, %v4064_v50  ;;  %v4030_v5 = vmul.f32 %v4029_v9, %v9349_v10 }
 0x2f9   : > { %v9550_v29 = vmul.f32 0.5, %v9405_v37  ;;  %v4077_v13 = vmul.f32 %v4076_v63, %v9511_v27  ;;  %v9553_v38 = vmul.f32 0.5, %v3436_v61  ;;  %v4709_v11 = vadd.f32 0.05243302, %v4708_v7 }
 0x2fa   : > { %v4721_v28 = vmul.f32 %v4720_v25, %v9452_v33  ;;  %v4756_v14 = vadd.f32 0.001143296, %v4755_v35  ;;  %v4688_v0 = vmul.f32 %v9506_v26, %v4687_v40  ;;  %v4047_v60 = vsub.f32 1.0, %v4046_v24  ;;  %v5662_v40 = vld [vmem:[%s10795_s7] sm:$0xff] }
 0x2fb   : > { %v4078_v50 = vadd.f32 0.014752088, %v4077_v13  ;;  %v4744_v12 = vmul.f32 2.1237322e-06, %v9530_v16  ;;  %v4673_v32 = vadd.f32 1.1283791, %v4672_v55  ;;  %v4066_v63 = vmul.f32 %v4065_v15, %v9511_v27  ;;  %5708 = vmatpush.bf16.msra.mxu3 %v5662_v40  ;;  %5290 = vmatpush.bf16.msra.mxu1 %v5662_v40 }
 0x2fc   : > { %v4722_v9 = vadd.f32 0.4994258, %v4721_v28  ;;  %v9559_v37 = vmul.f32 0.5, %v9459_v8  ;;  %v4696_v61 = vand.u32 2147483648, %v9456_v2  ;;  %v4031_v7 = vadd.f32 0.18741608, %v4030_v5 }
 0x2fd   : > { %v4079_v25 = vmul.f32 %v4078_v50, %v9511_v27  ;;  %v9565_v35 = vadd.f32 %v9468_v19, %v3733_v48  ;;  %vm3601_vm2 = vweird.f32 %v9204_v43  ;;  %vm4691_vm3 = vweird.f32 %v9506_v26 }
 0x2fe   : > { %v4710_v8 = vmul.f32 %v4709_v11, %v9452_v33  ;;  %v4723_v55 = vmul.f32 %v4722_v9, %v9452_v33  ;;  %v4757_v24 = vmul.f32 %v4756_v14, %v9530_v16  ;;  %vm3591_vm4 = vweird.f32 %v9392_v41 }
 0x2ff   : > { %v4689_v15 = vadd.f32 %v9506_v26, %v4688_v0  ;;  %v4048_v5 = vmul.f32 %v9538_v62, %v4047_v60  ;;  %v4080_v13 = vadd.f32 0.112945676, %v4079_v25  ;;  %v4745_v28 = vadd.f32 0.00028619796, %v4744_v12 }
 0x300   : > { %vm3600_vm5 = vweird.f32 %v9147_v34  ;;  %v4674_v48 = vmul.f32 %v4673_v32, %v9267_v22  ;;  %v9580_v50 = vadd.f32 1.0, %v4723_v55  ;;  %v4067_v11 = vadd.f32 0.0036580483, %v4066_v63 }
 0x301   : > { %v4758_v9 = vadd.f32 0.014752088, %v4757_v24  ;;  %vm3590_vm6 = vweird.f32 %v9311_v39  ;;  %vm4690_vm7 = vweird.f32 %v9456_v2  ;;  %v4694_v0 = vand.u32 2147483647, %v9456_v2  ;;  %vm9630_vm14 = vmor %vm3600_vm5, %vm3601_vm2 }
 0x302   : > { %v4081_v14 = vmul.f32 %v4080_v13, %v9511_v27  ;;  %v9587_v12 = vmul.f32 0.70710677, %v9565_v35  ;;  %vm9591_vm9 = vmor %vm4690_vm7, %vm4691_vm3  ;;  %v4697_v22 = vor.u32 1.1754944e-38, %v4696_v61  ;;  %v4032_v32 = vmul.f32 %v4031_v7, %v9349_v10 }
 0x303   : > { %vm4051_vm10 = vweird.f32 %v9538_v62  ;;  %v4056_v63 = vand.u32 2147483648, %v9493_v30  ;;  %v4693_v2 = vsel %vm9591_vm9, %v9506_v26, %v4689_v15  ;;  %v4049_v25 = vadd.f32 %v9538_v62, %v4048_v5  ;;  %vm9646_vm1 = vmor %vm3590_vm6, %vm3591_vm4 }
 0x304   : > { %v4711_v40 = vadd.f32 0.18741608, %v4710_v8  ;;  %v4082_v55 = vadd.f32 0.4994258, %v4081_v14  ;;  %5824 = vrcp.f32 %v9580_v50  ;;  %v4068_v24 = vmul.f32 %v4067_v11, %v9511_v27  ;;  %v3775_v11 = vpop.f32.mrf.mxu2 }
 0x305   : > { %v4746_v61 = vmul.f32 %v4745_v28, %v9530_v16  ;;  %v4759_v10 = vmul.f32 %v4758_v9, %v9530_v16  ;;  %vm4050_vm11 = vweird.f32 %v9493_v30  ;;  %v4054_v7 = vand.u32 2147483647, %v9493_v30 }
 0x306   : > { %v4083_v13 = vmul.f32 %v4082_v55, %v9511_v27  ;;  %v4102_v26 = vmul.f32 %v9587_v12, %v9587_v12  ;;  %vm4695_vm12 = vcmp.eq.f32.partialorder %v4694_v0, 8.507059e+37  ;;  %v4033_v8 = vadd.f32 1.1283791, %v4032_v32  ;;  %vm9613_vm13 = vmor %vm4050_vm11, %vm4051_vm10 }
 0x307   : > { %v4057_v5 = vor.u32 1.1754944e-38, %v4056_v63  ;;  %v4760_v28 = vadd.f32 0.112945676, %v4759_v10  ;;  %v4698_v9 = vsel %vm4695_vm12, %v4697_v22, %v4693_v2  ;;  %v4053_v30 = vsel %vm9613_vm13, %v9538_v62, %v4049_v25 }
 0x308   : > { %v9620_v14 = vadd.f32 1.0, %v4083_v13  ;;  %v9622_v60 = vmin.f32 %v4102_v26, 16.0  ;;  %v4712_v0 = vmul.f32 %v4711_v40, %v9452_v33  ;;  %v4069_v32 = vadd.f32 0.05243302, %v4068_v24 }
 0x309   : > { %v4747_v55 = vadd.f32 0.0036580483, %v4746_v61  ;;  %v4761_v36 = vmul.f32 %v4760_v28, %v9530_v16  ;;  %v11312_v62 = vclamps-f32 %v9527_v23, 1.0  ;;  %vm4055_vm15 = vcmp.eq.f32.partialorder %v4054_v7, 8.507059e+37 }
 0x30a   : > { %5826 = vrcp.f32 %v9620_v14  ;;  %v9638_v33 = vadd.f32 %v9468_v19, %v3775_v11  ;;  %v9640_v2 = vpop.eup %5824  ;;  %v4699_v25 = vmul.f32 %v4698_v9, %v4674_v48  ;;  %v4034_v23 = vmul.f32 %v4033_v8, %v9319_v56 }
 0x30b   : > { %v5145_v63 = vadd.f32 1.0, %v11312_v62  ;;  %v4058_v40 = vsel %vm4055_vm15, %v4057_v5, %v4053_v30  ;;  %v3438_v24 = vsub.f32 1.5, %v9553_v38  ;;  %v4762_v61 = vadd.f32 0.4994258, %v4761_v36 }
 0x30c   : > { %v4104_v10 = vmul.f32 2.1237322e-06, %v9622_v60  ;;  %v3593_v7 = vsel %vm9646_vm1, %v9392_v41, %v9533_v57  ;;  %v3603_v39 = vsel %vm9630_vm14, %v9204_v43, %v9306_v6  ;;  %v4713_v13 = vadd.f32 1.1283791, %v4712_v0 }
 0x30d   : > { %v4070_v48 = vmul.f32 %v4069_v32, %v9511_v27  ;;  %v4748_v56 = vmul.f32 %v4747_v55, %v9530_v16  ;;  %v4115_v38 = vmul.f32 3.8918573e-05, %v9622_v60  ;;  %v4059_v36 = vmul.f32 %v4058_v40, %v4034_v23 }
 0x30e   : > { %v4726_v26 = vmul.f32 %v9640_v2, %v9580_v50  ;;  %v4763_v8 = vmul.f32 %v4762_v61, %v9530_v16  ;;  %v9668_v41 = vmul.f32 0.70710677, %v9638_v33  ;;  %v4105_v57 = vadd.f32 0.00028619796, %v4104_v10 }
 0x30f   : > { %v4116_v15 = vadd.f32 0.001143296, %v4115_v38  ;;  %v3634_v43 = vmul.f32 %v3593_v7, %v8819_v21  ;;  %v3635_v6 = vmul.f32 %v3603_v39, %v8765_v51  ;;  %v9675_v28 = vmul.f32 %v5145_v63, %v9278_v58  ;;  %v3735_v63 = vpop.f32.mrf.mxu0 }
 0x310   : > { %v9672_v5 = vpop.eup %5826  ;;  %v5623_v11 = vclamps-f32 %v4699_v25, 1.0  ;;  %v9678_v9 = vmul.f32 %v9474_v54, %v3438_v24  ;;  %v4782_v30 = vmul.f32 %v9668_v41, %v9668_v41  ;;  %vm3441_vm2 = vweird.f32 %v9474_v54 }
 0x311   : > { %v4071_v0 = vadd.f32 0.18741608, %v4070_v48  ;;  %v4749_v32 = vadd.f32 0.05243302, %v4748_v56  ;;  %v4117_v21 = vmul.f32 %v4116_v15, %v9622_v60  ;;  %v3651_v55 = vpack.c.bf16 %v3635_v6, %v3634_v43 }
 0x312   : > { %v4727_v51 = vsub.f32 1.0, %v4726_v26  ;;  %v4086_v22 = vmul.f32 %v9672_v5, %v9620_v14  ;;  %v9687_v58 = vmul.f32 0.5, %v9471_v1  ;;  %v9689_v62 = vadd.f32 1.0, %v4763_v8 }
 0x313   : > { %vm3430_vm3 = vweird.f32 %v9240_v59  ;;  %vm3431_vm4 = vweird.f32 %v9293_v45  ;;  %v5607_v34 = vclamps-f32 %v4059_v36, 1.0  ;;  %vm3440_vm5 = vweird.f32 %v9429_v46  ;;  %5602 = vmatmul.msk.bf16.gmra.mxu2 %vm2924_vm8, %v3651_v55 }
 0x314   : > { %v9695_v25 = vmul.f32 %v4713_v13, %v9434_v49  ;;  %v9698_v23 = vmul.f32 0.5, %v9565_v35  ;;  %v4106_v40 = vmul.f32 %v4105_v57, %v9622_v60  ;;  %v5162_v1 = vadd.f32 1.0, %v5623_v11  ;;  %vm9742_vm11 = vmor %vm3440_vm5, %vm3441_vm2 }
 0x315   : > { %v4734_v24 = vand.u32 2147483647, %v9580_v50  ;;  %v4118_v61 = vadd.f32 0.014752088, %v4117_v21  ;;  %v9703_v10 = vmin.f32 %v4782_v30, 16.0  ;;  %v4736_v7 = vand.u32 2147483648, %v9580_v50  ;;  %vm9766_vm13 = vmor %vm3430_vm3, %vm3431_vm4 }
 0x316   : > { %v4072_v39 = vmul.f32 %v4071_v0, %v9511_v27  ;;  %v4750_v49 = vmul.f32 %v4749_v32, %v9530_v16  ;;  %v9709_v13 = vadd.f32 %v9468_v19, %v3735_v63  ;;  %v4728_v35 = vmul.f32 %v9640_v2, %v4727_v51 }
 0x317   : > { %v4087_v48 = vsub.f32 1.0, %v4086_v22  ;;  %5828 = vrcp.f32 %v9689_v62  ;;  %v4119_v56 = vmul.f32 %v4118_v61, %v9622_v60  ;;  %v5146_v38 = vadd.f32 1.0, %v5607_v34 }
 0x318   : > { %vm4730_vm6 = vweird.f32 %v9580_v50  ;;  %v4107_v36 = vadd.f32 0.0036580483, %v4106_v40  ;;  %v4795_v26 = vmul.f32 3.8918573e-05, %v9703_v10  ;;  %v9717_v27 = vmul.f32 %v5162_v1, %v9422_v47  ;;  %v3738_v50 = vpop.f32.mrf.mxu0 }
 0x319   : > { %v4120_v8 = vadd.f32 0.112945676, %v4119_v56  ;;  %v4784_v57 = vmul.f32 2.1237322e-06, %v9703_v10  ;;  %v9721_v15 = vmul.f32 0.70710677, %v9709_v13  ;;  %v4729_v0 = vadd.f32 %v9640_v2, %v4728_v35 }
 0x31a   : > { %vm9723_vm7 = vcmp.eq.f32.partialorder %v4734_v24, 8.507059e+37  ;;  %v4737_v6 = vor.u32 1.1754944e-38, %v4736_v7  ;;  %v4073_v11 = vadd.f32 1.1283791, %v4072_v39  ;;  %v4751_v30 = vadd.f32 0.18741608, %v4750_v49 }
 0x31b   : > { %vm4731_vm9 = vweird.f32 %v9640_v2  ;;  %v4088_v47 = vmul.f32 %v9672_v5, %v4087_v48  ;;  %v4121_v32 = vmul.f32 %v4120_v8, %v9622_v60  ;;  %v9732_v21 = vmul.f32 %v5146_v38, %v9438_v18 }
 0x31c   : > { %vm4090_vm10 = vweird.f32 %v9620_v14  ;;  %v4108_v55 = vmul.f32 %v4107_v36, %v9622_v60  ;;  %v4796_v51 = vadd.f32 0.001143296, %v4795_v26  ;;  %v4094_v34 = vand.u32 2147483647, %v9620_v14  ;;  %vm9751_vm12 = vmor %vm4730_vm6, %vm4731_vm9 }
 0x31d   : > { %v9736_v22 = vpop.eup %5828  ;;  %v4122_v40 = vadd.f32 0.4994258, %v4121_v32  ;;  %v4785_v18 = vadd.f32 0.00028619796, %v4784_v57  ;;  %v4142_v1 = vmul.f32 %v9721_v15, %v9721_v15  ;;  %v4096_v61 = vand.u32 2147483648, %v9620_v14 }
 0x31e   : > { %v4752_v46 = vmul.f32 %v4751_v30, %v9530_v16  ;;  %v4797_v7 = vmul.f32 %v4796_v51, %v9703_v10  ;;  %v3443_v39 = vsel %vm9742_vm11, %v9474_v54, %v9678_v9  ;;  %v4733_v49 = vsel %vm9751_vm12, %v9640_v2, %v4729_v0 }
 0x31f   : > { %v4089_v16 = vadd.f32 %v9672_v5, %v4088_v47  ;;  %vm4091_vm14 = vweird.f32 %v9672_v5  ;;  %v4123_v35 = vmul.f32 %v4122_v40, %v9622_v60  ;;  %v4766_v54 = vmul.f32 %v9736_v22, %v9689_v62 }
 0x320   : > { %v4109_v9 = vadd.f32 0.05243302, %v4108_v55  ;;  %v4798_v48 = vadd.f32 0.014752088, %v4797_v7  ;;  %v3433_v59 = vsel %vm9766_vm13, %v9293_v45, %v9516_v4  ;;  %v4786_v2 = vmul.f32 %v4785_v18, %v9703_v10  ;;  %vm9791_vm15 = vmor %vm4090_vm10, %vm4091_vm14  ;;  %v3778_v55 = vpop.f32.mrf.mxu2 }
 0x321   : > { %v9782_v56 = vadd.f32 1.0, %v4123_v35  ;;  %v9785_v38 = vmin.f32 %v4142_v1, 16.0  ;;  %v3619_v36 = vmul.f32 %v3443_v39, %v8830_v52  ;;  %v4074_v26 = vmul.f32 %v4073_v11, %v9488_v31 }
 0x322   : > { %vm9795_vm1 = vcmp.eq.f32.partialorder %v4094_v34, 8.507059e+37  ;;  %v9800_v45 = vmul.f32 0.5, %v9638_v33  ;;  %v4799_v4 = vmul.f32 %v4798_v48, %v9703_v10  ;;  %v4738_v52 = vsel %vm9723_vm7, %v4737_v6, %v4733_v49 }
 0x323   : > { %v4093_v31 = vsel %vm9791_vm15, %v9672_v5, %v4089_v16  ;;  %v4097_v14 = vor.u32 1.1754944e-38, %v4096_v61  ;;  %v3618_v11 = vmul.f32 %v3433_v59, %v8792_v3  ;;  %v4753_v30 = vadd.f32 1.1283791, %v4752_v46 }
 0x324   : > { %v4767_v0 = vsub.f32 1.0, %v4766_v54  ;;  %v4110_v47 = vmul.f32 %v4109_v9, %v9622_v60  ;;  %v4800_v32 = vadd.f32 0.112945676, %v4799_v4  ;;  %5830 = vrcp.f32 %v9782_v56 }
 0x325   : > { %v4787_v33 = vadd.f32 0.0036580483, %v4786_v2  ;;  %v4155_v51 = vmul.f32 3.8918573e-05, %v9785_v38  ;;  %v3643_v43 = vpack.c.bf16 %v3619_v36, %v3618_v11  ;;  %v4739_v6 = vmul.f32 %v4738_v52, %v9695_v25 }
 0x326   : > { %v4098_v5 = vsel %vm9795_vm1, %v4097_v14, %v4093_v31  ;;  %v4774_v63 = vand.u32 2147483647, %v9689_v62  ;;  %v4801_v3 = vmul.f32 %v4800_v32, %v9703_v10  ;;  %v4144_v34 = vmul.f32 2.1237322e-06, %v9785_v38 }
 0x327   : > { %v4156_v40 = vadd.f32 0.001143296, %v4155_v51  ;;  %5594 = vmatmul.msk.bf16.gmra.mxu0 %vm2924_vm8, %v3643_v43  ;;  %v9820_v18 = vadd.f32 %v9468_v19, %v3778_v55  ;;  %v5214_v1 = vpack.c.bf16 %v9283_v44, %v9131_v42  ;;  %v4768_v25 = vmul.f32 %v9736_v22, %v4767_v0 }
 0x328   : > { %v4111_v24 = vadd.f32 0.18741608, %v4110_v47  ;;  %v4802_v61 = vadd.f32 0.4994258, %v4801_v3  ;;  %vm5234_vm2 = vcmask 130048   ;;  %vm4770_vm3 = vweird.f32 %v9689_v62  ;;  %v3780_v32 = vpop.f32.mrf.mxu2 }
 0x329   : > { %v4788_v46 = vmul.f32 %v4787_v33, %v9703_v10  ;;  %v4157_v7 = vmul.f32 %v4156_v40, %v9785_v38  ;;  %v9829_v39 = vmul.f32 0.70710677, %v9820_v18  ;;  %5647 = vmatmul.msk.bf16.vlgmr.msra.gmra.mxu3 %vm5234_vm2, %v5214_v1  ;;  %v5624_v49 = vclamps-f32 %v4739_v6, 1.0 }
 0x32a   : > { %v4099_v16 = vmul.f32 %v4098_v5, %v4074_v26  ;;  %vm4771_vm8 = vweird.f32 %v9736_v22  ;;  %v4776_v42 = vand.u32 2147483648, %v9689_v62  ;;  %v9834_v44 = vpop.eup %5830  ;;  %vm9836_vm4 = vcmp.eq.f32.partialorder %v4774_v63, 8.507059e+37 }
 0x32b   : > { %v4803_v54 = vmul.f32 %v4802_v61, %v9703_v10  ;;  %v4145_v9 = vadd.f32 0.00028619796, %v4144_v34  ;;  %v4158_v48 = vadd.f32 0.014752088, %v4157_v7  ;;  %v4822_v59 = vmul.f32 %v9829_v39, %v9829_v39  ;;  %vm9871_vm5 = vmor %vm4770_vm3, %vm4771_vm8 }
 0x32c   : > { %v4769_v2 = vadd.f32 %v9736_v22, %v4768_v25  ;;  %v4112_v36 = vmul.f32 %v4111_v24, %v9622_v60  ;;  %v9846_v26 = vadd.f32 %v9468_v19, %v3738_v50  ;;  %v5206_v8 = vpack.c.bf16 %v9286_v20, %v9152_v53 }
 0x32d   : > { %v4789_v57 = vadd.f32 0.05243302, %v4788_v46  ;;  %v9850_v4 = vadd.f32 1.0, %v4803_v54  ;;  %v4159_v52 = vmul.f32 %v4158_v48, %v9785_v38  ;;  %v9853_v31 = vmin.f32 %v4822_v59, 16.0 }
 0x32e   : > { %v5163_v14 = vadd.f32 1.0, %v5624_v49  ;;  %v4777_v11 = vor.u32 1.1754944e-38, %v4776_v42  ;;  %v4126_v0 = vmul.f32 %v9834_v44, %v9782_v56  ;;  %v9858_v60 = vmul.f32 0.70710677, %v9846_v26  ;;  %5639 = vmatmul.msk.bf16.vlgmr.msra.gmra.mxu1 %vm5234_vm2, %v5206_v8 }
 0x32f   : > { %v5608_v47 = vclamps-f32 %v4099_v16, 1.0  ;;  %5832 = vrcp.f32 %v9850_v4  ;;  %v9863_v53 = vmul.f32 0.5, %v9709_v13  ;;  %v4146_v20 = vmul.f32 %v4145_v9, %v9785_v38 }
 0x330   : > { %v4754_v55 = vmul.f32 %v4753_v30, %v9500_v17  ;;  %v4113_v51 = vadd.f32 1.1283791, %v4112_v36  ;;  %v4160_v43 = vadd.f32 0.112945676, %v4159_v52  ;;  %v4824_v6 = vmul.f32 2.1237322e-06, %v9853_v31 }
 0x331   : > { %v4773_v13 = vsel %vm9871_vm5, %v9736_v22, %v4769_v2  ;;  %v4790_v5 = vmul.f32 %v4789_v57, %v9703_v10  ;;  %v4835_v17 = vmul.f32 3.8918573e-05, %v9853_v31  ;;  %v4182_v30 = vmul.f32 %v9858_v60, %v9858_v60 }
 0x332   : > { %v9884_v62 = vmul.f32 %v5163_v14, %v9550_v29  ;;  %v4127_v63 = vsub.f32 1.0, %v4126_v0  ;;  %v4161_v3 = vmul.f32 %v4160_v43, %v9785_v38  ;;  %v9888_v34 = vadd.f32 %v9468_v19, %v3780_v32 }
 0x333   : > { %v9890_v40 = vadd.f32 1.0, %v5608_v47  ;;  %v4147_v1 = vadd.f32 0.0036580483, %v4146_v20  ;;  %v4836_v22 = vadd.f32 0.001143296, %v4835_v17  ;;  %v9892_v25 = vmin.f32 %v4182_v30, 16.0 }
 0x334   : > { %v4778_v24 = vsel %vm9836_vm4, %v4777_v11, %v4773_v13  ;;  %v9897_v61 = vmul.f32 %v4113_v51, %v9587_v12  ;;  %v4162_v29 = vadd.f32 0.4994258, %v4161_v3  ;;  %v4825_v46 = vadd.f32 0.00028619796, %v4824_v6 }
 0x335   : > { %v9899_v7 = vpop.eup %5832  ;;  %v4134_v50 = vand.u32 2147483647, %v9782_v56  ;;  %v4791_v49 = vadd.f32 0.18741608, %v4790_v5  ;;  %v4837_v16 = vmul.f32 %v4836_v22, %v9853_v31  ;;  %v4195_v42 = vmul.f32 3.8918573e-05, %v9892_v25 }
 0x336   : > { %v4128_v54 = vmul.f32 %v9834_v44, %v4127_v63  ;;  %v4806_v35 = vmul.f32 %v9899_v7, %v9850_v4  ;;  %v4184_v9 = vmul.f32 2.1237322e-06, %v9892_v25  ;;  %v9909_v12 = vmul.f32 0.70710677, %v9888_v34 }
 0x337   : > { %v9911_v48 = vmul.f32 %v4778_v24, %v4754_v55  ;;  %v4148_v59 = vmul.f32 %v4147_v1, %v9785_v38  ;;  %v4163_v2 = vmul.f32 %v4162_v29, %v9785_v38  ;;  %v4838_v36 = vadd.f32 0.014752088, %v4837_v16 }
 0x338   : > { %v4136_v8 = vand.u32 2147483648, %v9782_v56  ;;  %v4807_v57 = vsub.f32 1.0, %v4806_v35  ;;  %v4826_v52 = vmul.f32 %v4825_v46, %v9853_v31  ;;  %v4196_v14 = vadd.f32 0.001143296, %v4195_v42 }
 0x339   : > { %vm4131_vm6 = vweird.f32 %v9834_v44  ;;  %v4792_v11 = vmul.f32 %v4791_v49, %v9703_v10  ;;  %v9919_v0 = vadd.f32 1.0, %v4163_v2  ;;  %v4839_v47 = vmul.f32 %v4838_v36, %v9853_v31 }
 0x33a   : > { %v4129_v20 = vadd.f32 %v9834_v44, %v4128_v54  ;;  %v4185_v32 = vadd.f32 0.00028619796, %v4184_v9  ;;  %v4197_v55 = vmul.f32 %v4196_v14, %v9892_v25  ;;  %v4862_v33 = vmul.f32 %v9909_v12, %v9909_v12 }
 0x33b   : > { %vm4130_vm7 = vweird.f32 %v9782_v56  ;;  %vm9927_vm9 = vcmp.eq.f32.partialorder %v4134_v50, 8.507059e+37  ;;  %v4149_v43 = vadd.f32 0.05243302, %v4148_v59  ;;  %5834 = vrcp.f32 %v9919_v0 }
 0x33c   : > { %v5625_v10 = vclamps-f32 %v9911_v48, 1.0  ;;  %v4808_v6 = vmul.f32 %v9899_v7, %v4807_v57  ;;  %v4827_v13 = vadd.f32 0.0036580483, %v4826_v52  ;;  %v4840_v5 = vadd.f32 0.112945676, %v4839_v47  ;;  %vm9936_vm10 = vmor %vm4130_vm7, %vm4131_vm6  ;;  %v3740_v52 = vpop.f32.mrf.mxu0 }
 0x33d   : > { %v4137_v56 = vor.u32 1.1754944e-38, %v4136_v8  ;;  %v4793_v30 = vadd.f32 1.1283791, %v4792_v11  ;;  %v4198_v63 = vadd.f32 0.014752088, %v4197_v55  ;;  %v9940_v3 = vmin.f32 %v4862_v33, 16.0 }
 0x33e   : > { %v4133_v1 = vsel %vm9936_vm10, %v9834_v44, %v4129_v20  ;;  %v4816_v22 = vand.u32 2147483648, %v9850_v4  ;;  %v4841_v24 = vmul.f32 %v4840_v5, %v9853_v31  ;;  %v4186_v29 = vmul.f32 %v4185_v32, %v9892_v25 }
 0x33f   : > { %v4150_v46 = vmul.f32 %v4149_v43, %v9785_v38  ;;  %v4199_v50 = vmul.f32 %v4198_v63, %v9892_v25  ;;  %v4864_v49 = vmul.f32 2.1237322e-06, %v9940_v3  ;;  %v4875_v16 = vmul.f32 3.8918573e-05, %v9940_v3 }
 0x340   : > { %v4809_v42 = vadd.f32 %v9899_v7, %v4808_v6  ;;  %vm4811_vm11 = vweird.f32 %v9899_v7  ;;  %v4828_v44 = vmul.f32 %v4827_v13, %v9853_v31  ;;  %v4842_v54 = vadd.f32 0.4994258, %v4841_v24 }
 0x341   : > { %v9955_v35 = vpop.eup %5834  ;;  %v4138_v9 = vsel %vm9927_vm9, %v4137_v56, %v4133_v1  ;;  %v4200_v48 = vadd.f32 0.112945676, %v4199_v50  ;;  %v4865_v59 = vadd.f32 0.00028619796, %v4864_v49  ;;  %v4876_v2 = vadd.f32 0.001143296, %v4875_v16 }
 0x342   : > { %vm4810_vm12 = vweird.f32 %v9850_v4  ;;  %v4814_v36 = vand.u32 2147483647, %v9850_v4  ;;  %v4817_v8 = vor.u32 1.1754944e-38, %v4816_v22  ;;  %v4187_v57 = vadd.f32 0.0036580483, %v4186_v29 }
 0x343   : > { %vm9961_vm13 = vmor %vm4810_vm12, %vm4811_vm11  ;;  %v4151_v11 = vadd.f32 0.18741608, %v4150_v46  ;;  %v4843_v47 = vmul.f32 %v4842_v54, %v9853_v31  ;;  %v4201_v20 = vmul.f32 %v4200_v48, %v9892_v25  ;;  %v4866_v32 = vmul.f32 %v4865_v59, %v9940_v3  ;;  %v11338_v54 = vld [vmem:[#allocation5_spill] sm:$0xff] }
 0x344   : > { %v4139_v55 = vmul.f32 %v4138_v9, %v9897_v61  ;;  %v4813_v4 = vsel %vm9961_vm13, %v9899_v7, %v4809_v42  ;;  %v4166_v33 = vmul.f32 %v9955_v35, %v9919_v0  ;;  %v4829_v51 = vadd.f32 0.05243302, %v4828_v44  ;;  %v11337_v44 = vld [vmem:[#allocation36_spill] sm:$0xff] }
 0x345   : > { %v9974_v43 = vadd.f32 1.0, %v4843_v47  ;;  %v4202_v6 = vadd.f32 0.4994258, %v4201_v20  ;;  %v4877_v13 = vmul.f32 %v4876_v2, %v9940_v3  ;;  %v9978_v5 = vadd.f32 %v9468_v19, %v3740_v52 }
 0x346   : > { %v9982_v17 = vmul.f32 %v9890_v40, %v9559_v37  ;;  %v5164_v61 = vadd.f32 1.0, %v5625_v10  ;;  %vm4815_vm14 = vcmp.eq.f32.partialorder %v4814_v36, 8.507059e+37  ;;  %v4188_v7 = vmul.f32 %v4187_v57, %v9892_v25 }
 0x347   : > { %v4794_v56 = vmul.f32 %v4793_v30, %v9668_v41  ;;  %v4818_v63 = vsel %vm4815_vm14, %v4817_v8, %v4813_v4  ;;  %5836 = vrcp.f32 %v9974_v43  ;;  %v4867_v1 = vadd.f32 0.0036580483, %v4866_v32 }
 0x348   : > { %v5609_v22 = vclamps-f32 %v4139_v55, 1.0  ;;  %v4152_v24 = vmul.f32 %v4151_v11, %v9785_v38  ;;  %v4167_v29 = vsub.f32 1.0, %v4166_v33  ;;  %v4203_v46 = vmul.f32 %v4202_v6, %v9892_v25 }
 0x349   : > { %v9990_v50 = vmul.f32 0.5, %v9820_v18  ;;  %v4830_v37 = vmul.f32 %v4829_v51, %v9853_v31  ;;  %v4878_v40 = vadd.f32 0.014752088, %v4877_v13  ;;  %v9994_v10 = vmul.f32 0.70710677, %v9978_v5 }
 0x34a   : > { %v9997_v41 = vmul.f32 %v5164_v61, %v9687_v58  ;;  %v4819_v30 = vmul.f32 %v4818_v63, %v4794_v56  ;;  %v4189_v49 = vadd.f32 0.05243302, %v4188_v7  ;;  %v9999_v16 = vadd.f32 1.0, %v4203_v46  ;;  %v11341_v56 = vld [vmem:[#allocation9_spill] sm:$0xff] }
 0x34b   : > { %v4868_v38 = vmul.f32 %v4867_v1, %v9940_v3  ;;  %v4879_v42 = vmul.f32 %v4878_v40, %v9940_v3  ;;  %v4222_v18 = vmul.f32 %v9994_v10, %v9994_v10  ;;  %v5215_v9 = vpack.c.bf16 %v11338_v54, %v11337_v44 }
 0x34c   : > { %v10007_v48 = vadd.f32 1.0, %v5609_v22  ;;  %v4153_v59 = vadd.f32 1.1283791, %v4152_v24  ;;  %v4168_v58 = vmul.f32 %v9955_v35, %v4167_v29  ;;  %5838 = vrcp.f32 %v9999_v16 }
 0x34d   : > { %v10011_v2 = vpop.eup %5836  ;;  %vm4170_vm15 = vweird.f32 %v9919_v0  ;;  %v4174_v36 = vand.u32 2147483647, %v9919_v0  ;;  %v4831_v8 = vadd.f32 0.18741608, %v4830_v37  ;;  %v4880_v57 = vadd.f32 0.112945676, %v4879_v42  ;;  %5648 = vmatmul.msk.bf16.gmra.mxu3 %vm5234_vm2, %v5215_v9 }
 0x34e   : > { %v5626_v52 = vclamps-f32 %v4819_v30, 1.0  ;;  %v4176_v14 = vand.u32 2147483648, %v9919_v0  ;;  %v4846_v11 = vmul.f32 %v10011_v2, %v9974_v43  ;;  %v10019_v47 = vmin.f32 %v4222_v18, 16.0 }
 0x34f   : > { %vm4171_vm1 = vweird.f32 %v9955_v35  ;;  %v4190_v20 = vmul.f32 %v4189_v49, %v9892_v25  ;;  %v4869_v32 = vadd.f32 0.05243302, %v4868_v38  ;;  %v4881_v55 = vmul.f32 %v4880_v57, %v9940_v3 }
 0x350   : > { %v4169_v4 = vadd.f32 %v9955_v35, %v4168_v58  ;;  %v4847_v33 = vsub.f32 1.0, %v4846_v11  ;;  %v4224_v51 = vmul.f32 2.1237322e-06, %v10019_v47  ;;  %v4235_v6 = vmul.f32 3.8918573e-05, %v10019_v47  ;;  %vm10041_vm8 = vmor %vm4170_vm15, %vm4171_vm1 }
 0x351   : > { %vm10027_vm3 = vcmp.eq.f32.partialorder %v4174_v36, 8.507059e+37  ;;  %v4832_v61 = vmul.f32 %v4831_v8, %v9853_v31  ;;  %v4882_v7 = vadd.f32 0.4994258, %v4881_v55  ;;  %v5207_v63 = vpack.c.bf16 %v9675_v28, %v11341_v56 }
 0x352   : > { %v10034_v1 = vpop.eup %5838  ;;  %v4177_v22 = vor.u32 1.1754944e-38, %v4176_v14  ;;  %v4848_v24 = vmul.f32 %v10011_v2, %v4847_v33  ;;  %v4225_v29 = vadd.f32 0.00028619796, %v4224_v51  ;;  %v4236_v46 = vadd.f32 0.001143296, %v4235_v6 }
 0x353   : > { %v5165_v37 = vadd.f32 1.0, %v5626_v52  ;;  %v4206_v31 = vmul.f32 %v10034_v1, %v9999_v16  ;;  %v4870_v28 = vmul.f32 %v4869_v32, %v9940_v3  ;;  %v4883_v30 = vmul.f32 %v4882_v7, %v9940_v3  ;;  %5640 = vmatmul.msk.bf16.gmra.mxu1 %vm5234_vm2, %v5207_v63 }
 0x354   : > { %v4173_v49 = vsel %vm10041_vm8, %v9955_v35, %v4169_v4  ;;  %v4191_v38 = vadd.f32 0.18741608, %v4190_v20  ;;  %v4226_v0 = vmul.f32 %v4225_v29, %v10019_v47  ;;  %v4237_v42 = vmul.f32 %v4236_v46, %v10019_v47 }
 0x355   : > { %v4833_v18 = vadd.f32 1.1283791, %v4832_v61  ;;  %vm4851_vm4 = vweird.f32 %v10011_v2  ;;  %v4854_v44 = vand.u32 2147483647, %v9974_v43  ;;  %v10057_v54 = vadd.f32 1.0, %v4883_v30 }
 0x356   : > { %v4849_v9 = vadd.f32 %v10011_v2, %v4848_v24  ;;  %v4207_v58 = vsub.f32 1.0, %v4206_v31  ;;  %v4227_v36 = vadd.f32 0.0036580483, %v4226_v0  ;;  %v4238_v8 = vadd.f32 0.014752088, %v4237_v42 }
 0x357   : > { %v4178_v35 = vsel %vm10027_vm3, %v4177_v22, %v4173_v49  ;;  %v4856_v57 = vand.u32 2147483648, %v9974_v43  ;;  %v4871_v52 = vadd.f32 0.18741608, %v4870_v28  ;;  %5840 = vrcp.f32 %v10057_v54 }
 0x358   : > { %v4154_v14 = vmul.f32 %v4153_v59, %v9721_v15  ;;  %vm4850_vm5 = vweird.f32 %v9974_v43  ;;  %v4192_v11 = vmul.f32 %v4191_v38, %v9892_v25  ;;  %v4228_v20 = vmul.f32 %v4227_v36, %v10019_v47 }
 0x359   : > { %v10069_v32 = vmul.f32 %v5165_v37, %v9800_v45  ;;  %v4834_v55 = vmul.f32 %v4833_v18, %v9829_v39  ;;  %vm10074_vm6 = vmor %vm4850_vm5, %vm4851_vm4  ;;  %v4239_v33 = vmul.f32 %v4238_v8, %v10019_v47  ;;  %v5216_v15 = vpack.c.bf16 %v9884_v62, %v9717_v27  ;;  %v3783_v62 = vpop.f32.mrf.mxu2 }
 0x35a   : > { %v4179_v43 = vmul.f32 %v4178_v35, %v4154_v14  ;;  %v4853_v25 = vsel %vm10074_vm6, %v10011_v2, %v4849_v9  ;;  %v4208_v45 = vmul.f32 %v10034_v1, %v4207_v58  ;;  %v4229_v59 = vadd.f32 0.05243302, %v4228_v20 }
 0x35b   : > { %vm4855_vm7 = vcmp.eq.f32.partialorder %v4854_v44, 8.507059e+37  ;;  %v4857_v39 = vor.u32 1.1754944e-38, %v4856_v57  ;;  %v4872_v51 = vmul.f32 %v4871_v52, %v9940_v3  ;;  %v4240_v6 = vadd.f32 0.112945676, %v4239_v33  ;;  %v3743_v33 = vpop.f32.mrf.mxu0 }
 0x35c   : > { %v4193_v13 = vadd.f32 1.1283791, %v4192_v11  ;;  %vm4210_vm9 = vweird.f32 %v9999_v16  ;;  %v4214_v61 = vand.u32 2147483647, %v9999_v16  ;;  %v4216_v27 = vand.u32 2147483648, %v9999_v16 }
 0x35d   : > { %v5841_v7 = vpop.eup %5840  ;;  %v4858_v56 = vsel %vm4855_vm7, %v4857_v39, %v4853_v25  ;;  %v4230_v2 = vmul.f32 %v4229_v59, %v10019_v47  ;;  %v4241_v63 = vmul.f32 %v4240_v6, %v10019_v47  ;;  %5649 = vmatmul.msk.bf16.gmra.mxu3 %vm5234_vm2, %v5216_v15  ;;  %v10093_v22 = vadd.f32 %v9468_v19, %v3783_v62 }
 0x35e   : > { %v5610_v3 = vclamps-f32 %v4179_v43, 1.0  ;;  %v4209_v24 = vadd.f32 %v10034_v1, %v4208_v45  ;;  %vm4211_vm10 = vweird.f32 %v10034_v1  ;;  %v4886_v29 = vmul.f32 %v5841_v7, %v10057_v54 }
 0x35f   : > { %v4873_v46 = vadd.f32 1.1283791, %v4872_v51  ;;  %v4242_v37 = vadd.f32 0.4994258, %v4241_v63  ;;  %v5208_v40 = vpack.c.bf16 %v9982_v17, %v9732_v21  ;;  %v10101_v31 = vmul.f32 0.70710677, %v10093_v22  ;;  %vm10110_vm12 = vmor %vm4210_vm9, %vm4211_vm10 }
 0x360   : > { %v4859_v28 = vmul.f32 %v4858_v56, %v4834_v55  ;;  %vm10103_vm11 = vcmp.eq.f32.partialorder %v4214_v61, 8.507059e+37  ;;  %v4887_v19 = vsub.f32 1.0, %v4886_v29  ;;  %v4894_v49 = vand.u32 2147483647, %v10057_v54 }
 0x361   : > { %v4896_v0 = vand.u32 2147483648, %v10057_v54  ;;  %v4231_v21 = vadd.f32 0.18741608, %v4230_v2  ;;  %v4243_v17 = vmul.f32 %v4242_v37, %v10019_v47  ;;  %v4902_v42 = vmul.f32 %v10101_v31, %v10101_v31  ;;  %v3785_v52 = vpop.f32.mrf.mxu2 }
 0x362   : > { %v4213_v18 = vsel %vm10110_vm12, %v10034_v1, %v4209_v24  ;;  %v4217_v44 = vor.u32 1.1754944e-38, %v4216_v27  ;;  %v4888_v9 = vmul.f32 %v5841_v7, %v4887_v19  ;;  %vm4891_vm13 = vweird.f32 %v5841_v7 }
 0x363   : > { %v5149_v16 = vadd.f32 1.0, %v5610_v3  ;;  %v4874_v58 = vmul.f32 %v4873_v46, %v9909_v12  ;;  %v10122_v36 = vadd.f32 1.0, %v4243_v17  ;;  %5641 = vmatmul.msk.bf16.gmra.mxu1 %vm5234_vm2, %v5208_v40  ;;  %v10125_v8 = vmin.f32 %v4902_v42, 16.0 }
 0x364   : > { %v5627_v35 = vclamps-f32 %v4859_v28, 1.0  ;;  %v4889_v57 = vadd.f32 %v5841_v7, %v4888_v9  ;;  %vm4890_vm14 = vweird.f32 %v10057_v54  ;;  %vm4895_vm15 = vcmp.eq.f32.partialorder %v4894_v49, 8.507059e+37  ;;  %v10137_v54 = vld [vmem:[%s10794_s6] ss:$0 sm:$0xff] }
 0x365   : > { %v4218_v1 = vsel %vm10103_vm11, %v4217_v44, %v4213_v18  ;;  %vm4892_vm1 = vmor %vm4890_vm14, %vm4891_vm13  ;;  %v4897_v14 = vor.u32 1.1754944e-38, %v4896_v0  ;;  %v4232_v11 = vmul.f32 %v4231_v21, %v10019_v47  ;;  %5842 = vrcp.f32 %v10122_v36  ;;  %v3745_v18 = vpop.f32.mrf.mxu0 }
 0x366   : > { %v4893_v12 = vsel %vm4892_vm1, %v5841_v7, %v4889_v57  ;;  %v4904_v20 = vmul.f32 2.1237322e-06, %v10125_v8  ;;  %v4915_v55 = vmul.f32 3.8918573e-05, %v10125_v8  ;;  %v10140_v4 = vadd.f32 %v10137_v54, %v3785_v52 }
 0x367   : > { %v5181_v15 = vmul.f32 %v5149_v16, %v9863_v53  ;;  %v4194_v47 = vmul.f32 %v4193_v13, %v9858_v60  ;;  %v4898_v43 = vsel %vm4895_vm15, %v4897_v14, %v4893_v12  ;;  %v10145_v25 = vadd.f32 %v10137_v54, %v3743_v33 }
 0x368   : > { %v5166_v45 = vadd.f32 1.0, %v5627_v35  ;;  %v4899_v59 = vmul.f32 %v4898_v43, %v4874_v58  ;;  %v4905_v39 = vadd.f32 0.00028619796, %v4904_v20  ;;  %v4916_v51 = vadd.f32 0.001143296, %v4915_v55 }
 0x369   : > { %v10147_v6 = vmul.f32 %v4218_v1, %v4194_v47  ;;  %v5217_v61 = vpack.c.bf16 %v10069_v32, %v9997_v41  ;;  %v10152_v27 = vmul.f32 0.70710677, %v10140_v4  ;;  %v10155_v53 = vmul.f32 0.70710677, %v10145_v25 }
 0x36a   : > { %v5180_v60 = vmul.f32 %v10007_v48, %v9698_v23  ;;  %v4233_v13 = vadd.f32 1.1283791, %v4232_v11  ;;  %v4906_v62 = vmul.f32 %v4905_v39, %v10125_v8  ;;  %v4917_v7 = vmul.f32 %v4916_v51, %v10125_v8 }
 0x36b   : > { %v5843_v56 = vpop.eup %5842  ;;  %v3823_v2 = vmul.f32 0.5, %v9888_v34  ;;  %v4256_v63 = vand.u32 2147483648, %v10122_v36  ;;  %v4942_v41 = vmul.f32 %v10152_v27, %v10152_v27  ;;  %v4262_v32 = vmul.f32 %v10155_v53, %v10155_v53 }
 0x36c   : > { %v10168_v3 = vmul.f32 %v5166_v45, %v9990_v50  ;;  %v5628_v23 = vclamps-f32 %v4899_v59, 1.0  ;;  %v4246_v48 = vmul.f32 %v5843_v56, %v10122_v36  ;;  %v5209_v24 = vpack.c.bf16 %v5181_v15, %v5180_v60 }
 0x36d   : > { %v5611_v29 = vclamps-f32 %v10147_v6, 1.0  ;;  %5650 = vmatmul.msk.bf16.gmra.mxu3 %vm5234_vm2, %v5217_v61  ;;  %v4918_v34 = vadd.f32 0.014752088, %v4917_v7  ;;  %v10173_v46 = vmin.f32 %v4942_v41, 16.0  ;;  %v10175_v37 = vmin.f32 %v4262_v32, 16.0 }
 0x36e   : > { %v4234_v40 = vmul.f32 %v4233_v13, %v9994_v10  ;;  %v4247_v28 = vsub.f32 1.0, %v4246_v48  ;;  %v4254_v30 = vand.u32 2147483647, %v10122_v36  ;;  %v4907_v50 = vadd.f32 0.0036580483, %v4906_v62 }
 0x36f   : > { %v4257_v19 = vor.u32 1.1754944e-38, %v4256_v63  ;;  %v4919_v49 = vmul.f32 %v4918_v34, %v10125_v8  ;;  %v4944_v38 = vmul.f32 2.1237322e-06, %v10173_v46  ;;  %v4955_v0 = vmul.f32 3.8918573e-05, %v10173_v46 }
 0x370   : > { %v5167_v21 = vadd.f32 1.0, %v5628_v23  ;;  %v4248_v17 = vmul.f32 %v5843_v56, %v4247_v28  ;;  %vm4251_vm3 = vweird.f32 %v5843_v56  ;;  %v4275_v42 = vmul.f32 3.8918573e-05, %v10175_v37 }
 0x371   : > { %vm4250_vm8 = vweird.f32 %v10122_v36  ;;  %v4920_v10 = vadd.f32 0.112945676, %v4919_v49  ;;  %v4945_v44 = vadd.f32 0.00028619796, %v4944_v38  ;;  %v4956_v9 = vadd.f32 0.001143296, %v4955_v0 }
 0x372   : > { %v4249_v16 = vadd.f32 %v5843_v56, %v4248_v17  ;;  %v4908_v58 = vmul.f32 %v4907_v50, %v10125_v8  ;;  %v4264_v35 = vmul.f32 2.1237322e-06, %v10175_v37  ;;  %v4276_v57 = vadd.f32 0.001143296, %v4275_v42  ;;  %vm4252_vm4 = vmor %vm4250_vm8, %vm4251_vm3 }
 0x373   : > { %5642 = vmatmul.msk.bf16.gmra.mxu1 %vm5234_vm2, %v5209_v24  ;;  %v4921_v52 = vmul.f32 %v4920_v10, %v10125_v8  ;;  %v4946_v1 = vmul.f32 %v4945_v44, %v10173_v46  ;;  %v4957_v14 = vmul.f32 %v4956_v9, %v10173_v46  ;;  %v10191_v36 = vadd.f32 %v10137_v54, %v3745_v18 }
 0x374   : > { %v5199_v11 = vmul.f32 %v5167_v21, %v3823_v2  ;;  %v4253_v12 = vsel %vm4252_vm4, %v5843_v56, %v4249_v16  ;;  %vm4255_vm5 = vcmp.eq.f32.partialorder %v4254_v30, 8.507059e+37  ;;  %v4277_v20 = vmul.f32 %v4276_v57, %v10175_v37  ;;  %v3788_v2 = vpop.f32.mrf.mxu2 }
 0x375   : > { %v4258_v55 = vsel %vm4255_vm5, %v4257_v19, %v4253_v12  ;;  %v4922_v33 = vadd.f32 0.4994258, %v4921_v52  ;;  %v4947_v15 = vadd.f32 0.0036580483, %v4946_v1  ;;  %v4958_v47 = vadd.f32 0.014752088, %v4957_v14 }
 0x376   : > { %v4259_v43 = vmul.f32 %v4258_v55, %v4234_v40  ;;  %v4909_v45 = vadd.f32 0.05243302, %v4908_v58  ;;  %v4265_v59 = vadd.f32 0.00028619796, %v4264_v35  ;;  %v4278_v39 = vadd.f32 0.014752088, %v4277_v20 }
 0x377   : > { %v4923_v51 = vmul.f32 %v4922_v33, %v10125_v8  ;;  %v4948_v6 = vmul.f32 %v4947_v15, %v10173_v46  ;;  %v4959_v61 = vmul.f32 %v4958_v47, %v10173_v46  ;;  %v10198_v60 = vmul.f32 0.70710677, %v10191_v36 }
 0x378   : > { %v5150_v13 = vadd.f32 1.0, %v5611_v29  ;;  %v3807_v62 = vmul.f32 0.5, %v9978_v5  ;;  %v5612_v7 = vclamps-f32 %v4259_v43, 1.0  ;;  %v4279_v56 = vmul.f32 %v4278_v39, %v10175_v37 }
 0x379   : > { %v10202_v63 = vadd.f32 1.0, %v4923_v51  ;;  %v5218_v41 = vpack.c.bf16 %v5199_v11, %v10168_v3  ;;  %v4960_v32 = vadd.f32 0.112945676, %v4959_v61  ;;  %v4302_v23 = vmul.f32 %v10198_v60, %v10198_v60 }
 0x37a   : > { %v5151_v48 = vadd.f32 1.0, %v5612_v7  ;;  %v4910_v24 = vmul.f32 %v4909_v45, %v10125_v8  ;;  %v4266_v34 = vmul.f32 %v4265_v59, %v10175_v37  ;;  %v4280_v29 = vadd.f32 0.112945676, %v4279_v56 }
 0x37b   : > { %v3806_v5 = vmul.f32 0.5, %v9846_v26  ;;  %5844 = vrcp.f32 %v10202_v63  ;;  %v4949_v40 = vadd.f32 0.05243302, %v4948_v6  ;;  %v4961_v30 = vmul.f32 %v4960_v32, %v10173_v46 }
 0x37c   : > { %v5183_v28 = vmul.f32 %v5151_v48, %v3807_v62  ;;  %v4281_v3 = vmul.f32 %v4280_v29, %v10175_v37  ;;  %v10214_v19 = vmin.f32 %v4302_v23, 16.0  ;;  %v4911_v49 = vadd.f32 0.18741608, %v4910_v24  ;;  %v3790_v52 = vpop.f32.mrf.mxu2 }
 0x37d   : > { %v5182_v50 = vmul.f32 %v5150_v13, %v3806_v5  ;;  %5651 = vmatmul.msk.bf16.gmra.mxu3 %vm5234_vm2, %v5218_v41  ;;  %v4962_v38 = vadd.f32 0.4994258, %v4961_v30  ;;  %v4267_v0 = vadd.f32 0.0036580483, %v4266_v34  ;;  %v4950_v17 = vmul.f32 %v4949_v40, %v10173_v46 }
 0x37e   : > { %v4282_v26 = vadd.f32 0.4994258, %v4281_v3  ;;  %v4315_v42 = vmul.f32 3.8918573e-05, %v10214_v19  ;;  %v4304_v10 = vmul.f32 2.1237322e-06, %v10214_v19  ;;  %v4912_v58 = vmul.f32 %v4911_v49, %v10125_v8 }
 0x37f   : > { %v5210_v21 = vpack.c.bf16 %v5183_v28, %v5182_v50  ;;  %v4963_v18 = vmul.f32 %v4962_v38, %v10173_v46  ;;  %v4951_v1 = vadd.f32 0.18741608, %v4950_v17  ;;  %v4268_v14 = vmul.f32 %v4267_v0, %v10175_v37  ;;  %v3748_v50 = vpop.f32.mrf.mxu0 }
 0x380   : > { %v4283_v9 = vmul.f32 %v4282_v26, %v10175_v37  ;;  %v4316_v16 = vadd.f32 0.001143296, %v4315_v42  ;;  %v4305_v55 = vadd.f32 0.00028619796, %v4304_v10  ;;  %v10232_v8 = vadd.f32 %v10137_v54, %v3788_v2 }
 0x381   : > { %v5845_v44 = vpop.eup %5844  ;;  %v10223_v57 = vadd.f32 1.0, %v4963_v18  ;;  %v10235_v33 = vadd.f32 %v10137_v54, %v3790_v52  ;;  %v4913_v15 = vadd.f32 1.1283791, %v4912_v58  ;;  %v4934_v43 = vand.u32 2147483647, %v10202_v63 }
 0x382   : > { %v4926_v35 = vmul.f32 %v5845_v44, %v10202_v63  ;;  %v10227_v11 = vadd.f32 1.0, %v4283_v9  ;;  %v4317_v12 = vmul.f32 %v4316_v16, %v10214_v19  ;;  %v4936_v45 = vand.u32 2147483648, %v10202_v63 }
 0x383   : > { %5643 = vmatmul.msk.bf16.gmra.mxu1 %vm5234_vm2, %v5210_v21  ;;  %5846 = vrcp.f32 %v10223_v57  ;;  %v4952_v39 = vmul.f32 %v4951_v1, %v10173_v46  ;;  %v4269_v51 = vadd.f32 0.05243302, %v4268_v14  ;;  %v4306_v6 = vmul.f32 %v4305_v55, %v10214_v19 }
 0x384   : > { %v4927_v20 = vsub.f32 1.0, %v4926_v35  ;;  %5848 = vrcp.f32 %v10227_v11  ;;  %v4318_v59 = vadd.f32 0.014752088, %v4317_v12  ;;  %v10243_v61 = vmul.f32 0.70710677, %v10232_v8 }
 0x385   : > { %vm4931_vm6 = vweird.f32 %v5845_v44  ;;  %v10247_v7 = vmul.f32 0.70710677, %v10235_v33  ;;  %v4914_v2 = vmul.f32 %v4913_v15, %v10101_v31  ;;  %vm4930_vm7 = vweird.f32 %v10202_v63 }
 0x386   : > { %v4928_v47 = vmul.f32 %v5845_v44, %v4927_v20  ;;  %v4319_v62 = vmul.f32 %v4318_v59, %v10214_v19  ;;  %v4982_v41 = vmul.f32 %v10243_v61, %v10243_v61  ;;  %vm10253_vm9 = vcmp.eq.f32.partialorder %v4934_v43, 8.507059e+37  ;;  %vm10258_vm10 = vmor %vm4930_vm7, %vm4931_vm6 }
 0x387   : > { %v4937_v32 = vor.u32 1.1754944e-38, %v4936_v45  ;;  %v4953_v24 = vadd.f32 1.1283791, %v4952_v39  ;;  %v4270_v34 = vmul.f32 %v4269_v51, %v10175_v37  ;;  %v4307_v31 = vadd.f32 0.0036580483, %v4306_v6 }
 0x388   : > { %v4929_v13 = vadd.f32 %v5845_v44, %v4928_v47  ;;  %v4320_v29 = vadd.f32 0.112945676, %v4319_v62  ;;  %v10267_v28 = vmin.f32 %v4982_v41, 16.0  ;;  %v5022_v30 = vmul.f32 %v10247_v7, %v10247_v7 }
 0x389   : > { %v5847_v56 = vpop.eup %5846  ;;  %vm4970_vm11 = vweird.f32 %v10223_v57  ;;  %v4974_v3 = vand.u32 2147483647, %v10223_v57  ;;  %v4976_v49 = vand.u32 2147483648, %v10223_v57  ;;  %v4308_v18 = vmul.f32 %v4307_v31, %v10214_v19 }
 0x38a   : > { %v4966_v23 = vmul.f32 %v5847_v56, %v10223_v57  ;;  %v10263_v5 = vpop.eup %5848  ;;  %v4933_v63 = vsel %vm10258_vm10, %v5845_v44, %v4929_v13  ;;  %v4321_v38 = vmul.f32 %v4320_v29, %v10214_v19  ;;  %vm4971_vm12 = vweird.f32 %v5847_v56 }
 0x38b   : > { %v4984_v21 = vmul.f32 2.1237322e-06, %v10267_v28  ;;  %v4995_v17 = vmul.f32 3.8918573e-05, %v10267_v28  ;;  %v4938_v26 = vsel %vm10253_vm9, %v4937_v32, %v4933_v63  ;;  %v4286_v42 = vmul.f32 %v10263_v5, %v10227_v11  ;;  %vm4972_vm13 = vmor %vm4970_vm11, %vm4971_vm12 }
 0x38c   : > { %v4967_v40 = vsub.f32 1.0, %v4966_v23  ;;  %v4322_v10 = vadd.f32 0.4994258, %v4321_v38  ;;  %v10282_v58 = vmin.f32 %v5022_v30, 16.0  ;;  %v4954_v35 = vmul.f32 %v4953_v24, %v10152_v27 }
 0x38d   : > { %v4985_v9 = vadd.f32 0.00028619796, %v4984_v21  ;;  %v4996_v16 = vadd.f32 0.001143296, %v4995_v17  ;;  %v4977_v52 = vor.u32 1.1754944e-38, %v4976_v49  ;;  %v4939_v12 = vmul.f32 %v4938_v26, %v4914_v2 }
 0x38e   : > { %v4968_v0 = vmul.f32 %v5847_v56, %v4967_v40  ;;  %v4271_v1 = vadd.f32 0.18741608, %v4270_v34  ;;  %v4323_v14 = vmul.f32 %v4322_v10, %v10214_v19  ;;  %vm4975_vm14 = vcmp.eq.f32.partialorder %v4974_v3, 8.507059e+37 }
 0x38f   : > { %v4997_v55 = vmul.f32 %v4996_v16, %v10267_v28  ;;  %v4986_v43 = vmul.f32 %v4985_v9, %v10267_v28  ;;  %v4287_v59 = vsub.f32 1.0, %v4286_v42  ;;  %v4309_v27 = vadd.f32 0.05243302, %v4308_v18 }
 0x390   : > { %v4969_v44 = vadd.f32 %v5847_v56, %v4968_v0  ;;  %v10289_v47 = vadd.f32 1.0, %v4323_v14  ;;  %v5024_v57 = vmul.f32 2.1237322e-06, %v10282_v58  ;;  %v4272_v39 = vmul.f32 %v4271_v1, %v10175_v37 }
 0x391   : > { %v5629_v51 = vclamps-f32 %v4939_v12, 1.0  ;;  %v4998_v13 = vadd.f32 0.014752088, %v4997_v55  ;;  %v10296_v62 = vadd.f32 %v10137_v54, %v3748_v50  ;;  %v3824_v2 = vmul.f32 0.5, %v10093_v22 }
 0x392   : > { %v4973_v20 = vsel %vm4972_vm13, %v5847_v56, %v4969_v44  ;;  %5850 = vrcp.f32 %v10289_v47  ;;  %v3750_v56 = vpop.f32.mrf.mxu0  ;;  %v3825_v41 = vmul.f32 0.5, %v10140_v4  ;;  %v4987_v46 = vadd.f32 0.0036580483, %v4986_v43 }
 0x393   : > { %v4978_v15 = vsel %vm4975_vm14, %v4977_v52, %v4973_v20  ;;  %v5035_v32 = vmul.f32 3.8918573e-05, %v10282_v58  ;;  %v4288_v23 = vmul.f32 %v10263_v5, %v4287_v59  ;;  %v4310_v37 = vmul.f32 %v4309_v27, %v10214_v19 }
 0x394   : > { %v4979_v45 = vmul.f32 %v4978_v15, %v4954_v35  ;;  %v4999_v48 = vmul.f32 %v4998_v13, %v10267_v28  ;;  %v5025_v24 = vadd.f32 0.00028619796, %v5024_v57  ;;  %v4273_v31 = vadd.f32 1.1283791, %v4272_v39 }
 0x395   : > { %v5036_v29 = vadd.f32 0.001143296, %v5035_v32  ;;  %v10305_v63 = vadd.f32 %v10137_v54, %v3750_v56  ;;  %v5168_v40 = vadd.f32 1.0, %v5629_v51  ;;  %vm4290_vm15 = vweird.f32 %v10227_v11 }
 0x396   : > { %v5630_v6 = vclamps-f32 %v4979_v45, 1.0  ;;  %v5000_v22 = vadd.f32 0.112945676, %v4999_v48  ;;  %v10309_v4 = vmul.f32 0.70710677, %v10296_v62  ;;  %vm4291_vm1 = vweird.f32 %v10263_v5 }
 0x397   : > { %v4294_v50 = vand.u32 2147483647, %v10227_v11  ;;  %v4988_v3 = vmul.f32 %v4987_v46, %v10267_v28  ;;  %v5037_v49 = vmul.f32 %v5036_v29, %v10282_v58  ;;  %v4289_v38 = vadd.f32 %v10263_v5, %v4288_v23  ;;  %vm10337_vm3 = vmor %vm4290_vm15, %vm4291_vm1  ;;  %v3793_v46 = vpop.f32.mrf.mxu2 }
 0x398   : > { %v5169_v34 = vadd.f32 1.0, %v5630_v6  ;;  %v10311_v30 = vpop.eup %5850  ;;  %v4311_v0 = vadd.f32 0.18741608, %v4310_v37  ;;  %v5001_v21 = vmul.f32 %v5000_v22, %v10267_v28  ;;  %v5026_v17 = vmul.f32 %v5025_v24, %v10282_v58 }
 0x399   : > { %v5038_v42 = vadd.f32 0.014752088, %v5037_v49  ;;  %v4342_v18 = vmul.f32 %v10309_v4, %v10309_v4  ;;  %v10323_v10 = vmul.f32 0.70710677, %v10305_v63  ;;  %v5200_v44 = vmul.f32 %v5168_v40, %v3824_v2 }
 0x39a   : > { %v5201_v26 = vmul.f32 %v5169_v34, %v3825_v41  ;;  %v4296_v9 = vand.u32 2147483648, %v10227_v11  ;;  %v4326_v16 = vmul.f32 %v10311_v30, %v10289_v47  ;;  %v5002_v35 = vadd.f32 0.4994258, %v5001_v21 }
 0x39b   : > { %v4989_v52 = vadd.f32 0.05243302, %v4988_v3  ;;  %v5039_v1 = vmul.f32 %v5038_v42, %v10282_v58  ;;  %v10329_v14 = vmin.f32 %v4342_v18, 16.0  ;;  %v4382_v12 = vmul.f32 %v10323_v10, %v10323_v10 }
 0x39c   : > { %vm10341_vm8 = vcmp.eq.f32.partialorder %v4294_v50, 8.507059e+37  ;;  %v4312_v15 = vmul.f32 %v4311_v0, %v10214_v19  ;;  %v5003_v43 = vmul.f32 %v5002_v35, %v10267_v28  ;;  %v5027_v45 = vadd.f32 0.0036580483, %v5026_v17 }
 0x39d   : > { %v4293_v59 = vsel %vm10337_vm3, %v10263_v5, %v4289_v38  ;;  %v5040_v27 = vadd.f32 0.112945676, %v5039_v1  ;;  %v4344_v11 = vmul.f32 2.1237322e-06, %v10329_v14  ;;  %v5219_v57 = vpack.c.bf16 %v5201_v26, %v5200_v44 }
 0x39e   : > { %v4297_v39 = vor.u32 1.1754944e-38, %v4296_v9  ;;  %v4327_v51 = vsub.f32 1.0, %v4326_v16  ;;  %v10351_v6 = vadd.f32 1.0, %v5003_v43  ;;  %v4355_v13 = vmul.f32 3.8918573e-05, %v10329_v14 }
 0x39f   : > { %v4990_v56 = vmul.f32 %v4989_v52, %v10267_v28  ;;  %v5041_v19 = vmul.f32 %v5040_v27, %v10282_v58  ;;  %v4345_v2 = vadd.f32 0.00028619796, %v4344_v11  ;;  %v10356_v41 = vmin.f32 %v4382_v12, 16.0  ;;  %5652 = vmatmul.msk.bf16.gmra.mxu3 %vm5234_vm2, %v5219_v57 }
 0x3a0   : > { %v10360_v5 = vmul.f32 0.5, %v10145_v25  ;;  %v4298_v32 = vsel %vm10341_vm8, %v4297_v39, %v4293_v59  ;;  %5852 = vrcp.f32 %v10351_v6  ;;  %v5028_v23 = vmul.f32 %v5027_v45, %v10282_v58 }
 0x3a1   : > { %v4274_v37 = vmul.f32 %v4273_v31, %v10155_v53  ;;  %v10368_v48 = vmul.f32 0.5, %v10191_v36  ;;  %v4313_v24 = vadd.f32 1.1283791, %v4312_v15  ;;  %v5042_v34 = vadd.f32 0.4994258, %v5041_v19 }
 0x3a2   : > { %v4328_v29 = vmul.f32 %v10311_v30, %v4327_v51  ;;  %v4346_v40 = vmul.f32 %v4345_v2, %v10329_v14  ;;  %v4356_v25 = vadd.f32 0.001143296, %v4355_v13  ;;  %v10373_v22 = vadd.f32 %v10137_v54, %v3793_v46 }
 0x3a3   : > { %v4299_v50 = vmul.f32 %v4298_v32, %v4274_v37  ;;  %v4991_v3 = vadd.f32 0.18741608, %v4990_v56  ;;  %v5043_v49 = vmul.f32 %v5042_v34, %v10282_v58  ;;  %v4384_v38 = vmul.f32 2.1237322e-06, %v10356_v41 }
 0x3a4   : > { %v5029_v53 = vadd.f32 0.05243302, %v5028_v23  ;;  %v4347_v31 = vadd.f32 0.0036580483, %v4346_v40  ;;  %v4357_v36 = vmul.f32 %v4356_v25, %v10329_v14  ;;  %v4395_v0 = vmul.f32 3.8918573e-05, %v10356_v41  ;;  %v3753_v19 = vpop.f32.mrf.mxu0 }
 0x3a5   : > { %vm4331_vm4 = vweird.f32 %v10311_v30  ;;  %v4336_v21 = vand.u32 2147483648, %v10289_v47  ;;  %v10381_v17 = vadd.f32 1.0, %v5043_v49  ;;  %v4385_v26 = vadd.f32 0.00028619796, %v4384_v38 }
 0x3a6   : > { %v10383_v42 = vpop.eup %5852  ;;  %v4329_v18 = vadd.f32 %v10311_v30, %v4328_v29  ;;  %v4358_v44 = vadd.f32 0.014752088, %v4357_v36  ;;  %v4396_v9 = vadd.f32 0.001143296, %v4395_v0  ;;  %v10387_v16 = vmul.f32 0.70710677, %v10373_v22 }
 0x3a7   : > { %vm4330_vm5 = vweird.f32 %v10289_v47  ;;  %v5006_v35 = vmul.f32 %v10383_v42, %v10351_v6  ;;  %5854 = vrcp.f32 %v10381_v17  ;;  %v4348_v52 = vmul.f32 %v4347_v31, %v10329_v14 }
 0x3a8   : > { %v5613_v1 = vclamps-f32 %v4299_v50, 1.0  ;;  %v4334_v12 = vand.u32 2147483647, %v10289_v47  ;;  %v4992_v20 = vmul.f32 %v4991_v3, %v10267_v28  ;;  %v5030_v55 = vmul.f32 %v5029_v53, %v10282_v58  ;;  %vm10399_vm6 = vmor %vm4330_vm5, %vm4331_vm4 }
 0x3a9   : > { %v5007_v43 = vsub.f32 1.0, %v5006_v35  ;;  %v4359_v45 = vmul.f32 %v4358_v44, %v10329_v14  ;;  %v4386_v59 = vmul.f32 %v4385_v26, %v10356_v41  ;;  %v4397_v27 = vmul.f32 %v4396_v9, %v10356_v41 }
 0x3aa   : > { %v4314_v11 = vmul.f32 %v4313_v24, %v10198_v60  ;;  %v4333_v28 = vsel %vm10399_vm6, %v10311_v30, %v4329_v18  ;;  %v4337_v47 = vor.u32 1.1754944e-38, %v4336_v21  ;;  %v5062_v57 = vmul.f32 %v10387_v16, %v10387_v16 }
 0x3ab   : > { %v5008_v39 = vmul.f32 %v10383_v42, %v5007_v43  ;;  %v4349_v51 = vadd.f32 0.05243302, %v4348_v52  ;;  %v4360_v13 = vadd.f32 0.112945676, %v4359_v45  ;;  %v4398_v56 = vadd.f32 0.014752088, %v4397_v27 }
 0x3ac   : > { %v5152_v2 = vadd.f32 1.0, %v5613_v1  ;;  %vm4335_vm7 = vcmp.eq.f32.partialorder %v4334_v12, 8.507059e+37  ;;  %v4993_v46 = vadd.f32 1.1283791, %v4992_v20  ;;  %v4387_v32 = vadd.f32 0.0036580483, %v4386_v59 }
 0x3ad   : > { %v10413_v23 = vpop.eup %5854  ;;  %v4338_v60 = vsel %vm4335_vm7, %v4337_v47, %v4333_v28  ;;  %v5031_v37 = vadd.f32 0.18741608, %v5030_v55  ;;  %v4361_v30 = vmul.f32 %v4360_v13, %v10329_v14  ;;  %v4399_v24 = vmul.f32 %v4398_v56, %v10356_v41  ;;  %v5292_v13 = vpop.f32.mrf.mxu1 }
 0x3ae   : > { %vm5011_vm9 = vweird.f32 %v10383_v42  ;;  %v5046_v34 = vmul.f32 %v10413_v23, %v10381_v17  ;;  %v10420_v29 = vmin.f32 %v5062_v57, 16.0  ;;  %v10423_v40 = vadd.f32 %v10137_v54, %v3753_v19  ;;  %v5332_v56 = vpop.f32.mrf.mxu3 }
 0x3af   : > { %v5009_v25 = vadd.f32 %v10383_v42, %v5008_v39  ;;  %v4350_v50 = vmul.f32 %v4349_v51, %v10329_v14  ;;  %v4362_v3 = vadd.f32 0.4994258, %v4361_v30  ;;  %v4400_v49 = vadd.f32 0.112945676, %v4399_v24  ;;  %v10466_v51 = vld [vmem:[%s10796_s8] ss:$0 sm:$0xff] }
 0x3b0   : > { %v4339_v38 = vmul.f32 %v4338_v60, %v4314_v11  ;;  %vm5010_vm10 = vweird.f32 %v10351_v6  ;;  %v5016_v53 = vand.u32 2147483648, %v10351_v6  ;;  %v4388_v31 = vmul.f32 %v4387_v32, %v10356_v41 }
 0x3b1   : > { %v5014_v36 = vand.u32 2147483647, %v10351_v6  ;;  %v5047_v0 = vsub.f32 1.0, %v5046_v34  ;;  %v4363_v21 = vmul.f32 %v4362_v3, %v10329_v14  ;;  %v4401_v26 = vmul.f32 %v4400_v49, %v10356_v41  ;;  %vm10435_vm11 = vmor %vm5010_vm10, %vm5011_vm9 }
 0x3b2   : > { %v5032_v44 = vmul.f32 %v5031_v37, %v10282_v58  ;;  %v5064_v9 = vmul.f32 2.1237322e-06, %v10420_v29  ;;  %v5075_v35 = vmul.f32 3.8918573e-05, %v10420_v29  ;;  %v10443_v52 = vmul.f32 0.70710677, %v10423_v40 }
 0x3b3   : > { %v5013_v6 = vsel %vm10435_vm11, %v10383_v42, %v5009_v25  ;;  %v4351_v1 = vadd.f32 0.18741608, %v4350_v50  ;;  %v10448_v12 = vadd.f32 1.0, %v4363_v21  ;;  %v4402_v20 = vadd.f32 0.4994258, %v4401_v26 }
 0x3b4   : > { %v5614_v55 = vclamps-f32 %v4339_v38, 1.0  ;;  %v10451_v15 = vmul.f32 0.5, %v10232_v8  ;;  %v5017_v58 = vor.u32 1.1754944e-38, %v5016_v53  ;;  %v4389_v43 = vadd.f32 0.05243302, %v4388_v31 }
 0x3b5   : > { %vm5015_vm12 = vcmp.eq.f32.partialorder %v5014_v36, 8.507059e+37  ;;  %v5048_v45 = vmul.f32 %v10413_v23, %v5047_v0  ;;  %5856 = vrcp.f32 %v10448_v12  ;;  %v5076_v59 = vadd.f32 0.001143296, %v5075_v35  ;;  %v3795_v36 = vpop.f32.mrf.mxu2 }
 0x3b6   : > { %v5018_v27 = vsel %vm5015_vm12, %v5017_v58, %v5013_v6  ;;  %v4403_v11 = vmul.f32 %v4402_v20, %v10356_v41  ;;  %v5065_v42 = vadd.f32 0.00028619796, %v5064_v9  ;;  %v4422_v28 = vmul.f32 %v10443_v52, %v10443_v52 }
 0x3b7   : > { %v10459_v47 = vmul.f32 %v5152_v2, %v10360_v5  ;;  %v4994_v8 = vmul.f32 %v4993_v46, %v10243_v61  ;;  %v5033_v57 = vadd.f32 1.1283791, %v5032_v44  ;;  %v4352_v39 = vmul.f32 %v4351_v1, %v10329_v14 }
 0x3b8   : > { %v5153_v19 = vadd.f32 1.0, %v5614_v55  ;;  %v5054_v32 = vand.u32 2147483647, %v10381_v17  ;;  %v4390_v60 = vmul.f32 %v4389_v43, %v10356_v41  ;;  %v10470_v37 = vadd.f32 1.0, %v4403_v11  ;;  %v5334_v11 = vpop.f32.mrf.mxu3 }
 0x3b9   : > { %v5019_v5 = vmul.f32 %v5018_v27, %v4994_v8  ;;  %v5049_v61 = vadd.f32 %v10413_v23, %v5048_v45  ;;  %vm5051_vm13 = vweird.f32 %v10413_v23  ;;  %v5077_v14 = vmul.f32 %v5076_v59, %v10420_v29  ;;  %v5294_v27 = vpop.f32.mrf.mxu1 }
 0x3ba   : > { %v5056_v2 = vand.u32 2147483648, %v10381_v17  ;;  %5858 = vrcp.f32 %v10470_v37  ;;  %v5066_v46 = vmul.f32 %v5065_v42, %v10420_v29  ;;  %v10478_v30 = vmin.f32 %v4422_v28, 16.0 }
 0x3bb   : > { %v10480_v24 = vpop.eup %5856  ;;  %vm5050_vm14 = vweird.f32 %v10381_v17  ;;  %v4353_v34 = vadd.f32 1.1283791, %v4352_v39  ;;  %v5078_v25 = vadd.f32 0.014752088, %v5077_v14  ;;  %v5293_v50 = vadd.f32 %v10466_v51, %v5292_v13 }
 0x3bc   : > { %v10485_v3 = vmul.f32 %v5153_v19, %v10368_v48  ;;  %v5034_v49 = vmul.f32 %v5033_v57, %v10247_v7  ;;  %vm10488_vm15 = vmor %vm5050_vm14, %vm5051_vm13  ;;  %v4366_v53 = vmul.f32 %v10480_v24, %v10448_v12  ;;  %v4391_v31 = vadd.f32 0.18741608, %v4390_v60 }
 0x3bd   : > { %v5631_v17 = vclamps-f32 %v5019_v5, 1.0  ;;  %v5053_v0 = vsel %vm10488_vm15, %v10413_v23, %v5049_v61  ;;  %vm5055_vm1 = vcmp.eq.f32.partialorder %v5054_v32, 8.507059e+37  ;;  %v5079_v48 = vmul.f32 %v5078_v25, %v10420_v29 }
 0x3be   : > { %v5057_v21 = vor.u32 1.1754944e-38, %v5056_v2  ;;  %v4367_v26 = vsub.f32 1.0, %v4366_v53  ;;  %v5067_v7 = vadd.f32 0.0036580483, %v5066_v46  ;;  %v4435_v18 = vmul.f32 3.8918573e-05, %v10478_v30  ;;  %v3755_v53 = vpop.f32.mrf.mxu0 }
 0x3bf   : > { %v10507_v44 = vmul.f32 %v4353_v34, %v10309_v4  ;;  %v5080_v9 = vadd.f32 0.112945676, %v5079_v48  ;;  %v5372_v23 = vpack.c.bf16 %v5293_v50, %v5293_v50  ;;  %v10510_v35 = vadd.f32 %v10137_v54, %v3795_v36 }
 0x3c0   : > { %v10512_v6 = vpop.eup %5858  ;;  %v5058_v1 = vsel %vm5055_vm1, %v5057_v21, %v5053_v0  ;;  %v4392_v20 = vmul.f32 %v4391_v31, %v10356_v41  ;;  %v4436_v55 = vadd.f32 0.001143296, %v4435_v18  ;;  %v5333_v58 = vadd.f32 %v10466_v51, %v5332_v56 }
 0x3c1   : > { %v10516_v43 = vadd.f32 1.0, %v5631_v17  ;;  %v4374_v45 = vand.u32 2147483647, %v10448_v12  ;;  %v4406_v4 = vmul.f32 %v10512_v6, %v10470_v37  ;;  %v5081_v59 = vmul.f32 %v5080_v9, %v10420_v29  ;;  %5404 = vst.msk [vmem:[%s10504_s25] sm:$0xf] %vm502_vm0, %v5372_v23 }
 0x3c2   : > { %v4368_v42 = vmul.f32 %v10480_v24, %v4367_v26  ;;  %v4376_v41 = vand.u32 2147483648, %v10448_v12  ;;  %v5068_v28 = vmul.f32 %v5067_v7, %v10420_v29  ;;  %v4437_v8 = vmul.f32 %v4436_v55, %v10478_v30 }
 0x3c3   : > { %v5059_v57 = vmul.f32 %v5058_v1, %v5034_v49  ;;  %v4407_v39 = vsub.f32 1.0, %v4406_v4  ;;  %v5082_v13 = vadd.f32 0.4994258, %v5081_v59  ;;  %v10529_v56 = vmul.f32 0.70710677, %v10510_v35 }
 0x3c4   : > { %v4393_v19 = vadd.f32 1.1283791, %v4392_v20  ;;  %v4424_v32 = vmul.f32 2.1237322e-06, %v10478_v30  ;;  %v4438_v60 = vadd.f32 0.014752088, %v4437_v8  ;;  %v5388_v5 = vpack.c.bf16 %v5333_v58, %v5333_v58 }
 0x3c5   : > { %v4408_v61 = vmul.f32 %v10512_v6, %v4407_v39  ;;  %v4416_v14 = vand.u32 2147483648, %v10470_v37  ;;  %v5083_v2 = vmul.f32 %v5082_v13, %v10420_v29  ;;  %v5102_v46 = vmul.f32 %v10529_v56, %v10529_v56 }
 0x3c6   : > { %v4369_v34 = vadd.f32 %v10480_v24, %v4368_v42  ;;  %vm4371_vm3 = vweird.f32 %v10480_v24  ;;  %vm4411_vm8 = vweird.f32 %v10512_v6  ;;  %v4439_v25 = vmul.f32 %v4438_v60, %v10478_v30  ;;  %5420 = vst.msk [vmem:[%s10504_s25 + $0x40] sm:$0xf] %vm502_vm0, %v5388_v5 }
 0x3c7   : > { %v4409_v50 = vadd.f32 %v10512_v6, %v4408_v61  ;;  %v10544_v49 = vadd.f32 1.0, %v5083_v2  ;;  %v10546_v38 = vmin.f32 %v5102_v46, 16.0  ;;  %v5211_v31 = vpack.c.bf16 %v10485_v3, %v10459_v47 }
 0x3c8   : > { %vm4410_vm4 = vweird.f32 %v10470_v37  ;;  %v4414_v36 = vand.u32 2147483647, %v10470_v37  ;;  %v4425_v17 = vadd.f32 0.00028619796, %v4424_v32  ;;  %v4440_v0 = vadd.f32 0.112945676, %v4439_v25 }
 0x3c9   : > { %vm4370_vm5 = vweird.f32 %v10448_v12  ;;  %vm10553_vm6 = vcmp.eq.f32.partialorder %v4374_v45, 8.507059e+37  ;;  %v4377_v21 = vor.u32 1.1754944e-38, %v4376_v41  ;;  %vm10559_vm7 = vmor %vm4410_vm4, %vm4411_vm8  ;;  %5860 = vrcp.f32 %v10544_v49  ;;  %5644 = vmatmul.msk.bf16.gmra.mxu1 %vm5234_vm2, %v5211_v31 }
 0x3ca   : > { %v5632_v47 = vclamps-f32 %v5059_v57, 1.0  ;;  %vm10567_vm9 = vmor %vm4370_vm5, %vm4371_vm3  ;;  %v4413_v37 = vsel %vm10559_vm7, %v10512_v6, %v4409_v50  ;;  %v5069_v3 = vadd.f32 0.05243302, %v5068_v28  ;;  %v10575_v7 = vadd.f32 %v10137_v54, %v3755_v53 }
 0x3cb   : > { %v4373_v18 = vsel %vm10567_vm9, %v10480_v24, %v4369_v34  ;;  %v4417_v9 = vor.u32 1.1754944e-38, %v4416_v14  ;;  %v4441_v23 = vmul.f32 %v4440_v0, %v10478_v30  ;;  %v5104_v1 = vmul.f32 2.1237322e-06, %v10546_v38 }
 0x3cc   : > { %v4394_v58 = vmul.f32 %v4393_v19, %v10323_v10  ;;  %vm4415_vm10 = vcmp.eq.f32.partialorder %v4414_v36, 8.507059e+37  ;;  %v4426_v6 = vmul.f32 %v4425_v17, %v10478_v30  ;;  %v5115_v45 = vmul.f32 3.8918573e-05, %v10546_v38 }
 0x3cd   : > { %v4418_v54 = vsel %vm4415_vm10, %v4417_v9, %v4413_v37  ;;  %v4442_v4 = vadd.f32 0.4994258, %v4441_v23  ;;  %v5105_v59 = vadd.f32 0.00028619796, %v5104_v1  ;;  %v5295_v42 = vadd.f32 %v10466_v51, %v5294_v27 }
 0x3ce   : > { %v4378_v24 = vsel %vm10553_vm6, %v4377_v21, %v4373_v18  ;;  %v5116_v41 = vadd.f32 0.001143296, %v5115_v45  ;;  %v10589_v28 = vmul.f32 0.70710677, %v10575_v7  ;;  %v5335_v10 = vadd.f32 %v10466_v51, %v5334_v11 }
 0x3cf   : > { %v10592_v8 = vpop.eup %5860  ;;  %v5171_v57 = vadd.f32 1.0, %v5632_v47  ;;  %v5070_v39 = vmul.f32 %v5069_v3, %v10420_v29  ;;  %v5106_v13 = vmul.f32 %v5105_v59, %v10546_v38  ;;  %v5373_v19 = vpack.c.bf16 %v5295_v42, %v5295_v42 }
 0x3d0   : > { %v5297_v20 = vpop.f32.mrf.mxu1  ;;  %v5337_v55 = vpop.f32.mrf.mxu3  ;;  %v3827_v27 = vmul.f32 0.5, %v10235_v33  ;;  %v4419_v32 = vmul.f32 %v4418_v54, %v4394_v58  ;;  %v4443_v60 = vmul.f32 %v4442_v4, %v10478_v30  ;;  %v5117_v5 = vmul.f32 %v5116_v41, %v10546_v38 }
 0x3d1   : > { %v4379_v61 = vmul.f32 %v4378_v24, %v10507_v44  ;;  %v5086_v11 = vmul.f32 %v10592_v8, %v10544_v49  ;;  %v4427_v14 = vadd.f32 0.0036580483, %v4426_v6  ;;  %v4462_v2 = vmul.f32 %v10589_v28, %v10589_v28  ;;  %5405 = vst.msk [vmem:[%s10504_s25 + $0x4] sm:$0xf] %vm502_vm0, %v5373_v19 }
 0x3d2   : > { %v5107_v46 = vadd.f32 0.0036580483, %v5106_v13  ;;  %v5118_v34 = vadd.f32 0.014752088, %v5117_v5  ;;  %v5389_v33 = vpack.c.bf16 %v5335_v10, %v5335_v10  ;;  %v5298_v25 = vadd.f32 %v10466_v51, %v5297_v20 }
 0x3d3   : > { %v5202_v50 = vmul.f32 %v10516_v43, %v10451_v15  ;;  %v5203_v53 = vmul.f32 %v5171_v57, %v3827_v27  ;;  %v5071_v44 = vadd.f32 0.18741608, %v5070_v39  ;;  %v5616_v17 = vclamps-f32 %v4419_v32, 1.0 }
 0x3d4   : > { %v10609_v0 = vadd.f32 1.0, %v4443_v60  ;;  %v5119_v48 = vmul.f32 %v5118_v34, %v10546_v38  ;;  %v10612_v21 = vmin.f32 %v4462_v2, 16.0  ;;  %5421 = vst.msk [vmem:[%s10504_s25 + $0x44] sm:$0xf] %vm502_vm0, %v5389_v33  ;;  %v5615_v26 = vclamps-f32 %v4379_v61, 1.0 }
 0x3d5   : > { %v4428_v47 = vmul.f32 %v4427_v14, %v10478_v30  ;;  %v5374_v12 = vpack.c.bf16 %v5298_v25, %v5298_v25  ;;  %v5338_v15 = vadd.f32 %v10466_v51, %v5337_v55  ;;  %v5087_v43 = vsub.f32 1.0, %v5086_v11 }
 0x3d6   : > { %v5108_v37 = vmul.f32 %v5107_v46, %v10546_v38  ;;  %v5120_v3 = vadd.f32 0.112945676, %v5119_v48  ;;  %v4464_v18 = vmul.f32 2.1237322e-06, %v10612_v21  ;;  %v4475_v9 = vmul.f32 3.8918573e-05, %v10612_v21 }
 0x3d7   : > { %5406 = vst.msk [vmem:[%s10504_s25 + $0x8] sm:$0xf] %vm502_vm0, %v5374_v12  ;;  %v5390_v23 = vpack.c.bf16 %v5338_v15, %v5338_v15  ;;  %v5220_v1 = vpack.c.bf16 %v5203_v53, %v5202_v50  ;;  %v5155_v58 = vadd.f32 1.0, %v5616_v17  ;;  %5862 = vrcp.f32 %v10609_v0 }
 0x3d8   : > { %v5299_v31 = vpop.f32.mrf.mxu1  ;;  %v5339_v36 = vpop.f32.mrf.mxu3  ;;  %v5121_v55 = vmul.f32 %v5120_v3, %v10546_v38  ;;  %v4465_v6 = vadd.f32 0.00028619796, %v4464_v18  ;;  %v5154_v45 = vadd.f32 1.0, %v5615_v26  ;;  %v4476_v54 = vadd.f32 0.001143296, %v4475_v9 }
 0x3d9   : > { %v5300_v20 = vadd.f32 %v10466_v51, %v5299_v31  ;;  %5422 = vst.msk [vmem:[%s10504_s25 + $0x48] sm:$0xf] %vm502_vm0, %v5390_v23  ;;  %5653 = vmatmul.msk.bf16.gmra.mxu3 %vm5234_vm2, %v5220_v1  ;;  %v5340_v59 = vadd.f32 %v10466_v51, %v5339_v36  ;;  %v3810_v42 = vmul.f32 0.5, %v10296_v62  ;;  %v3811_v24 = vmul.f32 0.5, %v10305_v63 }
 0x3da   : > { %v5088_v41 = vmul.f32 %v10592_v8, %v5087_v43  ;;  %v5109_v10 = vadd.f32 0.05243302, %v5108_v37  ;;  %v5122_v57 = vadd.f32 0.4994258, %v5121_v55  ;;  %v4466_v39 = vmul.f32 %v4465_v6, %v10612_v21 }
 0x3db   : > { %v5375_v4 = vpack.c.bf16 %v5300_v20, %v5300_v20  ;;  %v4477_v13 = vmul.f32 %v4476_v54, %v10612_v21  ;;  %v5391_v19 = vpack.c.bf16 %v5340_v59, %v5340_v59  ;;  %v5187_v60 = vmul.f32 %v5155_v58, %v3811_v24 }
 0x3dc   : > { %v5072_v5 = vmul.f32 %v5071_v44, %v10420_v29  ;;  %v4429_v62 = vadd.f32 0.05243302, %v4428_v47  ;;  %v5186_v61 = vmul.f32 %v5154_v45, %v3810_v42  ;;  %v5123_v11 = vmul.f32 %v5122_v57, %v10546_v38 }
 0x3dd   : > { %5407 = vst.msk [vmem:[%s10504_s25 + $0xc] sm:$0xf] %vm502_vm0, %v5375_v4  ;;  %v4478_v14 = vadd.f32 0.014752088, %v4477_v13  ;;  %v10643_v46 = vpop.eup %5862  ;;  %v5089_v34 = vadd.f32 %v10592_v8, %v5088_v41  ;;  %vm5091_vm11 = vweird.f32 %v10592_v8  ;;  %v5110_v29 = vmul.f32 %v5109_v10, %v10546_v38 }
 0x3de   : > { %5423 = vst.msk [vmem:[%s10504_s25 + $0x4c] sm:$0xf] %vm502_vm0, %v5391_v19  ;;  %v10648_v25 = vadd.f32 1.0, %v5123_v11  ;;  %v4467_v50 = vadd.f32 0.0036580483, %v4466_v39  ;;  %v5096_v31 = vand.u32 2147483648, %v10544_v49  ;;  %v4430_v36 = vmul.f32 %v4429_v62, %v10478_v30 }
 0x3df   : > { %v4479_v53 = vmul.f32 %v4478_v14, %v10612_v21  ;;  %v5212_v17 = vpack.c.bf16 %v5187_v60, %v5186_v61  ;;  %vm5090_vm12 = vweird.f32 %v10544_v49  ;;  %v5094_v48 = vand.u32 2147483647, %v10544_v49 }
 0x3e0   : > { %v5302_v27 = vpop.f32.mrf.mxu1  ;;  %v5342_v32 = vpop.f32.mrf.mxu3  ;;  %v4446_v26 = vmul.f32 %v10643_v46, %v10609_v0  ;;  %5864 = vrcp.f32 %v10648_v25  ;;  %vm10664_vm13 = vmor %vm5090_vm12, %vm5091_vm11  ;;  %v5111_v12 = vadd.f32 0.18741608, %v5110_v29  ;;  %v5073_v43 = vadd.f32 1.1283791, %v5072_v5 }
 0x3e1   : > { %v5303_v63 = vadd.f32 %v10466_v51, %v5302_v27  ;;  %v5343_v2 = vadd.f32 %v10466_v51, %v5342_v32  ;;  %v4480_v15 = vadd.f32 0.112945676, %v4479_v53  ;;  %5645 = vmatmul.msk.bf16.gmra.mxu1 %vm5234_vm2, %v5212_v17  ;;  %v5093_v49 = vsel %vm10664_vm13, %v10592_v8, %v5089_v34 }
 0x3e2   : > { %v4468_v37 = vmul.f32 %v4467_v50, %v10612_v21  ;;  %v5097_v9 = vor.u32 1.1754944e-38, %v5096_v31  ;;  %vm5095_vm14 = vcmp.eq.f32.partialorder %v5094_v48, 8.507059e+37  ;;  %v4431_v20 = vadd.f32 0.18741608, %v4430_v36 }
 0x3e3   : > { %v5376_v33 = vpack.c.bf16 %v5303_v63, %v5303_v63  ;;  %v5392_v44 = vpack.c.bf16 %v5343_v2, %v5343_v2  ;;  %v4481_v23 = vmul.f32 %v4480_v15, %v10612_v21  ;;  %v4447_v58 = vsub.f32 1.0, %v4446_v26 }
 0x3e4   : > { %v5098_v6 = vsel %vm5095_vm14, %v5097_v9, %v5093_v49  ;;  %v5112_v45 = vmul.f32 %v5111_v12, %v10546_v38  ;;  %v5074_v59 = vmul.f32 %v5073_v43, %v10387_v16  ;;  %v4469_v42 = vadd.f32 0.05243302, %v4468_v37 }
 0x3e5   : > { %5408 = vst.msk [vmem:[%s10504_s25 + $0x10] sm:$0xf] %vm502_vm0, %v5376_v33  ;;  %v4482_v8 = vadd.f32 0.4994258, %v4481_v23  ;;  %v4448_v57 = vmul.f32 %v10643_v46, %v4447_v58  ;;  %v4432_v38 = vmul.f32 %v4431_v20, %v10478_v30  ;;  %v4456_v13 = vand.u32 2147483648, %v10609_v0 }
 0x3e6   : > { %5424 = vst.msk [vmem:[%s10504_s25 + $0x50] sm:$0xf] %vm502_vm0, %v5392_v44  ;;  %v5865_v4 = vpop.eup %5864  ;;  %v5099_v10 = vmul.f32 %v5098_v6, %v5074_v59  ;;  %v5113_v19 = vadd.f32 1.1283791, %v5112_v45  ;;  %v5134_v16 = vand.u32 2147483647, %v10648_v25  ;;  %v4470_v60 = vmul.f32 %v4469_v42, %v10612_v21 }
 0x3e7   : > { %v5126_v41 = vmul.f32 %v5865_v4, %v10648_v25  ;;  %v4483_v39 = vmul.f32 %v4482_v8, %v10612_v21  ;;  %v5136_v32 = vand.u32 2147483648, %v10648_v25  ;;  %vm5131_vm15 = vweird.f32 %v5865_v4 }
 0x3e8   : > { %v5304_v3 = vpop.f32.mrf.mxu1  ;;  %v5344_v18 = vpop.f32.mrf.mxu3  ;;  %v5633_v14 = vclamps-f32 %v5099_v10, 1.0  ;;  %v4449_v2 = vadd.f32 %v10643_v46, %v4448_v57  ;;  %vm4451_vm1 = vweird.f32 %v10643_v46  ;;  %vm5130_vm3 = vweird.f32 %v10648_v25 }
 0x3e9   : > { %v5305_v1 = vadd.f32 %v10466_v51, %v5304_v3  ;;  %v5345_v55 = vadd.f32 %v10466_v51, %v5344_v18  ;;  %v5127_v27 = vsub.f32 1.0, %v5126_v41  ;;  %v10690_v5 = vadd.f32 1.0, %v4483_v39  ;;  %vm5132_vm4 = vmor %vm5130_vm3, %vm5131_vm15 }
 0x3ea   : > { %vm4450_vm8 = vweird.f32 %v10609_v0  ;;  %v4454_v50 = vand.u32 2147483647, %v10609_v0  ;;  %v5137_v53 = vor.u32 1.1754944e-38, %v5136_v32  ;;  %v4471_v44 = vadd.f32 0.18741608, %v4470_v60 }
 0x3eb   : > { %v5377_v54 = vpack.c.bf16 %v5305_v1, %v5305_v1  ;;  %v5393_v24 = vpack.c.bf16 %v5345_v55, %v5345_v55  ;;  %v5128_v61 = vmul.f32 %v5865_v4, %v5127_v27  ;;  %5866 = vrcp.f32 %v10690_v5  ;;  %vm10700_vm5 = vmor %vm4450_vm8, %vm4451_vm1 }
 0x3ec   : > { %v5114_v36 = vmul.f32 %v5113_v19, %v10529_v56  ;;  %vm5135_vm6 = vcmp.eq.f32.partialorder %v5134_v16, 8.507059e+37  ;;  %v4433_v25 = vadd.f32 1.1283791, %v4432_v38  ;;  %v4453_v48 = vsel %vm10700_vm5, %v10643_v46, %v4449_v2 }
 0x3ed   : > { %5409 = vst.msk [vmem:[%s10504_s25 + $0x14] sm:$0xf] %vm502_vm0, %v5377_v54  ;;  %v5129_v34 = vadd.f32 %v5865_v4, %v5128_v61  ;;  %v5172_v0 = vadd.f32 1.0, %v5633_v14  ;;  %v4457_v47 = vor.u32 1.1754944e-38, %v4456_v13  ;;  %v3828_v43 = vmul.f32 0.5, %v10373_v22 }
 0x3ee   : > { %5425 = vst.msk [vmem:[%s10504_s25 + $0x54] sm:$0xf] %vm502_vm0, %v5393_v24  ;;  %vm4455_vm7 = vcmp.eq.f32.partialorder %v4454_v50, 8.507059e+37  ;;  %v4472_v56 = vmul.f32 %v4471_v44, %v10612_v21  ;;  %v4434_v23 = vmul.f32 %v4433_v25, %v10443_v52  ;;  %v3829_v1 = vmul.f32 0.5, %v10510_v35 }
 0x3ef   : > { %v5133_v17 = vsel %vm5132_vm4, %v5865_v4, %v5129_v34  ;;  %v4458_v3 = vsel %vm4455_vm7, %v4457_v47, %v4453_v48  ;;  %v5204_v22 = vmul.f32 %v5172_v0, %v3828_v43  ;;  %v4496_v8 = vand.u32 2147483648, %v10690_v5 }
 0x3f0   : > { %v5307_v62 = vpop.f32.mrf.mxu1  ;;  %v5347_v63 = vpop.f32.mrf.mxu3  ;;  %v5138_v26 = vsel %vm5135_vm6, %v5137_v53, %v5133_v17  ;;  %v4459_v6 = vmul.f32 %v4458_v3, %v4434_v23  ;;  %v4473_v45 = vadd.f32 1.1283791, %v4472_v56  ;;  %v4494_v42 = vand.u32 2147483647, %v10690_v5 }
 0x3f1   : > { %v5308_v11 = vadd.f32 %v10466_v51, %v5307_v62  ;;  %v5348_v30 = vadd.f32 %v10466_v51, %v5347_v63  ;;  %v5139_v12 = vmul.f32 %v5138_v26, %v5114_v36  ;;  %v5867_v15 = vpop.eup %5866  ;;  %vm4490_vm10 = vweird.f32 %v10690_v5 }
 0x3f2   : > { %v4486_v9 = vmul.f32 %v5867_v15, %v10690_v5  ;;  %vm4491_vm9 = vweird.f32 %v5867_v15  ;;  %v5617_v24 = vclamps-f32 %v4459_v6, 1.0  ;;  %v4474_v41 = vmul.f32 %v4473_v45, %v10589_v28 }
 0x3f3   : > { %v5378_v29 = vpack.c.bf16 %v5308_v11, %v5308_v11  ;;  %v5394_v33 = vpack.c.bf16 %v5348_v30, %v5348_v30  ;;  %v5634_v18 = vclamps-f32 %v5139_v12, 1.0  ;;  %vm4492_vm11 = vmor %vm4490_vm10, %vm4491_vm9  ;;  %v4497_v10 = vor.u32 1.1754944e-38, %v4496_v8 }
 0x3f4   : > { %v4487_v55 = vsub.f32 1.0, %v4486_v9  ;;  %vm4495_vm12 = vcmp.eq.f32.partialorder %v4494_v42, 8.507059e+37  ;;  %v5156_v5 = vadd.f32 1.0, %v5617_v24  ;;  %v3812_v62 = vmul.f32 0.5, %v10423_v40 }
 0x3f5   : > { %5410 = vst.msk [vmem:[%s10504_s25 + $0x18] sm:$0xf] %vm502_vm0, %v5378_v29  ;;  %v5173_v58 = vadd.f32 1.0, %v5634_v18  ;;  %v3813_v63 = vmul.f32 0.5, %v10575_v7 }
 0x3f6   : > { %5426 = vst.msk [vmem:[%s10504_s25 + $0x58] sm:$0xf] %vm502_vm0, %v5394_v33  ;;  %v4488_v59 = vmul.f32 %v5867_v15, %v4487_v55  ;;  %v5188_v14 = vmul.f32 %v5156_v5, %v3812_v62 }
 0x3f7   : > { %v5205_v4 = vmul.f32 %v5173_v58, %v3829_v1 }
 0x3f8   : > { %v5309_v49 = vpop.f32.mrf.mxu1  ;;  %v5349_v37 = vpop.f32.mrf.mxu3  ;;  %v4489_v52 = vadd.f32 %v5867_v15, %v4488_v59 }
 0x3f9   : > { %v5310_v46 = vadd.f32 %v10466_v51, %v5309_v49  ;;  %v5350_v20 = vadd.f32 %v10466_v51, %v5349_v37  ;;  %v5221_v35 = vpack.c.bf16 %v5205_v4, %v5204_v22 }
 0x3fa   : > { %v4493_v38 = vsel %vm4492_vm11, %v5867_v15, %v4489_v52 }
 0x3fb   : > { %v5379_v21 = vpack.c.bf16 %v5310_v46, %v5310_v46  ;;  %v5395_v54 = vpack.c.bf16 %v5350_v20, %v5350_v20  ;;  %5654 = vmatmul.msk.bf16.gmra.mxu3 %vm5234_vm2, %v5221_v35  ;;  %v4498_v27 = vsel %vm4495_vm12, %v4497_v10, %v4493_v38 }
 0x3fc   : > { %v4499_v16 = vmul.f32 %v4498_v27, %v4474_v41 }
 0x3fd   : > { %5411 = vst.msk [vmem:[%s10504_s25 + $0x1c] sm:$0xf] %vm502_vm0, %v5379_v21 }
 0x3fe   : > { %5427 = vst.msk [vmem:[%s10504_s25 + $0x5c] sm:$0xf] %vm502_vm0, %v5395_v54  ;;  %v5618_v28 = vclamps-f32 %v4499_v16, 1.0 }
 0x400   : > { %v5312_v57 = vpop.f32.mrf.mxu1  ;;  %v5352_v39 = vpop.f32.mrf.mxu3  ;;  %v5157_v61 = vadd.f32 1.0, %v5618_v28 }
 0x401   : > { %v5313_v13 = vadd.f32 %v10466_v51, %v5312_v57  ;;  %v5353_v19 = vadd.f32 %v10466_v51, %v5352_v39 }
 0x402   : > { %v5189_v2 = vmul.f32 %v5157_v61, %v3813_v63 }
 0x403   : > { %v5380_v32 = vpack.c.bf16 %v5313_v13, %v5313_v13  ;;  %v5396_v60 = vpack.c.bf16 %v5353_v19, %v5353_v19 }
 0x404   : > { %v5213_v33 = vpack.c.bf16 %v5189_v2, %v5188_v14 }
 0x405   : > { %5412 = vst.msk [vmem:[%s10504_s25 + $0x20] sm:$0xf] %vm502_vm0, %v5380_v32 }
 0x406   : > { %5428 = vst.msk [vmem:[%s10504_s25 + $0x60] sm:$0xf] %vm502_vm0, %v5396_v60  ;;  %5646 = vmatmul.msk.bf16.gmra.mxu1 %vm5234_vm2, %v5213_v33 }
 0x408   : > { %v5314_v11 = vpop.f32.mrf.mxu1  ;;  %v5354_v30 = vpop.f32.mrf.mxu3 }
 0x409   : > { %v5315_v34 = vadd.f32 %v10466_v51, %v5314_v11  ;;  %v5355_v29 = vadd.f32 %v10466_v51, %v5354_v30 }
 0x40b   : > { %v5381_v50 = vpack.c.bf16 %v5315_v34, %v5315_v34  ;;  %v5397_v53 = vpack.c.bf16 %v5355_v29, %v5355_v29 }
 0x40d   : > { %5413 = vst.msk [vmem:[%s10504_s25 + $0x24] sm:$0xf] %vm502_vm0, %v5381_v50 }
 0x40e   : > { %5429 = vst.msk [vmem:[%s10504_s25 + $0x64] sm:$0xf] %vm502_vm0, %v5397_v53 }
 0x422   : > { %v5357_v40 = vpop.f32.mrf.mxu3 }
 0x423   : > { %v5358_v7 = vadd.f32 %v10466_v51, %v5357_v40 }
 0x425   : > { %v5398_v44 = vpack.c.bf16 %v5358_v7, %v5358_v7 }
 0x427   : > { %5430 = vst.msk [vmem:[%s10504_s25 + $0x68] sm:$0xf] %vm502_vm0, %v5398_v44 }
 0x42a   : > { %v5359_v31 = vpop.f32.mrf.mxu3 }
 0x42b   : > { %v5360_v36 = vadd.f32 %v10466_v51, %v5359_v31 }
 0x42d   : > { %v5399_v17 = vpack.c.bf16 %v5360_v36, %v5360_v36 }
 0x42f   : > { %5431 = vst.msk [vmem:[%s10504_s25 + $0x6c] sm:$0xf] %vm502_vm0, %v5399_v17 }
 0x446   : > { %v5317_v25 = vpop.f32.mrf.mxu1 }
 0x447   : > { %v5318_v48 = vadd.f32 %v10466_v51, %v5317_v25 }
 0x449   : > { %v5382_v26 = vpack.c.bf16 %v5318_v48, %v5318_v48 }
 0x44b   : > { %5414 = vst.msk [vmem:[%s10504_s25 + $0x28] sm:$0xf] %vm502_vm0, %v5382_v26 }
 0x44e   : > { %v5319_v0 = vpop.f32.mrf.mxu1 }
 0x44f   : > { %v5320_v47 = vadd.f32 %v10466_v51, %v5319_v0 }
 0x451   : > { %v5383_v12 = vpack.c.bf16 %v5320_v47, %v5320_v47 }
 0x453   : > { %5415 = vst.msk [vmem:[%s10504_s25 + $0x2c] sm:$0xf] %vm502_vm0, %v5383_v12 }
 0x45c   : > { %v5362_v15 = vpop.f32.mrf.mxu3 }
 0x45d   : > { %v5363_v43 = vadd.f32 %v10466_v51, %v5362_v15 }
 0x45e   : > { %v5322_v49 = vpop.f32.mrf.mxu1 }
 0x45f   : > { %v5400_v56 = vpack.c.bf16 %v5363_v43, %v5363_v43  ;;  %v5323_v37 = vadd.f32 %v10466_v51, %v5322_v49 }
 0x461   : > { %5432 = vst.msk [vmem:[%s10504_s25 + $0x70] sm:$0xf] %vm502_vm0, %v5400_v56  ;;  %v5384_v3 = vpack.c.bf16 %v5323_v37, %v5323_v37 }
 0x463   : > { %5416 = vst.msk [vmem:[%s10504_s25 + $0x30] sm:$0xf] %vm502_vm0, %v5384_v3 }
 0x464   : > { %v5364_v18 = vpop.f32.mrf.mxu3 }
 0x465   : > { %v5365_v9 = vadd.f32 %v10466_v51, %v5364_v18 }
 0x466   : > { %v5324_v23 = vpop.f32.mrf.mxu1 }
 0x467   : > { %v5401_v46 = vpack.c.bf16 %v5365_v9, %v5365_v9  ;;  %v5325_v1 = vadd.f32 %v10466_v51, %v5324_v23 }
 0x469   : > { %5433 = vst.msk [vmem:[%s10504_s25 + $0x74] sm:$0xf] %vm502_vm0, %v5401_v46  ;;  %v5385_v20 = vpack.c.bf16 %v5325_v1, %v5325_v1 }
 0x46b   : > { %5417 = vst.msk [vmem:[%s10504_s25 + $0x34] sm:$0xf] %vm502_vm0, %v5385_v20 }
 0x47e   : > { %v5367_v22 = vpop.f32.mrf.mxu3 }
 0x47f   : > { %v5368_v58 = vadd.f32 %v10466_v51, %v5367_v22 }
 0x481   : > { %v5402_v55 = vpack.c.bf16 %v5368_v58, %v5368_v58 }
 0x483   : > { %5434 = vst.msk [vmem:[%s10504_s25 + $0x78] sm:$0xf] %vm502_vm0, %v5402_v55  ;;  %v5327_v21 = vpop.f32.mrf.mxu1 }
 0x484   : > { %v5328_v6 = vadd.f32 %v10466_v51, %v5327_v21 }
 0x486   : > { %v5369_v45 = vpop.f32.mrf.mxu3  ;;  %v5386_v8 = vpack.c.bf16 %v5328_v6, %v5328_v6 }
 0x487   : > { %v5370_v54 = vadd.f32 %v10466_v51, %v5369_v45 }
 0x488   : > { %5418 = vst.msk [vmem:[%s10504_s25 + $0x38] sm:$0xf] %vm502_vm0, %v5386_v8 }
 0x489   : > { %v5403_v4 = vpack.c.bf16 %v5370_v54, %v5370_v54 }
 0x48b   : > { %5435 = vst.msk [vmem:[%s10504_s25 + $0x7c] sm:$0xf] %vm502_vm0, %v5403_v4  ;;  %v5329_v59 = vpop.f32.mrf.mxu1 }
 0x48c   : > { %v5330_v42 = vadd.f32 %v10466_v51, %v5329_v59 }
 0x48e   : > { %v5387_v52 = vpack.c.bf16 %v5330_v42, %v5330_v42 }
 0x490   : > { %5419 = vst.msk [vmem:[%s10504_s25 + $0x3c] sm:$0xf] %vm502_vm0, %v5387_v52 }
 0x491 PF: > { %s19_s30 = sadd.s32 1, %s5895_s30   ;;  %s11374_s28 = smov %s5891_s29 }
 0x492   : > { %p16_p5 = scmp.ge.s32.totalorder %s19_s30, 4   ;;  %s11375_s29 = smov %s11377_s10 }
 0x494   :  { %18 = sbr.rel (!%p16_p5) target bundleno = 2 (0x2), region = 102 }

</bundles_post_ra>
